<compile_context>
chip_gen: v7x
topology: tpu7x:2x2x1
jax: 0.10.0
libtpu: 0.0.40
codegen_flags: <defaults>
</compile_context>

<pallas_src>
import functools
import math

import jax
import jax.numpy as jnp
from jax.experimental import pallas as pl
from jax.experimental.pallas import tpu as pltpu


def _build_pe_table(d_model: int, max_len: int = 366, dtype=jnp.float32) -> jnp.ndarray:
    """Deterministic sin/cos table, identical to the PyTorch __init__."""
    assert d_model % 2 == 0, "d_model must be even (matches 0::2 / 1::2 slicing)"
    position = jnp.arange(0, max_len, dtype=jnp.float32)[:, None]            # (max_len, 1)
    div_term = jnp.exp(
        jnp.arange(0, d_model, 2, dtype=jnp.float32) * -(math.log(10000.0) / d_model)
    )                                                                         # (d_model/2,)
    ang = position * div_term                                                 # (max_len, d_model/2)
    body = jnp.zeros((max_len, d_model), dtype=jnp.float32)
    body = body.at[:, 0::2].set(jnp.sin(ang))
    body = body.at[:, 1::2].set(jnp.cos(ang))
    pe = jnp.concatenate([jnp.zeros((1, d_model), jnp.float32), body], axis=0)
    return pe.astype(dtype)                                                   # (max_len+1, d_model)


def _make_gather_kernel(p: int, r_pad: int, r_chunk: int, compute_dtype, precision):
    """Kernel factory: packed one-hot gather via transposed, R-chunked matmuls."""
    n_chunks = r_pad // r_chunk

    def kernel(doy_ref, pe_ref, out_ref):
        # doy_ref: (1, p, tmq) int32   — lane-dense indices for this block
        # pe_ref:  (p * r_pad, d_out)  — block-diagonal replicated pe table,
        #                                VMEM-resident (constant block index)
        # out_ref: (tmq, d_out)        — p gathered rows packed per output row
        tmq, d_out = out_ref.shape
        idx_all = doy_ref[0]                                   # (p, tmq) int32
        acc = jnp.zeros((tmq, d_out), jnp.float32)

        for k in range(p):                                     # tiny static loop
            idx_k = idx_all[k:k + 1, :]                        # (1, tmq)

            def body(c, a, idx_k=idx_k, k=k):
                row0 = c * r_chunk
                # Transposed one-hot chunk: R on sublanes, rows on lanes.
                rows = jax.lax.broadcasted_iota(jnp.int32, (r_chunk, tmq), 0) + row0
                oh_t = (rows == idx_k).astype(compute_dtype)   # (r_chunk, tmq)
                off = pl.multiple_of(k * r_pad + row0, r_chunk)
                rhs = pe_ref[pl.ds(off, r_chunk), :]           # (r_chunk, d_out)
                return a + jax.lax.dot_general(
                    oh_t, rhs,
                    dimension_numbers=(((0,), (0,)), ((), ())),  # contract sublane dim
                    preferred_element_type=jnp.float32,
                    precision=precision,
                )

            acc = jax.lax.fori_loop(0, n_chunks, body, acc, unroll=True)

        out_ref[...] = acc.astype(out_ref.dtype)

    return kernel


def _choose_tm(n: int, p: int, block_rows: int) -> int:
    """Pick rows-per-grid-step: big tiles, but keep >= 8 steps for v7x balance."""
    unit = 8 * p                                       # tmq must be a sublane multiple
    tm = max(unit, (block_rows // unit) * unit)
    while tm > unit and (n + tm - 1) // tm < 8:
        tm = max(unit, (tm // 2 // unit) * unit)
    return tm


def positional_encoding_forward(
    pe: jnp.ndarray,
    doy: jnp.ndarray,
    *,
    block_rows: int = 1024,
    exact: bool = True,
    min_rows_for_pallas: int = 1024,
) -> jnp.ndarray:
    """out = pe[doy, :] — Pallas batched-gather kernel with a tiny-N fallback.

    exact=True  : f32 table, Precision.HIGHEST matmul -> bit-identical gather.
    exact=False : bf16 table, single-pass bf16 MXU matmul (~1e-3 abs error).
    Out-of-range indices (> max_len) yield an all-zero row (documented caveat).
    """
    d_model = pe.shape[1]
    doy_flat = doy.reshape(-1).astype(jnp.int32)                          # (N,)
    n = doy_flat.shape[0]

    packable = (d_model <= 128 and 128 % d_model == 0) or (d_model % 128 == 0)
    # Tiny gathers (or awkward d_model): XLA's fused gather is strictly better.
    # TODO(synk): add a padded-d_model Pallas path if production d_model is not
    # a divisor/multiple of 128.
    if n < min_rows_for_pallas or not packable:
        return jnp.take(pe, doy_flat, axis=0).reshape(doy.shape + (d_model,))

    p = (128 // d_model) if d_model < 128 else 1       # rows packed per 128-lane row
    d_out = p * d_model

    r_chunk = 64
    r = pe.shape[0]
    r_pad = pl.cdiv(r, r_chunk) * r_chunk              # zero rows, never indexed

    table_dtype = pe.dtype if exact else jnp.bfloat16
    precision = jax.lax.Precision.HIGHEST if exact else None

    pe_pad = jnp.pad(pe, ((0, r_pad - r), (0, 0)))
    if p > 1:
        # Block-diagonal replication: slab k holds pe in columns [k*d, (k+1)*d).
        eye = jnp.eye(p, dtype=pe_pad.dtype)
        pe_rhs = jnp.einsum("rd,kq->krqd", pe_pad, eye).reshape(p * r_pad, d_out)
    else:
        pe_rhs = pe_pad
    pe_rhs = pe_rhs.astype(table_dtype)                # (p*r_pad, d_out)

    tm = _choose_tm(n, p, block_rows)                  # rows of pe gathered per step
    tmq = tm // p                                      # packed output rows per step
    n_pad = pl.cdiv(n, tm) * tm
    n_blocks = n_pad // tm

    # Pad with 0 -> gathers the all-zero padding row; sliced off below.
    doy_pad = jnp.pad(doy_flat, (0, n_pad - n))
    # Lane-dense index layout: doy_arranged[b, k, m] = doy_pad[b*tm + m*p + k]
    doy_arranged = doy_pad.reshape(n_blocks, tmq, p).transpose(0, 2, 1)

    kernel = _make_gather_kernel(p, r_pad, r_chunk, table_dtype, precision)

    out_packed = pl.pallas_call(
        kernel,
        out_shape=jax.ShapeDtypeStruct((n_blocks * tmq, d_out), pe.dtype),
        grid=(n_blocks,),
        in_specs=[
            pl.BlockSpec((1, p, tmq), lambda i: (i, 0, 0)),          # per-block indices
            pl.BlockSpec((p * r_pad, d_out), lambda i: (0, 0)),      # resident pe table
        ],
        out_specs=pl.BlockSpec((tmq, d_out), lambda i: (i, 0)),      # lane-dense (>=128)
        compiler_params=pltpu.CompilerParams(
            dimension_semantics=("parallel",),                       # v7x: both TCs
        ),
    )(doy_arranged, pe_rhs)

    # (n_pad / p, p*d_model) -> (n_pad, d_model) is a free row-major view.
    out_flat = out_packed.reshape(n_pad, d_model)
    return out_flat[:n].reshape(doy.shape + (d_model,))


if __name__ == "__main__":
    d_model = 32
    max_len = 366

    pe = _build_pe_table(d_model, max_len)
    key = jax.random.PRNGKey(0)
    k_small, k_large = jax.random.split(key)

    # Small shape consistent with the module usage (batch=2, seq=8).
    doy_small = jax.random.randint(
        k_small, (2, 8), minval=0, maxval=max_len + 1, dtype=jnp.int32
    )
    # Larger case: multiple grid steps, row padding, packed output path.
    doy_large = jax.random.randint(
        k_large, (4, 300), minval=0, maxval=max_len + 1, dtype=jnp.int32
    )

    # Force the Pallas path (min_rows_for_pallas=0) so the kernel is exercised
    # at demo sizes; production callers keep the default threshold.
    out_small = jax.block_until_ready(
        positional_encoding_forward(pe, doy_small, min_rows_for_pallas=0)
    )
    out_large = jax.block_until_ready(
        positional_encoding_forward(pe, doy_large, min_rows_for_pallas=0)
    )
    out_bf16 = jax.block_until_ready(
        positional_encoding_forward(pe, doy_large, exact=False, min_rows_for_pallas=0)
    )

    ref_small = jnp.take(pe, doy_small, axis=0)
    ref_large = jnp.take(pe, doy_large, axis=0)

    assert out_small.shape == (2, 8, d_model)
    assert out_large.shape == (4, 300, d_model)
    assert jnp.allclose(out_small, ref_small, atol=1e-6, rtol=0.0), "small-case mismatch"
    assert jnp.allclose(out_large, ref_large, atol=1e-6, rtol=0.0), "large-case mismatch"
    assert jnp.allclose(out_bf16, ref_large, atol=1e-2, rtol=0.0), "bf16-path mismatch"

    print("KERNEL_OK")
</pallas_src>

<mosaic_0001>
module attributes {stable_mosaic.version = 11 : i64} {
  func.func @kernel(%arg0: i32, %arg1: memref<1x4x8xi32, #tpu.memory_space<vmem>>, %arg2: memref<1536x128xf32, #tpu.memory_space<vmem>>, %arg3: memref<8x128xf32, #tpu.memory_space<vmem>>) attributes {dimension_semantics = [#tpu.dimension_semantics<parallel>], iteration_bounds = array<i64: 1>, scalar_prefetch = 0 : i64, scratch_operands = 0 : i64, tpu.core_type = #tpu.core_type<tc>, window_params = [{transform_indices = @transform_0, window_bounds = array<i64: 1, 4, 8>}, {pipeline_mode = #tpu.pipeline_mode<synchronous>, transform_indices = @transform_1, window_bounds = array<i64: 1536, 128>}, {transform_indices = @transform_2, window_bounds = array<i64: 8, 128>}]} {
    %c0 = arith.constant 0 : index
    %c0_0 = arith.constant 0 : index
    %c0_1 = arith.constant 0 : index
    %0 = vector.load %arg1[%c0, %c0_0, %c0_1] : memref<1x4x8xi32, #tpu.memory_space<vmem>>, vector<1x4x8xi32>
    %1 = vector.shape_cast %0 : vector<1x4x8xi32> to vector<4x8xi32>
    %cst = arith.constant 0.000000e+00 : f32
    %2 = vector.broadcast %cst : f32 to vector<8x128xf32>
    %3 = vector.extract_strided_slice %1 {offsets = [0, 0], sizes = [1, 8], strides = [1, 1]} : vector<4x8xi32> to vector<1x8xi32>
    %c0_i32 = arith.constant 0 : i32
    %c64_i32 = arith.constant 64 : i32
    %4 = arith.muli %c0_i32, %c64_i32 : i32
    %5 = tpu.iota {dimensions = array<i32: 0>} : vector<64x8xi32>
    %6 = vector.broadcast %4 : i32 to vector<64x8xi32>
    %7 = arith.addi %5, %6 : vector<64x8xi32>
    %8 = vector.broadcast %3 : vector<1x8xi32> to vector<64x8xi32>
    %9 = arith.cmpi eq, %7, %8 : vector<64x8xi32>
    %10 = arith.extui %9 : vector<64x8xi1> to vector<64x8xi32>
    %11 = arith.sitofp %10 : vector<64x8xi32> to vector<64x8xf32>
    %c0_i32_2 = arith.constant 0 : i32
    %12 = arith.addi %c0_i32_2, %4 : i32
    %13 = tpu.assume_multiple %12, 64 : i32
    %14 = arith.index_cast %13 : i32 to index
    %c0_3 = arith.constant 0 : index
    %15 = vector.load %arg2[%14, %c0_3] : memref<1536x128xf32, #tpu.memory_space<vmem>>, vector<64x128xf32>
    %cst_4 = arith.constant dense<0.000000e+00> : vector<8x128xf32>
    %16 = tpu.matmul %11, %15, %cst_4 {dimension_numbers = #tpu.dot_dimension_numbers<[0], [0], [1], [1], [0, 1, 1, 1], [], []>, precision = #tpu.contract_precision<fp32>} : vector<64x8xf32>, vector<64x128xf32>, vector<8x128xf32> -> vector<8x128xf32>
    %17 = arith.addf %2, %16 : vector<8x128xf32>
    %c1_i32 = arith.constant 1 : i32
    %c64_i32_5 = arith.constant 64 : i32
    %18 = arith.muli %c1_i32, %c64_i32_5 : i32
    %19 = tpu.iota {dimensions = array<i32: 0>} : vector<64x8xi32>
    %20 = vector.broadcast %18 : i32 to vector<64x8xi32>
    %21 = arith.addi %19, %20 : vector<64x8xi32>
    %22 = vector.broadcast %3 : vector<1x8xi32> to vector<64x8xi32>
    %23 = arith.cmpi eq, %21, %22 : vector<64x8xi32>
    %24 = arith.extui %23 : vector<64x8xi1> to vector<64x8xi32>
    %25 = arith.sitofp %24 : vector<64x8xi32> to vector<64x8xf32>
    %c0_i32_6 = arith.constant 0 : i32
    %26 = arith.addi %c0_i32_6, %18 : i32
    %27 = tpu.assume_multiple %26, 64 : i32
    %28 = arith.index_cast %27 : i32 to index
    %c0_7 = arith.constant 0 : index
    %29 = vector.load %arg2[%28, %c0_7] : memref<1536x128xf32, #tpu.memory_space<vmem>>, vector<64x128xf32>
    %cst_8 = arith.constant dense<0.000000e+00> : vector<8x128xf32>
    %30 = tpu.matmul %25, %29, %cst_8 {dimension_numbers = #tpu.dot_dimension_numbers<[0], [0], [1], [1], [0, 1, 1, 1], [], []>, precision = #tpu.contract_precision<fp32>} : vector<64x8xf32>, vector<64x128xf32>, vector<8x128xf32> -> vector<8x128xf32>
    %31 = arith.addf %17, %30 : vector<8x128xf32>
    %c2_i32 = arith.constant 2 : i32
    %c64_i32_9 = arith.constant 64 : i32
    %32 = arith.muli %c2_i32, %c64_i32_9 : i32
    %33 = tpu.iota {dimensions = array<i32: 0>} : vector<64x8xi32>
    %34 = vector.broadcast %32 : i32 to vector<64x8xi32>
    %35 = arith.addi %33, %34 : vector<64x8xi32>
    %36 = vector.broadcast %3 : vector<1x8xi32> to vector<64x8xi32>
    %37 = arith.cmpi eq, %35, %36 : vector<64x8xi32>
    %38 = arith.extui %37 : vector<64x8xi1> to vector<64x8xi32>
    %39 = arith.sitofp %38 : vector<64x8xi32> to vector<64x8xf32>
    %c0_i32_10 = arith.constant 0 : i32
    %40 = arith.addi %c0_i32_10, %32 : i32
    %41 = tpu.assume_multiple %40, 64 : i32
    %42 = arith.index_cast %41 : i32 to index
    %c0_11 = arith.constant 0 : index
    %43 = vector.load %arg2[%42, %c0_11] : memref<1536x128xf32, #tpu.memory_space<vmem>>, vector<64x128xf32>
    %cst_12 = arith.constant dense<0.000000e+00> : vector<8x128xf32>
    %44 = tpu.matmul %39, %43, %cst_12 {dimension_numbers = #tpu.dot_dimension_numbers<[0], [0], [1], [1], [0, 1, 1, 1], [], []>, precision = #tpu.contract_precision<fp32>} : vector<64x8xf32>, vector<64x128xf32>, vector<8x128xf32> -> vector<8x128xf32>
    %45 = arith.addf %31, %44 : vector<8x128xf32>
    %c3_i32 = arith.constant 3 : i32
    %c64_i32_13 = arith.constant 64 : i32
    %46 = arith.muli %c3_i32, %c64_i32_13 : i32
    %47 = tpu.iota {dimensions = array<i32: 0>} : vector<64x8xi32>
    %48 = vector.broadcast %46 : i32 to vector<64x8xi32>
    %49 = arith.addi %47, %48 : vector<64x8xi32>
    %50 = vector.broadcast %3 : vector<1x8xi32> to vector<64x8xi32>
    %51 = arith.cmpi eq, %49, %50 : vector<64x8xi32>
    %52 = arith.extui %51 : vector<64x8xi1> to vector<64x8xi32>
    %53 = arith.sitofp %52 : vector<64x8xi32> to vector<64x8xf32>
    %c0_i32_14 = arith.constant 0 : i32
    %54 = arith.addi %c0_i32_14, %46 : i32
    %55 = tpu.assume_multiple %54, 64 : i32
    %56 = arith.index_cast %55 : i32 to index
    %c0_15 = arith.constant 0 : index
    %57 = vector.load %arg2[%56, %c0_15] : memref<1536x128xf32, #tpu.memory_space<vmem>>, vector<64x128xf32>
    %cst_16 = arith.constant dense<0.000000e+00> : vector<8x128xf32>
    %58 = tpu.matmul %53, %57, %cst_16 {dimension_numbers = #tpu.dot_dimension_numbers<[0], [0], [1], [1], [0, 1, 1, 1], [], []>, precision = #tpu.contract_precision<fp32>} : vector<64x8xf32>, vector<64x128xf32>, vector<8x128xf32> -> vector<8x128xf32>
    %59 = arith.addf %45, %58 : vector<8x128xf32>
    %c4_i32 = arith.constant 4 : i32
    %c64_i32_17 = arith.constant 64 : i32
    %60 = arith.muli %c4_i32, %c64_i32_17 : i32
    %61 = tpu.iota {dimensions = array<i32: 0>} : vector<64x8xi32>
    %62 = vector.broadcast %60 : i32 to vector<64x8xi32>
    %63 = arith.addi %61, %62 : vector<64x8xi32>
    %64 = vector.broadcast %3 : vector<1x8xi32> to vector<64x8xi32>
    %65 = arith.cmpi eq, %63, %64 : vector<64x8xi32>
    %66 = arith.extui %65 : vector<64x8xi1> to vector<64x8xi32>
    %67 = arith.sitofp %66 : vector<64x8xi32> to vector<64x8xf32>
    %c0_i32_18 = arith.constant 0 : i32
    %68 = arith.addi %c0_i32_18, %60 : i32
    %69 = tpu.assume_multiple %68, 64 : i32
    %70 = arith.index_cast %69 : i32 to index
    %c0_19 = arith.constant 0 : index
    %71 = vector.load %arg2[%70, %c0_19] : memref<1536x128xf32, #tpu.memory_space<vmem>>, vector<64x128xf32>
    %cst_20 = arith.constant dense<0.000000e+00> : vector<8x128xf32>
    %72 = tpu.matmul %67, %71, %cst_20 {dimension_numbers = #tpu.dot_dimension_numbers<[0], [0], [1], [1], [0, 1, 1, 1], [], []>, precision = #tpu.contract_precision<fp32>} : vector<64x8xf32>, vector<64x128xf32>, vector<8x128xf32> -> vector<8x128xf32>
    %73 = arith.addf %59, %72 : vector<8x128xf32>
    %c5_i32 = arith.constant 5 : i32
    %c64_i32_21 = arith.constant 64 : i32
    %74 = arith.muli %c5_i32, %c64_i32_21 : i32
    %75 = tpu.iota {dimensions = array<i32: 0>} : vector<64x8xi32>
    %76 = vector.broadcast %74 : i32 to vector<64x8xi32>
    %77 = arith.addi %75, %76 : vector<64x8xi32>
    %78 = vector.broadcast %3 : vector<1x8xi32> to vector<64x8xi32>
    %79 = arith.cmpi eq, %77, %78 : vector<64x8xi32>
    %80 = arith.extui %79 : vector<64x8xi1> to vector<64x8xi32>
    %81 = arith.sitofp %80 : vector<64x8xi32> to vector<64x8xf32>
    %c0_i32_22 = arith.constant 0 : i32
    %82 = arith.addi %c0_i32_22, %74 : i32
    %83 = tpu.assume_multiple %82, 64 : i32
    %84 = arith.index_cast %83 : i32 to index
    %c0_23 = arith.constant 0 : index
    %85 = vector.load %arg2[%84, %c0_23] : memref<1536x128xf32, #tpu.memory_space<vmem>>, vector<64x128xf32>
    %cst_24 = arith.constant dense<0.000000e+00> : vector<8x128xf32>
    %86 = tpu.matmul %81, %85, %cst_24 {dimension_numbers = #tpu.dot_dimension_numbers<[0], [0], [1], [1], [0, 1, 1, 1], [], []>, precision = #tpu.contract_precision<fp32>} : vector<64x8xf32>, vector<64x128xf32>, vector<8x128xf32> -> vector<8x128xf32>
    %87 = arith.addf %73, %86 : vector<8x128xf32>
    %c6_i32 = arith.constant 6 : i32
    %88 = vector.extract_strided_slice %1 {offsets = [1, 0], sizes = [1, 8], strides = [1, 1]} : vector<4x8xi32> to vector<1x8xi32>
    %c0_i32_25 = arith.constant 0 : i32
    %c64_i32_26 = arith.constant 64 : i32
    %89 = arith.muli %c0_i32_25, %c64_i32_26 : i32
    %90 = tpu.iota {dimensions = array<i32: 0>} : vector<64x8xi32>
    %91 = vector.broadcast %89 : i32 to vector<64x8xi32>
    %92 = arith.addi %90, %91 : vector<64x8xi32>
    %93 = vector.broadcast %88 : vector<1x8xi32> to vector<64x8xi32>
    %94 = arith.cmpi eq, %92, %93 : vector<64x8xi32>
    %95 = arith.extui %94 : vector<64x8xi1> to vector<64x8xi32>
    %96 = arith.sitofp %95 : vector<64x8xi32> to vector<64x8xf32>
    %c384_i32 = arith.constant 384 : i32
    %97 = arith.addi %c384_i32, %89 : i32
    %98 = tpu.assume_multiple %97, 64 : i32
    %99 = arith.index_cast %98 : i32 to index
    %c0_27 = arith.constant 0 : index
    %100 = vector.load %arg2[%99, %c0_27] : memref<1536x128xf32, #tpu.memory_space<vmem>>, vector<64x128xf32>
    %cst_28 = arith.constant dense<0.000000e+00> : vector<8x128xf32>
    %101 = tpu.matmul %96, %100, %cst_28 {dimension_numbers = #tpu.dot_dimension_numbers<[0], [0], [1], [1], [0, 1, 1, 1], [], []>, precision = #tpu.contract_precision<fp32>} : vector<64x8xf32>, vector<64x128xf32>, vector<8x128xf32> -> vector<8x128xf32>
    %102 = arith.addf %87, %101 : vector<8x128xf32>
    %c1_i32_29 = arith.constant 1 : i32
    %c64_i32_30 = arith.constant 64 : i32
    %103 = arith.muli %c1_i32_29, %c64_i32_30 : i32
    %104 = tpu.iota {dimensions = array<i32: 0>} : vector<64x8xi32>
    %105 = vector.broadcast %103 : i32 to vector<64x8xi32>
    %106 = arith.addi %104, %105 : vector<64x8xi32>
    %107 = vector.broadcast %88 : vector<1x8xi32> to vector<64x8xi32>
    %108 = arith.cmpi eq, %106, %107 : vector<64x8xi32>
    %109 = arith.extui %108 : vector<64x8xi1> to vector<64x8xi32>
    %110 = arith.sitofp %109 : vector<64x8xi32> to vector<64x8xf32>
    %c384_i32_31 = arith.constant 384 : i32
    %111 = arith.addi %c384_i32_31, %103 : i32
    %112 = tpu.assume_multiple %111, 64 : i32
    %113 = arith.index_cast %112 : i32 to index
    %c0_32 = arith.constant 0 : index
    %114 = vector.load %arg2[%113, %c0_32] : memref<1536x128xf32, #tpu.memory_space<vmem>>, vector<64x128xf32>
    %cst_33 = arith.constant dense<0.000000e+00> : vector<8x128xf32>
    %115 = tpu.matmul %110, %114, %cst_33 {dimension_numbers = #tpu.dot_dimension_numbers<[0], [0], [1], [1], [0, 1, 1, 1], [], []>, precision = #tpu.contract_precision<fp32>} : vector<64x8xf32>, vector<64x128xf32>, vector<8x128xf32> -> vector<8x128xf32>
    %116 = arith.addf %102, %115 : vector<8x128xf32>
    %c2_i32_34 = arith.constant 2 : i32
    %c64_i32_35 = arith.constant 64 : i32
    %117 = arith.muli %c2_i32_34, %c64_i32_35 : i32
    %118 = tpu.iota {dimensions = array<i32: 0>} : vector<64x8xi32>
    %119 = vector.broadcast %117 : i32 to vector<64x8xi32>
    %120 = arith.addi %118, %119 : vector<64x8xi32>
    %121 = vector.broadcast %88 : vector<1x8xi32> to vector<64x8xi32>
    %122 = arith.cmpi eq, %120, %121 : vector<64x8xi32>
    %123 = arith.extui %122 : vector<64x8xi1> to vector<64x8xi32>
    %124 = arith.sitofp %123 : vector<64x8xi32> to vector<64x8xf32>
    %c384_i32_36 = arith.constant 384 : i32
    %125 = arith.addi %c384_i32_36, %117 : i32
    %126 = tpu.assume_multiple %125, 64 : i32
    %127 = arith.index_cast %126 : i32 to index
    %c0_37 = arith.constant 0 : index
    %128 = vector.load %arg2[%127, %c0_37] : memref<1536x128xf32, #tpu.memory_space<vmem>>, vector<64x128xf32>
    %cst_38 = arith.constant dense<0.000000e+00> : vector<8x128xf32>
    %129 = tpu.matmul %124, %128, %cst_38 {dimension_numbers = #tpu.dot_dimension_numbers<[0], [0], [1], [1], [0, 1, 1, 1], [], []>, precision = #tpu.contract_precision<fp32>} : vector<64x8xf32>, vector<64x128xf32>, vector<8x128xf32> -> vector<8x128xf32>
    %130 = arith.addf %116, %129 : vector<8x128xf32>
    %c3_i32_39 = arith.constant 3 : i32
    %c64_i32_40 = arith.constant 64 : i32
    %131 = arith.muli %c3_i32_39, %c64_i32_40 : i32
    %132 = tpu.iota {dimensions = array<i32: 0>} : vector<64x8xi32>
    %133 = vector.broadcast %131 : i32 to vector<64x8xi32>
    %134 = arith.addi %132, %133 : vector<64x8xi32>
    %135 = vector.broadcast %88 : vector<1x8xi32> to vector<64x8xi32>
    %136 = arith.cmpi eq, %134, %135 : vector<64x8xi32>
    %137 = arith.extui %136 : vector<64x8xi1> to vector<64x8xi32>
    %138 = arith.sitofp %137 : vector<64x8xi32> to vector<64x8xf32>
    %c384_i32_41 = arith.constant 384 : i32
    %139 = arith.addi %c384_i32_41, %131 : i32
    %140 = tpu.assume_multiple %139, 64 : i32
    %141 = arith.index_cast %140 : i32 to index
    %c0_42 = arith.constant 0 : index
    %142 = vector.load %arg2[%141, %c0_42] : memref<1536x128xf32, #tpu.memory_space<vmem>>, vector<64x128xf32>
    %cst_43 = arith.constant dense<0.000000e+00> : vector<8x128xf32>
    %143 = tpu.matmul %138, %142, %cst_43 {dimension_numbers = #tpu.dot_dimension_numbers<[0], [0], [1], [1], [0, 1, 1, 1], [], []>, precision = #tpu.contract_precision<fp32>} : vector<64x8xf32>, vector<64x128xf32>, vector<8x128xf32> -> vector<8x128xf32>
    %144 = arith.addf %130, %143 : vector<8x128xf32>
    %c4_i32_44 = arith.constant 4 : i32
    %c64_i32_45 = arith.constant 64 : i32
    %145 = arith.muli %c4_i32_44, %c64_i32_45 : i32
    %146 = tpu.iota {dimensions = array<i32: 0>} : vector<64x8xi32>
    %147 = vector.broadcast %145 : i32 to vector<64x8xi32>
    %148 = arith.addi %146, %147 : vector<64x8xi32>
    %149 = vector.broadcast %88 : vector<1x8xi32> to vector<64x8xi32>
    %150 = arith.cmpi eq, %148, %149 : vector<64x8xi32>
    %151 = arith.extui %150 : vector<64x8xi1> to vector<64x8xi32>
    %152 = arith.sitofp %151 : vector<64x8xi32> to vector<64x8xf32>
    %c384_i32_46 = arith.constant 384 : i32
    %153 = arith.addi %c384_i32_46, %145 : i32
    %154 = tpu.assume_multiple %153, 64 : i32
    %155 = arith.index_cast %154 : i32 to index
    %c0_47 = arith.constant 0 : index
    %156 = vector.load %arg2[%155, %c0_47] : memref<1536x128xf32, #tpu.memory_space<vmem>>, vector<64x128xf32>
    %cst_48 = arith.constant dense<0.000000e+00> : vector<8x128xf32>
    %157 = tpu.matmul %152, %156, %cst_48 {dimension_numbers = #tpu.dot_dimension_numbers<[0], [0], [1], [1], [0, 1, 1, 1], [], []>, precision = #tpu.contract_precision<fp32>} : vector<64x8xf32>, vector<64x128xf32>, vector<8x128xf32> -> vector<8x128xf32>
    %158 = arith.addf %144, %157 : vector<8x128xf32>
    %c5_i32_49 = arith.constant 5 : i32
    %c64_i32_50 = arith.constant 64 : i32
    %159 = arith.muli %c5_i32_49, %c64_i32_50 : i32
    %160 = tpu.iota {dimensions = array<i32: 0>} : vector<64x8xi32>
    %161 = vector.broadcast %159 : i32 to vector<64x8xi32>
    %162 = arith.addi %160, %161 : vector<64x8xi32>
    %163 = vector.broadcast %88 : vector<1x8xi32> to vector<64x8xi32>
    %164 = arith.cmpi eq, %162, %163 : vector<64x8xi32>
    %165 = arith.extui %164 : vector<64x8xi1> to vector<64x8xi32>
    %166 = arith.sitofp %165 : vector<64x8xi32> to vector<64x8xf32>
    %c384_i32_51 = arith.constant 384 : i32
    %167 = arith.addi %c384_i32_51, %159 : i32
    %168 = tpu.assume_multiple %167, 64 : i32
    %169 = arith.index_cast %168 : i32 to index
    %c0_52 = arith.constant 0 : index
    %170 = vector.load %arg2[%169, %c0_52] : memref<1536x128xf32, #tpu.memory_space<vmem>>, vector<64x128xf32>
    %cst_53 = arith.constant dense<0.000000e+00> : vector<8x128xf32>
    %171 = tpu.matmul %166, %170, %cst_53 {dimension_numbers = #tpu.dot_dimension_numbers<[0], [0], [1], [1], [0, 1, 1, 1], [], []>, precision = #tpu.contract_precision<fp32>} : vector<64x8xf32>, vector<64x128xf32>, vector<8x128xf32> -> vector<8x128xf32>
    %172 = arith.addf %158, %171 : vector<8x128xf32>
    %c6_i32_54 = arith.constant 6 : i32
    %173 = vector.extract_strided_slice %1 {offsets = [2, 0], sizes = [1, 8], strides = [1, 1]} : vector<4x8xi32> to vector<1x8xi32>
    %c0_i32_55 = arith.constant 0 : i32
    %c64_i32_56 = arith.constant 64 : i32
    %174 = arith.muli %c0_i32_55, %c64_i32_56 : i32
    %175 = tpu.iota {dimensions = array<i32: 0>} : vector<64x8xi32>
    %176 = vector.broadcast %174 : i32 to vector<64x8xi32>
    %177 = arith.addi %175, %176 : vector<64x8xi32>
    %178 = vector.broadcast %173 : vector<1x8xi32> to vector<64x8xi32>
    %179 = arith.cmpi eq, %177, %178 : vector<64x8xi32>
    %180 = arith.extui %179 : vector<64x8xi1> to vector<64x8xi32>
    %181 = arith.sitofp %180 : vector<64x8xi32> to vector<64x8xf32>
    %c768_i32 = arith.constant 768 : i32
    %182 = arith.addi %c768_i32, %174 : i32
    %183 = tpu.assume_multiple %182, 64 : i32
    %184 = arith.index_cast %183 : i32 to index
    %c0_57 = arith.constant 0 : index
    %185 = vector.load %arg2[%184, %c0_57] : memref<1536x128xf32, #tpu.memory_space<vmem>>, vector<64x128xf32>
    %cst_58 = arith.constant dense<0.000000e+00> : vector<8x128xf32>
    %186 = tpu.matmul %181, %185, %cst_58 {dimension_numbers = #tpu.dot_dimension_numbers<[0], [0], [1], [1], [0, 1, 1, 1], [], []>, precision = #tpu.contract_precision<fp32>} : vector<64x8xf32>, vector<64x128xf32>, vector<8x128xf32> -> vector<8x128xf32>
    %187 = arith.addf %172, %186 : vector<8x128xf32>
    %c1_i32_59 = arith.constant 1 : i32
    %c64_i32_60 = arith.constant 64 : i32
    %188 = arith.muli %c1_i32_59, %c64_i32_60 : i32
    %189 = tpu.iota {dimensions = array<i32: 0>} : vector<64x8xi32>
    %190 = vector.broadcast %188 : i32 to vector<64x8xi32>
    %191 = arith.addi %189, %190 : vector<64x8xi32>
    %192 = vector.broadcast %173 : vector<1x8xi32> to vector<64x8xi32>
    %193 = arith.cmpi eq, %191, %192 : vector<64x8xi32>
    %194 = arith.extui %193 : vector<64x8xi1> to vector<64x8xi32>
    %195 = arith.sitofp %194 : vector<64x8xi32> to vector<64x8xf32>
    %c768_i32_61 = arith.constant 768 : i32
    %196 = arith.addi %c768_i32_61, %188 : i32
    %197 = tpu.assume_multiple %196, 64 : i32
    %198 = arith.index_cast %197 : i32 to index
    %c0_62 = arith.constant 0 : index
    %199 = vector.load %arg2[%198, %c0_62] : memref<1536x128xf32, #tpu.memory_space<vmem>>, vector<64x128xf32>
    %cst_63 = arith.constant dense<0.000000e+00> : vector<8x128xf32>
    %200 = tpu.matmul %195, %199, %cst_63 {dimension_numbers = #tpu.dot_dimension_numbers<[0], [0], [1], [1], [0, 1, 1, 1], [], []>, precision = #tpu.contract_precision<fp32>} : vector<64x8xf32>, vector<64x128xf32>, vector<8x128xf32> -> vector<8x128xf32>
    %201 = arith.addf %187, %200 : vector<8x128xf32>
    %c2_i32_64 = arith.constant 2 : i32
    %c64_i32_65 = arith.constant 64 : i32
    %202 = arith.muli %c2_i32_64, %c64_i32_65 : i32
    %203 = tpu.iota {dimensions = array<i32: 0>} : vector<64x8xi32>
    %204 = vector.broadcast %202 : i32 to vector<64x8xi32>
    %205 = arith.addi %203, %204 : vector<64x8xi32>
    %206 = vector.broadcast %173 : vector<1x8xi32> to vector<64x8xi32>
    %207 = arith.cmpi eq, %205, %206 : vector<64x8xi32>
    %208 = arith.extui %207 : vector<64x8xi1> to vector<64x8xi32>
    %209 = arith.sitofp %208 : vector<64x8xi32> to vector<64x8xf32>
    %c768_i32_66 = arith.constant 768 : i32
    %210 = arith.addi %c768_i32_66, %202 : i32
    %211 = tpu.assume_multiple %210, 64 : i32
    %212 = arith.index_cast %211 : i32 to index
    %c0_67 = arith.constant 0 : index
    %213 = vector.load %arg2[%212, %c0_67] : memref<1536x128xf32, #tpu.memory_space<vmem>>, vector<64x128xf32>
    %cst_68 = arith.constant dense<0.000000e+00> : vector<8x128xf32>
    %214 = tpu.matmul %209, %213, %cst_68 {dimension_numbers = #tpu.dot_dimension_numbers<[0], [0], [1], [1], [0, 1, 1, 1], [], []>, precision = #tpu.contract_precision<fp32>} : vector<64x8xf32>, vector<64x128xf32>, vector<8x128xf32> -> vector<8x128xf32>
    %215 = arith.addf %201, %214 : vector<8x128xf32>
    %c3_i32_69 = arith.constant 3 : i32
    %c64_i32_70 = arith.constant 64 : i32
    %216 = arith.muli %c3_i32_69, %c64_i32_70 : i32
    %217 = tpu.iota {dimensions = array<i32: 0>} : vector<64x8xi32>
    %218 = vector.broadcast %216 : i32 to vector<64x8xi32>
    %219 = arith.addi %217, %218 : vector<64x8xi32>
    %220 = vector.broadcast %173 : vector<1x8xi32> to vector<64x8xi32>
    %221 = arith.cmpi eq, %219, %220 : vector<64x8xi32>
    %222 = arith.extui %221 : vector<64x8xi1> to vector<64x8xi32>
    %223 = arith.sitofp %222 : vector<64x8xi32> to vector<64x8xf32>
    %c768_i32_71 = arith.constant 768 : i32
    %224 = arith.addi %c768_i32_71, %216 : i32
    %225 = tpu.assume_multiple %224, 64 : i32
    %226 = arith.index_cast %225 : i32 to index
    %c0_72 = arith.constant 0 : index
    %227 = vector.load %arg2[%226, %c0_72] : memref<1536x128xf32, #tpu.memory_space<vmem>>, vector<64x128xf32>
    %cst_73 = arith.constant dense<0.000000e+00> : vector<8x128xf32>
    %228 = tpu.matmul %223, %227, %cst_73 {dimension_numbers = #tpu.dot_dimension_numbers<[0], [0], [1], [1], [0, 1, 1, 1], [], []>, precision = #tpu.contract_precision<fp32>} : vector<64x8xf32>, vector<64x128xf32>, vector<8x128xf32> -> vector<8x128xf32>
    %229 = arith.addf %215, %228 : vector<8x128xf32>
    %c4_i32_74 = arith.constant 4 : i32
    %c64_i32_75 = arith.constant 64 : i32
    %230 = arith.muli %c4_i32_74, %c64_i32_75 : i32
    %231 = tpu.iota {dimensions = array<i32: 0>} : vector<64x8xi32>
    %232 = vector.broadcast %230 : i32 to vector<64x8xi32>
    %233 = arith.addi %231, %232 : vector<64x8xi32>
    %234 = vector.broadcast %173 : vector<1x8xi32> to vector<64x8xi32>
    %235 = arith.cmpi eq, %233, %234 : vector<64x8xi32>
    %236 = arith.extui %235 : vector<64x8xi1> to vector<64x8xi32>
    %237 = arith.sitofp %236 : vector<64x8xi32> to vector<64x8xf32>
    %c768_i32_76 = arith.constant 768 : i32
    %238 = arith.addi %c768_i32_76, %230 : i32
    %239 = tpu.assume_multiple %238, 64 : i32
    %240 = arith.index_cast %239 : i32 to index
    %c0_77 = arith.constant 0 : index
    %241 = vector.load %arg2[%240, %c0_77] : memref<1536x128xf32, #tpu.memory_space<vmem>>, vector<64x128xf32>
    %cst_78 = arith.constant dense<0.000000e+00> : vector<8x128xf32>
    %242 = tpu.matmul %237, %241, %cst_78 {dimension_numbers = #tpu.dot_dimension_numbers<[0], [0], [1], [1], [0, 1, 1, 1], [], []>, precision = #tpu.contract_precision<fp32>} : vector<64x8xf32>, vector<64x128xf32>, vector<8x128xf32> -> vector<8x128xf32>
    %243 = arith.addf %229, %242 : vector<8x128xf32>
    %c5_i32_79 = arith.constant 5 : i32
    %c64_i32_80 = arith.constant 64 : i32
    %244 = arith.muli %c5_i32_79, %c64_i32_80 : i32
    %245 = tpu.iota {dimensions = array<i32: 0>} : vector<64x8xi32>
    %246 = vector.broadcast %244 : i32 to vector<64x8xi32>
    %247 = arith.addi %245, %246 : vector<64x8xi32>
    %248 = vector.broadcast %173 : vector<1x8xi32> to vector<64x8xi32>
    %249 = arith.cmpi eq, %247, %248 : vector<64x8xi32>
    %250 = arith.extui %249 : vector<64x8xi1> to vector<64x8xi32>
    %251 = arith.sitofp %250 : vector<64x8xi32> to vector<64x8xf32>
    %c768_i32_81 = arith.constant 768 : i32
    %252 = arith.addi %c768_i32_81, %244 : i32
    %253 = tpu.assume_multiple %252, 64 : i32
    %254 = arith.index_cast %253 : i32 to index
    %c0_82 = arith.constant 0 : index
    %255 = vector.load %arg2[%254, %c0_82] : memref<1536x128xf32, #tpu.memory_space<vmem>>, vector<64x128xf32>
    %cst_83 = arith.constant dense<0.000000e+00> : vector<8x128xf32>
    %256 = tpu.matmul %251, %255, %cst_83 {dimension_numbers = #tpu.dot_dimension_numbers<[0], [0], [1], [1], [0, 1, 1, 1], [], []>, precision = #tpu.contract_precision<fp32>} : vector<64x8xf32>, vector<64x128xf32>, vector<8x128xf32> -> vector<8x128xf32>
    %257 = arith.addf %243, %256 : vector<8x128xf32>
    %c6_i32_84 = arith.constant 6 : i32
    %258 = vector.extract_strided_slice %1 {offsets = [3, 0], sizes = [1, 8], strides = [1, 1]} : vector<4x8xi32> to vector<1x8xi32>
    %c0_i32_85 = arith.constant 0 : i32
    %c64_i32_86 = arith.constant 64 : i32
    %259 = arith.muli %c0_i32_85, %c64_i32_86 : i32
    %260 = tpu.iota {dimensions = array<i32: 0>} : vector<64x8xi32>
    %261 = vector.broadcast %259 : i32 to vector<64x8xi32>
    %262 = arith.addi %260, %261 : vector<64x8xi32>
    %263 = vector.broadcast %258 : vector<1x8xi32> to vector<64x8xi32>
    %264 = arith.cmpi eq, %262, %263 : vector<64x8xi32>
    %265 = arith.extui %264 : vector<64x8xi1> to vector<64x8xi32>
    %266 = arith.sitofp %265 : vector<64x8xi32> to vector<64x8xf32>
    %c1152_i32 = arith.constant 1152 : i32
    %267 = arith.addi %c1152_i32, %259 : i32
    %268 = tpu.assume_multiple %267, 64 : i32
    %269 = arith.index_cast %268 : i32 to index
    %c0_87 = arith.constant 0 : index
    %270 = vector.load %arg2[%269, %c0_87] : memref<1536x128xf32, #tpu.memory_space<vmem>>, vector<64x128xf32>
    %cst_88 = arith.constant dense<0.000000e+00> : vector<8x128xf32>
    %271 = tpu.matmul %266, %270, %cst_88 {dimension_numbers = #tpu.dot_dimension_numbers<[0], [0], [1], [1], [0, 1, 1, 1], [], []>, precision = #tpu.contract_precision<fp32>} : vector<64x8xf32>, vector<64x128xf32>, vector<8x128xf32> -> vector<8x128xf32>
    %272 = arith.addf %257, %271 : vector<8x128xf32>
    %c1_i32_89 = arith.constant 1 : i32
    %c64_i32_90 = arith.constant 64 : i32
    %273 = arith.muli %c1_i32_89, %c64_i32_90 : i32
    %274 = tpu.iota {dimensions = array<i32: 0>} : vector<64x8xi32>
    %275 = vector.broadcast %273 : i32 to vector<64x8xi32>
    %276 = arith.addi %274, %275 : vector<64x8xi32>
    %277 = vector.broadcast %258 : vector<1x8xi32> to vector<64x8xi32>
    %278 = arith.cmpi eq, %276, %277 : vector<64x8xi32>
    %279 = arith.extui %278 : vector<64x8xi1> to vector<64x8xi32>
    %280 = arith.sitofp %279 : vector<64x8xi32> to vector<64x8xf32>
    %c1152_i32_91 = arith.constant 1152 : i32
    %281 = arith.addi %c1152_i32_91, %273 : i32
    %282 = tpu.assume_multiple %281, 64 : i32
    %283 = arith.index_cast %282 : i32 to index
    %c0_92 = arith.constant 0 : index
    %284 = vector.load %arg2[%283, %c0_92] : memref<1536x128xf32, #tpu.memory_space<vmem>>, vector<64x128xf32>
    %cst_93 = arith.constant dense<0.000000e+00> : vector<8x128xf32>
    %285 = tpu.matmul %280, %284, %cst_93 {dimension_numbers = #tpu.dot_dimension_numbers<[0], [0], [1], [1], [0, 1, 1, 1], [], []>, precision = #tpu.contract_precision<fp32>} : vector<64x8xf32>, vector<64x128xf32>, vector<8x128xf32> -> vector<8x128xf32>
    %286 = arith.addf %272, %285 : vector<8x128xf32>
    %c2_i32_94 = arith.constant 2 : i32
    %c64_i32_95 = arith.constant 64 : i32
    %287 = arith.muli %c2_i32_94, %c64_i32_95 : i32
    %288 = tpu.iota {dimensions = array<i32: 0>} : vector<64x8xi32>
    %289 = vector.broadcast %287 : i32 to vector<64x8xi32>
    %290 = arith.addi %288, %289 : vector<64x8xi32>
    %291 = vector.broadcast %258 : vector<1x8xi32> to vector<64x8xi32>
    %292 = arith.cmpi eq, %290, %291 : vector<64x8xi32>
    %293 = arith.extui %292 : vector<64x8xi1> to vector<64x8xi32>
    %294 = arith.sitofp %293 : vector<64x8xi32> to vector<64x8xf32>
    %c1152_i32_96 = arith.constant 1152 : i32
    %295 = arith.addi %c1152_i32_96, %287 : i32
    %296 = tpu.assume_multiple %295, 64 : i32
    %297 = arith.index_cast %296 : i32 to index
    %c0_97 = arith.constant 0 : index
    %298 = vector.load %arg2[%297, %c0_97] : memref<1536x128xf32, #tpu.memory_space<vmem>>, vector<64x128xf32>
    %cst_98 = arith.constant dense<0.000000e+00> : vector<8x128xf32>
    %299 = tpu.matmul %294, %298, %cst_98 {dimension_numbers = #tpu.dot_dimension_numbers<[0], [0], [1], [1], [0, 1, 1, 1], [], []>, precision = #tpu.contract_precision<fp32>} : vector<64x8xf32>, vector<64x128xf32>, vector<8x128xf32> -> vector<8x128xf32>
    %300 = arith.addf %286, %299 : vector<8x128xf32>
    %c3_i32_99 = arith.constant 3 : i32
    %c64_i32_100 = arith.constant 64 : i32
    %301 = arith.muli %c3_i32_99, %c64_i32_100 : i32
    %302 = tpu.iota {dimensions = array<i32: 0>} : vector<64x8xi32>
    %303 = vector.broadcast %301 : i32 to vector<64x8xi32>
    %304 = arith.addi %302, %303 : vector<64x8xi32>
    %305 = vector.broadcast %258 : vector<1x8xi32> to vector<64x8xi32>
    %306 = arith.cmpi eq, %304, %305 : vector<64x8xi32>
    %307 = arith.extui %306 : vector<64x8xi1> to vector<64x8xi32>
    %308 = arith.sitofp %307 : vector<64x8xi32> to vector<64x8xf32>
    %c1152_i32_101 = arith.constant 1152 : i32
    %309 = arith.addi %c1152_i32_101, %301 : i32
    %310 = tpu.assume_multiple %309, 64 : i32
    %311 = arith.index_cast %310 : i32 to index
    %c0_102 = arith.constant 0 : index
    %312 = vector.load %arg2[%311, %c0_102] : memref<1536x128xf32, #tpu.memory_space<vmem>>, vector<64x128xf32>
    %cst_103 = arith.constant dense<0.000000e+00> : vector<8x128xf32>
    %313 = tpu.matmul %308, %312, %cst_103 {dimension_numbers = #tpu.dot_dimension_numbers<[0], [0], [1], [1], [0, 1, 1, 1], [], []>, precision = #tpu.contract_precision<fp32>} : vector<64x8xf32>, vector<64x128xf32>, vector<8x128xf32> -> vector<8x128xf32>
    %314 = arith.addf %300, %313 : vector<8x128xf32>
    %c4_i32_104 = arith.constant 4 : i32
    %c64_i32_105 = arith.constant 64 : i32
    %315 = arith.muli %c4_i32_104, %c64_i32_105 : i32
    %316 = tpu.iota {dimensions = array<i32: 0>} : vector<64x8xi32>
    %317 = vector.broadcast %315 : i32 to vector<64x8xi32>
    %318 = arith.addi %316, %317 : vector<64x8xi32>
    %319 = vector.broadcast %258 : vector<1x8xi32> to vector<64x8xi32>
    %320 = arith.cmpi eq, %318, %319 : vector<64x8xi32>
    %321 = arith.extui %320 : vector<64x8xi1> to vector<64x8xi32>
    %322 = arith.sitofp %321 : vector<64x8xi32> to vector<64x8xf32>
    %c1152_i32_106 = arith.constant 1152 : i32
    %323 = arith.addi %c1152_i32_106, %315 : i32
    %324 = tpu.assume_multiple %323, 64 : i32
    %325 = arith.index_cast %324 : i32 to index
    %c0_107 = arith.constant 0 : index
    %326 = vector.load %arg2[%325, %c0_107] : memref<1536x128xf32, #tpu.memory_space<vmem>>, vector<64x128xf32>
    %cst_108 = arith.constant dense<0.000000e+00> : vector<8x128xf32>
    %327 = tpu.matmul %322, %326, %cst_108 {dimension_numbers = #tpu.dot_dimension_numbers<[0], [0], [1], [1], [0, 1, 1, 1], [], []>, precision = #tpu.contract_precision<fp32>} : vector<64x8xf32>, vector<64x128xf32>, vector<8x128xf32> -> vector<8x128xf32>
    %328 = arith.addf %314, %327 : vector<8x128xf32>
    %c5_i32_109 = arith.constant 5 : i32
    %c64_i32_110 = arith.constant 64 : i32
    %329 = arith.muli %c5_i32_109, %c64_i32_110 : i32
    %330 = tpu.iota {dimensions = array<i32: 0>} : vector<64x8xi32>
    %331 = vector.broadcast %329 : i32 to vector<64x8xi32>
    %332 = arith.addi %330, %331 : vector<64x8xi32>
    %333 = vector.broadcast %258 : vector<1x8xi32> to vector<64x8xi32>
    %334 = arith.cmpi eq, %332, %333 : vector<64x8xi32>
    %335 = arith.extui %334 : vector<64x8xi1> to vector<64x8xi32>
    %336 = arith.sitofp %335 : vector<64x8xi32> to vector<64x8xf32>
    %c1152_i32_111 = arith.constant 1152 : i32
    %337 = arith.addi %c1152_i32_111, %329 : i32
    %338 = tpu.assume_multiple %337, 64 : i32
    %339 = arith.index_cast %338 : i32 to index
    %c0_112 = arith.constant 0 : index
    %340 = vector.load %arg2[%339, %c0_112] : memref<1536x128xf32, #tpu.memory_space<vmem>>, vector<64x128xf32>
    %cst_113 = arith.constant dense<0.000000e+00> : vector<8x128xf32>
    %341 = tpu.matmul %336, %340, %cst_113 {dimension_numbers = #tpu.dot_dimension_numbers<[0], [0], [1], [1], [0, 1, 1, 1], [], []>, precision = #tpu.contract_precision<fp32>} : vector<64x8xf32>, vector<64x128xf32>, vector<8x128xf32> -> vector<8x128xf32>
    %342 = arith.addf %328, %341 : vector<8x128xf32>
    %c6_i32_114 = arith.constant 6 : i32
    %c0_115 = arith.constant 0 : index
    %c0_116 = arith.constant 0 : index
    %343 = vector.load %arg3[%c0_115, %c0_116] : memref<8x128xf32, #tpu.memory_space<vmem>>, vector<8x128xf32>
    tpu.vector_store %arg3[%c0_115, %c0_116], %342 {strides = array<i32>} : memref<8x128xf32, #tpu.memory_space<vmem>>, vector<8x128xf32>,
    return
  }
  func.func @transform_0(%arg0: i32) -> (i32, i32, i32) {
    %c0_i32 = arith.constant 0 : i32
    %c0_i32_0 = arith.constant 0 : i32
    %c0_i32_1 = arith.constant 0 : i32
    return %arg0, %c0_i32, %c0_i32_0 : i32, i32, i32
  }
  func.func @transform_1(%arg0: i32) -> (i32, i32) {
    %c0_i32 = arith.constant 0 : i32
    %c0_i32_0 = arith.constant 0 : i32
    %c0_i32_1 = arith.constant 0 : i32
    return %c0_i32, %c0_i32_0 : i32, i32
  }
  func.func @transform_2(%arg0: i32) -> (i32, i32) {
    %c0_i32 = arith.constant 0 : i32
    %c0_i32_0 = arith.constant 0 : i32
    return %arg0, %c0_i32 : i32, i32
  }
}

</mosaic_0001>

<bundles_post_ra>
// kernel: tpu_custom_call.1
= control target key start
LH: loop header
LB: loop body
LE: loop exit
PB: predicated region body
PF: predicated region fallthrough
CT: control target
= control target key end

     0   :  { %7 = vsyncpa [#allocation3], 0  ;;  %s25683_s0 = inlined_call_operand.hbm [shape: s32[1,4,8], index: 0, kind: input, shape index: {}]   ;;  %s25684_s1 = inlined_call_operand.hbm [shape: f32[1536,128], index: 1, kind: input, shape index: {}]   ;;  %s25685_s2 = inlined_call_operand.hbm [shape: f32[8,128], index: 2, kind: output, shape index: {}]  }
   0x1   :  { %8 = vsyncpa [#allocation6], 0 }
   0x2   :  { %9 = vsyncpa [#allocation4], 0  ;;  %s21233_s9 = smov [#allocation2]   ;;  %s21234_s11 = smov [#allocation5]  }
   0x3   :  { %s16_s10 = sshll.u32 %s21233_s9, 4  ;;  %s25_s12 = sshll.u32 %s21234_s11, 4  ;;  %s17_s10 = int_to_ptr.vmem [resolvable:$true] %s16_s10  ;;  %s21256_s12 = int_to_ptr.vmem [resolvable:$true] %s25_s12 }
   0x4   :  { %s21161_s15 = scalar_lea.hbm %s25683_s0, 64 }
   0x5   :  { %p21162_p0 = scmp.ne.s32.totalorder %s25683_s0, %s21161_s15  ;;  %p21165_p1 = scmp.lt.u32.totalorder %s21161_s15, %s25683_s0 }
   0x7   :  { %p21167_p2 = pnand %p21165_p1, %p21162_p0 }
   0x9   :  { %21170 = shalt.err (!%p21167_p2)
}
   0xa   :  { %s21171_s20 = scalar_lea.vmem %s17_s10, 64  ;;  %p21176_p4 = scmp.lt.s32.totalorder %s17_s10, %s17_s10 }
   0xb   :  { %p21172_p3 = scmp.ne.s32.totalorder %s17_s10, %s21171_s20  ;;  %p21177_p5 = scmp.lt.s32.totalorder %s21171_s20, %s21171_s20 }
   0xd   :  { %p21178_p6 = por %p21177_p5, %p21176_p4 }
   0xf   :  { %p21179_p7 = pnand %p21178_p6, %p21172_p3 }
  0x11   :  { %21182 = shalt.err (!%p21179_p7)
}
  0x12   :  { %19 = dma.hbm_to_vmem [thread:$0]  %s25683_s0, 64, %s17_s10, [#allocation3]  }
  0x13   :  { %s21183_s25 = scalar_lea.hbm %s25684_s1, 24576 }
  0x14   :  { %p21184_p8 = scmp.ne.s32.totalorder %s25684_s1, %s21183_s25  ;;  %p21187_p9 = scmp.lt.u32.totalorder %s21183_s25, %s25684_s1 }
  0x16   :  { %p21189_p10 = pnand %p21187_p9, %p21184_p8 }
  0x18   :  { %21192 = shalt.err (!%p21189_p10)
}
  0x19   :  { %s21193_s30 = scalar_lea.vmem %s21256_s12, 24576  ;;  %p21198_p12 = scmp.lt.s32.totalorder %s21256_s12, %s21256_s12 }
  0x1a   :  { %p21194_p11 = scmp.ne.s32.totalorder %s21256_s12, %s21193_s30  ;;  %p21199_p13 = scmp.lt.s32.totalorder %s21193_s30, %s21193_s30 }
  0x1c   :  { %p21200_p0 = por %p21199_p13, %p21198_p12 }
  0x1e   :  { %p21201_p1 = pnand %p21200_p0, %p21194_p11 }
  0x20   :  { %21204 = shalt.err (!%p21201_p1)
}
  0x21   :  { %s21235_s0 = smov 128   ;;  %s21236_s3 = smov 8  }
  0x22   :  { %31 = dma.hbm_to_vmem [thread:$0]  %s25684_s1, 24576, %s21256_s12, [#allocation6], %s21235_s0, %s21235_s0, %s21236_s3  }
  0x23   :  { %21227 = dma.done.wait [#allocation3], 64  }
  0x24   :  { %21228 = vsyncadd [#allocation3], 4294967232 }
  0x25   :  { %21229 = dma.done.wait [#allocation6], 24576  }
  0x26   :  { %21230 = vsyncadd [#allocation6], 4294942720  ;;  %v39_v0 = vlaneseq  ;;  %v25688_v1 = vmov 0.0|0.0   ;;  %v38_v13 = vld [vmem:[#allocation2] sm:$0xf]  ;;  %v25686_v23 = vmov 0.0  }
  0x27   :  { %18887 = vmatprep.subr.bf16.mxu1 %v25688_v1  ;;  %19751 = vmatprep.subr.bf16.mxu0 %v25688_v1  ;;  %v117_v63 = vld [vmem:[#allocation5 + $0x40] sm:$0xff]  ;;  %v124_v44 = vld [vmem:[#allocation5 + $0x78] sm:$0xff]  ;;  %s21240_s1 = smov [#allocation7]  }
  0x28   :  { %v21289_v2 = vshrl.u32 %v39_v0, 7  ;;  %v7399_v47 = vld [vmem:[#allocation5 + $0x320] sm:$0xff]  ;;  %v123_v0 = vld [vmem:[#allocation5 + $0x70] sm:$0xff]  ;;  %s14653_s6 = sshll.u32 %s21240_s1, 4  ;;  %s14654_s6 = int_to_ptr.vmem [resolvable:$true] %s14653_s6 }
  0x29   :  { %s21205_s7 = scalar_lea.vmem %s14654_s6, 128  ;;  %p21210_p3 = scmp.lt.s32.totalorder %s14654_s6, %s14654_s6 }
  0x2a   :  { %v50_v3 = vsub.s32 0, %v21289_v2  ;;  %v7368_v4 = vsub.s32 2, %v21289_v2  ;;  %v21294_v5 = vadd.s32 64, %v21289_v2  ;;  %v21297_v6 = vadd.s32 8, %v21289_v2  ;;  %p21206_p2 = scmp.ne.s32.totalorder %s14654_s6, %s21205_s7  ;;  %p21211_p4 = scmp.lt.s32.totalorder %s21205_s7, %s21205_s7 }
  0x2b   :  { %v21300_v7 = vadd.s32 16, %v21289_v2  ;;  %v21303_v8 = vadd.s32 24, %v21289_v2  ;;  %v21306_v9 = vadd.s32 32, %v21289_v2  ;;  %v21309_v10 = vadd.s32 40, %v21289_v2 }
  0x2c   :  { %25862 = vst [vmem:[#allocation11_spill] sm:$0xff] %v21294_v5  ;;  %v21312_v11 = vadd.s32 48, %v21289_v2  ;;  %v21315_v12 = vadd.s32 56, %v21289_v2  ;;  %v21318_v14 = vadd.s32 64, %v21297_v6  ;;  %v21320_v15 = vrot.slane %v38_v13, %v50_v3  ;;  %p21212_p5 = por %p21211_p4, %p21210_p3 }
  0x2d   :  { %v21322_v16 = vrot.slane %v38_v13, %v7368_v4  ;;  %v21325_v17 = vadd.s32 64, %v21300_v7  ;;  %v21328_v18 = vadd.s32 64, %v21303_v8  ;;  %v21331_v19 = vadd.s32 64, %v21306_v9  ;;  %v118_v13 = vld [vmem:[#allocation5 + $0x48] sm:$0xff] }
  0x2e   :  { %25863 = vst [vmem:[#allocation12_spill] sm:$0xff] %v21318_v14  ;;  %v21334_v20 = vadd.s32 64, %v21309_v10  ;;  %v21337_v21 = vadd.s32 64, %v21312_v11  ;;  %v21340_v22 = vadd.s32 64, %v21315_v12  ;;  %vm92_vm0 = vcmp.eq.s32.totalorder %v21294_v5, %v21320_v15  ;;  %p21213_p6 = pnand %p21212_p5, %p21206_p2 }
  0x2f   :  { %25864 = vst [vmem:[#allocation13_spill] sm:$0xff] %v21325_v17  ;;  %25865 = vst [vmem:[#allocation14_spill] sm:$0xff] %v21328_v18  ;;  %vm7370_vm1 = vcmp.eq.s32.totalorder %v21289_v2, %v21322_v16  ;;  %vm93_vm2 = vcmp.eq.s32.totalorder %v21318_v14, %v21320_v15  ;;  %vm7371_vm3 = vcmp.eq.s32.totalorder %v21297_v6, %v21322_v16  ;;  %v14671_v24 = vsel %vm92_vm0, 1.0, %v25686_v23 }
  0x30   :  { %25866 = vst [vmem:[#allocation15_spill] sm:$0xff] %v21331_v19  ;;  %25867 = vst [vmem:[#allocation16_spill] sm:$0xff] %v21334_v20  ;;  %v14759_v25 = vsel %vm7370_vm1, 1.0, %v25686_v23  ;;  %v14672_v26 = vsel %vm93_vm2, 1.0, %v25686_v23  ;;  %v14760_v27 = vsel %vm7371_vm3, 1.0, %v25686_v23  ;;  %vm94_vm4 = vcmp.eq.s32.totalorder %v21325_v17, %v21320_v15 }
  0x31   :  { %25868 = vst [vmem:[#allocation17_spill] sm:$0xff] %v21337_v21  ;;  %25869 = vst [vmem:[#allocation18_spill] sm:$0xff] %v21340_v22  ;;  %v20908_v28 = vpack.i.bf16 %v14759_v25, %v14671_v24  ;;  %v20910_v29 = vpack.i.bf16 %v14760_v27, %v14672_v26  ;;  %vm7372_vm5 = vcmp.eq.s32.totalorder %v21300_v7, %v21322_v16  ;;  %v14673_v30 = vsel %vm94_vm4, 1.0, %v25686_v23  ;;  %v7395_v24 = vld [vmem:[#allocation5 + $0x300] sm:$0xff]  ;;  %v7396_v25 = vld [vmem:[#allocation5 + $0x308] sm:$0xff] }
  0x32   :  { %v14761_v31 = vsel %vm7372_vm5, 1.0, %v25686_v23  ;;  %vm95_vm6 = vcmp.eq.s32.totalorder %v21328_v18, %v21320_v15  ;;  %vm7373_vm7 = vcmp.eq.s32.totalorder %v21303_v8, %v21322_v16  ;;  %vm96_vm8 = vcmp.eq.s32.totalorder %v21331_v19, %v21320_v15  ;;  %v122_v26 = vld [vmem:[#allocation5 + $0x68] sm:$0xff] }
  0x33   :  { %20909 = vxpose.xlu0.b32.start [1/8] (short) (narrow) %v20908_v28, 8  ;;  %v20912_v32 = vpack.i.bf16 %v14761_v31, %v14673_v30  ;;  %v14674_v33 = vsel %vm95_vm6, 1.0, %v25686_v23  ;;  %v14762_v34 = vsel %vm7373_vm7, 1.0, %v25686_v23  ;;  %v21369_v36 = vsel %vm96_vm8, 1.0, %v25686_v23  ;;  %v119_v28 = vld [vmem:[#allocation5 + $0x50] sm:$0xff]  ;;  %v121_v31 = vld [vmem:[#allocation5 + $0x60] sm:$0xff] }
  0x34   :  { %v20914_v35 = vpack.i.bf16 %v14762_v34, %v14674_v33  ;;  %vm7374_vm9 = vcmp.eq.s32.totalorder %v21306_v9, %v21322_v16  ;;  %vm97_vm10 = vcmp.eq.s32.totalorder %v21334_v20, %v21320_v15  ;;  %vm7375_vm11 = vcmp.eq.s32.totalorder %v21309_v10, %v21322_v16  ;;  %v7397_v30 = vld [vmem:[#allocation5 + $0x310] sm:$0xff] }
  0x35   :  { %v21376_v37 = vsel %vm7374_vm9, 1.0, %v25686_v23  ;;  %v21379_v38 = vsel %vm97_vm10, 1.0, %v25686_v23  ;;  %vm98_vm12 = vcmp.eq.s32.totalorder %v21337_v21, %v21320_v15  ;;  %v21388_v40 = vsel %vm7375_vm11, 1.0, %v25686_v23 }
  0x36   :  { %v20916_v39 = vpack.i.bf16 %v21376_v37, %v21369_v36  ;;  %v21391_v41 = vsel %vm98_vm12, 1.0, %v25686_v23  ;;  %vm7376_vm13 = vcmp.eq.s32.totalorder %v21312_v11, %v21322_v16  ;;  %vm99_vm14 = vcmp.eq.s32.totalorder %v21340_v22, %v21320_v15 }
  0x37   :  { %20911 = vxpose.xlu0.b32.cont [2/8] (short) (narrow) %v20910_v29, 8  ;;  %v21398_v43 = vsel %vm7376_vm13, 1.0, %v25686_v23  ;;  %vm7377_vm15 = vcmp.eq.s32.totalorder %v21315_v12, %v21322_v16  ;;  %v21407_v45 = vsel %vm99_vm14, 1.0, %v25686_v23  ;;  %vm52_vm0 = vcmp.eq.s32.totalorder %v21289_v2, %v21320_v15  ;;  %v120_v29 = vld [vmem:[#allocation5 + $0x58] sm:$0xff] }
  0x38   :  { %v21410_v46 = vsel %vm7377_vm15, 1.0, %v25686_v23  ;;  %v14663_v48 = vsel %vm52_vm0, 1.0, %v25686_v23  ;;  %vm7976_vm1 = vcmp.eq.s32.totalorder %v21294_v5, %v21322_v16  ;;  %vm53_vm2 = vcmp.eq.s32.totalorder %v21297_v6, %v21320_v15 }
  0x39   :  { %v14767_v49 = vsel %vm7976_vm1, 1.0, %v25686_v23  ;;  %v14664_v50 = vsel %vm53_vm2, 1.0, %v25686_v23  ;;  %vm7977_vm3 = vcmp.eq.s32.totalorder %v21318_v14, %v21322_v16  ;;  %vm54_vm4 = vcmp.eq.s32.totalorder %v21300_v7, %v21320_v15 }
  0x3a   :  { %v20929_v51 = vpack.i.bf16 %v14767_v49, %v14663_v48  ;;  %v14768_v52 = vsel %vm7977_vm3, 1.0, %v25686_v23  ;;  %v14665_v53 = vsel %vm54_vm4, 1.0, %v25686_v23  ;;  %vm7978_vm5 = vcmp.eq.s32.totalorder %v21325_v17, %v21322_v16 }
  0x3b   :  { %20913 = vxpose.xlu0.b32.cont [3/8] (short) (narrow) %v20912_v32, 8  ;;  %v20931_v54 = vpack.i.bf16 %v14768_v52, %v14664_v50  ;;  %v14769_v55 = vsel %vm7978_vm5, 1.0, %v25686_v23  ;;  %vm55_vm6 = vcmp.eq.s32.totalorder %v21303_v8, %v21320_v15  ;;  %vm7979_vm7 = vcmp.eq.s32.totalorder %v21328_v18, %v21322_v16 }
  0x3c   :  { %20930 = vxpose.xlu1.b32.start [1/8] (short) (narrow) %v20929_v51, 8  ;;  %v20933_v56 = vpack.i.bf16 %v14769_v55, %v14665_v53  ;;  %v21437_v57 = vsel %vm55_vm6, 1.0, %v25686_v23  ;;  %v21440_v58 = vsel %vm7979_vm7, 1.0, %v25686_v23  ;;  %vm56_vm8 = vcmp.eq.s32.totalorder %v21306_v9, %v21320_v15  ;;  %v7398_v51 = vld [vmem:[#allocation5 + $0x318] sm:$0xff] }
  0x3d   :  { %v21447_v60 = vsel %vm56_vm8, 1.0, %v25686_v23  ;;  %vm7980_vm9 = vcmp.eq.s32.totalorder %v21331_v19, %v21322_v16  ;;  %vm57_vm10 = vcmp.eq.s32.totalorder %v21309_v10, %v21320_v15  ;;  %vm7981_vm11 = vcmp.eq.s32.totalorder %v21334_v20, %v21322_v16 }
  0x3e   :  { %v21454_v61 = vsel %vm7980_vm9, 1.0, %v25686_v23  ;;  %v21457_v62 = vsel %vm57_vm10, 1.0, %v25686_v23  ;;  %vm58_vm12 = vcmp.eq.s32.totalorder %v21312_v11, %v21320_v15  ;;  %v21466_v3 = vsel %vm7981_vm11, 1.0, %v25686_v23 }
  0x3f   :  { %20915 = vxpose.xlu0.b32.cont [4/8] (short) (narrow) %v20914_v35, 8  ;;  %v21469_v4 = vsel %vm58_vm12, 1.0, %v25686_v23  ;;  %vm7982_vm13 = vcmp.eq.s32.totalorder %v21337_v21, %v21322_v16  ;;  %vm59_vm14 = vcmp.eq.s32.totalorder %v21315_v12, %v21320_v15  ;;  %vm7983_vm15 = vcmp.eq.s32.totalorder %v21340_v22, %v21322_v16  ;;  %v7400_v35 = vld [vmem:[#allocation5 + $0x328] sm:$0xff] }
  0x40   :  { %20932 = vxpose.xlu1.b32.cont [2/8] (short) (narrow) %v20931_v54, 8  ;;  %v21476_v27 = vsel %vm7982_vm13, 1.0, %v25686_v23  ;;  %v21485_v32 = vsel %vm59_vm14, 1.0, %v25686_v23  ;;  %v21488_v33 = vsel %vm7983_vm15, 1.0, %v25686_v23  ;;  %v162_v34 = vand.u32 4294901760, %v117_v63 }
  0x41   :  { %v165_v48 = vand.u32 4294901760, %v118_v13  ;;  %v7439_v49 = vand.u32 4294901760, %v7395_v24  ;;  %v7442_v50 = vand.u32 4294901760, %v7396_v25  ;;  %v168_v53 = vand.u32 4294901760, %v119_v28 }
  0x42   :  { %v21495_v52 = vsub.f32 %v117_v63, %v162_v34  ;;  %v171_v54 = vand.u32 4294901760, %v120_v29  ;;  %v7445_v55 = vand.u32 4294901760, %v7397_v30  ;;  %vm21239_vm0 = vmmov 0  }
  0x43   :  { %20917 = vxpose.xlu0.b32.cont [5/8] (short) (narrow) %v20916_v39, 8  ;;  %v21497_v23 = vpack.c.bf16 %v165_v48, %v162_v34  ;;  %v21499_v36 = vsub.f32 %v118_v13, %v165_v48  ;;  %v21501_v37 = vpack.c.bf16 %v7442_v50, %v7439_v49  ;;  %v21503_v39 = vsub.f32 %v7395_v24, %v7439_v49 }
  0x44   :  { %20934 = vxpose.xlu1.b32.cont [3/8] (short) (narrow) %v20933_v56, 8  ;;  %v21505_v63 = vsub.f32 %v7396_v25, %v7442_v50  ;;  %v21507_v59 = vpack.c.bf16 %v171_v54, %v168_v53  ;;  %v21509_v1 = vsub.f32 %v119_v28, %v168_v53  ;;  %v21511_v42 = vsub.f32 %v120_v29, %v171_v54  ;;  %v7401_v56 = vld [vmem:[#allocation5 + $0x330] sm:$0xff]  ;;  %v7402_v54 = vld [vmem:[#allocation5 + $0x338] sm:$0xff] }
  0x45   :  { %v25870_v13 = vpack.i.bf16 %v21388_v40, %v21379_v38  ;;  %18889 = vmatpush3.bf16.msra.mxu1 %v21497_v23  ;;  %v7448_v24 = vand.u32 4294901760, %v7398_v51  ;;  %v21517_v34 = vsub.f32 %v7397_v30, %v7445_v55  ;;  %v174_v48 = vand.u32 4294901760, %v121_v31  ;;  %19753 = vmatpush3.bf16.msra.mxu0 %v21501_v37 }
  0x46   :  { %v177_v49 = vand.u32 4294901760, %v122_v26  ;;  %v25871_v25 = vmov 0.0|0.0   ;;  %v7451_v28 = vand.u32 4294901760, %v7399_v47  ;;  %v7454_v50 = vand.u32 4294901760, %v7400_v35 }
  0x47   :  { %20919 = vxpose.xlu0.b32.cont [6/8] (short) (narrow) %v25870_v13, 8  ;;  %18890 = vmatprep.subr.bf16.mxu1 %v25871_v25  ;;  %v180_v29 = vand.u32 4294901760, %v123_v0  ;;  %v183_v53 = vand.u32 4294901760, %v124_v44  ;;  %v25872_v38 = vpack.i.bf16 %v21440_v58, %v21437_v57  ;;  %v21525_v40 = vpack.c.bf16 %v7448_v24, %v7445_v55 }
  0x48   :  { %19754 = vmatprep.subr.bf16.mxu0 %v25871_v25  ;;  %v21527_v30 = vsub.f32 %v7398_v51, %v7448_v24  ;;  %v21529_v13 = vpack.c.bf16 %v177_v49, %v174_v48  ;;  %v7457_v22 = vand.u32 4294901760, %v7401_v56  ;;  %v21531_v21 = vsub.f32 %v121_v31, %v174_v48 }
  0x49   :  { %20936 = vxpose.xlu1.b32.cont [4/8] (short) (narrow) %v25872_v38, 8  ;;  %v21533_v20 = vsub.f32 %v122_v26, %v177_v49  ;;  %v21535_v19 = vpack.c.bf16 %v7454_v50, %v7451_v28  ;;  %v21537_v18 = vsub.f32 %v7399_v47, %v7451_v28  ;;  %v25873_v57 = vpack.i.bf16 %v21398_v43, %v21391_v41 }
  0x4a   :  { %18892 = vmatpush3.bf16.msra.mxu1 %v21507_v59  ;;  %v21543_v58 = vsub.f32 %v7400_v35, %v7454_v50  ;;  %v21545_v51 = vpack.c.bf16 %v183_v53, %v180_v29  ;;  %v21547_v55 = vsub.f32 %v123_v0, %v180_v29  ;;  %v7460_v31 = vand.u32 4294901760, %v7402_v54  ;;  %19756 = vmatpush3.bf16.msra.mxu0 %v21525_v40 }
  0x4b   :  { %20921 = vxpose.xlu0.b32.cont [7/8] (short) (narrow) %v25873_v57, 8  ;;  %18893 = vmatprep.subr.bf16.mxu1 %v25871_v25  ;;  %v21551_v26 = vsub.f32 %v124_v44, %v183_v53  ;;  %v21553_v47 = vsub.f32 %v7401_v56, %v7457_v22  ;;  %v25711_v41 = vand.u32 4294901760, %v21495_v52  ;;  %v25874_v43 = vpack.i.bf16 %v21454_v61, %v21447_v60 }
  0x4c   :  { %19757 = vmatprep.subr.bf16.mxu0 %v25871_v25  ;;  %v21560_v35 = vpack.c.bf16 %v7460_v31, %v7457_v22  ;;  %v21562_v0 = vsub.f32 %v7402_v54, %v7460_v31  ;;  %v25710_v24 = vand.u32 4294901760, %v21499_v36  ;;  %v25702_v48 = vand.u32 4294901760, %v21503_v39 }
  0x4d   :  { %20938 = vxpose.xlu1.b32.cont [5/8] (short) (narrow) %v25874_v43, 8  ;;  %v25875_v44 = vmov 0.0   ;;  %v248_v60 = vsub.f32 %v21495_v52, %v25711_v41  ;;  %v25701_v22 = vand.u32 4294901760, %v21505_v63  ;;  %v25700_v61 = vand.u32 4294901760, %v21509_v1 }
  0x4e   :  { %16167 = vmatprep.mubr.msk.f32.mxu1 %vm21239_vm0, %v25875_v44  ;;  %17535 = vmatprep.mubr.msk.f32.mxu0 %vm21239_vm0, %v25875_v44  ;;  %v25703_v56 = vand.u32 4294901760, %v21511_v42  ;;  %v25876_v49 = vpack.i.bf16 %v21410_v46, %v21407_v45  ;;  %v255_v28 = vsub.f32 %v21499_v36, %v25710_v24  ;;  %v7525_v50 = vsub.f32 %v21503_v39, %v25702_v48 }
  0x4f   :  { %18895 = vmatpush3.bf16.msra.mxu1 %v21529_v13  ;;  %v25708_v29 = vand.u32 4294901760, %v21517_v34  ;;  %v25704_v53 = vand.u32 4294901760, %v21527_v30  ;;  %19759 = vmatpush3.bf16.msra.mxu0 %v21535_v19  ;;  %v249_v45 = vand.u32 4294901760, %v248_v60  ;;  %v7532_v46 = vsub.f32 %v21505_v63, %v25701_v22 }
  0x50   :  { %20923 = vxpose.xlu0.b32.end [8/8] (short) (narrow) %v25876_v49, 8  ;;  %18896 = vmatprep.subr.bf16.mxu1 %v25871_v25  ;;  %v262_v54 = vsub.f32 %v21509_v1, %v25700_v61  ;;  %v269_v38 = vsub.f32 %v21511_v42, %v25703_v56  ;;  %v25877_v57 = vpack.i.bf16 %v21466_v3, %v21457_v62  ;;  %v256_v31 = vand.u32 4294901760, %v255_v28 }
  0x51   :  { %19760 = vmatprep.subr.bf16.mxu0 %v25871_v25  ;;  %v7526_v43 = vand.u32 4294901760, %v7525_v50  ;;  %v7539_v60 = vsub.f32 %v21517_v34, %v25708_v29  ;;  %v7546_v49 = vsub.f32 %v21527_v30, %v25704_v53  ;;  %v7533_v61 = vand.u32 4294901760, %v7532_v46 }
  0x52   :  { %20940 = vxpose.xlu1.b32.cont [6/8] (short) (narrow) %v25877_v57, 8  ;;  %v263_v22 = vand.u32 4294901760, %v262_v54  ;;  %v270_v48 = vand.u32 4294901760, %v269_v38  ;;  %v25707_v56 = vand.u32 4294901760, %v21531_v21  ;;  %v21611_v62 = vpack.c.bf16 %v256_v31, %v249_v45 }
  0x53   :  { %18898 = vmatpush3.bf16.msra.mxu1 %v21545_v51  ;;  %v7540_v3 = vand.u32 4294901760, %v7539_v60  ;;  %v7547_v28 = vand.u32 4294901760, %v7546_v49  ;;  %v25706_v50 = vand.u32 4294901760, %v21533_v20  ;;  %19762 = vmatpush3.bf16.msra.mxu0 %v21560_v35  ;;  %v21616_v57 = vpack.c.bf16 %v7533_v61, %v7526_v43 }
  0x54   :  { %18899 = vmatprep.subr.bf16.mxu1 %v25871_v25  ;;  %v21618_v53 = vpack.c.bf16 %v270_v48, %v263_v22  ;;  %v276_v46 = vsub.f32 %v21531_v21, %v25707_v56  ;;  %v25705_v54 = vand.u32 4294901760, %v21537_v18  ;;  %v25878_v45 = vpack.i.bf16 %v21476_v27, %v21469_v4  ;;  %19763 = vmatprep.subr.bf16.mxu0 %v25871_v25 }
  0x55   :  { %v21628_v38 = vpack.c.bf16 %v7547_v28, %v7540_v3  ;;  %v283_v61 = vsub.f32 %v21533_v20, %v25706_v50  ;;  %v7559_v48 = vand.u32 4294901760, %v21543_v58  ;;  %v25709_v22 = vand.u32 4294901760, %v21547_v55 }
  0x56   :  { %20942 = vxpose.xlu1.b32.cont [7/8] (short) (narrow) %v25878_v45, 8  ;;  %v277_v31 = vand.u32 4294901760, %v276_v46  ;;  %v7553_v43 = vsub.f32 %v21537_v18, %v25705_v54  ;;  %v296_v4 = vand.u32 4294901760, %v21551_v26  ;;  %v25714_v27 = vand.u32 4294901760, %v21553_v47 }
  0x57   :  { %v284_v60 = vand.u32 4294901760, %v283_v61  ;;  %v7560_v49 = vsub.f32 %v21543_v58, %v7559_v48  ;;  %v290_v3 = vsub.f32 %v21547_v55, %v25709_v22  ;;  %v7573_v28 = vand.u32 4294901760, %v21562_v0 }
  0x58   :  { %v7554_v45 = vand.u32 4294901760, %v7553_v43  ;;  %v297_v46 = vsub.f32 %v21551_v26, %v296_v4  ;;  %v7567_v54 = vsub.f32 %v21553_v47, %v25714_v27  ;;  %v25879_v61 = vpack.i.bf16 %v21488_v33, %v21485_v32 }
  0x59   :  { %v21654_v56 = vpack.c.bf16 %v284_v60, %v277_v31  ;;  %v7561_v29 = vand.u32 4294901760, %v7560_v49  ;;  %v291_v22 = vand.u32 4294901760, %v290_v3  ;;  %v7574_v24 = vsub.f32 %v21562_v0, %v7573_v28 }
  0x5a   :  { %20944 = vxpose.xlu1.b32.end [8/8] (short) (narrow) %v25879_v61, 8  ;;  %v298_v43 = vand.u32 4294901760, %v297_v46  ;;  %v7568_v41 = vand.u32 4294901760, %v7567_v54  ;;  %v21687_v46 = vadd.s32 128, %v21297_v6  ;;  %v25885_v49 = vand.u32 4294901760, %v21505_v63 }
  0x5b   :  { %v21661_v14 = vpack.c.bf16 %v7561_v29, %v7554_v45  ;;  %v7575_v50 = vand.u32 4294901760, %v7574_v24  ;;  %v21678_v24 = vadd.s32 128, %v21289_v2  ;;  %v25888_v54 = vand.u32 4294901760, %v21511_v42 }
  0x5c   :  { %v21667_v31 = vpack.c.bf16 %v298_v43, %v291_v22  ;;  %25881 = vst [vmem:[#allocation20_spill] sm:$0xff] %v21687_v46  ;;  %v25884_v43 = vand.u32 4294901760, %v21503_v39  ;;  %vm1279_vm3 = vcmp.eq.s32.totalorder %v21687_v46, %v21320_v15  ;;  %vm8583_vm4 = vcmp.eq.s32.totalorder %v21687_v46, %v21322_v16 }
  0x5d   :  { %v21675_v29 = vpack.c.bf16 %v7575_v50, %v7568_v41  ;;  %25880 = vst [vmem:[#allocation19_spill] sm:$0xff] %v21678_v24  ;;  %vm1278_vm1 = vcmp.eq.s32.totalorder %v21678_v24, %v21320_v15  ;;  %vm8582_vm2 = vcmp.eq.s32.totalorder %v21678_v24, %v21322_v16  ;;  %v25882_v41 = vand.u32 4294901760, %v21495_v52 }
  0x5e   :  { %v14679_v22 = vsel %vm1278_vm1, 1.0, %v25875_v44  ;;  %v14775_v3 = vsel %vm8582_vm2, 1.0, %v25875_v44  ;;  %v25883_v50 = vand.u32 4294901760, %v21499_v36  ;;  %v21699_v60 = vpack.c.bf16 %v25885_v49, %v25884_v43 }
  0x5f   :  { %v20950_v45 = vpack.i.bf16 %v14775_v3, %v14679_v22  ;;  %v14680_v22 = vsel %vm1279_vm3, 1.0, %v25875_v44  ;;  %v14776_v3 = vsel %vm8583_vm4, 1.0, %v25875_v44  ;;  %v25889_v43 = vand.u32 4294901760, %v21517_v34 }
  0x60   :  { %v21693_v61 = vpack.c.bf16 %v25883_v50, %v25882_v41  ;;  %v21708_v41 = vadd.s32 128, %v21300_v7  ;;  %v25887_v50 = vand.u32 4294901760, %v21509_v1  ;;  %v25890_v33 = vand.u32 4294901760, %v21527_v30 }
  0x61   :  { %20951 = vxpose.xlu0.b32.start [1/8] (short) (narrow) %v20950_v45, 8  ;;  %v20952_v45 = vpack.i.bf16 %v14776_v3, %v14680_v22  ;;  %v21748_v46 = vadd.s32 128, %v21306_v9  ;;  %vm157_vm2 = vcmask 523264  }
  0x62   :  { %25886 = vst [vmem:[#allocation21_spill] sm:$0xff] %v21708_v41  ;;  %v21714_v49 = vpack.c.bf16 %v25888_v54, %v25887_v50  ;;  %v21720_v32 = vpack.c.bf16 %v25890_v33, %v25889_v43  ;;  %vm1280_vm5 = vcmp.eq.s32.totalorder %v21708_v41, %v21320_v15  ;;  %vm8584_vm6 = vcmp.eq.s32.totalorder %v21708_v41, %v21322_v16 }
  0x63   :  { %v14681_v22 = vsel %vm1280_vm5, 1.0, %v25875_v44  ;;  %v14777_v3 = vsel %vm8584_vm6, 1.0, %v25875_v44  ;;  %v21729_v54 = vadd.s32 128, %v21303_v8  ;;  %v25893_v50 = vand.u32 4294901760, %v21533_v20  ;;  %25895 = vst [vmem:[#allocation23_spill] sm:$0xff] %v21748_v46 }
  0x64   :  { %v20954_v27 = vpack.i.bf16 %v14777_v3, %v14681_v22  ;;  %v25894_v43 = vand.u32 4294901760, %v21537_v18  ;;  %vm1282_vm9 = vcmp.eq.s32.totalorder %v21748_v46, %v21320_v15  ;;  %vm8586_vm10 = vcmp.eq.s32.totalorder %v21748_v46, %v21322_v16 }
  0x65   :  { %20953 = vxpose.xlu0.b32.cont [2/8] (short) (narrow) %v20952_v45, 8  ;;  %25891 = vst [vmem:[#allocation22_spill] sm:$0xff] %v21729_v54  ;;  %v25892_v45 = vand.u32 4294901760, %v21531_v21  ;;  %vm1281_vm7 = vcmp.eq.s32.totalorder %v21729_v54, %v21320_v15  ;;  %vm8585_vm8 = vcmp.eq.s32.totalorder %v21729_v54, %v21322_v16  ;;  %v21765_v54 = vadd.s32 128, %v21309_v10 }
  0x66   :  { %v21739_v17 = vpack.c.bf16 %v7559_v48, %v25894_v43  ;;  %v14682_v22 = vsel %vm1281_vm7, 1.0, %v25875_v44  ;;  %v14778_v3 = vsel %vm8585_vm8, 1.0, %v25875_v44  ;;  %v25897_v48 = vand.u32 4294901760, %v21553_v47 }
  0x67   :  { %v21735_v33 = vpack.c.bf16 %v25893_v50, %v25892_v45  ;;  %v20956_v41 = vpack.i.bf16 %v14778_v3, %v14682_v22  ;;  %v14683_v43 = vsel %vm1282_vm9, 1.0, %v25875_v44  ;;  %v14779_v22 = vsel %vm8586_vm10, 1.0, %v25875_v44  ;;  %25898 = vst [vmem:[#allocation24_spill] sm:$0xff] %v21765_v54 }
  0x68   :  { %v21756_v50 = vpack.c.bf16 %v7573_v28, %v25897_v48  ;;  %v20958_v3 = vpack.i.bf16 %v14779_v22, %v14683_v43  ;;  %vm1283_vm11 = vcmp.eq.s32.totalorder %v21765_v54, %v21320_v15  ;;  %vm8587_vm12 = vcmp.eq.s32.totalorder %v21765_v54, %v21322_v16 }
  0x69   :  { %20955 = vxpose.xlu0.b32.cont [3/8] (short) (narrow) %v20954_v27, 8  ;;  %v25896_v27 = vand.u32 4294901760, %v21547_v55  ;;  %v14780_v28 = vsel %vm8587_vm12, 1.0, %v25875_v44 }
  0x6b   :  { %v21752_v45 = vpack.c.bf16 %v296_v4, %v25896_v27  ;;  %v14684_v4 = vsel %vm1283_vm11, 1.0, %v25875_v44  ;;  %v21774_v27 = vadd.s32 128, %v21312_v11 }
  0x6d   :  { %20957 = vxpose.xlu0.b32.cont [4/8] (short) (narrow) %v20956_v41, 8  ;;  %v20960_v41 = vpack.i.bf16 %v14780_v28, %v14684_v4  ;;  %25899 = vst [vmem:[#allocation25_spill] sm:$0xff] %v21774_v27  ;;  %vm1284_vm13 = vcmp.eq.s32.totalorder %v21774_v27, %v21320_v15  ;;  %vm8588_vm14 = vcmp.eq.s32.totalorder %v21774_v27, %v21322_v16 }
  0x6e   :  { %v14685_v48 = vsel %vm1284_vm13, 1.0, %v25875_v44  ;;  %v14781_v43 = vsel %vm8588_vm14, 1.0, %v25875_v44 }
  0x6f   :  { %v20962_v22 = vpack.i.bf16 %v14781_v43, %v14685_v48 }
  0x71   :  { %20959 = vxpose.xlu0.b32.cont [5/8] (short) (narrow) %v20958_v3, 8  ;;  %v21783_v3 = vadd.s32 128, %v21315_v12 }
  0x73   :  { %25900 = vst [vmem:[#allocation26_spill] sm:$0xff] %v21783_v3  ;;  %vm1285_vm15 = vcmp.eq.s32.totalorder %v21783_v3, %v21320_v15  ;;  %vm8589_vm1 = vcmp.eq.s32.totalorder %v21783_v3, %v21322_v16 }
  0x74   :  { %v14686_v4 = vsel %vm1285_vm15, 1.0, %v25875_v44  ;;  %v14782_v28 = vsel %vm8589_vm1, 1.0, %v25875_v44 }
  0x75   :  { %20961 = vxpose.xlu0.b32.cont [6/8] (short) (narrow) %v20960_v41, 8  ;;  %v20964_v41 = vpack.i.bf16 %v14782_v28, %v14686_v4 }
  0x79   :  { %20963 = vxpose.xlu0.b32.cont [7/8] (short) (narrow) %v20962_v22, 8 }
  0x7d   :  { %20965 = vxpose.xlu0.b32.end [8/8] (short) (narrow) %v20964_v41, 8 }
  0xb4   :  { %v20924_v27 = vpop.trf.xlu0 }
  0xb5   :  { %v20928_v54 = vunpack.i.h.bf16 %v20924_v27  ;;  %v20925_v48 = vunpack.i.l.bf16 %v20924_v27 }
  0xb7   :  { %v7436_v43 = vsel %vm157_vm2, %v20928_v54, 0  ;;  %v159_v22 = vsel %vm157_vm2, %v20925_v48, 0 }
  0xb8   :  { %v21793_v46 = vand.u32 4294901760, %v7436_v43  ;;  %v21795_v24 = vand.u32 4294901760, %v159_v22 }
  0xba   :  { %v21798_v3 = vsub.f32 %v7436_v43, %v21793_v46  ;;  %v21801_v5 = vsub.f32 %v159_v22, %v21795_v24  ;;  %v25904_v22 = vpack.c.bf16 %v21505_v63, %v21503_v39  ;;  %v25906_v39 = vpack.c.bf16 %v21511_v42, %v21509_v1 }
  0xbb   :  { %v25907_v63 = vpack.c.bf16 %v21527_v30, %v21517_v34  ;;  %v25909_v34 = vpack.c.bf16 %v21533_v20, %v21531_v21  ;;  %v25910_v30 = vpack.c.bf16 %v21543_v58, %v21537_v18  ;;  %v25912_v20 = vpack.c.bf16 %v21551_v26, %v21547_v55 }
  0xbc   :  { %v236_v4 = vand.u32 4294901760, %v21801_v5  ;;  %v7513_v28 = vand.u32 4294901760, %v21798_v3  ;;  %v25913_v18 = vpack.c.bf16 %v21562_v0, %v21553_v47  ;;  %v21930_v0 = vadd.s32 192, %v21312_v11 }
  0xbe   :  { %v237_v54 = vsub.f32 %v21801_v5, %v236_v4  ;;  %v7514_v27 = vsub.f32 %v21798_v3, %v7513_v28  ;;  %v21811_v41 = vpop.trf.xlu1  ;;  %25915 = vst [vmem:[#allocation33_spill] sm:$0xff] %v21930_v0  ;;  %vm1898_vm15 = vcmp.eq.s32.totalorder %v21930_v0, %v21320_v15  ;;  %vm9194_vm1 = vcmp.eq.s32.totalorder %v21930_v0, %v21322_v16 }
  0xc0   :  { %v238_v48 = vand.u32 4294901760, %v237_v54  ;;  %v7515_v43 = vand.u32 4294901760, %v7514_v27  ;;  %v21860_v27 = vadd.s32 192, %v21300_v7 }
  0xc2   :  { %16168 = vmatmul.mubr.f32.vlgmr.msra.gmra.mrb[0].mxu1 %v238_v48  ;;  %17536 = vmatmul.mubr.f32.vlgmr.msra.gmra.mrb[0].mxu0 %v7515_v43  ;;  %25905 = vst [vmem:[#allocation29_spill] sm:$0xff] %v21860_v27  ;;  %vm1894_vm7 = vcmp.eq.s32.totalorder %v21860_v27, %v21320_v15  ;;  %vm9190_vm8 = vcmp.eq.s32.totalorder %v21860_v27, %v21322_v16  ;;  %v21881_v43 = vadd.s32 192, %v21303_v8 }
  0xc3   :  { %18901 = vmatpush3.bf16.msra.mxu1 %v21611_v62  ;;  %19765 = vmatpush3.bf16.msra.mxu0 %v21616_v57  ;;  %v21828_v62 = vadd.s32 192, %v21289_v2 }
  0xc4   :  { %18902 = vmatprep.subr.bf16.mxu1 %v25871_v25  ;;  %19766 = vmatprep.subr.bf16.mxu0 %v25871_v25  ;;  %25908 = vst [vmem:[#allocation30_spill] sm:$0xff] %v21881_v43  ;;  %vm1895_vm9 = vcmp.eq.s32.totalorder %v21881_v43, %v21320_v15  ;;  %vm9191_vm10 = vcmp.eq.s32.totalorder %v21881_v43, %v21322_v16 }
  0xc5   :  { %16186 = vmatprep.mubr.msk.f32.mxu1 %vm21239_vm0, %v25875_v44  ;;  %17554 = vmatprep.mubr.msk.f32.mxu0 %vm21239_vm0, %v25875_v44  ;;  %25901 = vst [vmem:[#allocation27_spill] sm:$0xff] %v21828_v62  ;;  %vm1892_vm3 = vcmp.eq.s32.totalorder %v21828_v62, %v21320_v15  ;;  %vm9188_vm4 = vcmp.eq.s32.totalorder %v21828_v62, %v21322_v16  ;;  %v14690_v1 = vsel %vm1895_vm9, 1.0, %v25875_v44  ;;  %v14786_v42 = vsel %vm9191_vm10, 1.0, %v25875_v44 }
  0xc6   :  { %v14783_v57 = vsel %vm9188_vm4, 1.0, %v25875_v44 }
  0xc7   :  { %18904 = vmatpush3.bf16.msra.mxu1 %v21618_v53  ;;  %19768 = vmatpush3.bf16.msra.mxu0 %v21628_v38  ;;  %v14687_v53 = vsel %vm1892_vm3, 1.0, %v25875_v44 }
  0xc8   :  { %18905 = vmatprep.subr.bf16.mxu1 %v25871_v25  ;;  %19769 = vmatprep.subr.bf16.mxu0 %v25871_v25 }
  0xcb   :  { %18907 = vmatpush3.bf16.msra.mxu1 %v21654_v56  ;;  %19771 = vmatpush3.bf16.msra.mxu0 %v21661_v14  ;;  %v20971_v14 = vpack.i.bf16 %v14783_v57, %v14687_v53  ;;  %v21841_v56 = vadd.s32 192, %v21297_v6  ;;  %v20977_v53 = vpack.i.bf16 %v14786_v42, %v14690_v1  ;;  %v21898_v57 = vadd.s32 192, %v21306_v9  ;;  %v22007_v1 = vld [vmem:[#allocation5 + $0x28] sm:$0xff] }
  0xcc   :  { %18908 = vmatprep.subr.bf16.mxu1 %v25871_v25  ;;  %19772 = vmatprep.subr.bf16.mxu0 %v25871_v25 }
  0xcd   :  { %25902 = vst [vmem:[#allocation28_spill] sm:$0xff] %v21841_v56  ;;  %20972 = vxpose.xlu1.b32.start [1/8] (short) (narrow) %v20971_v14, 8  ;;  %vm1893_vm5 = vcmp.eq.s32.totalorder %v21841_v56, %v21320_v15  ;;  %vm9189_vm6 = vcmp.eq.s32.totalorder %v21841_v56, %v21322_v16  ;;  %25911 = vst [vmem:[#allocation31_spill] sm:$0xff] %v21898_v57  ;;  %vm1896_vm11 = vcmp.eq.s32.totalorder %v21898_v57, %v21320_v15 }
  0xce   :  { %v14688_v38 = vsel %vm1893_vm5, 1.0, %v25875_v44  ;;  %vm9192_vm12 = vcmp.eq.s32.totalorder %v21898_v57, %v21322_v16  ;;  %v14691_v21 = vsel %vm1896_vm11, 1.0, %v25875_v44  ;;  %v21915_v14 = vadd.s32 192, %v21309_v10 }
  0xcf   :  { %18910 = vmatpush3.bf16.msra.mxu1 %v21667_v31  ;;  %19774 = vmatpush3.bf16.msra.mxu0 %v21675_v29  ;;  %v14784_v31 = vsel %vm9189_vm6, 1.0, %v25875_v44  ;;  %v25903_v29 = vpack.c.bf16 %v21499_v36, %v21495_v52  ;;  %v14689_v52 = vsel %vm1894_vm7, 1.0, %v25875_v44  ;;  %v14785_v36 = vsel %vm9190_vm8, 1.0, %v25875_v44 }
  0xd0   :  { %18911 = vmatprep.subr.bf16.mxu1 %v25871_v25  ;;  %19775 = vmatprep.subr.bf16.mxu0 %v25871_v25  ;;  %v20973_v54 = vpack.i.bf16 %v14784_v31, %v14688_v38  ;;  %v20975_v48 = vpack.i.bf16 %v14785_v36, %v14689_v52  ;;  %v14787_v58 = vsel %vm9192_vm12, 1.0, %v25875_v44  ;;  %25914 = vst [vmem:[#allocation32_spill] sm:$0xff] %v21915_v14  ;;  %v14693_v31 = vsel %vm1898_vm15, 1.0, %v25875_v44 }
  0xd1   :  { %vm1897_vm13 = vcmp.eq.s32.totalorder %v21915_v14, %v21320_v15  ;;  %vm9193_vm14 = vcmp.eq.s32.totalorder %v21915_v14, %v21322_v16  ;;  %v20979_v55 = vpack.i.bf16 %v14787_v58, %v14691_v21 }
  0xd2   :  { %16187 = vmatmul.mubr.f32.vlgmr.msra.gmra.mrb[0].mxu1 %v21795_v24  ;;  %17555 = vmatmul.mubr.f32.vlgmr.msra.gmra.mrb[0].mxu0 %v21793_v46  ;;  %v14692_v26 = vsel %vm1897_vm13, 1.0, %v25875_v44  ;;  %v14788_v47 = vsel %vm9193_vm14, 1.0, %v25875_v44 }
  0xd3   :  { %18913 = vmatpush3.bf16.msra.mxu1 %v25903_v29  ;;  %19777 = vmatpush3.bf16.msra.mxu0 %v25904_v22  ;;  %v20981_v38 = vpack.i.bf16 %v14788_v47, %v14692_v26  ;;  %v14789_v29 = vsel %vm9194_vm1, 1.0, %v25875_v44  ;;  %v21949_v22 = vadd.s32 192, %v21315_v12 }
  0xd4   :  { %18914 = vmatprep.subr.bf16.mxu1 %v25871_v25  ;;  %19778 = vmatprep.subr.bf16.mxu0 %v25871_v25 }
  0xd5   :  { %16205 = vmatprep.mubr.msk.f32.mxu1 %vm21239_vm0, %v25875_v44  ;;  %17573 = vmatprep.mubr.msk.f32.mxu0 %vm21239_vm0, %v25875_v44  ;;  %25916 = vst [vmem:[#allocation34_spill] sm:$0xff] %v21949_v22  ;;  %vm1899_vm3 = vcmp.eq.s32.totalorder %v21949_v22, %v21320_v15  ;;  %vm9195_vm4 = vcmp.eq.s32.totalorder %v21949_v22, %v21322_v16 }
  0xd6   :  { %20974 = vxpose.xlu1.b32.cont [2/8] (short) (narrow) %v20973_v54, 8  ;;  %v20983_v54 = vpack.i.bf16 %v14789_v29, %v14693_v31  ;;  %v14694_v52 = vsel %vm1899_vm3, 1.0, %v25875_v44  ;;  %v14790_v36 = vsel %vm9195_vm4, 1.0, %v25875_v44 }
  0xd7   :  { %18916 = vmatpush3.bf16.msra.mxu1 %v25906_v39  ;;  %19780 = vmatpush3.bf16.msra.mxu0 %v25907_v63  ;;  %v20985_v63 = vpack.i.bf16 %v14790_v36, %v14694_v52  ;;  %v82_v36 = vld [vmem:[#allocation5 + $0x30] sm:$0xff] }
  0xd8   :  { %18917 = vmatprep.subr.bf16.mxu1 %v25871_v25  ;;  %19781 = vmatprep.subr.bf16.mxu0 %v25871_v25 }
  0xda   :  { %20976 = vxpose.xlu1.b32.cont [3/8] (short) (narrow) %v20975_v48, 8  ;;  %v80_v48 = vld [vmem:[#allocation5 + $0x20] sm:$0xff] }
  0xdb   :  { %18919 = vmatpush3.bf16.msra.mxu1 %v25909_v34  ;;  %19783 = vmatpush3.bf16.msra.mxu0 %v25910_v30  ;;  %v22009_v30 = vld [vmem:[#allocation5 + $0x360] sm:$0xff]  ;;  %v746_v58 = vand.u32 4294901760, %v80_v48 }
  0xdc   :  { %18920 = vmatprep.subr.bf16.mxu1 %v25871_v25  ;;  %19784 = vmatprep.subr.bf16.mxu0 %v25871_v25 }
  0xde   :  { %20978 = vxpose.xlu1.b32.cont [4/8] (short) (narrow) %v20977_v53, 8  ;;  %v22011_v53 = vld [vmem:[#allocation5 + $0x368] sm:$0xff] }
  0xdf   :  { %18922 = vmatpush3.bf16.msra.mxu1 %v25912_v20  ;;  %19786 = vmatpush3.bf16.msra.mxu0 %v25913_v18  ;;  %v8060_v47 = vand.u32 4294901760, %v22011_v53 }
  0xe0   :  { %18923 = vmatprep.subr.bf16.mxu1 %v25871_v25  ;;  %19787 = vmatprep.subr.bf16.mxu0 %v25871_v25 }
  0xe1   :  { %v21965_v39 = vpop.trf.xlu0 }
  0xe2   :  { %16206 = vmatmul.mubr.f32.vlgmr.msra.gmra.mrb[0].mxu1 %v21801_v5  ;;  %17574 = vmatmul.mubr.f32.vlgmr.msra.gmra.mrb[0].mxu0 %v21798_v3  ;;  %v76_v5 = vld [vmem:[#allocation5] sm:$0xff]  ;;  %v20946_v3 = vunpack.i.l.bf16 %v21811_v41 }
  0xe3   :  { %18925 = vmatpush3.bf16.msra.mxu1 %v21497_v23  ;;  %19789 = vmatpush3.bf16.msra.mxu0 %v21501_v37 }
  0xe4   :  { %18926 = vmatprep.subr.bf16.mxu1 %v25871_v25  ;;  %19790 = vmatprep.subr.bf16.mxu0 %v25871_v25 }
  0xe5   :  { %16224 = vmatprep.mubr.msk.f32.mxu1 %vm21239_vm0, %v25875_v44  ;;  %17592 = vmatprep.mubr.msk.f32.mxu0 %vm21239_vm0, %v25875_v44 }
  0xe6   :  { %20980 = vxpose.xlu1.b32.cont [5/8] (short) (narrow) %v20979_v55, 8  ;;  %v749_v55 = vand.u32 4294901760, %v22007_v1 }
  0xe7   :  { %18928 = vmatpush3.bf16.msra.mxu1 %v21507_v59  ;;  %19792 = vmatpush3.bf16.msra.mxu0 %v21525_v40 }
  0xe8   :  { %18929 = vmatprep.subr.bf16.mxu1 %v25871_v25  ;;  %19793 = vmatprep.subr.bf16.mxu0 %v25871_v25 }
  0xea   :  { %20982 = vxpose.xlu1.b32.cont [6/8] (short) (narrow) %v20981_v38, 8 }
  0xeb   :  { %18931 = vmatpush3.bf16.msra.mxu1 %v21529_v13  ;;  %19795 = vmatpush3.bf16.msra.mxu0 %v21535_v19 }
  0xec   :  { %18932 = vmatprep.subr.bf16.mxu1 %v25871_v25  ;;  %19796 = vmatprep.subr.bf16.mxu0 %v25871_v25 }
  0xee   :  { %20984 = vxpose.xlu1.b32.cont [7/8] (short) (narrow) %v20983_v54, 8 }
  0xef   :  { %18934 = vmatpush3.bf16.msra.mxu1 %v21545_v51  ;;  %19798 = vmatpush3.bf16.msra.mxu0 %v21560_v35 }
  0xf0   :  { %18935 = vmatprep.subr.bf16.mxu1 %v25871_v25  ;;  %19799 = vmatprep.subr.bf16.mxu0 %v25871_v25 }
  0xf2   :  { %16225 = vmatmul.mubr.f32.vlgmr.msra.gmra.mrb[0].mxu1 %v236_v4  ;;  %17593 = vmatmul.mubr.f32.vlgmr.msra.gmra.mrb[0].mxu0 %v7513_v28 }
  0xf3   :  { %18937 = vmatpush3.bf16.msra.mxu1 %v21693_v61  ;;  %19801 = vmatpush3.bf16.msra.mxu0 %v21699_v60  ;;  %v8002_v60 = vld [vmem:[#allocation5 + $0x348] sm:$0xff]  ;;  %v78_v61 = vld [vmem:[#allocation5 + $0x10] sm:$0xff] }
  0xf4   :  { %18938 = vmatprep.subr.bf16.mxu1 %v25871_v25  ;;  %19802 = vmatprep.subr.bf16.mxu0 %v25871_v25  ;;  %v8048_v28 = vand.u32 4294901760, %v8002_v60 }
  0xf5   :  { %16243 = vmatprep.mubr.msk.f32.mxu1 %vm21239_vm0, %v25875_v44  ;;  %17611 = vmatprep.mubr.msk.f32.mxu0 %vm21239_vm0, %v25875_v44 }
  0xf6   :  { %20986 = vxpose.xlu1.b32.end [8/8] (short) (narrow) %v20985_v63, 8  ;;  %v22023_v21 = vsub.f32 %v8002_v60, %v8048_v28  ;;  %v83_v63 = vld [vmem:[#allocation5 + $0x38] sm:$0xff]  ;;  %v752_v60 = vand.u32 4294901760, %v82_v36 }
  0xf7   :  { %18940 = vmatpush3.bf16.msra.mxu1 %v21714_v49  ;;  %19804 = vmatpush3.bf16.msra.mxu0 %v21720_v32  ;;  %v8001_v32 = vld [vmem:[#allocation5 + $0x340] sm:$0xff]  ;;  %v8004_v49 = vld [vmem:[#allocation5 + $0x358] sm:$0xff] }
  0xf8   :  { %18941 = vmatprep.subr.bf16.mxu1 %v25871_v25  ;;  %19805 = vmatprep.subr.bf16.mxu0 %v25871_v25  ;;  %v8045_v4 = vand.u32 4294901760, %v8001_v32  ;;  %v8054_v34 = vand.u32 4294901760, %v8004_v49 }
  0xfa   :  { %v22019_v18 = vsub.f32 %v8001_v32, %v8045_v4  ;;  %v22032_v31 = vpack.c.bf16 %v8048_v28, %v8045_v4  ;;  %v22058_v4 = vpack.c.bf16 %v749_v55, %v746_v58 }
  0xfb   :  { %18943 = vmatpush3.bf16.msra.mxu1 %v21735_v33  ;;  %19807 = vmatpush3.bf16.msra.mxu0 %v21739_v17  ;;  %v77_v17 = vld [vmem:[#allocation5 + $0x8] sm:$0xff]  ;;  %v734_v33 = vand.u32 4294901760, %v76_v5 }
  0xfc   :  { %18944 = vmatprep.subr.bf16.mxu1 %v25871_v25  ;;  %19808 = vmatprep.subr.bf16.mxu0 %v25871_v25 }
  0xfd   :  { %v22015_v20 = vsub.f32 %v76_v5, %v734_v33  ;;  %v8007_v5 = vld [vmem:[#allocation5 + $0x370] sm:$0xff] }
  0xff   :  { %18946 = vmatpush3.bf16.msra.mxu1 %v21752_v45  ;;  %19810 = vmatpush3.bf16.msra.mxu0 %v21756_v50  ;;  %v737_v45 = vand.u32 4294901760, %v77_v17  ;;  %v20949_v50 = vunpack.i.h.bf16 %v21811_v41 }
 0x100   :  { %18947 = vmatprep.subr.bf16.mxu1 %v25871_v25  ;;  %19811 = vmatprep.subr.bf16.mxu0 %v25871_v25 }
 0x101   :  { %v22017_v41 = vsub.f32 %v77_v17, %v737_v45  ;;  %v8042_v26 = vsel %vm157_vm2, %v20949_v50, 0  ;;  %v22030_v38 = vpack.c.bf16 %v737_v45, %v734_v33  ;;  %v25736_v17 = vand.u32 4294901760, %v22015_v20 }
 0x102   :  { %16244 = vmatmul.mubr.f32.vlgmr.msra.gmra.mrb[0].mxu1 %v21795_v24  ;;  %17612 = vmatmul.mubr.f32.vlgmr.msra.gmra.mrb[0].mxu0 %v21793_v46  ;;  %v22045_v33 = vand.u32 4294901760, %v8042_v26 }
 0x103   :  { %18949 = vmatpush3.bf16.msra.mxu1 %v21497_v23  ;;  %19813 = vmatpush3.bf16.msra.mxu0 %v21501_v37  ;;  %v79_v23 = vld [vmem:[#allocation5 + $0x18] sm:$0xff]  ;;  %v8003_v37 = vld [vmem:[#allocation5 + $0x350] sm:$0xff]  ;;  %v25735_v32 = vand.u32 4294901760, %v22017_v41 }
 0x104   :  { %18950 = vmatprep.subr.bf16.mxu1 %v25871_v25  ;;  %19814 = vmatprep.subr.bf16.mxu0 %v25871_v25  ;;  %v8051_v42 = vand.u32 4294901760, %v8003_v37 }
 0x105   :  { %16262 = vmatprep.mubr.msk.f32.mxu1 %vm21239_vm0, %v25875_v44  ;;  %17630 = vmatprep.mubr.msk.f32.mxu0 %vm21239_vm0, %v25875_v44 }
 0x106   :  { %v22036_v54 = vpack.c.bf16 %v8054_v34, %v8051_v42  ;;  %v22054_v50 = vsub.f32 %v8003_v37, %v8051_v42  ;;  %v22078_v42 = vsub.f32 %v8042_v26, %v22045_v33 }
 0x107   :  { %18952 = vmatpush3.bf16.msra.mxu1 %v21507_v59  ;;  %19816 = vmatpush3.bf16.msra.mxu0 %v21525_v40  ;;  %v740_v59 = vand.u32 4294901760, %v78_v61  ;;  %v743_v40 = vand.u32 4294901760, %v79_v23 }
 0x108   :  { %18953 = vmatprep.subr.bf16.mxu1 %v25871_v25  ;;  %19817 = vmatprep.subr.bf16.mxu0 %v25871_v25 }
 0x109   :  { %v22034_v29 = vpack.c.bf16 %v743_v40, %v740_v59  ;;  %v22040_v52 = vsub.f32 %v78_v61, %v740_v59  ;;  %v25739_v61 = vand.u32 4294901760, %v22023_v21  ;;  %v22064_v59 = vsub.f32 %v80_v48, %v746_v58 }
 0x10b   :  { %18955 = vmatpush3.bf16.msra.mxu1 %v21529_v13  ;;  %19819 = vmatpush3.bf16.msra.mxu0 %v21535_v19  ;;  %v731_v13 = vsel %vm157_vm2, %v20946_v3, 0  ;;  %v8057_v19 = vand.u32 4294901760, %v22009_v30  ;;  %v22056_v3 = vsub.f32 %v8004_v49, %v8054_v34  ;;  %v820_v49 = vsub.f32 %v22015_v20, %v25736_v17 }
 0x10c   :  { %18956 = vmatprep.subr.bf16.mxu1 %v25871_v25  ;;  %19820 = vmatprep.subr.bf16.mxu0 %v25871_v25  ;;  %v22047_v45 = vand.u32 4294901760, %v731_v13  ;;  %v8138_v58 = vsub.f32 %v22023_v21, %v25739_v61  ;;  %v22097_v17 = vsub.f32 %v22007_v1, %v749_v55  ;;  %v22103_v61 = vsub.f32 %v22011_v53, %v8060_v47 }
 0x10d   :  { %v22060_v28 = vpack.c.bf16 %v8060_v47, %v8057_v19  ;;  %v22100_v22 = vsub.f32 %v22009_v30, %v8057_v19  ;;  %v25918_v19 = vand.u32 4294901760, %v22040_v52  ;;  %v25921_v14 = vand.u32 4294901760, %v22056_v3 }
 0x10e   :  { %v22081_v34 = vsub.f32 %v731_v13, %v22047_v45  ;;  %v8139_v55 = vand.u32 4294901760, %v8138_v58  ;;  %v25751_v58 = vand.u32 4294901760, %v22064_v59 }
 0x10f   :  { %18958 = vmatpush3.bf16.msra.mxu1 %v21545_v51  ;;  %19822 = vmatpush3.bf16.msra.mxu0 %v21560_v35  ;;  %v22051_v51 = vsub.f32 %v79_v23, %v743_v40  ;;  %v8008_v35 = vld [vmem:[#allocation5 + $0x378] sm:$0xff]  ;;  %v755_v23 = vand.u32 4294901760, %v83_v63  ;;  %v8063_v40 = vand.u32 4294901760, %v8007_v5  ;;  %v834_v47 = vsub.f32 %v22040_v52, %v25918_v19 }
 0x110   :  { %18959 = vmatprep.subr.bf16.mxu1 %v25871_v25  ;;  %19823 = vmatprep.subr.bf16.mxu0 %v25871_v25  ;;  %v8066_v37 = vand.u32 4294901760, %v8008_v35  ;;  %v8152_v1 = vsub.f32 %v22056_v3, %v25921_v14  ;;  %v25750_v19 = vand.u32 4294901760, %v22097_v17  ;;  %v25922_v14 = vand.u32 4294901760, %v22081_v34 }
 0x111   :  { %v22105_v0 = vpack.c.bf16 %v755_v23, %v752_v60  ;;  %v22129_v57 = vsub.f32 %v83_v63, %v755_v23  ;;  %v848_v43 = vsub.f32 %v22064_v59, %v25751_v58 }
 0x112   :  { %16263 = vmatmul.mubr.f32.vlgmr.msra.gmra.mrb[0].mxu1 %v21795_v24  ;;  %17631 = vmatmul.mubr.f32.vlgmr.msra.gmra.mrb[0].mxu0 %v21793_v46  ;;  %v827_v24 = vsub.f32 %v22017_v41, %v25735_v32  ;;  %v25917_v46 = vand.u32 4294901760, %v22019_v18  ;;  %v22111_v13 = vpack.c.bf16 %v8066_v37, %v8063_v40  ;;  %v821_v32 = vand.u32 4294901760, %v820_v49 }
 0x113   :  { %18961 = vmatpush3.bf16.msra.mxu1 %v22030_v38  ;;  %19825 = vmatpush3.bf16.msra.mxu0 %v22032_v31  ;;  %v25920_v49 = vand.u32 4294901760, %v22054_v50  ;;  %v809_v63 = vsub.f32 %v22081_v34, %v25922_v14  ;;  %v849_v27 = vand.u32 4294901760, %v848_v43 }
 0x114   :  { %v8131_v48 = vsub.f32 %v22019_v18, %v25917_v46  ;;  %18962 = vmatprep.subr.bf16.mxu1 %v25871_v25  ;;  %19826 = vmatprep.subr.bf16.mxu0 %v25871_v25  ;;  %v22109_v46 = vsub.f32 %v82_v36, %v752_v60  ;;  %v828_v26 = vand.u32 4294901760, %v827_v24  ;;  %v25919_v36 = vand.u32 4294901760, %v22051_v51 }
 0x115   :  { %16281 = vmatprep.mubr.msk.f32.mxu1 %vm21239_vm0, %v25875_v44  ;;  %17649 = vmatprep.mubr.msk.f32.mxu0 %vm21239_vm0, %v25875_v44  ;;  %v8145_v24 = vsub.f32 %v22054_v50, %v25920_v49  ;;  %v855_v49 = vsub.f32 %v22097_v17, %v25750_v19 }
 0x116   :  { %v8132_v53 = vand.u32 4294901760, %v8131_v48  ;;  %v841_v60 = vsub.f32 %v22051_v51, %v25919_v36  ;;  %v22131_v48 = vsub.f32 %v8007_v5, %v8063_v40  ;;  %v22137_v36 = vsub.f32 %v8008_v35, %v8066_v37 }
 0x117   :  { %18964 = vmatpush3.bf16.msra.mxu1 %v22034_v29  ;;  %19828 = vmatpush3.bf16.msra.mxu0 %v22036_v54  ;;  %v18972_v30 = vpack.c.bf16 %v828_v26, %v821_v32  ;;  %v25923_v5 = vand.u32 4294901760, %v22078_v42  ;;  %v835_v35 = vand.u32 4294901760, %v834_v47  ;;  %v8146_v32 = vand.u32 4294901760, %v8145_v24 }
 0x118   :  { %18965 = vmatprep.subr.bf16.mxu1 %v25871_v25  ;;  %19829 = vmatprep.subr.bf16.mxu0 %v25871_v25  ;;  %v19836_v40 = vpack.c.bf16 %v8139_v55, %v8132_v53  ;;  %v842_v37 = vand.u32 4294901760, %v841_v60  ;;  %v8153_v26 = vand.u32 4294901760, %v8152_v1  ;;  %v25924_v53 = vand.u32 4294901760, %v22100_v22 }
 0x119   :  { %v8120_v23 = vsub.f32 %v22078_v42, %v25923_v5  ;;  %v25925_v55 = vand.u32 4294901760, %v22103_v61  ;;  %v810_v5 = vand.u32 4294901760, %v809_v63  ;;  %v25926_v56 = vand.u32 4294901760, %v22109_v46 }
 0x11a   :  { %v8159_v1 = vsub.f32 %v22100_v22, %v25924_v53  ;;  %v18975_v58 = vpack.c.bf16 %v842_v37, %v835_v35  ;;  %v19839_v14 = vpack.c.bf16 %v8153_v26, %v8146_v32  ;;  %v856_v53 = vand.u32 4294901760, %v855_v49 }
 0x11b   :  { %18967 = vmatpush3.bf16.msra.mxu1 %v22058_v4  ;;  %19831 = vmatpush3.bf16.msra.mxu0 %v22060_v28  ;;  %v8166_v47 = vsub.f32 %v22103_v61, %v25925_v55  ;;  %v8121_v19 = vand.u32 4294901760, %v8120_v23  ;;  %v862_v55 = vsub.f32 %v22109_v46, %v25926_v56  ;;  %v25927_v60 = vand.u32 4294901760, %v22129_v57 }
 0x11c   :  { %18968 = vmatprep.subr.bf16.mxu1 %v25871_v25  ;;  %19832 = vmatprep.subr.bf16.mxu0 %v25871_v25  ;;  %v8160_v63 = vand.u32 4294901760, %v8159_v1  ;;  %v25928_v62 = vand.u32 4294901760, %v22131_v48  ;;  %v18978_v56 = vpack.c.bf16 %v856_v53, %v849_v27  ;;  %v22190_v1 = vadd.s32 256, %v21289_v2 }
 0x11d   :  { %v869_v24 = vsub.f32 %v22129_v57, %v25927_v60  ;;  %v8167_v23 = vand.u32 4294901760, %v8166_v47  ;;  %v19848_v47 = vpack.c.bf16 %v22023_v21, %v22019_v18 }
 0x11e   :  { %v8173_v35 = vsub.f32 %v22131_v48, %v25928_v62  ;;  %25930 = vst [vmem:[#allocation35_spill] sm:$0xff] %v22190_v1  ;;  %vm2506_vm5 = vcmp.eq.s32.totalorder %v22190_v1, %v21320_v15  ;;  %vm9794_vm6 = vcmp.eq.s32.totalorder %v22190_v1, %v21322_v16 }
 0x11f   :  { %18970 = vmatpush3.bf16.msra.mxu1 %v22105_v0  ;;  %19834 = vmatpush3.bf16.msra.mxu0 %v22111_v13  ;;  %v19842_v49 = vpack.c.bf16 %v8167_v23, %v8160_v63  ;;  %v870_v62 = vand.u32 4294901760, %v869_v24  ;;  %v14695_v27 = vsel %vm2506_vm5, 1.0, %v25875_v44  ;;  %v22205_v24 = vadd.s32 256, %v21297_v6 }
 0x120   :  { %18971 = vmatprep.subr.bf16.mxu1 %v25871_v25  ;;  %19835 = vmatprep.subr.bf16.mxu0 %v25871_v25  ;;  %v19851_v63 = vpack.c.bf16 %v22056_v3, %v22054_v50 }
 0x121   :  { %25931 = vst [vmem:[#allocation36_spill] sm:$0xff] %v22205_v24  ;;  %vm2507_vm7 = vcmp.eq.s32.totalorder %v22205_v24, %v21320_v15  ;;  %vm9795_vm8 = vcmp.eq.s32.totalorder %v22205_v24, %v21322_v16 }
 0x122   :  { %16282 = vmatmul.mubr.f32.vlgmr.msra.gmra.mrb[0].mxu1 %v810_v5  ;;  %17650 = vmatmul.mubr.f32.vlgmr.msra.gmra.mrb[0].mxu0 %v8121_v19  ;;  %v25929_v19 = vand.u32 4294901760, %v22137_v36  ;;  %v14696_v5 = vsel %vm2507_vm7, 1.0, %v25875_v44  ;;  %v14792_v53 = vsel %vm9795_vm8, 1.0, %v25875_v44 }
 0x123   :  { %18973 = vmatpush3.bf16.msra.mxu1 %v18972_v30  ;;  %19837 = vmatpush3.bf16.msra.mxu0 %v19836_v40  ;;  %v863_v30 = vand.u32 4294901760, %v862_v55  ;;  %v8174_v40 = vand.u32 4294901760, %v8173_v35  ;;  %v18987_v55 = vpack.c.bf16 %v22051_v51, %v22040_v52  ;;  %v20994_v23 = vpack.i.bf16 %v14792_v53, %v14696_v5 }
 0x124   :  { %v8180_v43 = vsub.f32 %v22137_v36, %v25929_v19  ;;  %18974 = vmatprep.subr.bf16.mxu1 %v25871_v25  ;;  %19838 = vmatprep.subr.bf16.mxu0 %v25871_v25  ;;  %v22222_v35 = vadd.s32 256, %v21300_v7 }
 0x125   :  { %16300 = vmatprep.mubr.msk.f32.mxu1 %vm21239_vm0, %v25875_v44  ;;  %17668 = vmatprep.mubr.msk.f32.mxu0 %vm21239_vm0, %v25875_v44  ;;  %v18981_v32 = vpack.c.bf16 %v870_v62, %v863_v30  ;;  %v19854_v30 = vpack.c.bf16 %v22103_v61, %v22100_v22  ;;  %v22241_v62 = vadd.s32 256, %v21303_v8 }
 0x126   :  { %v8181_v37 = vand.u32 4294901760, %v8180_v43  ;;  %25932 = vst [vmem:[#allocation37_spill] sm:$0xff] %v22222_v35  ;;  %vm2508_vm9 = vcmp.eq.s32.totalorder %v22222_v35, %v21320_v15  ;;  %vm9796_vm10 = vcmp.eq.s32.totalorder %v22222_v35, %v21322_v16 }
 0x127   :  { %18976 = vmatpush3.bf16.msra.mxu1 %v18975_v58  ;;  %19840 = vmatpush3.bf16.msra.mxu0 %v19839_v14  ;;  %v14791_v58 = vsel %vm9794_vm6, 1.0, %v25875_v44  ;;  %v18984_v14 = vpack.c.bf16 %v22017_v41, %v22015_v20  ;;  %v14697_v19 = vsel %vm2508_vm9, 1.0, %v25875_v44  ;;  %v14793_v43 = vsel %vm9796_vm10, 1.0, %v25875_v44  ;;  %25933 = vst [vmem:[#allocation38_spill] sm:$0xff] %v22241_v62 }
 0x128   :  { %18977 = vmatprep.subr.bf16.mxu1 %v25871_v25  ;;  %19841 = vmatprep.subr.bf16.mxu0 %v25871_v25  ;;  %v19845_v26 = vpack.c.bf16 %v8181_v37, %v8174_v40  ;;  %v20992_v60 = vpack.i.bf16 %v14791_v58, %v14695_v27  ;;  %vm2509_vm11 = vcmp.eq.s32.totalorder %v22241_v62, %v21320_v15  ;;  %v22256_v58 = vadd.s32 256, %v21306_v9 }
 0x129   :  { %vm9797_vm12 = vcmp.eq.s32.totalorder %v22241_v62, %v21322_v16  ;;  %v14698_v40 = vsel %vm2509_vm11, 1.0, %v25875_v44 }
 0x12a   :  { %20993 = vxpose.xlu0.b32.start [1/8] (short) (narrow) %v20992_v60, 8  ;;  %v14794_v37 = vsel %vm9797_vm12, 1.0, %v25875_v44  ;;  %25934 = vst [vmem:[#allocation39_spill] sm:$0xff] %v22256_v58  ;;  %vm2510_vm13 = vcmp.eq.s32.totalorder %v22256_v58, %v21320_v15  ;;  %vm9798_vm14 = vcmp.eq.s32.totalorder %v22256_v58, %v21322_v16  ;;  %v22267_v60 = vadd.s32 256, %v21309_v10 }
 0x12b   :  { %18979 = vmatpush3.bf16.msra.mxu1 %v18978_v56  ;;  %19843 = vmatpush3.bf16.msra.mxu0 %v19842_v49  ;;  %v18990_v56 = vpack.c.bf16 %v22097_v17, %v22064_v59  ;;  %v20996_v49 = vpack.i.bf16 %v14793_v43, %v14697_v19  ;;  %v20998_v27 = vpack.i.bf16 %v14794_v37, %v14698_v40  ;;  %v25939_v40 = vand.u32 4294901760, %v22017_v41 }
 0x12c   :  { %18980 = vmatprep.subr.bf16.mxu1 %v25871_v25  ;;  %19844 = vmatprep.subr.bf16.mxu0 %v25871_v25  ;;  %25935 = vst [vmem:[#allocation40_spill] sm:$0xff] %v22267_v60  ;;  %vm2511_vm15 = vcmp.eq.s32.totalorder %v22267_v60, %v21320_v15  ;;  %vm9799_vm1 = vcmp.eq.s32.totalorder %v22267_v60, %v21322_v16 }
 0x12d   :  { %v14700_v53 = vsel %vm2511_vm15, 1.0, %v25875_v44 }
 0x12e   :  { %20995 = vxpose.xlu0.b32.cont [2/8] (short) (narrow) %v20994_v23, 8 }
 0x12f   :  { %18982 = vmatpush3.bf16.msra.mxu1 %v18981_v32  ;;  %19846 = vmatpush3.bf16.msra.mxu0 %v19845_v26  ;;  %v18993_v32 = vpack.c.bf16 %v22129_v57, %v22109_v46  ;;  %v19857_v26 = vpack.c.bf16 %v22137_v36, %v22131_v48 }
 0x130   :  { %18983 = vmatprep.subr.bf16.mxu1 %v25871_v25  ;;  %19847 = vmatprep.subr.bf16.mxu0 %v25871_v25 }
 0x132   :  { %16301 = vmatmul.mubr.f32.vlgmr.msra.gmra.mrb[0].mxu1 %v22047_v45  ;;  %17669 = vmatmul.mubr.f32.vlgmr.msra.gmra.mrb[0].mxu0 %v22045_v33 }
 0x133   :  { %18985 = vmatpush3.bf16.msra.mxu1 %v18984_v14  ;;  %19849 = vmatpush3.bf16.msra.mxu0 %v19848_v47  ;;  %v14699_v14 = vsel %vm2510_vm13, 1.0, %v25875_v44  ;;  %v14795_v47 = vsel %vm9798_vm14, 1.0, %v25875_v44 }
 0x134   :  { %18986 = vmatprep.subr.bf16.mxu1 %v25871_v25  ;;  %19850 = vmatprep.subr.bf16.mxu0 %v25871_v25  ;;  %v21000_v5 = vpack.i.bf16 %v14795_v47, %v14699_v14 }
 0x135   :  { %16319 = vmatprep.mubr.msk.f32.mxu1 %vm21239_vm0, %v25875_v44  ;;  %17687 = vmatprep.mubr.msk.f32.mxu0 %vm21239_vm0, %v25875_v44 }
 0x136   :  { %20997 = vxpose.xlu0.b32.cont [3/8] (short) (narrow) %v20996_v49, 8  ;;  %v25938_v49 = vand.u32 4294901760, %v22015_v20  ;;  %v25943_v20 = vand.u32 4294901760, %v22078_v42 }
 0x137   :  { %18988 = vmatpush3.bf16.msra.mxu1 %v18987_v55  ;;  %19852 = vmatpush3.bf16.msra.mxu0 %v19851_v63  ;;  %v14796_v55 = vsel %vm9799_vm1, 1.0, %v25875_v44  ;;  %v22282_v63 = vadd.s32 256, %v21312_v11 }
 0x138   :  { %18989 = vmatprep.subr.bf16.mxu1 %v25871_v25  ;;  %19853 = vmatprep.subr.bf16.mxu0 %v25871_v25  ;;  %v21002_v23 = vpack.i.bf16 %v14796_v55, %v14700_v53  ;;  %v19008_v37 = vpack.c.bf16 %v25939_v40, %v25938_v49  ;;  %v25946_v55 = vand.u32 4294901760, %v22054_v50 }
 0x139   :  { %25936 = vst [vmem:[#allocation41_spill] sm:$0xff] %v22282_v63  ;;  %vm2512_vm3 = vcmp.eq.s32.totalorder %v22282_v63, %v21320_v15  ;;  %vm9800_vm4 = vcmp.eq.s32.totalorder %v22282_v63, %v21322_v16 }
 0x13a   :  { %20999 = vxpose.xlu0.b32.cont [4/8] (short) (narrow) %v20998_v27, 8  ;;  %v14701_v19 = vsel %vm2512_vm3, 1.0, %v25875_v44  ;;  %v14797_v43 = vsel %vm9800_vm4, 1.0, %v25875_v44 }
 0x13b   :  { %18991 = vmatpush3.bf16.msra.mxu1 %v18990_v56  ;;  %19855 = vmatpush3.bf16.msra.mxu0 %v19854_v30  ;;  %v22301_v56 = vadd.s32 256, %v21315_v12  ;;  %v21004_v30 = vpack.i.bf16 %v14797_v43, %v14701_v19 }
 0x13c   :  { %18992 = vmatprep.subr.bf16.mxu1 %v25871_v25  ;;  %19856 = vmatprep.subr.bf16.mxu0 %v25871_v25 }
 0x13d   :  { %25937 = vst [vmem:[#allocation42_spill] sm:$0xff] %v22301_v56  ;;  %vm2513_vm5 = vcmp.eq.s32.totalorder %v22301_v56, %v21320_v15  ;;  %vm9801_vm6 = vcmp.eq.s32.totalorder %v22301_v56, %v21322_v16 }
 0x13e   :  { %21001 = vxpose.xlu0.b32.cont [5/8] (short) (narrow) %v21000_v5, 8  ;;  %v14702_v14 = vsel %vm2513_vm5, 1.0, %v25875_v44  ;;  %v14798_v47 = vsel %vm9801_vm6, 1.0, %v25875_v44  ;;  %v25942_v5 = vand.u32 4294901760, %v22081_v34 }
 0x13f   :  { %18994 = vmatpush3.bf16.msra.mxu1 %v18993_v32  ;;  %19858 = vmatpush3.bf16.msra.mxu0 %v19857_v26  ;;  %v25940_v32 = vand.u32 4294901760, %v22019_v18  ;;  %v25941_v26 = vand.u32 4294901760, %v22023_v21  ;;  %v21006_v41 = vpack.i.bf16 %v14798_v47, %v14702_v14  ;;  %v25944_v18 = vand.u32 4294901760, %v22040_v52 }
 0x140   :  { %18995 = vmatprep.subr.bf16.mxu1 %v25871_v25  ;;  %19859 = vmatprep.subr.bf16.mxu0 %v25871_v25  ;;  %v25945_v21 = vand.u32 4294901760, %v22051_v51  ;;  %v25948_v52 = vand.u32 4294901760, %v22064_v59  ;;  %v25949_v51 = vand.u32 4294901760, %v22097_v17  ;;  %v25953_v59 = vand.u32 4294901760, %v22129_v57 }
 0x141   :  { %v19872_v27 = vpack.c.bf16 %v25941_v26, %v25940_v32  ;;  %v25954_v17 = vand.u32 4294901760, %v22131_v48  ;;  %v20970_v57 = vunpack.i.h.bf16 %v21965_v39  ;;  %v1304_v48 = vld [vmem:[#allocation5 + $0x88] sm:$0xff]  ;;  %v1306_v32 = vld [vmem:[#allocation5 + $0x98] sm:$0xff] }
 0x142   :  { %16320 = vmatmul.mubr.f32.vlgmr.msra.gmra.mrb[0].mxu1 %v22081_v34  ;;  %17688 = vmatmul.mubr.f32.vlgmr.msra.gmra.mrb[0].mxu0 %v22078_v42  ;;  %v19011_v53 = vpack.c.bf16 %v25945_v21, %v25944_v18  ;;  %v19014_v50 = vpack.c.bf16 %v25949_v51, %v25948_v52  ;;  %v25951_v42 = vand.u32 4294901760, %v22103_v61  ;;  %v20967_v61 = vunpack.i.l.bf16 %v21965_v39  ;;  %v8611_v51 = vld [vmem:[#allocation5 + $0x3a0] sm:$0xff] }
 0x143   :  { %18997 = vmatpush3.bf16.msra.mxu1 %v22030_v38  ;;  %19861 = vmatpush3.bf16.msra.mxu0 %v22032_v31  ;;  %v8648_v39 = vsel %vm157_vm2, %v20970_v57, 0  ;;  %v1356_v21 = vand.u32 4294901760, %v1306_v32 }
 0x144   :  { %18998 = vmatprep.subr.bf16.mxu1 %v25871_v25  ;;  %19862 = vmatprep.subr.bf16.mxu0 %v25871_v25 }
 0x145   :  { %16338 = vmatprep.mubr.msk.f32.mxu1 %vm21239_vm0, %v25875_v44  ;;  %17706 = vmatprep.mubr.msk.f32.mxu0 %vm21239_vm0, %v25875_v44 }
 0x146   :  { %21003 = vxpose.xlu0.b32.cont [6/8] (short) (narrow) %v21002_v23, 8  ;;  %v25947_v23 = vand.u32 4294901760, %v22056_v3  ;;  %v25950_v3 = vand.u32 4294901760, %v22100_v22  ;;  %v25955_v22 = vand.u32 4294901760, %v22137_v36  ;;  %v8607_v36 = vld [vmem:[#allocation5 + $0x380] sm:$0xff] }
 0x147   :  { %19000 = vmatpush3.bf16.msra.mxu1 %v22034_v29  ;;  %19864 = vmatpush3.bf16.msra.mxu0 %v22036_v54  ;;  %v8651_v14 = vand.u32 4294901760, %v8607_v36 }
 0x148   :  { %19001 = vmatprep.subr.bf16.mxu1 %v25871_v25  ;;  %19865 = vmatprep.subr.bf16.mxu0 %v25871_v25  ;;  %v19875_v19 = vpack.c.bf16 %v25947_v23, %v25946_v55  ;;  %v19878_v34 = vpack.c.bf16 %v25951_v42, %v25950_v3  ;;  %v19881_v40 = vpack.c.bf16 %v25955_v22, %v25954_v17  ;;  %v1308_v55 = vld [vmem:[#allocation5 + $0xa8] sm:$0xff]  ;;  %v8663_v22 = vand.u32 4294901760, %v8611_v51 }
 0x14a   :  { %21005 = vxpose.xlu0.b32.cont [7/8] (short) (narrow) %v21004_v30, 8  ;;  %v25952_v30 = vand.u32 4294901760, %v22109_v46  ;;  %v1303_v46 = vld [vmem:[#allocation5 + $0x80] sm:$0xff] }
 0x14b   :  { %19003 = vmatpush3.bf16.msra.mxu1 %v22058_v4  ;;  %19867 = vmatpush3.bf16.msra.mxu0 %v22060_v28  ;;  %v1347_v26 = vand.u32 4294901760, %v1303_v46 }
 0x14c   :  { %19004 = vmatprep.subr.bf16.mxu1 %v25871_v25  ;;  %19868 = vmatprep.subr.bf16.mxu0 %v25871_v25  ;;  %v19017_v49 = vpack.c.bf16 %v25953_v59, %v25952_v30 }
 0x14e   :  { %21007 = vxpose.xlu0.b32.end [8/8] (short) (narrow) %v21006_v41, 8  ;;  %v22391_v41 = vsub.f32 %v1303_v46, %v1347_v26  ;;  %v1309_v46 = vld [vmem:[#allocation5 + $0xb0] sm:$0xff] }
 0x14f   :  { %19006 = vmatpush3.bf16.msra.mxu1 %v22105_v0  ;;  %19870 = vmatpush3.bf16.msra.mxu0 %v22111_v13 }
 0x150   :  { %19007 = vmatprep.subr.bf16.mxu1 %v25871_v25  ;;  %19871 = vmatprep.subr.bf16.mxu0 %v25871_v25  ;;  %v25758_v57 = vand.u32 4294901760, %v22391_v41 }
 0x152   :  { %16339 = vmatmul.mubr.f32.vlgmr.msra.gmra.mrb[0].mxu1 %v25942_v5  ;;  %17707 = vmatmul.mubr.f32.vlgmr.msra.gmra.mrb[0].mxu0 %v25943_v20  ;;  %v22385_v5 = vand.u32 4294901760, %v8648_v39 }
 0x153   :  { %19009 = vmatpush3.bf16.msra.mxu1 %v19008_v37  ;;  %19873 = vmatpush3.bf16.msra.mxu0 %v19872_v27  ;;  %v1305_v37 = vld [vmem:[#allocation5 + $0x90] sm:$0xff]  ;;  %v1350_v27 = vand.u32 4294901760, %v1304_v48 }
 0x154   :  { %19010 = vmatprep.subr.bf16.mxu1 %v25871_v25  ;;  %19874 = vmatprep.subr.bf16.mxu0 %v25871_v25  ;;  %v1353_v18 = vand.u32 4294901760, %v1305_v37 }
 0x155   :  { %16357 = vmatprep.mubr.msk.f32.mxu1 %vm21239_vm0, %v25875_v44  ;;  %17725 = vmatprep.mubr.msk.f32.mxu0 %vm21239_vm0, %v25875_v44  ;;  %v22395_v23 = vsub.f32 %v1304_v48, %v1350_v27  ;;  %v1310_v48 = vld [vmem:[#allocation5 + $0xb8] sm:$0xff] }
 0x156   :  { %v22413_v17 = vpack.c.bf16 %v1356_v21, %v1353_v18 }
 0x157   :  { %19012 = vmatpush3.bf16.msra.mxu1 %v19011_v53  ;;  %19876 = vmatpush3.bf16.msra.mxu0 %v19875_v19  ;;  %v1307_v53 = vld [vmem:[#allocation5 + $0xa0] sm:$0xff]  ;;  %v22397_v19 = vsub.f32 %v8607_v36, %v8651_v14  ;;  %v25756_v36 = vand.u32 4294901760, %v22395_v23 }
 0x158   :  { %19013 = vmatprep.subr.bf16.mxu1 %v25871_v25  ;;  %19877 = vmatprep.subr.bf16.mxu0 %v25871_v25  ;;  %v1359_v59 = vand.u32 4294901760, %v1307_v53 }
 0x15a   :  { %v22353_v43 = vpop.trf.xlu1 }
 0x15b   :  { %19015 = vmatpush3.bf16.msra.mxu1 %v19014_v50  ;;  %19879 = vmatpush3.bf16.msra.mxu0 %v19878_v34  ;;  %v22401_v50 = vpack.c.bf16 %v1350_v27, %v1347_v26  ;;  %v22406_v34 = vsub.f32 %v8648_v39, %v22385_v5  ;;  %v22435_v27 = vsub.f32 %v1307_v53, %v1359_v59 }
 0x15c   :  { %19016 = vmatprep.subr.bf16.mxu1 %v25871_v25  ;;  %19880 = vmatprep.subr.bf16.mxu0 %v25871_v25 }
 0x15f   :  { %19018 = vmatpush3.bf16.msra.mxu1 %v19017_v49  ;;  %19882 = vmatpush3.bf16.msra.mxu0 %v19881_v40  ;;  %v1362_v49 = vand.u32 4294901760, %v1308_v55 }
 0x160   :  { %19019 = vmatprep.subr.bf16.mxu1 %v25871_v25  ;;  %19883 = vmatprep.subr.bf16.mxu0 %v25871_v25 }
 0x162   :  { %16358 = vmatmul.mubr.f32.vlgmr.msra.gmra.mrb[0].mxu1 %v22047_v45  ;;  %17726 = vmatmul.mubr.f32.vlgmr.msra.gmra.mrb[0].mxu0 %v22045_v33 }
 0x163   :  { %19021 = vmatpush3.bf16.msra.mxu1 %v22030_v38  ;;  %19885 = vmatpush3.bf16.msra.mxu0 %v22032_v31  ;;  %v8608_v38 = vld [vmem:[#allocation5 + $0x388] sm:$0xff]  ;;  %v1344_v31 = vsel %vm157_vm2, %v20967_v61, 0  ;;  %v22418_v61 = vsub.f32 %v1305_v37, %v1353_v18  ;;  %v22433_v37 = vpack.c.bf16 %v1362_v49, %v1359_v59  ;;  %v8613_v18 = vld [vmem:[#allocation5 + $0x3b0] sm:$0xff] }
 0x164   :  { %19022 = vmatprep.subr.bf16.mxu1 %v25871_v25  ;;  %19886 = vmatprep.subr.bf16.mxu0 %v25871_v25  ;;  %v8654_v47 = vand.u32 4294901760, %v8608_v38  ;;  %v22387_v20 = vand.u32 4294901760, %v1344_v31 }
 0x165   :  { %16376 = vmatprep.mubr.msk.f32.mxu1 %vm21239_vm0, %v25875_v44  ;;  %17744 = vmatprep.mubr.msk.f32.mxu0 %vm21239_vm0, %v25875_v44 }
 0x166   :  { %v22399_v52 = vsub.f32 %v8608_v38, %v8654_v47  ;;  %v22409_v30 = vsub.f32 %v1344_v31, %v22387_v20  ;;  %v22423_v38 = vsub.f32 %v1306_v32, %v1356_v21  ;;  %v1440_v21 = vsub.f32 %v22395_v23, %v25756_v36 }
 0x167   :  { %19024 = vmatpush3.bf16.msra.mxu1 %v22034_v29  ;;  %19888 = vmatpush3.bf16.msra.mxu0 %v22036_v54  ;;  %v8609_v29 = vld [vmem:[#allocation5 + $0x390] sm:$0xff]  ;;  %v8610_v54 = vld [vmem:[#allocation5 + $0x398] sm:$0xff]  ;;  %v22466_v36 = vsub.f32 %v8611_v51, %v8663_v22 }
 0x168   :  { %19025 = vmatprep.subr.bf16.mxu1 %v25871_v25  ;;  %19889 = vmatprep.subr.bf16.mxu0 %v25871_v25  ;;  %v8657_v3 = vand.u32 4294901760, %v8609_v29  ;;  %v8660_v42 = vand.u32 4294901760, %v8610_v54 }
 0x16a   :  { %v22425_v39 = vpack.c.bf16 %v8660_v42, %v8657_v3  ;;  %v22427_v31 = vsub.f32 %v8609_v29, %v8657_v3  ;;  %v22429_v26 = vsub.f32 %v8610_v54, %v8660_v42  ;;  %v1365_v29 = vand.u32 4294901760, %v1309_v46 }
 0x16b   :  { %19027 = vmatpush3.bf16.msra.mxu1 %v22058_v4  ;;  %19891 = vmatpush3.bf16.msra.mxu0 %v22060_v28  ;;  %v8612_v4 = vld [vmem:[#allocation5 + $0x3a8] sm:$0xff]  ;;  %v22403_v28 = vpack.c.bf16 %v8654_v47, %v8651_v14  ;;  %v22437_v14 = vsub.f32 %v1308_v55, %v1362_v49  ;;  %v1368_v54 = vand.u32 4294901760, %v1310_v48  ;;  %v25768_v3 = vand.u32 4294901760, %v22418_v61 }
 0x16c   :  { %19028 = vmatprep.subr.bf16.mxu1 %v25871_v25  ;;  %19892 = vmatprep.subr.bf16.mxu0 %v25871_v25  ;;  %v8666_v40 = vand.u32 4294901760, %v8612_v4  ;;  %v22474_v56 = vsub.f32 %v1309_v46, %v1365_v29  ;;  %v25956_v42 = vand.u32 4294901760, %v22409_v30  ;;  %v25957_v46 = vand.u32 4294901760, %v22423_v38 }
 0x16d   :  { %v22472_v47 = vpack.c.bf16 %v1368_v54, %v1365_v29  ;;  %v1447_v63 = vsub.f32 %v22418_v61, %v25768_v3  ;;  %v25959_v60 = vand.u32 4294901760, %v22429_v26 }
 0x16e   :  { %v22442_v32 = vpack.c.bf16 %v8666_v40, %v8663_v22  ;;  %v1422_v59 = vsub.f32 %v22409_v30, %v25956_v42  ;;  %v1454_v29 = vsub.f32 %v22423_v38, %v25957_v46  ;;  %v25958_v42 = vand.u32 4294901760, %v22427_v31 }
 0x16f   :  { %19030 = vmatpush3.bf16.msra.mxu1 %v22105_v0  ;;  %19894 = vmatpush3.bf16.msra.mxu0 %v22111_v13  ;;  %v25757_v0 = vand.u32 4294901760, %v22397_v19  ;;  %v25759_v13 = vand.u32 4294901760, %v22399_v52  ;;  %v8758_v58 = vsub.f32 %v22429_v26, %v25959_v60  ;;  %v1448_v62 = vand.u32 4294901760, %v1447_v63 }
 0x170   :  { %19031 = vmatprep.subr.bf16.mxu1 %v25871_v25  ;;  %19895 = vmatprep.subr.bf16.mxu0 %v25871_v25  ;;  %v8751_v49 = vsub.f32 %v22427_v31, %v25958_v42  ;;  %v1455_v35 = vand.u32 4294901760, %v1454_v29  ;;  %v25962_v60 = vand.u32 4294901760, %v22437_v14  ;;  %v1474_v24 = vand.u32 4294901760, %v22474_v56 }
 0x171   :  { %v8737_v53 = vsub.f32 %v22397_v19, %v25757_v0  ;;  %v8744_v55 = vsub.f32 %v22399_v52, %v25759_v13  ;;  %v22468_v0 = vsub.f32 %v8612_v4, %v8666_v40  ;;  %v1441_v4 = vand.u32 4294901760, %v1440_v21 }
 0x172   :  { %16377 = vmatmul.mubr.f32.vlgmr.msra.gmra.mrb[0].mxu1 %v22047_v45  ;;  %17745 = vmatmul.mubr.f32.vlgmr.msra.gmra.mrb[0].mxu0 %v22045_v33  ;;  %v8614_v45 = vld [vmem:[#allocation5 + $0x3b8] sm:$0xff]  ;;  %v1433_v33 = vsub.f32 %v22391_v41, %v25758_v57  ;;  %v8669_v57 = vand.u32 4294901760, %v8613_v18  ;;  %v1468_v42 = vsub.f32 %v22437_v14, %v25962_v60  ;;  %v25963_v63 = vand.u32 4294901760, %v22466_v36 }
 0x173   :  { %19033 = vmatpush3.bf16.msra.mxu1 %v22401_v50  ;;  %19897 = vmatpush3.bf16.msra.mxu0 %v22403_v28  ;;  %v8672_v13 = vand.u32 4294901760, %v8614_v45  ;;  %v8738_v22 = vand.u32 4294901760, %v8737_v53  ;;  %v8745_v40 = vand.u32 4294901760, %v8744_v55  ;;  %v19047_v60 = vpack.c.bf16 %v1455_v35, %v1448_v62 }
 0x174   :  { %19034 = vmatprep.subr.bf16.mxu1 %v25871_v25  ;;  %19898 = vmatprep.subr.bf16.mxu0 %v25871_v25  ;;  %v1434_v51 = vand.u32 4294901760, %v1433_v33  ;;  %v22494_v33 = vsub.f32 %v1310_v48, %v1368_v54  ;;  %v22502_v46 = vsub.f32 %v8613_v18, %v8669_v57  ;;  %v25960_v48 = vand.u32 4294901760, %v22406_v34 }
 0x175   :  { %16395 = vmatprep.mubr.msk.f32.mxu1 %vm21239_vm0, %v25875_v44  ;;  %17763 = vmatprep.mubr.msk.f32.mxu0 %vm21239_vm0, %v25875_v44  ;;  %v22496_v21 = vpack.c.bf16 %v8672_v13, %v8669_v57  ;;  %v22504_v3 = vsub.f32 %v8614_v45, %v8672_v13  ;;  %v19908_v53 = vpack.c.bf16 %v8745_v40, %v8738_v22  ;;  %v8752_v57 = vand.u32 4294901760, %v8751_v49 }
 0x176   :  { %v8726_v54 = vsub.f32 %v22406_v34, %v25960_v48  ;;  %v19044_v55 = vpack.c.bf16 %v1441_v4, %v1434_v51  ;;  %v8759_v18 = vand.u32 4294901760, %v8758_v58  ;;  %v25961_v13 = vand.u32 4294901760, %v22435_v27 }
 0x177   :  { %19036 = vmatpush3.bf16.msra.mxu1 %v22413_v17  ;;  %19900 = vmatpush3.bf16.msra.mxu0 %v22425_v39  ;;  %v1481_v1 = vand.u32 4294901760, %v22494_v33  ;;  %v8765_v58 = vsub.f32 %v22466_v36, %v25963_v63  ;;  %v25964_v49 = vand.u32 4294901760, %v22468_v0  ;;  %v8778_v4 = vand.u32 4294901760, %v22502_v46 }
 0x178   :  { %19037 = vmatprep.subr.bf16.mxu1 %v25871_v25  ;;  %19901 = vmatprep.subr.bf16.mxu0 %v25871_v25  ;;  %v1461_v45 = vsub.f32 %v22435_v27, %v25961_v13  ;;  %v1423_v40 = vand.u32 4294901760, %v1422_v59  ;;  %v8727_v29 = vand.u32 4294901760, %v8726_v54  ;;  %v19911_v48 = vpack.c.bf16 %v8759_v18, %v8752_v57 }
 0x179   :  { %v8772_v51 = vsub.f32 %v22468_v0, %v25964_v49  ;;  %v1469_v63 = vand.u32 4294901760, %v1468_v42  ;;  %v1475_v49 = vsub.f32 %v22474_v56, %v1474_v24  ;;  %v1482_v22 = vsub.f32 %v22494_v33, %v1481_v1 }
 0x17a   :  { %v1462_v13 = vand.u32 4294901760, %v1461_v45  ;;  %v8766_v59 = vand.u32 4294901760, %v8765_v58  ;;  %v8779_v35 = vsub.f32 %v22502_v46, %v8778_v4  ;;  %v25965_v62 = vand.u32 4294901760, %v22504_v3 }
 0x17b   :  { %19039 = vmatpush3.bf16.msra.mxu1 %v22433_v37  ;;  %19903 = vmatpush3.bf16.msra.mxu0 %v22442_v32  ;;  %v8773_v54 = vand.u32 4294901760, %v8772_v51  ;;  %v1483_v18 = vand.u32 4294901760, %v1482_v22 }
 0x17c   :  { %19040 = vmatprep.subr.bf16.mxu1 %v25871_v25  ;;  %19904 = vmatprep.subr.bf16.mxu0 %v25871_v25  ;;  %v8786_v42 = vsub.f32 %v22504_v3, %v25965_v62  ;;  %v8780_v45 = vand.u32 4294901760, %v8779_v35  ;;  %v19059_v35 = vpack.c.bf16 %v22423_v38, %v22418_v61  ;;  %v19923_v62 = vpack.c.bf16 %v22429_v26, %v22427_v31 }
 0x17d   :  { %v19914_v57 = vpack.c.bf16 %v8773_v54, %v8766_v59 }
 0x17e   :  { %v8787_v58 = vand.u32 4294901760, %v8786_v42 }
 0x17f   :  { %19042 = vmatpush3.bf16.msra.mxu1 %v22472_v47  ;;  %19906 = vmatpush3.bf16.msra.mxu0 %v22496_v21 }
 0x180   :  { %19043 = vmatprep.subr.bf16.mxu1 %v25871_v25  ;;  %19907 = vmatprep.subr.bf16.mxu0 %v25871_v25 }
 0x182   :  { %16396 = vmatmul.mubr.f32.vlgmr.msra.gmra.mrb[0].mxu1 %v1423_v40  ;;  %17764 = vmatmul.mubr.f32.vlgmr.msra.gmra.mrb[0].mxu0 %v8727_v29  ;;  %v19917_v40 = vpack.c.bf16 %v8787_v58, %v8780_v45  ;;  %v22554_v29 = vadd.s32 320, %v21289_v2  ;;  %v19926_v45 = vpack.c.bf16 %v22468_v0, %v22466_v36 }
 0x183   :  { %19045 = vmatpush3.bf16.msra.mxu1 %v19044_v55  ;;  %19909 = vmatpush3.bf16.msra.mxu0 %v19908_v53  ;;  %v19050_v53 = vpack.c.bf16 %v1469_v63, %v1462_v13  ;;  %v1476_v55 = vand.u32 4294901760, %v1475_v49  ;;  %v19920_v13 = vpack.c.bf16 %v22399_v52, %v22397_v19  ;;  %v22569_v49 = vadd.s32 320, %v21297_v6 }
 0x184   :  { %19046 = vmatprep.subr.bf16.mxu1 %v25871_v25  ;;  %19910 = vmatprep.subr.bf16.mxu0 %v25871_v25  ;;  %vm3120_vm7 = vcmp.eq.s32.totalorder %v22554_v29, %v21320_v15  ;;  %vm10400_vm8 = vcmp.eq.s32.totalorder %v22554_v29, %v21322_v16 }
 0x185   :  { %16414 = vmatprep.mubr.msk.f32.mxu1 %vm21239_vm0, %v25875_v44  ;;  %17782 = vmatprep.mubr.msk.f32.mxu0 %vm21239_vm0, %v25875_v44  ;;  %v19053_v51 = vpack.c.bf16 %v1483_v18, %v1476_v55  ;;  %v14703_v22 = vsel %vm3120_vm7, 1.0, %v25875_v44  ;;  %vm3121_vm9 = vcmp.eq.s32.totalorder %v22569_v49, %v21320_v15  ;;  %vm10401_vm10 = vcmp.eq.s32.totalorder %v22569_v49, %v21322_v16 }
 0x186   :  { %v14704_v59 = vsel %vm3121_vm9, 1.0, %v25875_v44  ;;  %v14800_v54 = vsel %vm10401_vm10, 1.0, %v25875_v44  ;;  %v19062_v18 = vpack.c.bf16 %v22437_v14, %v22435_v27 }
 0x187   :  { %19048 = vmatpush3.bf16.msra.mxu1 %v19047_v60  ;;  %19912 = vmatpush3.bf16.msra.mxu0 %v19911_v48  ;;  %v14799_v60 = vsel %vm10400_vm8, 1.0, %v25875_v44  ;;  %v19056_v48 = vpack.c.bf16 %v22395_v23, %v22391_v41  ;;  %v21015_v42 = vpack.i.bf16 %v14800_v54, %v14704_v59 }
 0x188   :  { %19049 = vmatprep.subr.bf16.mxu1 %v25871_v25  ;;  %19913 = vmatprep.subr.bf16.mxu0 %v25871_v25  ;;  %v21013_v63 = vpack.i.bf16 %v14799_v60, %v14703_v22  ;;  %v19065_v60 = vpack.c.bf16 %v22494_v33, %v22474_v56  ;;  %v9213_v56 = vld [vmem:[#allocation5 + $0x3c0] sm:$0xff]  ;;  %v20988_v33 = vunpack.i.l.bf16 %v22353_v43 }
 0x18a   :  { %21014 = vxpose.xlu1.b32.start [1/8] (short) (narrow) %v21013_v63, 8  ;;  %v22620_v63 = vadd.s32 320, %v21306_v9 }
 0x18b   :  { %19051 = vmatpush3.bf16.msra.mxu1 %v19050_v53  ;;  %19915 = vmatpush3.bf16.msra.mxu0 %v19914_v57  ;;  %v22586_v53 = vadd.s32 320, %v21300_v7 }
 0x18c   :  { %19052 = vmatprep.subr.bf16.mxu1 %v25871_v25  ;;  %19916 = vmatprep.subr.bf16.mxu0 %v25871_v25  ;;  %25968 = vst [vmem:[#allocation45_spill] sm:$0xff] %v22620_v63  ;;  %vm3124_vm15 = vcmp.eq.s32.totalorder %v22620_v63, %v21320_v15  ;;  %vm10404_vm1 = vcmp.eq.s32.totalorder %v22620_v63, %v21322_v16 }
 0x18d   :  { %25966 = vst [vmem:[#allocation43_spill] sm:$0xff] %v22586_v53  ;;  %vm3122_vm11 = vcmp.eq.s32.totalorder %v22586_v53, %v21320_v15  ;;  %vm10402_vm12 = vcmp.eq.s32.totalorder %v22586_v53, %v21322_v16  ;;  %v14707_v59 = vsel %vm3124_vm15, 1.0, %v25875_v44  ;;  %v14803_v54 = vsel %vm10404_vm1, 1.0, %v25875_v44 }
 0x18e   :  { %21016 = vxpose.xlu1.b32.cont [2/8] (short) (narrow) %v21015_v42, 8  ;;  %v14705_v55 = vsel %vm3122_vm11, 1.0, %v25875_v44  ;;  %v14801_v57 = vsel %vm10402_vm12, 1.0, %v25875_v44 }
 0x18f   :  { %19054 = vmatpush3.bf16.msra.mxu1 %v19053_v51  ;;  %19918 = vmatpush3.bf16.msra.mxu0 %v19917_v40  ;;  %v21017_v58 = vpack.i.bf16 %v14801_v57, %v14705_v55  ;;  %v22605_v51 = vadd.s32 320, %v21303_v8  ;;  %v22646_v57 = vadd.s32 320, %v21312_v11 }
 0x190   :  { %19055 = vmatprep.subr.bf16.mxu1 %v25871_v25  ;;  %19919 = vmatprep.subr.bf16.mxu0 %v25871_v25 }
 0x191   :  { %25967 = vst [vmem:[#allocation44_spill] sm:$0xff] %v22605_v51  ;;  %vm3123_vm13 = vcmp.eq.s32.totalorder %v22605_v51, %v21320_v15  ;;  %vm10403_vm14 = vcmp.eq.s32.totalorder %v22605_v51, %v21322_v16  ;;  %25970 = vst [vmem:[#allocation47_spill] sm:$0xff] %v22646_v57  ;;  %vm3126_vm5 = vcmp.eq.s32.totalorder %v22646_v57, %v21320_v15 }
 0x192   :  { %16415 = vmatmul.mubr.f32.vlgmr.msra.gmra.mrb[0].mxu1 %v22387_v20  ;;  %17783 = vmatmul.mubr.f32.vlgmr.msra.gmra.mrb[0].mxu0 %v22385_v5  ;;  %v14706_v40 = vsel %vm3123_vm13, 1.0, %v25875_v44  ;;  %v14802_v22 = vsel %vm10403_vm14, 1.0, %v25875_v44  ;;  %vm10406_vm6 = vcmp.eq.s32.totalorder %v22646_v57, %v21322_v16 }
 0x193   :  { %19057 = vmatpush3.bf16.msra.mxu1 %v19056_v48  ;;  %19921 = vmatpush3.bf16.msra.mxu0 %v19920_v13  ;;  %v19929_v48 = vpack.c.bf16 %v22504_v3, %v22502_v46  ;;  %v21019_v13 = vpack.i.bf16 %v14802_v22, %v14706_v40  ;;  %v22665_v40 = vadd.s32 320, %v21315_v12  ;;  %v9215_v46 = vld [vmem:[#allocation5 + $0x3d0] sm:$0xff] }
 0x194   :  { %19058 = vmatprep.subr.bf16.mxu1 %v25871_v25  ;;  %19922 = vmatprep.subr.bf16.mxu0 %v25871_v25 }
 0x195   :  { %16433 = vmatprep.mubr.msk.f32.mxu1 %vm21239_vm0, %v25875_v44  ;;  %17801 = vmatprep.mubr.msk.f32.mxu0 %vm21239_vm0, %v25875_v44  ;;  %25971 = vst [vmem:[#allocation48_spill] sm:$0xff] %v22665_v40  ;;  %vm3127_vm7 = vcmp.eq.s32.totalorder %v22665_v40, %v21320_v15  ;;  %vm10407_vm8 = vcmp.eq.s32.totalorder %v22665_v40, %v21322_v16 }
 0x196   :  { %21018 = vxpose.xlu1.b32.cont [3/8] (short) (narrow) %v21017_v58, 8  ;;  %v14805_v58 = vsel %vm10406_vm6, 1.0, %v25875_v44 }
 0x197   :  { %19060 = vmatpush3.bf16.msra.mxu1 %v19059_v35  ;;  %19924 = vmatpush3.bf16.msra.mxu0 %v19923_v62  ;;  %v22631_v35 = vadd.s32 320, %v21309_v10  ;;  %v21021_v62 = vpack.i.bf16 %v14803_v54, %v14707_v59  ;;  %v25974_v59 = vand.u32 4294901760, %v22397_v19  ;;  %v25975_v54 = vand.u32 4294901760, %v22399_v52 }
 0x198   :  { %19061 = vmatprep.subr.bf16.mxu1 %v25871_v25  ;;  %19925 = vmatprep.subr.bf16.mxu0 %v25871_v25  ;;  %v25978_v19 = vand.u32 4294901760, %v22418_v61  ;;  %v25979_v52 = vand.u32 4294901760, %v22423_v38  ;;  %v25984_v38 = vand.u32 4294901760, %v22466_v36  ;;  %v25986_v36 = vand.u32 4294901760, %v22504_v3 }
 0x199   :  { %25969 = vst [vmem:[#allocation46_spill] sm:$0xff] %v22631_v35  ;;  %vm3125_vm3 = vcmp.eq.s32.totalorder %v22631_v35, %v21320_v15  ;;  %vm10405_vm4 = vcmp.eq.s32.totalorder %v22631_v35, %v21322_v16  ;;  %v14710_v15 = vsel %vm3127_vm7, 1.0, %v25875_v44  ;;  %v25976_v16 = vand.u32 4294901760, %v22409_v30 }
 0x19a   :  { %21020 = vxpose.xlu1.b32.cont [4/8] (short) (narrow) %v21019_v13, 8  ;;  %v14708_v42 = vsel %vm3125_vm3, 1.0, %v25875_v44  ;;  %v14804_v55 = vsel %vm10405_vm4, 1.0, %v25875_v44  ;;  %v20991_v3 = vunpack.i.h.bf16 %v22353_v43  ;;  %v9218_v43 = vld [vmem:[#allocation5 + $0x3e8] sm:$0xff] }
 0x19b   :  { %19063 = vmatpush3.bf16.msra.mxu1 %v19062_v18  ;;  %19927 = vmatpush3.bf16.msra.mxu0 %v19926_v45  ;;  %v21023_v18 = vpack.i.bf16 %v14804_v55, %v14708_v42  ;;  %v14709_v45 = vsel %vm3126_vm5, 1.0, %v25875_v44  ;;  %v14806_v42 = vsel %vm10407_vm8, 1.0, %v25875_v44  ;;  %v19083_v55 = vpack.c.bf16 %v25979_v52, %v25978_v19 }
 0x19c   :  { %19064 = vmatprep.subr.bf16.mxu1 %v25871_v25  ;;  %19928 = vmatprep.subr.bf16.mxu0 %v25871_v25  ;;  %v21025_v22 = vpack.i.bf16 %v14805_v58, %v14709_v45  ;;  %v25981_v45 = vand.u32 4294901760, %v22429_v26  ;;  %v1958_v19 = vsel %vm157_vm2, %v20988_v33, 0 }
 0x19e   :  { %21022 = vxpose.xlu1.b32.cont [5/8] (short) (narrow) %v21021_v62, 8  ;;  %v19944_v62 = vpack.c.bf16 %v25975_v54, %v25974_v59 }
 0x19f   :  { %19066 = vmatpush3.bf16.msra.mxu1 %v19065_v60  ;;  %19930 = vmatpush3.bf16.msra.mxu0 %v19929_v48  ;;  %v25972_v60 = vand.u32 4294901760, %v22391_v41  ;;  %v25973_v48 = vand.u32 4294901760, %v22395_v23  ;;  %v25977_v41 = vand.u32 4294901760, %v22406_v34  ;;  %v21027_v23 = vpack.i.bf16 %v14806_v42, %v14710_v15 }
 0x1a0   :  { %19067 = vmatprep.subr.bf16.mxu1 %v25871_v25  ;;  %19931 = vmatprep.subr.bf16.mxu0 %v25871_v25  ;;  %v9263_v42 = vand.u32 4294901760, %v9215_v46 }
 0x1a1   :  { %v19080_v13 = vpack.c.bf16 %v25973_v48, %v25972_v60 }
 0x1a2   :  { %16434 = vmatmul.mubr.f32.vlgmr.msra.gmra.mrb[0].mxu1 %v22409_v30  ;;  %17802 = vmatmul.mubr.f32.vlgmr.msra.gmra.mrb[0].mxu0 %v22406_v34  ;;  %v25982_v34 = vand.u32 4294901760, %v22435_v27  ;;  %v25983_v30 = vand.u32 4294901760, %v22437_v14  ;;  %v19089_v27 = vpack.c.bf16 %v1481_v1, %v1474_v24  ;;  %v19953_v14 = vpack.c.bf16 %v25986_v36, %v8778_v4  ;;  %v1917_v1 = vld [vmem:[#allocation5 + $0xc0] sm:$0xff]  ;;  %v1918_v24 = vld [vmem:[#allocation5 + $0xc8] sm:$0xff]  ;;  %v9216_v4 = vld [vmem:[#allocation5 + $0x3d8] sm:$0xff] }
 0x1a3   :  { %19069 = vmatpush3.bf16.msra.mxu1 %v22401_v50  ;;  %19933 = vmatpush3.bf16.msra.mxu0 %v22403_v28  ;;  %v1961_v60 = vand.u32 4294901760, %v1917_v1  ;;  %v1964_v48 = vand.u32 4294901760, %v1918_v24 }
 0x1a4   :  { %19070 = vmatprep.subr.bf16.mxu1 %v25871_v25  ;;  %19934 = vmatprep.subr.bf16.mxu0 %v25871_v25  ;;  %v19086_v61 = vpack.c.bf16 %v25983_v30, %v25982_v34 }
 0x1a5   :  { %16452 = vmatprep.mubr.msk.f32.mxu1 %vm21239_vm0, %v25875_v44  ;;  %17820 = vmatprep.mubr.msk.f32.mxu0 %vm21239_vm0, %v25875_v44  ;;  %v22749_v15 = vsub.f32 %v1917_v1, %v1961_v60  ;;  %v22755_v52 = vsub.f32 %v1918_v24, %v1964_v48  ;;  %v1924_v1 = vld [vmem:[#allocation5 + $0xf8] sm:$0xff] }
 0x1a6   :  { %21024 = vxpose.xlu1.b32.cont [6/8] (short) (narrow) %v21023_v18, 8  ;;  %v25980_v18 = vand.u32 4294901760, %v22427_v31  ;;  %v25985_v31 = vand.u32 4294901760, %v22468_v0  ;;  %v1919_v0 = vld [vmem:[#allocation5 + $0xd0] sm:$0xff] }
 0x1a7   :  { %19072 = vmatpush3.bf16.msra.mxu1 %v22413_v17  ;;  %19936 = vmatpush3.bf16.msra.mxu0 %v22425_v39 }
 0x1a8   :  { %19073 = vmatprep.subr.bf16.mxu1 %v25871_v25  ;;  %19937 = vmatprep.subr.bf16.mxu0 %v25871_v25  ;;  %v19947_v58 = vpack.c.bf16 %v25981_v45, %v25980_v18  ;;  %v19950_v26 = vpack.c.bf16 %v25985_v31, %v25984_v38  ;;  %v22771_v31 = vand.u32 4294901760, %v1958_v19 }
 0x1aa   :  { %21026 = vxpose.xlu1.b32.cont [7/8] (short) (narrow) %v21025_v22, 8 }
 0x1ab   :  { %19075 = vmatpush3.bf16.msra.mxu1 %v22433_v37  ;;  %19939 = vmatpush3.bf16.msra.mxu0 %v22442_v32 }
 0x1ac   :  { %19076 = vmatprep.subr.bf16.mxu1 %v25871_v25  ;;  %19940 = vmatprep.subr.bf16.mxu0 %v25871_v25 }
 0x1ae   :  { %21028 = vxpose.xlu1.b32.end [8/8] (short) (narrow) %v21027_v23, 8  ;;  %v9254_v23 = vsel %vm157_vm2, %v20991_v3, 0 }
 0x1af   :  { %19078 = vmatpush3.bf16.msra.mxu1 %v22472_v47  ;;  %19942 = vmatpush3.bf16.msra.mxu0 %v22496_v21  ;;  %v22769_v38 = vand.u32 4294901760, %v9254_v23 }
 0x1b0   :  { %19079 = vmatprep.subr.bf16.mxu1 %v25871_v25  ;;  %19943 = vmatprep.subr.bf16.mxu0 %v25871_v25 }
 0x1b2   :  { %16453 = vmatmul.mubr.f32.vlgmr.msra.gmra.mrb[0].mxu1 %v25976_v16  ;;  %17821 = vmatmul.mubr.f32.vlgmr.msra.gmra.mrb[0].mxu0 %v25977_v41  ;;  %v22717_v22 = vpop.trf.xlu0  ;;  %v9266_v16 = vand.u32 4294901760, %v9216_v4  ;;  %v9217_v41 = vld [vmem:[#allocation5 + $0x3e0] sm:$0xff] }
 0x1b3   :  { %19081 = vmatpush3.bf16.msra.mxu1 %v19080_v13  ;;  %19945 = vmatpush3.bf16.msra.mxu0 %v19944_v62  ;;  %v9257_v13 = vand.u32 4294901760, %v9213_v56  ;;  %v1922_v62 = vld [vmem:[#allocation5 + $0xe8] sm:$0xff]  ;;  %v9269_v30 = vand.u32 4294901760, %v9217_v41 }
 0x1b4   :  { %19082 = vmatprep.subr.bf16.mxu1 %v25871_v25  ;;  %19946 = vmatprep.subr.bf16.mxu0 %v25871_v25  ;;  %v1976_v45 = vand.u32 4294901760, %v1922_v62 }
 0x1b5   :  { %16471 = vmatprep.mubr.msk.f32.mxu1 %vm21239_vm0, %v25875_v44  ;;  %17839 = vmatprep.mubr.msk.f32.mxu0 %vm21239_vm0, %v25875_v44 }
 0x1b6   :  { %v22795_v33 = vsub.f32 %v1922_v62, %v1976_v45  ;;  %v22819_v62 = vsub.f32 %v9217_v41, %v9269_v30 }
 0x1b7   :  { %19084 = vmatpush3.bf16.msra.mxu1 %v19083_v55  ;;  %19948 = vmatpush3.bf16.msra.mxu0 %v19947_v58  ;;  %v22757_v55 = vsub.f32 %v9213_v56, %v9257_v13  ;;  %v22784_v56 = vsub.f32 %v9215_v46, %v9263_v42  ;;  %v22803_v46 = vsub.f32 %v1958_v19, %v22771_v31 }
 0x1b8   :  { %19085 = vmatprep.subr.bf16.mxu1 %v25871_v25  ;;  %19949 = vmatprep.subr.bf16.mxu0 %v25871_v25  ;;  %v25992_v63 = vand.u32 4294901760, %v22795_v33 }
 0x1b9   :  { %v25777_v24 = vand.u32 4294901760, %v22757_v55 }
 0x1ba   :  { %v2082_v51 = vsub.f32 %v22795_v33, %v25992_v63 }
 0x1bb   :  { %19087 = vmatpush3.bf16.msra.mxu1 %v19086_v61  ;;  %19951 = vmatpush3.bf16.msra.mxu0 %v19950_v26  ;;  %v9272_v61 = vand.u32 4294901760, %v9218_v43 }
 0x1bc   :  { %19088 = vmatprep.subr.bf16.mxu1 %v25871_v25  ;;  %19952 = vmatprep.subr.bf16.mxu0 %v25871_v25 }
 0x1bd   :  { %v22830_v19 = vsub.f32 %v9218_v43, %v9272_v61 }
 0x1bf   :  { %19090 = vmatpush3.bf16.msra.mxu1 %v19089_v27  ;;  %19954 = vmatpush3.bf16.msra.mxu0 %v19953_v14  ;;  %v22775_v27 = vpack.c.bf16 %v9266_v16, %v9263_v42  ;;  %v1923_v14 = vld [vmem:[#allocation5 + $0xf0] sm:$0xff] }
 0x1c0   :  { %19091 = vmatprep.subr.bf16.mxu1 %v25871_v25  ;;  %19955 = vmatprep.subr.bf16.mxu0 %v25871_v25 }
 0x1c2   :  { %16472 = vmatmul.mubr.f32.vlgmr.msra.gmra.mrb[0].mxu1 %v22387_v20  ;;  %17840 = vmatmul.mubr.f32.vlgmr.msra.gmra.mrb[0].mxu0 %v22385_v5 }
 0x1c3   :  { %19093 = vmatpush3.bf16.msra.mxu1 %v22401_v50  ;;  %19957 = vmatpush3.bf16.msra.mxu0 %v22403_v28  ;;  %v9214_v50 = vld [vmem:[#allocation5 + $0x3c8] sm:$0xff]  ;;  %v1920_v28 = vld [vmem:[#allocation5 + $0xd8] sm:$0xff] }
 0x1c4   :  { %19094 = vmatprep.subr.bf16.mxu1 %v25871_v25  ;;  %19958 = vmatprep.subr.bf16.mxu0 %v25871_v25  ;;  %v9260_v59 = vand.u32 4294901760, %v9214_v50  ;;  %v1970_v54 = vand.u32 4294901760, %v1920_v28 }
 0x1c5   :  { %16490 = vmatprep.mubr.msk.f32.mxu1 %vm21239_vm0, %v25875_v44  ;;  %17858 = vmatprep.mubr.msk.f32.mxu0 %vm21239_vm0, %v25875_v44 }
 0x1c6   :  { %v22763_v58 = vpack.c.bf16 %v9260_v59, %v9257_v13  ;;  %v22779_v36 = vsub.f32 %v1920_v28, %v1970_v54  ;;  %v9219_v13 = vld [vmem:[#allocation5 + $0x3f0] sm:$0xff] }
 0x1c7   :  { %19096 = vmatpush3.bf16.msra.mxu1 %v22413_v17  ;;  %19960 = vmatpush3.bf16.msra.mxu0 %v22425_v39  ;;  %v1967_v17 = vand.u32 4294901760, %v1919_v0  ;;  %v1921_v39 = vld [vmem:[#allocation5 + $0xe0] sm:$0xff] }
 0x1c8   :  { %19097 = vmatprep.subr.bf16.mxu1 %v25871_v25  ;;  %19961 = vmatprep.subr.bf16.mxu0 %v25871_v25  ;;  %v1973_v18 = vand.u32 4294901760, %v1921_v39 }
 0x1c9   :  { %v22765_v34 = vpack.c.bf16 %v1970_v54, %v1967_v17  ;;  %v22773_v26 = vsub.f32 %v1919_v0, %v1967_v17  ;;  %v9343_v54 = vsub.f32 %v22757_v55, %v25777_v24 }
 0x1ca   :  { %v22788_v0 = vpack.c.bf16 %v1976_v45, %v1973_v18  ;;  %v22793_v28 = vsub.f32 %v1921_v39, %v1973_v18  ;;  %v9275_v18 = vand.u32 4294901760, %v9219_v13 }
 0x1cb   :  { %19099 = vmatpush3.bf16.msra.mxu1 %v22433_v37  ;;  %19963 = vmatpush3.bf16.msra.mxu0 %v22442_v32  ;;  %v22759_v37 = vpack.c.bf16 %v1964_v48, %v1961_v60  ;;  %v22761_v32 = vsub.f32 %v9214_v50, %v9260_v59  ;;  %v22786_v50 = vsub.f32 %v9216_v4, %v9266_v16  ;;  %v1979_v4 = vand.u32 4294901760, %v1923_v14 }
 0x1cc   :  { %19100 = vmatprep.subr.bf16.mxu1 %v25871_v25  ;;  %19964 = vmatprep.subr.bf16.mxu0 %v25871_v25  ;;  %v22797_v60 = vpack.c.bf16 %v9272_v61, %v9269_v30  ;;  %v22800_v48 = vsub.f32 %v9254_v23, %v22769_v38  ;;  %v25784_v39 = vand.u32 4294901760, %v22773_v26  ;;  %v25783_v16 = vand.u32 4294901760, %v22779_v36 }
 0x1cd   :  { %v25778_v3 = vand.u32 4294901760, %v22761_v32  ;;  %v22837_v24 = vsub.f32 %v1923_v14, %v1979_v4 }
 0x1ce   :  { %v2061_v41 = vsub.f32 %v22773_v26, %v25784_v39  ;;  %v2068_v14 = vsub.f32 %v22779_v36, %v25783_v16  ;;  %v22864_v39 = vsub.f32 %v9219_v13, %v9275_v18 }
 0x1cf   :  { %19102 = vmatpush3.bf16.msra.mxu1 %v22472_v47  ;;  %19966 = vmatpush3.bf16.msra.mxu0 %v22496_v21  ;;  %v25780_v47 = vand.u32 4294901760, %v22749_v15  ;;  %v25779_v21 = vand.u32 4294901760, %v22755_v52  ;;  %v9350_v42 = vsub.f32 %v22761_v32, %v25778_v3 }
 0x1d0   :  { %19103 = vmatprep.subr.bf16.mxu1 %v25871_v25  ;;  %19967 = vmatprep.subr.bf16.mxu0 %v25871_v25  ;;  %v2062_v57 = vand.u32 4294901760, %v2061_v41  ;;  %v9384_v41 = vand.u32 4294901760, %v22864_v39 }
 0x1d1   :  { %v2047_v59 = vsub.f32 %v22749_v15, %v25780_v47  ;;  %v2054_v17 = vsub.f32 %v22755_v52, %v25779_v21  ;;  %v9344_v47 = vand.u32 4294901760, %v9343_v54  ;;  %v9351_v23 = vand.u32 4294901760, %v9350_v42 }
 0x1d2   :  { %16491 = vmatmul.mubr.f32.vlgmr.msra.gmra.mrb[0].mxu1 %v22387_v20  ;;  %17859 = vmatmul.mubr.f32.vlgmr.msra.gmra.mrb[0].mxu0 %v22385_v5  ;;  %v1982_v20 = vand.u32 4294901760, %v1924_v1  ;;  %v9220_v5 = vld [vmem:[#allocation5 + $0x3f8] sm:$0xff]  ;;  %v25990_v42 = vand.u32 4294901760, %v22800_v48 }
 0x1d3   :  { %19105 = vmatpush3.bf16.msra.mxu1 %v22759_v37  ;;  %19969 = vmatpush3.bf16.msra.mxu0 %v22763_v58  ;;  %v9278_v45 = vand.u32 4294901760, %v9220_v5  ;;  %v2048_v43 = vand.u32 4294901760, %v2047_v59  ;;  %v2055_v61 = vand.u32 4294901760, %v2054_v17  ;;  %v25988_v59 = vand.u32 4294901760, %v22786_v50 }
 0x1d4   :  { %19106 = vmatprep.subr.bf16.mxu1 %v25871_v25  ;;  %19970 = vmatprep.subr.bf16.mxu0 %v25871_v25  ;;  %v22835_v30 = vpack.c.bf16 %v1982_v20, %v1979_v4  ;;  %v25987_v4 = vand.u32 4294901760, %v22784_v56  ;;  %v22853_v40 = vsub.f32 %v1924_v1, %v1982_v20  ;;  %v25989_v20 = vand.u32 4294901760, %v22803_v46 }
 0x1d5   :  { %16509 = vmatprep.mubr.msk.f32.mxu1 %vm21239_vm0, %v25875_v44  ;;  %17877 = vmatprep.mubr.msk.f32.mxu0 %vm21239_vm0, %v25875_v44  ;;  %v9364_v17 = vsub.f32 %v22786_v50, %v25988_v59  ;;  %v22862_v16 = vpack.c.bf16 %v9278_v45, %v9275_v18  ;;  %v9332_v54 = vsub.f32 %v22800_v48, %v25990_v42  ;;  %v2069_v18 = vand.u32 4294901760, %v2068_v14 }
 0x1d6   :  { %v9357_v21 = vsub.f32 %v22784_v56, %v25987_v4  ;;  %v22866_v4 = vsub.f32 %v9220_v5, %v9278_v45  ;;  %v2036_v59 = vsub.f32 %v22803_v46, %v25989_v20  ;;  %v19116_v3 = vpack.c.bf16 %v2055_v61, %v2048_v43 }
 0x1d7   :  { %19108 = vmatpush3.bf16.msra.mxu1 %v22765_v34  ;;  %19972 = vmatpush3.bf16.msra.mxu0 %v22775_v27  ;;  %v19980_v13 = vpack.c.bf16 %v9351_v23, %v9344_v47  ;;  %v25991_v45 = vand.u32 4294901760, %v22793_v28  ;;  %v9365_v35 = vand.u32 4294901760, %v9364_v17  ;;  %v25993_v20 = vand.u32 4294901760, %v22819_v62 }
 0x1d8   :  { %19109 = vmatprep.subr.bf16.mxu1 %v25871_v25  ;;  %19973 = vmatprep.subr.bf16.mxu0 %v25871_v25  ;;  %v9358_v5 = vand.u32 4294901760, %v9357_v21  ;;  %v25994_v47 = vand.u32 4294901760, %v22830_v19  ;;  %v2037_v43 = vand.u32 4294901760, %v2036_v59  ;;  %v9333_v61 = vand.u32 4294901760, %v9332_v54 }
 0x1d9   :  { %v2075_v1 = vsub.f32 %v22793_v28, %v25991_v45  ;;  %v9371_v53 = vsub.f32 %v22819_v62, %v25993_v20  ;;  %v19119_v14 = vpack.c.bf16 %v2069_v18, %v2062_v57  ;;  %v2083_v20 = vand.u32 4294901760, %v2082_v51 }
 0x1da   :  { %v9378_v21 = vsub.f32 %v22830_v19, %v25994_v47  ;;  %v19983_v45 = vpack.c.bf16 %v9365_v35, %v9358_v5  ;;  %v25995_v47 = vand.u32 4294901760, %v22837_v24  ;;  %v25996_v59 = vand.u32 4294901760, %v22853_v40 }
 0x1db   :  { %19111 = vmatpush3.bf16.msra.mxu1 %v22788_v0  ;;  %19975 = vmatpush3.bf16.msra.mxu0 %v22797_v60  ;;  %v2076_v17 = vand.u32 4294901760, %v2075_v1  ;;  %v9372_v42 = vand.u32 4294901760, %v9371_v53  ;;  %v9385_v57 = vsub.f32 %v22864_v39, %v9384_v41  ;;  %v25997_v1 = vand.u32 4294901760, %v22866_v4 }
 0x1dc   :  { %19112 = vmatprep.subr.bf16.mxu1 %v25871_v25  ;;  %19976 = vmatprep.subr.bf16.mxu0 %v25871_v25  ;;  %v2089_v23 = vsub.f32 %v22837_v24, %v25995_v47  ;;  %v9379_v63 = vand.u32 4294901760, %v9378_v21  ;;  %v2096_v54 = vsub.f32 %v22853_v40, %v25996_v59  ;;  %v3728_v53 = vsub.s32 1, %v21289_v2 }
 0x1dd   :  { %v9392_v51 = vsub.f32 %v22866_v4, %v25997_v1  ;;  %v11008_v35 = vsub.s32 3, %v21289_v2  ;;  %v9386_v21 = vand.u32 4294901760, %v9385_v57  ;;  %v19995_v57 = vpack.c.bf16 %v22786_v50, %v22784_v56 }
 0x1de   :  { %v19986_v18 = vpack.c.bf16 %v9379_v63, %v9372_v42  ;;  %v2097_v5 = vand.u32 4294901760, %v2096_v54  ;;  %v19128_v63 = vpack.c.bf16 %v22755_v52, %v22749_v15  ;;  %v19131_v54 = vpack.c.bf16 %v22779_v36, %v22773_v26 }
 0x1df   :  { %19114 = vmatpush3.bf16.msra.mxu1 %v22835_v30  ;;  %19978 = vmatpush3.bf16.msra.mxu0 %v22862_v16 }
 0x1e0   :  { %19115 = vmatprep.subr.bf16.mxu1 %v25871_v25  ;;  %19979 = vmatprep.subr.bf16.mxu0 %v25871_v25 }
 0x1e2   :  { %16510 = vmatmul.mubr.f32.vlgmr.msra.gmra.mrb[0].mxu1 %v2037_v43  ;;  %17878 = vmatmul.mubr.f32.vlgmr.msra.gmra.mrb[0].mxu0 %v9333_v61  ;;  %v9393_v43 = vand.u32 4294901760, %v9392_v51  ;;  %v21160_v61 = vld [vmem:[#allocation2] sm:$0xf] }
 0x1e3   :  { %19117 = vmatpush3.bf16.msra.mxu1 %v19116_v3  ;;  %19981 = vmatpush3.bf16.msra.mxu0 %v19980_v13  ;;  %v19122_v3 = vpack.c.bf16 %v2083_v20, %v2076_v17  ;;  %v2090_v13 = vand.u32 4294901760, %v2089_v23  ;;  %v22919_v47 = vrot.slane %v21160_v61, %v3728_v53  ;;  %v22921_v59 = vrot.slane %v21160_v61, %v11008_v35 }
 0x1e4   :  { %19118 = vmatprep.subr.bf16.mxu1 %v25871_v25  ;;  %19982 = vmatprep.subr.bf16.mxu0 %v25871_v25  ;;  %v19989_v17 = vpack.c.bf16 %v9393_v43, %v9386_v21  ;;  %v19134_v35 = vpack.c.bf16 %v22795_v33, %v22793_v28  ;;  %v20001_v21 = vpack.c.bf16 %v22866_v4, %v22864_v39  ;;  %v9819_v39 = vld [vmem:[#allocation5 + $0x400] sm:$0xff] }
 0x1e5   :  { %16528 = vmatprep.mubr.msk.f32.mxu1 %vm21239_vm0, %v25875_v44  ;;  %17896 = vmatprep.mubr.msk.f32.mxu0 %vm21239_vm0, %v25875_v44  ;;  %v19125_v1 = vpack.c.bf16 %v2097_v5, %v2090_v13  ;;  %vm3730_vm9 = vcmp.eq.s32.totalorder %v21289_v2, %v22919_v47  ;;  %vm11010_vm10 = vcmp.eq.s32.totalorder %v21289_v2, %v22921_v59 }
 0x1e6   :  { %v14711_v42 = vsel %vm3730_vm9, 1.0, %v25875_v44  ;;  %v14807_v23 = vsel %vm11010_vm10, 1.0, %v25875_v44  ;;  %vm3731_vm11 = vcmp.eq.s32.totalorder %v21297_v6, %v22919_v47  ;;  %vm11011_vm12 = vcmp.eq.s32.totalorder %v21297_v6, %v22921_v59 }
 0x1e7   :  { %19120 = vmatpush3.bf16.msra.mxu1 %v19119_v14  ;;  %19984 = vmatpush3.bf16.msra.mxu0 %v19983_v45  ;;  %v19992_v14 = vpack.c.bf16 %v22761_v32, %v22757_v55  ;;  %v21034_v45 = vpack.i.bf16 %v14807_v23, %v14711_v42  ;;  %v14712_v2 = vsel %vm3731_vm11, 1.0, %v25875_v44  ;;  %v14808_v20 = vsel %vm11011_vm12, 1.0, %v25875_v44 }
 0x1e8   :  { %19121 = vmatprep.subr.bf16.mxu1 %v25871_v25  ;;  %19985 = vmatprep.subr.bf16.mxu0 %v25871_v25  ;;  %v21036_v51 = vpack.i.bf16 %v14808_v20, %v14712_v2  ;;  %vm3732_vm13 = vcmp.eq.s32.totalorder %v21300_v7, %v22919_v47  ;;  %vm11012_vm14 = vcmp.eq.s32.totalorder %v21300_v7, %v22921_v59  ;;  %v26000_v2 = vand.u32 4294901760, %v22757_v55 }
 0x1e9   :  { %21035 = vxpose.xlu0.b32.start [1/8] (short) (narrow) %v21034_v45, 8  ;;  %v14713_v6 = vsel %vm3732_vm13, 1.0, %v25875_v44  ;;  %v14809_v53 = vsel %vm11012_vm14, 1.0, %v25875_v44  ;;  %vm3733_vm15 = vcmp.eq.s32.totalorder %v21303_v8, %v22919_v47  ;;  %vm11013_vm1 = vcmp.eq.s32.totalorder %v21303_v8, %v22921_v59 }
 0x1ea   :  { %v21038_v13 = vpack.i.bf16 %v14809_v53, %v14713_v6  ;;  %v14714_v7 = vsel %vm3733_vm15, 1.0, %v25875_v44  ;;  %v19137_v5 = vpack.c.bf16 %v22853_v40, %v22837_v24  ;;  %vm3734_vm3 = vcmp.eq.s32.totalorder %v21306_v9, %v22919_v47 }
 0x1eb   :  { %19123 = vmatpush3.bf16.msra.mxu1 %v19122_v3  ;;  %19987 = vmatpush3.bf16.msra.mxu0 %v19986_v18  ;;  %v19998_v3 = vpack.c.bf16 %v22830_v19, %v22819_v62  ;;  %v14810_v18 = vsel %vm11013_vm1, 1.0, %v25875_v44  ;;  %vm11014_vm4 = vcmp.eq.s32.totalorder %v21306_v9, %v22921_v59  ;;  %v14715_v8 = vsel %vm3734_vm3, 1.0, %v25875_v44 }
 0x1ec   :  { %19124 = vmatprep.subr.bf16.mxu1 %v25871_v25  ;;  %19988 = vmatprep.subr.bf16.mxu0 %v25871_v25  ;;  %v21040_v43 = vpack.i.bf16 %v14810_v18, %v14714_v7  ;;  %v14811_v61 = vsel %vm11014_vm4, 1.0, %v25875_v44  ;;  %vm3735_vm5 = vcmp.eq.s32.totalorder %v21309_v10, %v22919_v47  ;;  %vm11015_vm6 = vcmp.eq.s32.totalorder %v21309_v10, %v22921_v59 }
 0x1ed   :  { %21037 = vxpose.xlu0.b32.cont [2/8] (short) (narrow) %v21036_v51, 8  ;;  %v21042_v9 = vpack.i.bf16 %v14811_v61, %v14715_v8  ;;  %vm3736_vm7 = vcmp.eq.s32.totalorder %v21312_v11, %v22919_v47  ;;  %vm11016_vm8 = vcmp.eq.s32.totalorder %v21312_v11, %v22921_v59  ;;  %vm3737_vm9 = vcmp.eq.s32.totalorder %v21315_v12, %v22919_v47 }
 0x1ee   :  { %v14717_v42 = vsel %vm3736_vm7, 1.0, %v25875_v44  ;;  %v14813_v23 = vsel %vm11016_vm8, 1.0, %v25875_v44  ;;  %vm11017_vm10 = vcmp.eq.s32.totalorder %v21315_v12, %v22921_v59  ;;  %v25998_v11 = vand.u32 4294901760, %v22749_v15 }
 0x1ef   :  { %19126 = vmatpush3.bf16.msra.mxu1 %v19125_v1  ;;  %19990 = vmatpush3.bf16.msra.mxu0 %v19989_v17  ;;  %v14716_v1 = vsel %vm3735_vm5, 1.0, %v25875_v44  ;;  %v14812_v17 = vsel %vm11015_vm6, 1.0, %v25875_v44  ;;  %v26001_v20 = vand.u32 4294901760, %v22761_v32  ;;  %v14814_v51 = vsel %vm11017_vm10, 1.0, %v25875_v44 }
 0x1f0   :  { %19127 = vmatprep.subr.bf16.mxu1 %v25871_v25  ;;  %19991 = vmatprep.subr.bf16.mxu0 %v25871_v25  ;;  %v21044_v10 = vpack.i.bf16 %v14812_v17, %v14716_v1  ;;  %v26002_v12 = vand.u32 4294901760, %v22803_v46  ;;  %v26003_v15 = vand.u32 4294901760, %v22800_v48  ;;  %v26004_v55 = vand.u32 4294901760, %v22773_v26  ;;  %v2536_v17 = vld [vmem:[#allocation5 + $0x128] sm:$0xff] }
 0x1f1   :  { %21039 = vxpose.xlu0.b32.cont [3/8] (short) (narrow) %v21038_v13, 8  ;;  %v26005_v32 = vand.u32 4294901760, %v22779_v36  ;;  %v26006_v53 = vand.u32 4294901760, %v22784_v56  ;;  %v26008_v26 = vand.u32 4294901760, %v22793_v28  ;;  %v26009_v36 = vand.u32 4294901760, %v22795_v33 }
 0x1f2   :  { %16529 = vmatmul.mubr.f32.vlgmr.msra.gmra.mrb[0].mxu1 %v22771_v31  ;;  %17897 = vmatmul.mubr.f32.vlgmr.msra.gmra.mrb[0].mxu0 %v22769_v38  ;;  %v26012_v7 = vand.u32 4294901760, %v22837_v24  ;;  %v26013_v28 = vand.u32 4294901760, %v22853_v40  ;;  %v26014_v33 = vand.u32 4294901760, %v22866_v4  ;;  %v2531_v40 = vld [vmem:[#allocation5 + $0x100] sm:$0xff]  ;;  %v2532_v24 = vld [vmem:[#allocation5 + $0x108] sm:$0xff]  ;;  %v21012_v4 = vunpack.i.h.bf16 %v22717_v22 }
 0x1f3   :  { %19129 = vmatpush3.bf16.msra.mxu1 %v19128_v63  ;;  %19993 = vmatpush3.bf16.msra.mxu0 %v19992_v14  ;;  %v21046_v63 = vpack.i.bf16 %v14813_v23, %v14717_v42  ;;  %v25999_v14 = vand.u32 4294901760, %v22755_v52  ;;  %v19155_v6 = vpack.c.bf16 %v26005_v32, %v26004_v55  ;;  %v19158_v56 = vpack.c.bf16 %v26009_v36, %v26008_v26 }
 0x1f4   :  { %19130 = vmatprep.subr.bf16.mxu1 %v25871_v25  ;;  %19994 = vmatprep.subr.bf16.mxu0 %v25871_v25  ;;  %v19161_v18 = vpack.c.bf16 %v26013_v28, %v26012_v7  ;;  %v2578_v8 = vand.u32 4294901760, %v2532_v24  ;;  %v9863_v61 = vand.u32 4294901760, %v9819_v39 }
 0x1f5   :  { %16547 = vmatprep.mubr.msk.f32.mxu1 %vm21239_vm0, %v25875_v44  ;;  %17915 = vmatprep.mubr.msk.f32.mxu0 %vm21239_vm0, %v25875_v44  ;;  %v19152_v45 = vpack.c.bf16 %v25999_v14, %v25998_v11  ;;  %v9860_v11 = vsel %vm157_vm2, %v21012_v4, 0 }
 0x1f6   :  { %21041 = vxpose.xlu0.b32.cont [4/8] (short) (narrow) %v21040_v43, 8  ;;  %v2575_v43 = vand.u32 4294901760, %v2531_v40 }
 0x1f7   :  { %19132 = vmatpush3.bf16.msra.mxu1 %v19131_v54  ;;  %19996 = vmatpush3.bf16.msra.mxu0 %v19995_v57  ;;  %v20016_v54 = vpack.c.bf16 %v26001_v20, %v26000_v2  ;;  %v14718_v57 = vsel %vm3737_vm9, 1.0, %v25875_v44  ;;  %v23103_v2 = vsub.f32 %v9819_v39, %v9863_v61 }
 0x1f8   :  { %19133 = vmatprep.subr.bf16.mxu1 %v25871_v25  ;;  %19997 = vmatprep.subr.bf16.mxu0 %v25871_v25  ;;  %v21048_v52 = vpack.i.bf16 %v14814_v51, %v14718_v57 }
 0x1f9   :  { %v9948_v26 = vand.u32 4294901760, %v23103_v2 }
 0x1fa   :  { %21043 = vxpose.xlu0.b32.cont [5/8] (short) (narrow) %v21042_v9, 8 }
 0x1fb   :  { %19135 = vmatpush3.bf16.msra.mxu1 %v19134_v35  ;;  %19999 = vmatpush3.bf16.msra.mxu0 %v19998_v3  ;;  %v26007_v35 = vand.u32 4294901760, %v22786_v50  ;;  %v26010_v50 = vand.u32 4294901760, %v22819_v62  ;;  %v20025_v62 = vpack.c.bf16 %v26014_v33, %v9384_v41  ;;  %v21009_v41 = vunpack.i.l.bf16 %v22717_v22  ;;  %v9824_v22 = vld [vmem:[#allocation5 + $0x428] sm:$0xff] }
 0x1fc   :  { %19136 = vmatprep.subr.bf16.mxu1 %v25871_v25  ;;  %20000 = vmatprep.subr.bf16.mxu0 %v25871_v25 }
 0x1fd   :  { %v20019_v3 = vpack.c.bf16 %v26007_v35, %v26006_v53  ;;  %v2572_v14 = vsel %vm157_vm2, %v21009_v41, 0  ;;  %v2537_v35 = vld [vmem:[#allocation5 + $0x130] sm:$0xff] }
 0x1fe   :  { %21045 = vxpose.xlu0.b32.cont [6/8] (short) (narrow) %v21044_v10, 8  ;;  %v23095_v10 = vsub.f32 %v2531_v40, %v2575_v43  ;;  %v23117_v55 = vand.u32 4294901760, %v2572_v14  ;;  %v9825_v40 = vld [vmem:[#allocation5 + $0x430] sm:$0xff] }
 0x1ff   :  { %19138 = vmatpush3.bf16.msra.mxu1 %v19137_v5  ;;  %20002 = vmatpush3.bf16.msra.mxu0 %v20001_v21  ;;  %v9821_v5 = vld [vmem:[#allocation5 + $0x410] sm:$0xff]  ;;  %v9822_v21 = vld [vmem:[#allocation5 + $0x418] sm:$0xff] }
 0x200   :  { %19139 = vmatprep.subr.bf16.mxu1 %v25871_v25  ;;  %20003 = vmatprep.subr.bf16.mxu0 %v25871_v25  ;;  %v9869_v42 = vand.u32 4294901760, %v9821_v5  ;;  %v9872_v23 = vand.u32 4294901760, %v9822_v21  ;;  %v23149_v33 = vsub.f32 %v2572_v14, %v23117_v55 }
 0x202   :  { %16548 = vmatmul.mubr.f32.vlgmr.msra.gmra.mrb[0].mxu1 %v22803_v46  ;;  %17916 = vmatmul.mubr.f32.vlgmr.msra.gmra.mrb[0].mxu0 %v22800_v48  ;;  %v26011_v48 = vand.u32 4294901760, %v22830_v19  ;;  %v2533_v19 = vld [vmem:[#allocation5 + $0x110] sm:$0xff]  ;;  %v23130_v36 = vsub.f32 %v9821_v5, %v9869_v42 }
 0x203   :  { %19141 = vmatpush3.bf16.msra.mxu1 %v22759_v37  ;;  %20005 = vmatpush3.bf16.msra.mxu0 %v22763_v58 }
 0x204   :  { %19142 = vmatprep.subr.bf16.mxu1 %v25871_v25  ;;  %20006 = vmatprep.subr.bf16.mxu0 %v25871_v25  ;;  %v20022_v46 = vpack.c.bf16 %v26011_v48, %v26010_v50  ;;  %v25796_v5 = vand.u32 4294901760, %v23130_v36 }
 0x205   :  { %16566 = vmatprep.mubr.msk.f32.mxu1 %vm21239_vm0, %v25875_v44  ;;  %17934 = vmatprep.mubr.msk.f32.mxu0 %vm21239_vm0, %v25875_v44 }
 0x206   :  { %21047 = vxpose.xlu0.b32.cont [7/8] (short) (narrow) %v21046_v63, 8  ;;  %v9823_v63 = vld [vmem:[#allocation5 + $0x420] sm:$0xff]  ;;  %v9963_v14 = vsub.f32 %v23130_v36, %v25796_v5 }
 0x207   :  { %19144 = vmatpush3.bf16.msra.mxu1 %v22765_v34  ;;  %20008 = vmatpush3.bf16.msra.mxu0 %v22775_v27 }
 0x208   :  { %19145 = vmatprep.subr.bf16.mxu1 %v25871_v25  ;;  %20009 = vmatprep.subr.bf16.mxu0 %v25871_v25 }
 0x20a   :  { %21049 = vxpose.xlu0.b32.end [8/8] (short) (narrow) %v21048_v52, 8  ;;  %v23115_v52 = vand.u32 4294901760, %v9860_v11 }
 0x20b   :  { %19147 = vmatpush3.bf16.msra.mxu1 %v22788_v0  ;;  %20011 = vmatpush3.bf16.msra.mxu0 %v22797_v60 }
 0x20c   :  { %19148 = vmatprep.subr.bf16.mxu1 %v25871_v25  ;;  %20012 = vmatprep.subr.bf16.mxu0 %v25871_v25 }
 0x20f   :  { %19150 = vmatpush3.bf16.msra.mxu1 %v22835_v30  ;;  %20014 = vmatpush3.bf16.msra.mxu0 %v22862_v16 }
 0x210   :  { %19151 = vmatprep.subr.bf16.mxu1 %v25871_v25  ;;  %20015 = vmatprep.subr.bf16.mxu0 %v25871_v25 }
 0x212   :  { %16567 = vmatmul.mubr.f32.vlgmr.msra.gmra.mrb[0].mxu1 %v26002_v12  ;;  %17935 = vmatmul.mubr.f32.vlgmr.msra.gmra.mrb[0].mxu0 %v26003_v15  ;;  %v23063_v13 = vpop.trf.xlu1  ;;  %v9875_v12 = vand.u32 4294901760, %v9823_v63  ;;  %v9878_v15 = vand.u32 4294901760, %v9824_v22 }
 0x213   :  { %19153 = vmatpush3.bf16.msra.mxu1 %v19152_v45  ;;  %20017 = vmatpush3.bf16.msra.mxu0 %v20016_v54  ;;  %v23101_v45 = vsub.f32 %v2532_v24, %v2578_v8  ;;  %v2590_v54 = vand.u32 4294901760, %v2536_v17 }
 0x214   :  { %19154 = vmatprep.subr.bf16.mxu1 %v25871_v25  ;;  %20018 = vmatprep.subr.bf16.mxu0 %v25871_v25  ;;  %v23143_v28 = vpack.c.bf16 %v9878_v15, %v9875_v12 }
 0x215   :  { %16585 = vmatprep.mubr.msk.f32.mxu1 %vm21239_vm0, %v25875_v44  ;;  %17953 = vmatprep.mubr.msk.f32.mxu0 %vm21239_vm0, %v25875_v44  ;;  %v23141_v7 = vsub.f32 %v2536_v17, %v2590_v54 }
 0x217   :  { %19156 = vmatpush3.bf16.msra.mxu1 %v19155_v6  ;;  %20020 = vmatpush3.bf16.msra.mxu0 %v20019_v3  ;;  %v23121_v6 = vpack.c.bf16 %v9872_v23, %v9869_v42  ;;  %v2538_v3 = vld [vmem:[#allocation5 + $0x138] sm:$0xff] }
 0x218   :  { %19157 = vmatprep.subr.bf16.mxu1 %v25871_v25  ;;  %20021 = vmatprep.subr.bf16.mxu0 %v25871_v25 }
 0x21b   :  { %19159 = vmatpush3.bf16.msra.mxu1 %v19158_v56  ;;  %20023 = vmatpush3.bf16.msra.mxu0 %v20022_v46  ;;  %v23132_v56 = vsub.f32 %v9822_v21, %v9872_v23  ;;  %v23176_v21 = vsub.f32 %v9824_v22, %v9878_v15  ;;  %v25801_v15 = vand.u32 4294901760, %v23141_v7 }
 0x21c   :  { %19160 = vmatprep.subr.bf16.mxu1 %v25871_v25  ;;  %20024 = vmatprep.subr.bf16.mxu0 %v25871_v25 }
 0x21f   :  { %19162 = vmatpush3.bf16.msra.mxu1 %v19161_v18  ;;  %20026 = vmatpush3.bf16.msra.mxu0 %v20025_v62  ;;  %v23146_v18 = vsub.f32 %v9860_v11, %v23115_v52  ;;  %v2593_v62 = vand.u32 4294901760, %v2537_v35 }
 0x220   :  { %19163 = vmatprep.subr.bf16.mxu1 %v25871_v25  ;;  %20027 = vmatprep.subr.bf16.mxu0 %v25871_v25 }
 0x222   :  { %16586 = vmatmul.mubr.f32.vlgmr.msra.gmra.mrb[0].mxu1 %v22771_v31  ;;  %17954 = vmatmul.mubr.f32.vlgmr.msra.gmra.mrb[0].mxu0 %v22769_v38 }
 0x223   :  { %19165 = vmatpush3.bf16.msra.mxu1 %v22759_v37  ;;  %20029 = vmatpush3.bf16.msra.mxu0 %v22763_v58  ;;  %v9820_v37 = vld [vmem:[#allocation5 + $0x408] sm:$0xff]  ;;  %v2534_v58 = vld [vmem:[#allocation5 + $0x118] sm:$0xff] }
 0x224   :  { %19166 = vmatprep.subr.bf16.mxu1 %v25871_v25  ;;  %20030 = vmatprep.subr.bf16.mxu0 %v25871_v25  ;;  %v9866_v9 = vand.u32 4294901760, %v9820_v37  ;;  %v2584_v1 = vand.u32 4294901760, %v2534_v58 }
 0x225   :  { %16604 = vmatprep.mubr.msk.f32.mxu1 %vm21239_vm0, %v25875_v44  ;;  %17972 = vmatprep.mubr.msk.f32.mxu0 %vm21239_vm0, %v25875_v44 }
 0x226   :  { %v23109_v57 = vpack.c.bf16 %v9866_v9, %v9863_v61  ;;  %v23125_v53 = vsub.f32 %v2534_v58, %v2584_v1  ;;  %v23165_v58 = vsub.f32 %v9823_v63, %v9875_v12  ;;  %v25795_v61 = vand.u32 4294901760, %v23132_v56 }
 0x227   :  { %19168 = vmatpush3.bf16.msra.mxu1 %v22765_v34  ;;  %20032 = vmatpush3.bf16.msra.mxu0 %v22775_v27  ;;  %v2581_v34 = vand.u32 4294901760, %v2533_v19  ;;  %v2535_v27 = vld [vmem:[#allocation5 + $0x120] sm:$0xff] }
 0x228   :  { %19169 = vmatprep.subr.bf16.mxu1 %v25871_v25  ;;  %20033 = vmatprep.subr.bf16.mxu0 %v25871_v25  ;;  %v2587_v20 = vand.u32 4294901760, %v2535_v27  ;;  %v25797_v41 = vand.u32 4294901760, %v23125_v53  ;;  %v9970_v12 = vsub.f32 %v23132_v56, %v25795_v61 }
 0x229   :  { %v23111_v51 = vpack.c.bf16 %v2584_v1, %v2581_v34  ;;  %v23119_v32 = vsub.f32 %v2533_v19, %v2581_v34  ;;  %v23183_v34 = vsub.f32 %v2537_v35, %v2593_v62  ;;  %v25804_v1 = vand.u32 4294901760, %v23149_v33 }
 0x22a   :  { %v23134_v50 = vpack.c.bf16 %v2590_v54, %v2587_v20  ;;  %v23139_v46 = vsub.f32 %v2535_v27, %v2587_v20  ;;  %v25799_v27 = vand.u32 4294901760, %v23146_v18  ;;  %v2682_v11 = vsub.f32 %v23125_v53, %v25797_v41 }
 0x22b   :  { %19171 = vmatpush3.bf16.msra.mxu1 %v22788_v0  ;;  %20035 = vmatpush3.bf16.msra.mxu0 %v22797_v60  ;;  %v23105_v0 = vpack.c.bf16 %v2578_v8, %v2575_v43  ;;  %v23107_v60 = vsub.f32 %v9820_v37, %v9866_v9  ;;  %v9949_v37 = vsub.f32 %v23103_v2, %v9948_v26  ;;  %v25798_v19 = vand.u32 4294901760, %v23119_v32 }
 0x22c   :  { %19172 = vmatprep.subr.bf16.mxu1 %v25871_v25  ;;  %20036 = vmatprep.subr.bf16.mxu0 %v25871_v25  ;;  %v9881_v43 = vand.u32 4294901760, %v9825_v40  ;;  %v25802_v20 = vand.u32 4294901760, %v23139_v46  ;;  %v25800_v35 = vand.u32 4294901760, %v23165_v58  ;;  %v9971_v5 = vand.u32 4294901760, %v9970_v12 }
 0x22d   :  { %v9955_v48 = vand.u32 4294901760, %v23107_v60  ;;  %v9950_v23 = vand.u32 4294901760, %v9949_v37  ;;  %v2675_v63 = vsub.f32 %v23119_v32, %v25798_v19  ;;  %v9938_v37 = vsub.f32 %v23146_v18, %v25799_v27 }
 0x22e   :  { %v2696_v41 = vsub.f32 %v23141_v7, %v25801_v15  ;;  %v9977_v19 = vsub.f32 %v23165_v58, %v25800_v35  ;;  %v2702_v27 = vand.u32 4294901760, %v23183_v34 }
 0x22f   :  { %19174 = vmatpush3.bf16.msra.mxu1 %v22835_v30  ;;  %20038 = vmatpush3.bf16.msra.mxu0 %v22862_v16  ;;  %v2660_v30 = vand.u32 4294901760, %v23095_v10  ;;  %v2667_v16 = vand.u32 4294901760, %v23101_v45  ;;  %v9956_v4 = vsub.f32 %v23107_v60, %v9955_v48  ;;  %v2676_v61 = vand.u32 4294901760, %v2675_v63 }
 0x230   :  { %19175 = vmatprep.subr.bf16.mxu1 %v25871_v25  ;;  %20039 = vmatprep.subr.bf16.mxu0 %v25871_v25  ;;  %v2697_v15 = vand.u32 4294901760, %v2696_v41 }
 0x231   :  { %v2661_v24 = vsub.f32 %v23095_v10, %v2660_v30  ;;  %v2668_v39 = vsub.f32 %v23101_v45, %v2667_v16  ;;  %v9957_v22 = vand.u32 4294901760, %v9956_v4 }
 0x232   :  { %16605 = vmatmul.mubr.f32.vlgmr.msra.gmra.mrb[0].mxu1 %v22771_v31  ;;  %17973 = vmatmul.mubr.f32.vlgmr.msra.gmra.mrb[0].mxu0 %v22769_v38  ;;  %v2596_v31 = vand.u32 4294901760, %v2538_v3  ;;  %v9826_v38 = vld [vmem:[#allocation5 + $0x438] sm:$0xff] }
 0x233   :  { %19177 = vmatpush3.bf16.msra.mxu1 %v23105_v0  ;;  %20041 = vmatpush3.bf16.msra.mxu0 %v23109_v57  ;;  %v9884_v8 = vand.u32 4294901760, %v9826_v38  ;;  %v2662_v17 = vand.u32 4294901760, %v2661_v24  ;;  %v2669_v42 = vand.u32 4294901760, %v2668_v39  ;;  %v23210_v24 = vsub.f32 %v9825_v40, %v9881_v43 }
 0x234   :  { %19178 = vmatprep.subr.bf16.mxu1 %v25871_v25  ;;  %20042 = vmatprep.subr.bf16.mxu0 %v25871_v25  ;;  %v23181_v9 = vpack.c.bf16 %v2596_v31, %v2593_v62  ;;  %v23199_v54 = vsub.f32 %v2538_v3, %v2596_v31  ;;  %v25803_v3 = vand.u32 4294901760, %v23176_v21  ;;  %v2650_v31 = vsub.f32 %v23149_v33, %v25804_v1 }
 0x235   :  { %16623 = vmatprep.mubr.msk.f32.mxu1 %vm21239_vm0, %v25875_v44  ;;  %17991 = vmatprep.mubr.msk.f32.mxu0 %vm21239_vm0, %v25875_v44  ;;  %v23208_v62 = vpack.c.bf16 %v9884_v8, %v9881_v43  ;;  %v23212_v39 = vsub.f32 %v9826_v38, %v9884_v8  ;;  %v19188_v4 = vpack.c.bf16 %v2669_v42, %v2662_v17  ;;  %v2683_v43 = vand.u32 4294901760, %v2682_v11 }
 0x236   :  { %v20052_v40 = vpack.c.bf16 %v9957_v22, %v9950_v23  ;;  %v9964_v38 = vand.u32 4294901760, %v9963_v14  ;;  %v2689_v8 = vsub.f32 %v23139_v46, %v25802_v20  ;;  %v9984_v17 = vsub.f32 %v23176_v21, %v25803_v3 }
 0x237   :  { %19180 = vmatpush3.bf16.msra.mxu1 %v23111_v51  ;;  %20044 = vmatpush3.bf16.msra.mxu0 %v23121_v6  ;;  %v2709_v42 = vand.u32 4294901760, %v23199_v54  ;;  %v9990_v23 = vand.u32 4294901760, %v23210_v24  ;;  %v9997_v63 = vand.u32 4294901760, %v23212_v39  ;;  %v2651_v22 = vand.u32 4294901760, %v2650_v31 }
 0x238   :  { %19181 = vmatprep.subr.bf16.mxu1 %v25871_v25  ;;  %20045 = vmatprep.subr.bf16.mxu0 %v25871_v25  ;;  %v9939_v11 = vand.u32 4294901760, %v9938_v37  ;;  %v19191_v14 = vpack.c.bf16 %v2683_v43, %v2676_v61  ;;  %v2690_v12 = vand.u32 4294901760, %v2689_v8  ;;  %v20055_v35 = vpack.c.bf16 %v9971_v5, %v9964_v38 }
 0x239   :  { %v9978_v20 = vand.u32 4294901760, %v9977_v19  ;;  %v2703_v3 = vsub.f32 %v23183_v34, %v2702_v27  ;;  %v9985_v1 = vand.u32 4294901760, %v9984_v17  ;;  %v2710_v31 = vsub.f32 %v23199_v54, %v2709_v42 }
 0x23a   :  { %v9991_v61 = vsub.f32 %v23210_v24, %v9990_v23  ;;  %v9998_v41 = vsub.f32 %v23212_v39, %v9997_v63  ;;  %v19194_v19 = vpack.c.bf16 %v2697_v15, %v2690_v12  ;;  %v26015_v15 = vld [vmem:[#allocation11_spill] sm:$0xff]  ;;  %v19203_v12 = vpack.c.bf16 %v23125_v53, %v23119_v32 }
 0x23b   :  { %19183 = vmatpush3.bf16.msra.mxu1 %v23134_v50  ;;  %20047 = vmatpush3.bf16.msra.mxu0 %v23143_v28  ;;  %v2704_v5 = vand.u32 4294901760, %v2703_v3  ;;  %v20058_v37 = vpack.c.bf16 %v9985_v1, %v9978_v20  ;;  %vm4336_vm11 = vcmp.eq.s32.totalorder %v26015_v15, %v22919_v47  ;;  %vm11616_vm12 = vcmp.eq.s32.totalorder %v26015_v15, %v22921_v59 }
 0x23c   :  { %19184 = vmatprep.subr.bf16.mxu1 %v25871_v25  ;;  %20048 = vmatprep.subr.bf16.mxu0 %v25871_v25  ;;  %v9999_v43 = vand.u32 4294901760, %v9998_v41  ;;  %v14719_v1 = vsel %vm4336_vm11, 1.0, %v25875_v44  ;;  %v14815_v20 = vsel %vm11616_vm12, 1.0, %v25875_v44  ;;  %v20064_v3 = vpack.c.bf16 %v23107_v60, %v23103_v2  ;;  %v26017_v41 = vld [vmem:[#allocation13_spill] sm:$0xff] }
 0x23d   :  { %v21055_v17 = vpack.i.bf16 %v14815_v20, %v14719_v1  ;;  %vm4338_vm15 = vcmp.eq.s32.totalorder %v26017_v41, %v22919_v47  ;;  %vm11618_vm1 = vcmp.eq.s32.totalorder %v26017_v41, %v22921_v59  ;;  %v19209_v15 = vpack.c.bf16 %v23199_v54, %v23183_v34  ;;  %v10425_v34 = vld [vmem:[#allocation5 + $0x440] sm:$0xff] }
 0x23e   :  { %v20073_v1 = vpack.c.bf16 %v23212_v39, %v23210_v24  ;;  %v26025_v2 = vand.u32 4294901760, %v23119_v32  ;;  %v26026_v60 = vand.u32 4294901760, %v23125_v53  ;;  %v26029_v32 = vand.u32 4294901760, %v23139_v46  ;;  %v10427_v39 = vld [vmem:[#allocation5 + $0x450] sm:$0xff] }
 0x23f   :  { %19186 = vmatpush3.bf16.msra.mxu1 %v23181_v9  ;;  %20050 = vmatpush3.bf16.msra.mxu0 %v23208_v62  ;;  %v26030_v53 = vand.u32 4294901760, %v23141_v7  ;;  %v21033_v54 = vunpack.i.h.bf16 %v23063_v13  ;;  %v21030_v24 = vunpack.i.l.bf16 %v23063_v13  ;;  %v10430_v13 = vld [vmem:[#allocation5 + $0x468] sm:$0xff] }
 0x240   :  { %19187 = vmatprep.subr.bf16.mxu1 %v25871_v25  ;;  %20051 = vmatprep.subr.bf16.mxu0 %v25871_v25 }
 0x241   :  { %21056 = vxpose.xlu1.b32.start [1/8] (short) (narrow) %v21055_v17, 8 }
 0x242   :  { %16624 = vmatmul.mubr.f32.vlgmr.msra.gmra.mrb[0].mxu1 %v2651_v22  ;;  %17992 = vmatmul.mubr.f32.vlgmr.msra.gmra.mrb[0].mxu0 %v9939_v11  ;;  %v26016_v22 = vld [vmem:[#allocation12_spill] sm:$0xff] }
 0x243   :  { %19189 = vmatpush3.bf16.msra.mxu1 %v19188_v4  ;;  %20053 = vmatpush3.bf16.msra.mxu0 %v20052_v40  ;;  %v2711_v4 = vand.u32 4294901760, %v2710_v31  ;;  %v9992_v40 = vand.u32 4294901760, %v9991_v61  ;;  %vm4337_vm13 = vcmp.eq.s32.totalorder %v26016_v22, %v22919_v47  ;;  %vm11617_vm14 = vcmp.eq.s32.totalorder %v26016_v22, %v22921_v59  ;;  %v26020_v22 = vld [vmem:[#allocation16_spill] sm:$0xff] }
 0x244   :  { %19190 = vmatprep.subr.bf16.mxu1 %v25871_v25  ;;  %20054 = vmatprep.subr.bf16.mxu0 %v25871_v25  ;;  %v14720_v11 = vsel %vm4337_vm13, 1.0, %v25875_v44  ;;  %v20067_v31 = vpack.c.bf16 %v23132_v56, %v23130_v36  ;;  %vm4341_vm7 = vcmp.eq.s32.totalorder %v26020_v22, %v22919_v47  ;;  %vm11621_vm8 = vcmp.eq.s32.totalorder %v26020_v22, %v22921_v59 }
 0x245   :  { %16642 = vmatprep.mubr.msk.f32.mxu1 %vm21239_vm0, %v25875_v44  ;;  %18010 = vmatprep.mubr.msk.f32.mxu0 %vm21239_vm0, %v25875_v44  ;;  %v19197_v38 = vpack.c.bf16 %v2711_v4, %v2704_v5  ;;  %v20061_v8 = vpack.c.bf16 %v9999_v43, %v9992_v40  ;;  %v14817_v5 = vsel %vm11618_vm1, 1.0, %v25875_v44  ;;  %v20070_v4 = vpack.c.bf16 %v23176_v21, %v23165_v58  ;;  %v26018_v43 = vld [vmem:[#allocation14_spill] sm:$0xff] }
 0x246   :  { %vm4339_vm3 = vcmp.eq.s32.totalorder %v26018_v43, %v22919_v47  ;;  %vm11619_vm4 = vcmp.eq.s32.totalorder %v26018_v43, %v22921_v59  ;;  %v10475_v22 = vand.u32 4294901760, %v10427_v39 }
 0x247   :  { %19192 = vmatpush3.bf16.msra.mxu1 %v19191_v14  ;;  %20056 = vmatpush3.bf16.msra.mxu0 %v20055_v35  ;;  %v19200_v35 = vpack.c.bf16 %v23101_v45, %v23095_v10  ;;  %v14816_v14 = vsel %vm11617_vm14, 1.0, %v25875_v44  ;;  %v26024_v10 = vand.u32 4294901760, %v23146_v18 }
 0x248   :  { %19193 = vmatprep.subr.bf16.mxu1 %v25871_v25  ;;  %20057 = vmatprep.subr.bf16.mxu0 %v25871_v25  ;;  %v21057_v61 = vpack.i.bf16 %v14816_v14, %v14720_v11  ;;  %v14724_v14 = vsel %vm4341_vm7, 1.0, %v25875_v44 }
 0x24a   :  { %21058 = vxpose.xlu1.b32.cont [2/8] (short) (narrow) %v21057_v61, 8 }
 0x24b   :  { %19195 = vmatpush3.bf16.msra.mxu1 %v19194_v19  ;;  %20059 = vmatpush3.bf16.msra.mxu0 %v20058_v37  ;;  %v14721_v19 = vsel %vm4338_vm15, 1.0, %v25875_v44  ;;  %v19206_v37 = vpack.c.bf16 %v23141_v7, %v23139_v46  ;;  %v19233_v46 = vpack.c.bf16 %v2709_v42, %v2702_v27  ;;  %v20097_v7 = vpack.c.bf16 %v9997_v63, %v9990_v23  ;;  %v3147_v27 = vld [vmem:[#allocation5 + $0x150] sm:$0xff]  ;;  %v10428_v42 = vld [vmem:[#allocation5 + $0x458] sm:$0xff] }
 0x24c   :  { %19196 = vmatprep.subr.bf16.mxu1 %v25871_v25  ;;  %20060 = vmatprep.subr.bf16.mxu0 %v25871_v25  ;;  %v21059_v40 = vpack.i.bf16 %v14817_v5, %v14721_v19 }
 0x24e   :  { %21060 = vxpose.xlu1.b32.cont [3/8] (short) (narrow) %v21059_v40, 8  ;;  %v20088_v40 = vpack.c.bf16 %v9955_v48, %v9948_v26  ;;  %v26028_v26 = vand.u32 4294901760, %v23132_v56  ;;  %v26031_v56 = vand.u32 4294901760, %v23165_v58  ;;  %v3145_v58 = vld [vmem:[#allocation5 + $0x140] sm:$0xff] }
 0x24f   :  { %19198 = vmatpush3.bf16.msra.mxu1 %v19197_v38  ;;  %20062 = vmatpush3.bf16.msra.mxu0 %v20061_v8  ;;  %v14722_v38 = vsel %vm4339_vm3, 1.0, %v25875_v44  ;;  %v14818_v8 = vsel %vm11619_vm4, 1.0, %v25875_v44  ;;  %v3189_v23 = vand.u32 4294901760, %v3145_v58 }
 0x250   :  { %19199 = vmatprep.subr.bf16.mxu1 %v25871_v25  ;;  %20063 = vmatprep.subr.bf16.mxu0 %v25871_v25  ;;  %v21061_v20 = vpack.i.bf16 %v14818_v8, %v14722_v38  ;;  %v26023_v8 = vand.u32 4294901760, %v23149_v33 }
 0x252   :  { %16643 = vmatmul.mubr.f32.vlgmr.msra.gmra.mrb[0].mxu1 %v23117_v55  ;;  %18011 = vmatmul.mubr.f32.vlgmr.msra.gmra.mrb[0].mxu0 %v23115_v52 }
 0x253   :  { %19201 = vmatpush3.bf16.msra.mxu1 %v19200_v35  ;;  %20065 = vmatpush3.bf16.msra.mxu0 %v20064_v3  ;;  %v26019_v35 = vld [vmem:[#allocation15_spill] sm:$0xff] }
 0x254   :  { %19202 = vmatprep.subr.bf16.mxu1 %v25871_v25  ;;  %20066 = vmatprep.subr.bf16.mxu0 %v25871_v25  ;;  %vm4340_vm5 = vcmp.eq.s32.totalorder %v26019_v35, %v22919_v47  ;;  %vm11620_vm6 = vcmp.eq.s32.totalorder %v26019_v35, %v22921_v59 }
 0x255   :  { %16661 = vmatprep.mubr.msk.f32.mxu1 %vm21239_vm0, %v25875_v44  ;;  %18029 = vmatprep.mubr.msk.f32.mxu0 %vm21239_vm0, %v25875_v44  ;;  %v14723_v3 = vsel %vm4340_vm5, 1.0, %v25875_v44  ;;  %v14819_v17 = vsel %vm11620_vm6, 1.0, %v25875_v44 }
 0x256   :  { %21062 = vxpose.xlu1.b32.cont [4/8] (short) (narrow) %v21061_v20, 8  ;;  %v21063_v11 = vpack.i.bf16 %v14819_v17, %v14723_v3  ;;  %v3150_v3 = vld [vmem:[#allocation5 + $0x168] sm:$0xff]  ;;  %v23435_v17 = vsub.f32 %v3145_v58, %v3189_v23  ;;  %v10431_v58 = vld [vmem:[#allocation5 + $0x470] sm:$0xff] }
 0x257   :  { %19204 = vmatpush3.bf16.msra.mxu1 %v19203_v12  ;;  %20068 = vmatpush3.bf16.msra.mxu0 %v20067_v31  ;;  %v14820_v12 = vsel %vm11621_vm8, 1.0, %v25875_v44  ;;  %v26021_v31 = vld [vmem:[#allocation17_spill] sm:$0xff] }
 0x258   :  { %19205 = vmatprep.subr.bf16.mxu1 %v25871_v25  ;;  %20069 = vmatprep.subr.bf16.mxu0 %v25871_v25  ;;  %vm4342_vm9 = vcmp.eq.s32.totalorder %v26021_v31, %v22919_v47  ;;  %vm11622_vm10 = vcmp.eq.s32.totalorder %v26021_v31, %v22921_v59  ;;  %v21065_v61 = vpack.i.bf16 %v14820_v12, %v14724_v14  ;;  %v10429_v14 = vld [vmem:[#allocation5 + $0x460] sm:$0xff]  ;;  %v10466_v12 = vsel %vm157_vm2, %v21033_v54, 0 }
 0x259   :  { %v14725_v41 = vsel %vm4342_vm9, 1.0, %v25875_v44  ;;  %v14821_v19 = vsel %vm11622_vm10, 1.0, %v25875_v44  ;;  %v3186_v31 = vsel %vm157_vm2, %v21030_v24, 0 }
 0x25a   :  { %21064 = vxpose.xlu1.b32.cont [5/8] (short) (narrow) %v21063_v11, 8  ;;  %v21067_v5 = vpack.i.bf16 %v14821_v19, %v14725_v41  ;;  %v10478_v11 = vand.u32 4294901760, %v10428_v42 }
 0x25b   :  { %19207 = vmatpush3.bf16.msra.mxu1 %v19206_v37  ;;  %20071 = vmatpush3.bf16.msra.mxu0 %v20070_v4  ;;  %v26022_v37 = vld [vmem:[#allocation18_spill] sm:$0xff]  ;;  %v19224_v4 = vpack.c.bf16 %v2667_v16, %v2660_v30  ;;  %v19227_v30 = vpack.c.bf16 %v26026_v60, %v26025_v2  ;;  %v26027_v16 = vand.u32 4294901760, %v23130_v36  ;;  %v19230_v36 = vpack.c.bf16 %v26030_v53, %v26029_v32  ;;  %v3151_v60 = vld [vmem:[#allocation5 + $0x170] sm:$0xff] }
 0x25c   :  { %19208 = vmatprep.subr.bf16.mxu1 %v25871_v25  ;;  %20072 = vmatprep.subr.bf16.mxu0 %v25871_v25  ;;  %vm4343_vm11 = vcmp.eq.s32.totalorder %v26022_v37, %v22919_v47  ;;  %vm11623_vm12 = vcmp.eq.s32.totalorder %v26022_v37, %v22921_v59 }
 0x25d   :  { %v14726_v43 = vsel %vm4343_vm11, 1.0, %v25875_v44  ;;  %v14822_v38 = vsel %vm11623_vm12, 1.0, %v25875_v44  ;;  %v20091_v48 = vpack.c.bf16 %v26028_v26, %v26027_v16  ;;  %v23470_v26 = vsub.f32 %v10427_v39, %v10475_v22 }
 0x25e   :  { %21066 = vxpose.xlu1.b32.cont [6/8] (short) (narrow) %v21065_v61, 8  ;;  %v21069_v45 = vpack.i.bf16 %v14822_v38, %v14726_v43  ;;  %v10484_v43 = vand.u32 4294901760, %v10430_v13  ;;  %v23455_v38 = vand.u32 4294901760, %v10466_v12 }
 0x25f   :  { %19210 = vmatpush3.bf16.msra.mxu1 %v19209_v15  ;;  %20074 = vmatpush3.bf16.msra.mxu0 %v20073_v1  ;;  %v10469_v1 = vand.u32 4294901760, %v10425_v34  ;;  %v25806_v39 = vand.u32 4294901760, %v23470_v26 }
 0x260   :  { %19211 = vmatprep.subr.bf16.mxu1 %v25871_v25  ;;  %20075 = vmatprep.subr.bf16.mxu0 %v25871_v25 }
 0x261   :  { %v23443_v41 = vsub.f32 %v10425_v34, %v10469_v1 }
 0x262   :  { %16662 = vmatmul.mubr.f32.vlgmr.msra.gmra.mrb[0].mxu1 %v23149_v33  ;;  %18030 = vmatmul.mubr.f32.vlgmr.msra.gmra.mrb[0].mxu0 %v23146_v18  ;;  %v26032_v18 = vand.u32 4294901760, %v23176_v21  ;;  %v3146_v21 = vld [vmem:[#allocation5 + $0x148] sm:$0xff] }
 0x263   :  { %19213 = vmatpush3.bf16.msra.mxu1 %v23105_v0  ;;  %20077 = vmatpush3.bf16.msra.mxu0 %v23109_v57  ;;  %v3192_v63 = vand.u32 4294901760, %v3146_v21  ;;  %v10554_v16 = vand.u32 4294901760, %v23443_v41 }
 0x264   :  { %19214 = vmatprep.subr.bf16.mxu1 %v25871_v25  ;;  %20078 = vmatprep.subr.bf16.mxu0 %v25871_v25  ;;  %v20094_v33 = vpack.c.bf16 %v26032_v18, %v26031_v56 }
 0x265   :  { %16680 = vmatprep.mubr.msk.f32.mxu1 %vm21239_vm0, %v25875_v44  ;;  %18048 = vmatprep.mubr.msk.f32.mxu0 %vm21239_vm0, %v25875_v44  ;;  %v23441_v61 = vsub.f32 %v3146_v21, %v3192_v63 }
 0x266   :  { %21068 = vxpose.xlu1.b32.cont [7/8] (short) (narrow) %v21067_v5, 8  ;;  %v3204_v5 = vand.u32 4294901760, %v3150_v3 }
 0x267   :  { %19216 = vmatpush3.bf16.msra.mxu1 %v23111_v51  ;;  %20080 = vmatpush3.bf16.msra.mxu0 %v23121_v6 }
 0x268   :  { %19217 = vmatprep.subr.bf16.mxu1 %v25871_v25  ;;  %20081 = vmatprep.subr.bf16.mxu0 %v25871_v25  ;;  %v23481_v56 = vsub.f32 %v3150_v3, %v3204_v5 }
 0x26a   :  { %21070 = vxpose.xlu1.b32.end [8/8] (short) (narrow) %v21069_v45, 8  ;;  %v23461_v45 = vpack.c.bf16 %v10478_v11, %v10475_v22 }
 0x26b   :  { %19219 = vmatpush3.bf16.msra.mxu1 %v23134_v50  ;;  %20083 = vmatpush3.bf16.msra.mxu0 %v23143_v28 }
 0x26c   :  { %19220 = vmatprep.subr.bf16.mxu1 %v25871_v25  ;;  %20084 = vmatprep.subr.bf16.mxu0 %v25871_v25 }
 0x26e   :  { %v23403_v15 = vpop.trf.xlu0 }
 0x26f   :  { %19222 = vmatpush3.bf16.msra.mxu1 %v23181_v9  ;;  %20086 = vmatpush3.bf16.msra.mxu0 %v23208_v62 }
 0x270   :  { %19223 = vmatprep.subr.bf16.mxu1 %v25871_v25  ;;  %20087 = vmatprep.subr.bf16.mxu0 %v25871_v25 }
 0x272   :  { %16681 = vmatmul.mubr.f32.vlgmr.msra.gmra.mrb[0].mxu1 %v26023_v8  ;;  %18049 = vmatmul.mubr.f32.vlgmr.msra.gmra.mrb[0].mxu0 %v26024_v10  ;;  %v23457_v8 = vand.u32 4294901760, %v3186_v31 }
 0x273   :  { %19225 = vmatpush3.bf16.msra.mxu1 %v19224_v4  ;;  %20089 = vmatpush3.bf16.msra.mxu0 %v20088_v40  ;;  %v10481_v40 = vand.u32 4294901760, %v10429_v14 }
 0x274   :  { %19226 = vmatprep.subr.bf16.mxu1 %v25871_v25  ;;  %20090 = vmatprep.subr.bf16.mxu0 %v25871_v25 }
 0x275   :  { %16699 = vmatprep.mubr.msk.f32.mxu1 %vm21239_vm0, %v25875_v44  ;;  %18067 = vmatprep.mubr.msk.f32.mxu0 %vm21239_vm0, %v25875_v44  ;;  %v23483_v18 = vpack.c.bf16 %v10484_v43, %v10481_v40 }
 0x277   :  { %19228 = vmatpush3.bf16.msra.mxu1 %v19227_v30  ;;  %20092 = vmatpush3.bf16.msra.mxu0 %v20091_v48  ;;  %v3152_v30 = vld [vmem:[#allocation5 + $0x178] sm:$0xff]  ;;  %v23472_v48 = vsub.f32 %v10428_v42, %v10478_v11  ;;  %v23516_v42 = vsub.f32 %v10430_v13, %v10484_v43  ;;  %v25811_v43 = vand.u32 4294901760, %v23481_v56 }
 0x278   :  { %19229 = vmatprep.subr.bf16.mxu1 %v25871_v25  ;;  %20093 = vmatprep.subr.bf16.mxu0 %v25871_v25 }
 0x27b   :  { %19231 = vmatpush3.bf16.msra.mxu1 %v19230_v36  ;;  %20095 = vmatpush3.bf16.msra.mxu0 %v20094_v33  ;;  %v23486_v33 = vsub.f32 %v10466_v12, %v23455_v38 }
 0x27c   :  { %19232 = vmatprep.subr.bf16.mxu1 %v25871_v25  ;;  %20096 = vmatprep.subr.bf16.mxu0 %v25871_v25 }
 0x27f   :  { %19234 = vmatpush3.bf16.msra.mxu1 %v19233_v46  ;;  %20098 = vmatpush3.bf16.msra.mxu0 %v20097_v7  ;;  %v23489_v46 = vsub.f32 %v3186_v31, %v23457_v8  ;;  %v3207_v7 = vand.u32 4294901760, %v3151_v60  ;;  %v10569_v31 = vsub.f32 %v23470_v26, %v25806_v39 }
 0x280   :  { %19235 = vmatprep.subr.bf16.mxu1 %v25871_v25  ;;  %20099 = vmatprep.subr.bf16.mxu0 %v25871_v25 }
 0x282   :  { %16700 = vmatmul.mubr.f32.vlgmr.msra.gmra.mrb[0].mxu1 %v23117_v55  ;;  %18068 = vmatmul.mubr.f32.vlgmr.msra.gmra.mrb[0].mxu0 %v23115_v52 }
 0x283   :  { %19237 = vmatpush3.bf16.msra.mxu1 %v23105_v0  ;;  %20101 = vmatpush3.bf16.msra.mxu0 %v23109_v57  ;;  %v10426_v0 = vld [vmem:[#allocation5 + $0x448] sm:$0xff]  ;;  %v3148_v57 = vld [vmem:[#allocation5 + $0x158] sm:$0xff] }
 0x284   :  { %19238 = vmatprep.subr.bf16.mxu1 %v25871_v25  ;;  %20102 = vmatprep.subr.bf16.mxu0 %v25871_v25  ;;  %v10472_v20 = vand.u32 4294901760, %v10426_v0  ;;  %v3198_v35 = vand.u32 4294901760, %v3148_v57 }
 0x285   :  { %16718 = vmatprep.mubr.msk.f32.mxu1 %vm21239_vm0, %v25875_v44  ;;  %18086 = vmatprep.mubr.msk.f32.mxu0 %vm21239_vm0, %v25875_v44 }
 0x286   :  { %v23449_v37 = vpack.c.bf16 %v10472_v20, %v10469_v1  ;;  %v23465_v2 = vsub.f32 %v3148_v57, %v3198_v35  ;;  %v23505_v57 = vsub.f32 %v10429_v14, %v10481_v40  ;;  %v25805_v1 = vand.u32 4294901760, %v23472_v48 }
 0x287   :  { %19240 = vmatpush3.bf16.msra.mxu1 %v23111_v51  ;;  %20104 = vmatpush3.bf16.msra.mxu0 %v23121_v6  ;;  %v3195_v51 = vand.u32 4294901760, %v3147_v27  ;;  %v3149_v6 = vld [vmem:[#allocation5 + $0x160] sm:$0xff] }
 0x288   :  { %19241 = vmatprep.subr.bf16.mxu1 %v25871_v25  ;;  %20105 = vmatprep.subr.bf16.mxu0 %v25871_v25  ;;  %v3201_v19 = vand.u32 4294901760, %v3149_v6  ;;  %v25807_v24 = vand.u32 4294901760, %v23465_v2  ;;  %v10576_v40 = vsub.f32 %v23472_v48, %v25805_v1 }
 0x289   :  { %v23451_v4 = vpack.c.bf16 %v3198_v35, %v3195_v51  ;;  %v23459_v10 = vsub.f32 %v3147_v27, %v3195_v51  ;;  %v23523_v51 = vsub.f32 %v3151_v60, %v3207_v7  ;;  %v25814_v35 = vand.u32 4294901760, %v23489_v46 }
 0x28a   :  { %v23474_v32 = vpack.c.bf16 %v3204_v5, %v3201_v19  ;;  %v23479_v36 = vsub.f32 %v3149_v6, %v3201_v19  ;;  %v25809_v6 = vand.u32 4294901760, %v23486_v33  ;;  %v3296_v12 = vsub.f32 %v23465_v2, %v25807_v24 }
 0x28b   :  { %19243 = vmatpush3.bf16.msra.mxu1 %v23134_v50  ;;  %20107 = vmatpush3.bf16.msra.mxu0 %v23143_v28  ;;  %v23445_v50 = vpack.c.bf16 %v3192_v63, %v3189_v23  ;;  %v23447_v28 = vsub.f32 %v10426_v0, %v10472_v20  ;;  %v10555_v0 = vsub.f32 %v23443_v41, %v10554_v16  ;;  %v25808_v27 = vand.u32 4294901760, %v23459_v10 }
 0x28c   :  { %19244 = vmatprep.subr.bf16.mxu1 %v25871_v25  ;;  %20108 = vmatprep.subr.bf16.mxu0 %v25871_v25  ;;  %v10487_v23 = vand.u32 4294901760, %v10431_v58  ;;  %v25812_v19 = vand.u32 4294901760, %v23479_v36  ;;  %v25810_v60 = vand.u32 4294901760, %v23505_v57  ;;  %v10577_v39 = vand.u32 4294901760, %v10576_v40 }
 0x28d   :  { %v10561_v53 = vand.u32 4294901760, %v23447_v28  ;;  %v10556_v11 = vand.u32 4294901760, %v10555_v0  ;;  %v3289_v14 = vsub.f32 %v23459_v10, %v25808_v27  ;;  %v10544_v0 = vsub.f32 %v23486_v33, %v25809_v6 }
 0x28e   :  { %v3310_v24 = vsub.f32 %v23481_v56, %v25811_v43  ;;  %v10583_v27 = vsub.f32 %v23505_v57, %v25810_v60  ;;  %v3316_v6 = vand.u32 4294901760, %v23523_v51 }
 0x28f   :  { %19246 = vmatpush3.bf16.msra.mxu1 %v23181_v9  ;;  %20110 = vmatpush3.bf16.msra.mxu0 %v23208_v62  ;;  %v3274_v9 = vand.u32 4294901760, %v23435_v17  ;;  %v3281_v62 = vand.u32 4294901760, %v23441_v61  ;;  %v10562_v54 = vsub.f32 %v23447_v28, %v10561_v53  ;;  %v3290_v1 = vand.u32 4294901760, %v3289_v14 }
 0x290   :  { %19247 = vmatprep.subr.bf16.mxu1 %v25871_v25  ;;  %20111 = vmatprep.subr.bf16.mxu0 %v25871_v25  ;;  %v3311_v43 = vand.u32 4294901760, %v3310_v24 }
 0x291   :  { %v3275_v21 = vsub.f32 %v23435_v17, %v3274_v9  ;;  %v3282_v34 = vsub.f32 %v23441_v61, %v3281_v62  ;;  %v10563_v13 = vand.u32 4294901760, %v10562_v54 }
 0x292   :  { %16719 = vmatmul.mubr.f32.vlgmr.msra.gmra.mrb[0].mxu1 %v23117_v55  ;;  %18087 = vmatmul.mubr.f32.vlgmr.msra.gmra.mrb[0].mxu0 %v23115_v52  ;;  %v3210_v55 = vand.u32 4294901760, %v3152_v30  ;;  %v10432_v52 = vld [vmem:[#allocation5 + $0x478] sm:$0xff] }
 0x293   :  { %19249 = vmatpush3.bf16.msra.mxu1 %v23445_v50  ;;  %20113 = vmatpush3.bf16.msra.mxu0 %v23449_v37  ;;  %v10490_v63 = vand.u32 4294901760, %v10432_v52  ;;  %v3276_v3 = vand.u32 4294901760, %v3275_v21  ;;  %v3283_v22 = vand.u32 4294901760, %v3282_v34  ;;  %v23550_v21 = vsub.f32 %v10431_v58, %v10487_v23 }
 0x294   :  { %19250 = vmatprep.subr.bf16.mxu1 %v25871_v25  ;;  %20114 = vmatprep.subr.bf16.mxu0 %v25871_v25  ;;  %v23521_v20 = vpack.c.bf16 %v3210_v55, %v3207_v7  ;;  %v23539_v5 = vsub.f32 %v3152_v30, %v3210_v55  ;;  %v25813_v30 = vand.u32 4294901760, %v23516_v42  ;;  %v3264_v55 = vsub.f32 %v23489_v46, %v25814_v35 }
 0x295   :  { %16737 = vmatprep.mubr.msk.f32.mxu1 %vm21239_vm0, %v25875_v44  ;;  %18105 = vmatprep.mubr.msk.f32.mxu0 %vm21239_vm0, %v25875_v44  ;;  %v23548_v7 = vpack.c.bf16 %v10490_v63, %v10487_v23  ;;  %v23552_v34 = vsub.f32 %v10432_v52, %v10490_v63  ;;  %v19260_v54 = vpack.c.bf16 %v3283_v22, %v3276_v3  ;;  %v3297_v23 = vand.u32 4294901760, %v3296_v12 }
 0x296   :  { %v20124_v58 = vpack.c.bf16 %v10563_v13, %v10556_v11  ;;  %v10570_v52 = vand.u32 4294901760, %v10569_v31  ;;  %v3303_v63 = vsub.f32 %v23479_v36, %v25812_v19  ;;  %v10590_v3 = vsub.f32 %v23516_v42, %v25813_v30 }
 0x297   :  { %19252 = vmatpush3.bf16.msra.mxu1 %v23451_v4  ;;  %20116 = vmatpush3.bf16.msra.mxu0 %v23461_v45  ;;  %v3323_v22 = vand.u32 4294901760, %v23539_v5  ;;  %v10596_v11 = vand.u32 4294901760, %v23550_v21  ;;  %v10603_v14 = vand.u32 4294901760, %v23552_v34  ;;  %v3265_v13 = vand.u32 4294901760, %v3264_v55 }
 0x298   :  { %19253 = vmatprep.subr.bf16.mxu1 %v25871_v25  ;;  %20117 = vmatprep.subr.bf16.mxu0 %v25871_v25  ;;  %v10545_v12 = vand.u32 4294901760, %v10544_v0  ;;  %v19263_v31 = vpack.c.bf16 %v3297_v23, %v3290_v1  ;;  %v3304_v40 = vand.u32 4294901760, %v3303_v63  ;;  %v20127_v60 = vpack.c.bf16 %v10577_v39, %v10570_v52 }
 0x299   :  { %v10584_v19 = vand.u32 4294901760, %v10583_v27  ;;  %v3317_v30 = vsub.f32 %v23523_v51, %v3316_v6  ;;  %v10591_v35 = vand.u32 4294901760, %v10590_v3  ;;  %v3324_v55 = vsub.f32 %v23539_v5, %v3323_v22 }
 0x29a   :  { %v10597_v1 = vsub.f32 %v23550_v21, %v10596_v11  ;;  %v10604_v24 = vsub.f32 %v23552_v34, %v10603_v14  ;;  %v19266_v27 = vpack.c.bf16 %v3311_v43, %v3304_v40  ;;  %v26033_v43 = vld [vmem:[#allocation19_spill] sm:$0xff]  ;;  %v19275_v40 = vpack.c.bf16 %v23465_v2, %v23459_v10 }
 0x29b   :  { %19255 = vmatpush3.bf16.msra.mxu1 %v23474_v32  ;;  %20119 = vmatpush3.bf16.msra.mxu0 %v23483_v18  ;;  %v3318_v39 = vand.u32 4294901760, %v3317_v30  ;;  %v20130_v0 = vpack.c.bf16 %v10591_v35, %v10584_v19  ;;  %vm4942_vm13 = vcmp.eq.s32.totalorder %v26033_v43, %v22919_v47  ;;  %vm12222_vm14 = vcmp.eq.s32.totalorder %v26033_v43, %v22921_v59 }
 0x29c   :  { %19256 = vmatprep.subr.bf16.mxu1 %v25871_v25  ;;  %20120 = vmatprep.subr.bf16.mxu0 %v25871_v25  ;;  %v10605_v23 = vand.u32 4294901760, %v10604_v24  ;;  %v14727_v35 = vsel %vm4942_vm13, 1.0, %v25875_v44  ;;  %v14823_v19 = vsel %vm12222_vm14, 1.0, %v25875_v44  ;;  %v20136_v30 = vpack.c.bf16 %v23447_v28, %v23443_v41  ;;  %v26035_v24 = vld [vmem:[#allocation21_spill] sm:$0xff] }
 0x29d   :  { %v21076_v3 = vpack.i.bf16 %v14823_v19, %v14727_v35  ;;  %vm4944_vm3 = vcmp.eq.s32.totalorder %v26035_v24, %v22919_v47  ;;  %vm12224_vm4 = vcmp.eq.s32.totalorder %v26035_v24, %v22921_v59  ;;  %v19281_v43 = vpack.c.bf16 %v23539_v5, %v23523_v51  ;;  %v11035_v51 = vld [vmem:[#allocation5 + $0x480] sm:$0xff] }
 0x29e   :  { %v20145_v35 = vpack.c.bf16 %v23552_v34, %v23550_v21  ;;  %v26043_v41 = vand.u32 4294901760, %v23459_v10  ;;  %v26044_v28 = vand.u32 4294901760, %v23465_v2  ;;  %v26047_v10 = vand.u32 4294901760, %v23479_v36  ;;  %v11037_v34 = vld [vmem:[#allocation5 + $0x490] sm:$0xff] }
 0x29f   :  { %19258 = vmatpush3.bf16.msra.mxu1 %v23521_v20  ;;  %20122 = vmatpush3.bf16.msra.mxu0 %v23548_v7  ;;  %v26048_v2 = vand.u32 4294901760, %v23481_v56  ;;  %v21054_v5 = vunpack.i.h.bf16 %v23403_v15  ;;  %v21051_v21 = vunpack.i.l.bf16 %v23403_v15  ;;  %v11040_v15 = vld [vmem:[#allocation5 + $0x4a8] sm:$0xff] }
 0x2a0   :  { %19259 = vmatprep.subr.bf16.mxu1 %v25871_v25  ;;  %20123 = vmatprep.subr.bf16.mxu0 %v25871_v25 }
 0x2a1   :  { %21077 = vxpose.xlu0.b32.start [1/8] (short) (narrow) %v21076_v3, 8 }
 0x2a2   :  { %16738 = vmatmul.mubr.f32.vlgmr.msra.gmra.mrb[0].mxu1 %v3265_v13  ;;  %18106 = vmatmul.mubr.f32.vlgmr.msra.gmra.mrb[0].mxu0 %v10545_v12  ;;  %v26034_v13 = vld [vmem:[#allocation20_spill] sm:$0xff] }
 0x2a3   :  { %19261 = vmatpush3.bf16.msra.mxu1 %v19260_v54  ;;  %20125 = vmatpush3.bf16.msra.mxu0 %v20124_v58  ;;  %v3325_v54 = vand.u32 4294901760, %v3324_v55  ;;  %v10598_v58 = vand.u32 4294901760, %v10597_v1  ;;  %vm4943_vm15 = vcmp.eq.s32.totalorder %v26034_v13, %v22919_v47  ;;  %vm12223_vm1 = vcmp.eq.s32.totalorder %v26034_v13, %v22921_v59  ;;  %v26038_v13 = vld [vmem:[#allocation24_spill] sm:$0xff] }
 0x2a4   :  { %19262 = vmatprep.subr.bf16.mxu1 %v25871_v25  ;;  %20126 = vmatprep.subr.bf16.mxu0 %v25871_v25  ;;  %v14728_v12 = vsel %vm4943_vm15, 1.0, %v25875_v44  ;;  %v20139_v55 = vpack.c.bf16 %v23472_v48, %v23470_v26  ;;  %vm4947_vm9 = vcmp.eq.s32.totalorder %v26038_v13, %v22919_v47  ;;  %vm12227_vm10 = vcmp.eq.s32.totalorder %v26038_v13, %v22921_v59 }
 0x2a5   :  { %16756 = vmatprep.mubr.msk.f32.mxu1 %vm21239_vm0, %v25875_v44  ;;  %18124 = vmatprep.mubr.msk.f32.mxu0 %vm21239_vm0, %v25875_v44  ;;  %v19269_v52 = vpack.c.bf16 %v3325_v54, %v3318_v39  ;;  %v20133_v63 = vpack.c.bf16 %v10605_v23, %v10598_v58  ;;  %v14825_v39 = vsel %vm12224_vm4, 1.0, %v25875_v44  ;;  %v20142_v54 = vpack.c.bf16 %v23516_v42, %v23505_v57  ;;  %v26036_v23 = vld [vmem:[#allocation22_spill] sm:$0xff] }
 0x2a6   :  { %vm4945_vm5 = vcmp.eq.s32.totalorder %v26036_v23, %v22919_v47  ;;  %vm12225_vm6 = vcmp.eq.s32.totalorder %v26036_v23, %v22921_v59  ;;  %v11085_v13 = vand.u32 4294901760, %v11037_v34 }
 0x2a7   :  { %19264 = vmatpush3.bf16.msra.mxu1 %v19263_v31  ;;  %20128 = vmatpush3.bf16.msra.mxu0 %v20127_v60  ;;  %v19272_v60 = vpack.c.bf16 %v23441_v61, %v23435_v17  ;;  %v14824_v31 = vsel %vm12223_vm1, 1.0, %v25875_v44  ;;  %v26042_v17 = vand.u32 4294901760, %v23486_v33 }
 0x2a8   :  { %19265 = vmatprep.subr.bf16.mxu1 %v25871_v25  ;;  %20129 = vmatprep.subr.bf16.mxu0 %v25871_v25  ;;  %v21078_v1 = vpack.i.bf16 %v14824_v31, %v14728_v12  ;;  %v14732_v31 = vsel %vm4947_vm9, 1.0, %v25875_v44 }
 0x2aa   :  { %21079 = vxpose.xlu0.b32.cont [2/8] (short) (narrow) %v21078_v1, 8 }
 0x2ab   :  { %19267 = vmatpush3.bf16.msra.mxu1 %v19266_v27  ;;  %20131 = vmatpush3.bf16.msra.mxu0 %v20130_v0  ;;  %v14729_v27 = vsel %vm4944_vm3, 1.0, %v25875_v44  ;;  %v19278_v0 = vpack.c.bf16 %v23481_v56, %v23479_v36  ;;  %v19305_v36 = vpack.c.bf16 %v3323_v22, %v3316_v6  ;;  %v20169_v56 = vpack.c.bf16 %v10603_v14, %v10596_v11  ;;  %v3757_v6 = vld [vmem:[#allocation5 + $0x190] sm:$0xff]  ;;  %v11038_v22 = vld [vmem:[#allocation5 + $0x498] sm:$0xff] }
 0x2ac   :  { %19268 = vmatprep.subr.bf16.mxu1 %v25871_v25  ;;  %20132 = vmatprep.subr.bf16.mxu0 %v25871_v25  ;;  %v21080_v58 = vpack.i.bf16 %v14825_v39, %v14729_v27 }
 0x2ae   :  { %21081 = vxpose.xlu0.b32.cont [3/8] (short) (narrow) %v21080_v58, 8  ;;  %v20160_v58 = vpack.c.bf16 %v10561_v53, %v10554_v16  ;;  %v26046_v16 = vand.u32 4294901760, %v23472_v48  ;;  %v26049_v48 = vand.u32 4294901760, %v23505_v57  ;;  %v3755_v57 = vld [vmem:[#allocation5 + $0x180] sm:$0xff] }
 0x2af   :  { %19270 = vmatpush3.bf16.msra.mxu1 %v19269_v52  ;;  %20134 = vmatpush3.bf16.msra.mxu0 %v20133_v63  ;;  %v14730_v52 = vsel %vm4945_vm5, 1.0, %v25875_v44  ;;  %v14826_v63 = vsel %vm12225_vm6, 1.0, %v25875_v44  ;;  %v3799_v11 = vand.u32 4294901760, %v3755_v57 }
 0x2b0   :  { %19271 = vmatprep.subr.bf16.mxu1 %v25871_v25  ;;  %20135 = vmatprep.subr.bf16.mxu0 %v25871_v25  ;;  %v21082_v19 = vpack.i.bf16 %v14826_v63, %v14730_v52  ;;  %v26041_v63 = vand.u32 4294901760, %v23489_v46 }
 0x2b2   :  { %16757 = vmatmul.mubr.f32.vlgmr.msra.gmra.mrb[0].mxu1 %v23457_v8  ;;  %18125 = vmatmul.mubr.f32.vlgmr.msra.gmra.mrb[0].mxu0 %v23455_v38 }
 0x2b3   :  { %19273 = vmatpush3.bf16.msra.mxu1 %v19272_v60  ;;  %20137 = vmatpush3.bf16.msra.mxu0 %v20136_v30  ;;  %v26037_v60 = vld [vmem:[#allocation23_spill] sm:$0xff] }
 0x2b4   :  { %19274 = vmatprep.subr.bf16.mxu1 %v25871_v25  ;;  %20138 = vmatprep.subr.bf16.mxu0 %v25871_v25  ;;  %vm4946_vm7 = vcmp.eq.s32.totalorder %v26037_v60, %v22919_v47  ;;  %vm12226_vm8 = vcmp.eq.s32.totalorder %v26037_v60, %v22921_v59 }
 0x2b5   :  { %16775 = vmatprep.mubr.msk.f32.mxu1 %vm21239_vm0, %v25875_v44  ;;  %18143 = vmatprep.mubr.msk.f32.mxu0 %vm21239_vm0, %v25875_v44  ;;  %v14731_v30 = vsel %vm4946_vm7, 1.0, %v25875_v44  ;;  %v14827_v3 = vsel %vm12226_vm8, 1.0, %v25875_v44 }
 0x2b6   :  { %21083 = vxpose.xlu0.b32.cont [4/8] (short) (narrow) %v21082_v19, 8  ;;  %v21084_v12 = vpack.i.bf16 %v14827_v3, %v14731_v30  ;;  %v3760_v30 = vld [vmem:[#allocation5 + $0x1a8] sm:$0xff]  ;;  %v23775_v3 = vsub.f32 %v3755_v57, %v3799_v11  ;;  %v11041_v57 = vld [vmem:[#allocation5 + $0x4b0] sm:$0xff] }
 0x2b7   :  { %19276 = vmatpush3.bf16.msra.mxu1 %v19275_v40  ;;  %20140 = vmatpush3.bf16.msra.mxu0 %v20139_v55  ;;  %v14828_v40 = vsel %vm12227_vm10, 1.0, %v25875_v44  ;;  %v26039_v55 = vld [vmem:[#allocation25_spill] sm:$0xff] }
 0x2b8   :  { %19277 = vmatprep.subr.bf16.mxu1 %v25871_v25  ;;  %20141 = vmatprep.subr.bf16.mxu0 %v25871_v25  ;;  %vm4948_vm11 = vcmp.eq.s32.totalorder %v26039_v55, %v22919_v47  ;;  %vm12228_vm12 = vcmp.eq.s32.totalorder %v26039_v55, %v22921_v59  ;;  %v21086_v1 = vpack.i.bf16 %v14828_v40, %v14732_v31  ;;  %v11039_v31 = vld [vmem:[#allocation5 + $0x4a0] sm:$0xff]  ;;  %v11076_v40 = vsel %vm157_vm2, %v21054_v5, 0 }
 0x2b9   :  { %v14733_v24 = vsel %vm4948_vm11, 1.0, %v25875_v44  ;;  %v14829_v27 = vsel %vm12228_vm12, 1.0, %v25875_v44  ;;  %v3796_v55 = vsel %vm157_vm2, %v21051_v21, 0 }
 0x2ba   :  { %21085 = vxpose.xlu0.b32.cont [5/8] (short) (narrow) %v21084_v12, 8  ;;  %v21088_v39 = vpack.i.bf16 %v14829_v27, %v14733_v24  ;;  %v11088_v12 = vand.u32 4294901760, %v11038_v22 }
 0x2bb   :  { %19279 = vmatpush3.bf16.msra.mxu1 %v19278_v0  ;;  %20143 = vmatpush3.bf16.msra.mxu0 %v20142_v54  ;;  %v26040_v0 = vld [vmem:[#allocation26_spill] sm:$0xff]  ;;  %v19296_v54 = vpack.c.bf16 %v3281_v62, %v3274_v9  ;;  %v19299_v9 = vpack.c.bf16 %v26044_v28, %v26043_v41  ;;  %v26045_v62 = vand.u32 4294901760, %v23470_v26  ;;  %v19302_v26 = vpack.c.bf16 %v26048_v2, %v26047_v10  ;;  %v3761_v28 = vld [vmem:[#allocation5 + $0x1b0] sm:$0xff] }
 0x2bc   :  { %19280 = vmatprep.subr.bf16.mxu1 %v25871_v25  ;;  %20144 = vmatprep.subr.bf16.mxu0 %v25871_v25  ;;  %vm4949_vm13 = vcmp.eq.s32.totalorder %v26040_v0, %v22919_v47  ;;  %vm12229_vm14 = vcmp.eq.s32.totalorder %v26040_v0, %v22921_v59 }
 0x2bd   :  { %v14734_v23 = vsel %vm4949_vm13, 1.0, %v25875_v44  ;;  %v14830_v52 = vsel %vm12229_vm14, 1.0, %v25875_v44  ;;  %v20163_v53 = vpack.c.bf16 %v26046_v16, %v26045_v62  ;;  %v23810_v16 = vsub.f32 %v11037_v34, %v11085_v13 }
 0x2be   :  { %21087 = vxpose.xlu0.b32.cont [6/8] (short) (narrow) %v21086_v1, 8  ;;  %v21090_v61 = vpack.i.bf16 %v14830_v52, %v14734_v23  ;;  %v11094_v23 = vand.u32 4294901760, %v11040_v15  ;;  %v23795_v52 = vand.u32 4294901760, %v11076_v40 }
 0x2bf   :  { %19282 = vmatpush3.bf16.msra.mxu1 %v19281_v43  ;;  %20146 = vmatpush3.bf16.msra.mxu0 %v20145_v35  ;;  %v11079_v35 = vand.u32 4294901760, %v11035_v51  ;;  %v25816_v34 = vand.u32 4294901760, %v23810_v16 }
 0x2c0   :  { %19283 = vmatprep.subr.bf16.mxu1 %v25871_v25  ;;  %20147 = vmatprep.subr.bf16.mxu0 %v25871_v25 }
 0x2c1   :  { %v23783_v24 = vsub.f32 %v11035_v51, %v11079_v35 }
 0x2c2   :  { %16776 = vmatmul.mubr.f32.vlgmr.msra.gmra.mrb[0].mxu1 %v23489_v46  ;;  %18144 = vmatmul.mubr.f32.vlgmr.msra.gmra.mrb[0].mxu0 %v23486_v33  ;;  %v26050_v33 = vand.u32 4294901760, %v23516_v42  ;;  %v3756_v42 = vld [vmem:[#allocation5 + $0x188] sm:$0xff] }
 0x2c3   :  { %19285 = vmatpush3.bf16.msra.mxu1 %v23445_v50  ;;  %20149 = vmatpush3.bf16.msra.mxu0 %v23449_v37  ;;  %v3802_v14 = vand.u32 4294901760, %v3756_v42  ;;  %v11164_v62 = vand.u32 4294901760, %v23783_v24 }
 0x2c4   :  { %19286 = vmatprep.subr.bf16.mxu1 %v25871_v25  ;;  %20150 = vmatprep.subr.bf16.mxu0 %v25871_v25  ;;  %v20166_v46 = vpack.c.bf16 %v26050_v33, %v26049_v48 }
 0x2c5   :  { %16794 = vmatprep.mubr.msk.f32.mxu1 %vm21239_vm0, %v25875_v44  ;;  %18162 = vmatprep.mubr.msk.f32.mxu0 %vm21239_vm0, %v25875_v44  ;;  %v23781_v1 = vsub.f32 %v3756_v42, %v3802_v14 }
 0x2c6   :  { %21089 = vxpose.xlu0.b32.cont [7/8] (short) (narrow) %v21088_v39, 8  ;;  %v3814_v39 = vand.u32 4294901760, %v3760_v30 }
 0x2c7   :  { %19288 = vmatpush3.bf16.msra.mxu1 %v23451_v4  ;;  %20152 = vmatpush3.bf16.msra.mxu0 %v23461_v45 }
 0x2c8   :  { %19289 = vmatprep.subr.bf16.mxu1 %v25871_v25  ;;  %20153 = vmatprep.subr.bf16.mxu0 %v25871_v25  ;;  %v23821_v48 = vsub.f32 %v3760_v30, %v3814_v39 }
 0x2ca   :  { %21091 = vxpose.xlu0.b32.end [8/8] (short) (narrow) %v21090_v61, 8  ;;  %v23801_v61 = vpack.c.bf16 %v11088_v12, %v11085_v13 }
 0x2cb   :  { %19291 = vmatpush3.bf16.msra.mxu1 %v23474_v32  ;;  %20155 = vmatpush3.bf16.msra.mxu0 %v23483_v18 }
 0x2cc   :  { %19292 = vmatprep.subr.bf16.mxu1 %v25871_v25  ;;  %20156 = vmatprep.subr.bf16.mxu0 %v25871_v25 }
 0x2ce   :  { %v23743_v43 = vpop.trf.xlu1 }
 0x2cf   :  { %19294 = vmatpush3.bf16.msra.mxu1 %v23521_v20  ;;  %20158 = vmatpush3.bf16.msra.mxu0 %v23548_v7 }
 0x2d0   :  { %19295 = vmatprep.subr.bf16.mxu1 %v25871_v25  ;;  %20159 = vmatprep.subr.bf16.mxu0 %v25871_v25 }
 0x2d2   :  { %16795 = vmatmul.mubr.f32.vlgmr.msra.gmra.mrb[0].mxu1 %v26041_v63  ;;  %18163 = vmatmul.mubr.f32.vlgmr.msra.gmra.mrb[0].mxu0 %v26042_v17  ;;  %v23797_v63 = vand.u32 4294901760, %v3796_v55 }
 0x2d3   :  { %19297 = vmatpush3.bf16.msra.mxu1 %v19296_v54  ;;  %20161 = vmatpush3.bf16.msra.mxu0 %v20160_v58  ;;  %v11091_v58 = vand.u32 4294901760, %v11039_v31 }
 0x2d4   :  { %19298 = vmatprep.subr.bf16.mxu1 %v25871_v25  ;;  %20162 = vmatprep.subr.bf16.mxu0 %v25871_v25 }
 0x2d5   :  { %16813 = vmatprep.mubr.msk.f32.mxu1 %vm21239_vm0, %v25875_v44  ;;  %18181 = vmatprep.mubr.msk.f32.mxu0 %vm21239_vm0, %v25875_v44  ;;  %v23823_v33 = vpack.c.bf16 %v11094_v23, %v11091_v58 }
 0x2d7   :  { %19300 = vmatpush3.bf16.msra.mxu1 %v19299_v9  ;;  %20164 = vmatpush3.bf16.msra.mxu0 %v20163_v53  ;;  %v3762_v9 = vld [vmem:[#allocation5 + $0x1b8] sm:$0xff]  ;;  %v23812_v53 = vsub.f32 %v11038_v22, %v11088_v12  ;;  %v23856_v22 = vsub.f32 %v11040_v15, %v11094_v23  ;;  %v25821_v23 = vand.u32 4294901760, %v23821_v48 }
 0x2d8   :  { %19301 = vmatprep.subr.bf16.mxu1 %v25871_v25  ;;  %20165 = vmatprep.subr.bf16.mxu0 %v25871_v25 }
 0x2db   :  { %19303 = vmatpush3.bf16.msra.mxu1 %v19302_v26  ;;  %20167 = vmatpush3.bf16.msra.mxu0 %v20166_v46  ;;  %v23826_v46 = vsub.f32 %v11076_v40, %v23795_v52 }
 0x2dc   :  { %19304 = vmatprep.subr.bf16.mxu1 %v25871_v25  ;;  %20168 = vmatprep.subr.bf16.mxu0 %v25871_v25 }
 0x2df   :  { %19306 = vmatpush3.bf16.msra.mxu1 %v19305_v36  ;;  %20170 = vmatpush3.bf16.msra.mxu0 %v20169_v56  ;;  %v23829_v36 = vsub.f32 %v3796_v55, %v23797_v63  ;;  %v3817_v56 = vand.u32 4294901760, %v3761_v28  ;;  %v11179_v55 = vsub.f32 %v23810_v16, %v25816_v34 }
 0x2e0   :  { %19307 = vmatprep.subr.bf16.mxu1 %v25871_v25  ;;  %20171 = vmatprep.subr.bf16.mxu0 %v25871_v25 }
 0x2e2   :  { %16814 = vmatmul.mubr.f32.vlgmr.msra.gmra.mrb[0].mxu1 %v23457_v8  ;;  %18182 = vmatmul.mubr.f32.vlgmr.msra.gmra.mrb[0].mxu0 %v23455_v38 }
 0x2e3   :  { %19309 = vmatpush3.bf16.msra.mxu1 %v23445_v50  ;;  %20173 = vmatpush3.bf16.msra.mxu0 %v23449_v37  ;;  %v11036_v50 = vld [vmem:[#allocation5 + $0x488] sm:$0xff]  ;;  %v3758_v37 = vld [vmem:[#allocation5 + $0x198] sm:$0xff] }
 0x2e4   :  { %19310 = vmatprep.subr.bf16.mxu1 %v25871_v25  ;;  %20174 = vmatprep.subr.bf16.mxu0 %v25871_v25  ;;  %v11082_v19 = vand.u32 4294901760, %v11036_v50  ;;  %v3808_v60 = vand.u32 4294901760, %v3758_v37 }
 0x2e5   :  { %16832 = vmatprep.mubr.msk.f32.mxu1 %vm21239_vm0, %v25875_v44  ;;  %18200 = vmatprep.mubr.msk.f32.mxu0 %vm21239_vm0, %v25875_v44 }
 0x2e6   :  { %v23789_v0 = vpack.c.bf16 %v11082_v19, %v11079_v35  ;;  %v23805_v41 = vsub.f32 %v3758_v37, %v3808_v60  ;;  %v23845_v37 = vsub.f32 %v11039_v31, %v11091_v58  ;;  %v25815_v35 = vand.u32 4294901760, %v23812_v53 }
 0x2e7   :  { %19312 = vmatpush3.bf16.msra.mxu1 %v23451_v4  ;;  %20176 = vmatpush3.bf16.msra.mxu0 %v23461_v45  ;;  %v3805_v4 = vand.u32 4294901760, %v3757_v6  ;;  %v3759_v45 = vld [vmem:[#allocation5 + $0x1a0] sm:$0xff] }
 0x2e8   :  { %19313 = vmatprep.subr.bf16.mxu1 %v25871_v25  ;;  %20177 = vmatprep.subr.bf16.mxu0 %v25871_v25  ;;  %v3811_v27 = vand.u32 4294901760, %v3759_v45  ;;  %v25817_v21 = vand.u32 4294901760, %v23805_v41  ;;  %v11186_v58 = vsub.f32 %v23812_v53, %v25815_v35 }
 0x2e9   :  { %v23791_v54 = vpack.c.bf16 %v3808_v60, %v3805_v4  ;;  %v23799_v17 = vsub.f32 %v3757_v6, %v3805_v4  ;;  %v23863_v4 = vsub.f32 %v3761_v28, %v3817_v56  ;;  %v25824_v60 = vand.u32 4294901760, %v23829_v36 }
 0x2ea   :  { %v23814_v10 = vpack.c.bf16 %v3814_v39, %v3811_v27  ;;  %v23819_v26 = vsub.f32 %v3759_v45, %v3811_v27  ;;  %v25819_v45 = vand.u32 4294901760, %v23826_v46  ;;  %v3906_v40 = vsub.f32 %v23805_v41, %v25817_v21 }
 0x2eb   :  { %19315 = vmatpush3.bf16.msra.mxu1 %v23474_v32  ;;  %20179 = vmatpush3.bf16.msra.mxu0 %v23483_v18  ;;  %v23785_v32 = vpack.c.bf16 %v3802_v14, %v3799_v11  ;;  %v23787_v18 = vsub.f32 %v11036_v50, %v11082_v19  ;;  %v11165_v50 = vsub.f32 %v23783_v24, %v11164_v62  ;;  %v25818_v6 = vand.u32 4294901760, %v23799_v17 }
 0x2ec   :  { %19316 = vmatprep.subr.bf16.mxu1 %v25871_v25  ;;  %20180 = vmatprep.subr.bf16.mxu0 %v25871_v25  ;;  %v11097_v11 = vand.u32 4294901760, %v11041_v57  ;;  %v25822_v27 = vand.u32 4294901760, %v23819_v26  ;;  %v25820_v28 = vand.u32 4294901760, %v23845_v37  ;;  %v11187_v34 = vand.u32 4294901760, %v11186_v58 }
 0x2ed   :  { %v11171_v2 = vand.u32 4294901760, %v23787_v18  ;;  %v11166_v12 = vand.u32 4294901760, %v11165_v50  ;;  %v3899_v31 = vsub.f32 %v23799_v17, %v25818_v6  ;;  %v11154_v50 = vsub.f32 %v23826_v46, %v25819_v45 }
 0x2ee   :  { %v3920_v21 = vsub.f32 %v23821_v48, %v25821_v23  ;;  %v11193_v6 = vsub.f32 %v23845_v37, %v25820_v28  ;;  %v3926_v45 = vand.u32 4294901760, %v23863_v4 }
 0x2ef   :  { %19318 = vmatpush3.bf16.msra.mxu1 %v23521_v20  ;;  %20182 = vmatpush3.bf16.msra.mxu0 %v23548_v7  ;;  %v3884_v20 = vand.u32 4294901760, %v23775_v3  ;;  %v3891_v7 = vand.u32 4294901760, %v23781_v1  ;;  %v11172_v5 = vsub.f32 %v23787_v18, %v11171_v2  ;;  %v3900_v35 = vand.u32 4294901760, %v3899_v31 }
 0x2f0   :  { %19319 = vmatprep.subr.bf16.mxu1 %v25871_v25  ;;  %20183 = vmatprep.subr.bf16.mxu0 %v25871_v25  ;;  %v3921_v23 = vand.u32 4294901760, %v3920_v21 }
 0x2f1   :  { %v3885_v42 = vsub.f32 %v23775_v3, %v3884_v20  ;;  %v3892_v51 = vsub.f32 %v23781_v1, %v3891_v7  ;;  %v11173_v15 = vand.u32 4294901760, %v11172_v5 }
 0x2f2   :  { %16833 = vmatmul.mubr.f32.vlgmr.msra.gmra.mrb[0].mxu1 %v23457_v8  ;;  %18201 = vmatmul.mubr.f32.vlgmr.msra.gmra.mrb[0].mxu0 %v23455_v38  ;;  %v3820_v8 = vand.u32 4294901760, %v3762_v9  ;;  %v11042_v38 = vld [vmem:[#allocation5 + $0x4b8] sm:$0xff] }
 0x2f3   :  { %19321 = vmatpush3.bf16.msra.mxu1 %v23785_v32  ;;  %20185 = vmatpush3.bf16.msra.mxu0 %v23789_v0  ;;  %v11100_v14 = vand.u32 4294901760, %v11042_v38  ;;  %v3886_v30 = vand.u32 4294901760, %v3885_v42  ;;  %v3893_v13 = vand.u32 4294901760, %v3892_v51  ;;  %v23890_v42 = vsub.f32 %v11041_v57, %v11097_v11 }
 0x2f4   :  { %19322 = vmatprep.subr.bf16.mxu1 %v25871_v25  ;;  %20186 = vmatprep.subr.bf16.mxu0 %v25871_v25  ;;  %v23861_v19 = vpack.c.bf16 %v3820_v8, %v3817_v56  ;;  %v23879_v39 = vsub.f32 %v3762_v9, %v3820_v8  ;;  %v25823_v9 = vand.u32 4294901760, %v23856_v22  ;;  %v3874_v8 = vsub.f32 %v23829_v36, %v25824_v60 }
 0x2f5   :  { %16851 = vmatprep.mubr.msk.f32.mxu1 %vm21239_vm0, %v25875_v44  ;;  %18219 = vmatprep.mubr.msk.f32.mxu0 %vm21239_vm0, %v25875_v44  ;;  %v23888_v56 = vpack.c.bf16 %v11100_v14, %v11097_v11  ;;  %v23892_v51 = vsub.f32 %v11042_v38, %v11100_v14  ;;  %v19332_v5 = vpack.c.bf16 %v3893_v13, %v3886_v30  ;;  %v3907_v11 = vand.u32 4294901760, %v3906_v40 }
 0x2f6   :  { %v20196_v57 = vpack.c.bf16 %v11173_v15, %v11166_v12  ;;  %v11180_v38 = vand.u32 4294901760, %v11179_v55  ;;  %v3913_v14 = vsub.f32 %v23819_v26, %v25822_v27  ;;  %v11200_v30 = vsub.f32 %v23856_v22, %v25823_v9 }
 0x2f7   :  { %19324 = vmatpush3.bf16.msra.mxu1 %v23791_v54  ;;  %20188 = vmatpush3.bf16.msra.mxu0 %v23801_v61  ;;  %v3933_v13 = vand.u32 4294901760, %v23879_v39  ;;  %v11206_v12 = vand.u32 4294901760, %v23890_v42  ;;  %v11213_v31 = vand.u32 4294901760, %v23892_v51  ;;  %v3875_v15 = vand.u32 4294901760, %v3874_v8 }
 0x2f8   :  { %19325 = vmatprep.subr.bf16.mxu1 %v25871_v25  ;;  %20189 = vmatprep.subr.bf16.mxu0 %v25871_v25  ;;  %v11155_v40 = vand.u32 4294901760, %v11154_v50  ;;  %v19335_v55 = vpack.c.bf16 %v3907_v11, %v3900_v35  ;;  %v3914_v58 = vand.u32 4294901760, %v3913_v14  ;;  %v20199_v28 = vpack.c.bf16 %v11187_v34, %v11180_v38 }
 0x2f9   :  { %v11194_v27 = vand.u32 4294901760, %v11193_v6  ;;  %v3927_v9 = vsub.f32 %v23863_v4, %v3926_v45  ;;  %v11201_v60 = vand.u32 4294901760, %v11200_v30  ;;  %v3934_v8 = vsub.f32 %v23879_v39, %v3933_v13 }
 0x2fa   :  { %v11207_v35 = vsub.f32 %v23890_v42, %v11206_v12  ;;  %v11214_v21 = vsub.f32 %v23892_v51, %v11213_v31  ;;  %v19338_v6 = vpack.c.bf16 %v3921_v23, %v3914_v58  ;;  %v26051_v23 = vld [vmem:[#allocation27_spill] sm:$0xff]  ;;  %v19347_v58 = vpack.c.bf16 %v23805_v41, %v23799_v17 }
 0x2fb   :  { %19327 = vmatpush3.bf16.msra.mxu1 %v23814_v10  ;;  %20191 = vmatpush3.bf16.msra.mxu0 %v23823_v33  ;;  %v3928_v34 = vand.u32 4294901760, %v3927_v9  ;;  %v20202_v50 = vpack.c.bf16 %v11201_v60, %v11194_v27  ;;  %vm5548_vm15 = vcmp.eq.s32.totalorder %v26051_v23, %v22919_v47  ;;  %vm12828_vm1 = vcmp.eq.s32.totalorder %v26051_v23, %v22921_v59 }
 0x2fc   :  { %19328 = vmatprep.subr.bf16.mxu1 %v25871_v25  ;;  %20192 = vmatprep.subr.bf16.mxu0 %v25871_v25  ;;  %v11215_v11 = vand.u32 4294901760, %v11214_v21  ;;  %v14735_v60 = vsel %vm5548_vm15, 1.0, %v25875_v44  ;;  %v14831_v27 = vsel %vm12828_vm1, 1.0, %v25875_v44  ;;  %v20208_v9 = vpack.c.bf16 %v23787_v18, %v23783_v24  ;;  %v26053_v21 = vld [vmem:[#allocation29_spill] sm:$0xff] }
 0x2fd   :  { %v21097_v30 = vpack.i.bf16 %v14831_v27, %v14735_v60  ;;  %vm5550_vm5 = vcmp.eq.s32.totalorder %v26053_v21, %v22919_v47  ;;  %vm12830_vm6 = vcmp.eq.s32.totalorder %v26053_v21, %v22921_v59  ;;  %v19353_v23 = vpack.c.bf16 %v23879_v39, %v23863_v4  ;;  %v11641_v4 = vld [vmem:[#allocation5 + $0x4c0] sm:$0xff] }
 0x2fe   :  { %v20217_v60 = vpack.c.bf16 %v23892_v51, %v23890_v42  ;;  %v26061_v24 = vand.u32 4294901760, %v23799_v17  ;;  %v26062_v18 = vand.u32 4294901760, %v23805_v41  ;;  %v26065_v17 = vand.u32 4294901760, %v23819_v26  ;;  %v11643_v51 = vld [vmem:[#allocation5 + $0x4d0] sm:$0xff] }
 0x2ff   :  { %19330 = vmatpush3.bf16.msra.mxu1 %v23861_v19  ;;  %20194 = vmatpush3.bf16.msra.mxu0 %v23888_v56  ;;  %v26066_v41 = vand.u32 4294901760, %v23821_v48  ;;  %v21075_v39 = vunpack.i.h.bf16 %v23743_v43  ;;  %v21072_v42 = vunpack.i.l.bf16 %v23743_v43  ;;  %v11646_v43 = vld [vmem:[#allocation5 + $0x4e8] sm:$0xff] }
 0x300   :  { %19331 = vmatprep.subr.bf16.mxu1 %v25871_v25  ;;  %20195 = vmatprep.subr.bf16.mxu0 %v25871_v25 }
 0x301   :  { %21098 = vxpose.xlu1.b32.start [1/8] (short) (narrow) %v21097_v30, 8 }
 0x302   :  { %16852 = vmatmul.mubr.f32.vlgmr.msra.gmra.mrb[0].mxu1 %v3875_v15  ;;  %18220 = vmatmul.mubr.f32.vlgmr.msra.gmra.mrb[0].mxu0 %v11155_v40  ;;  %v26052_v15 = vld [vmem:[#allocation28_spill] sm:$0xff] }
 0x303   :  { %19333 = vmatpush3.bf16.msra.mxu1 %v19332_v5  ;;  %20197 = vmatpush3.bf16.msra.mxu0 %v20196_v57  ;;  %v3935_v5 = vand.u32 4294901760, %v3934_v8  ;;  %v11208_v57 = vand.u32 4294901760, %v11207_v35  ;;  %vm5549_vm3 = vcmp.eq.s32.totalorder %v26052_v15, %v22919_v47  ;;  %vm12829_vm4 = vcmp.eq.s32.totalorder %v26052_v15, %v22921_v59  ;;  %v26056_v15 = vld [vmem:[#allocation32_spill] sm:$0xff] }
 0x304   :  { %19334 = vmatprep.subr.bf16.mxu1 %v25871_v25  ;;  %20198 = vmatprep.subr.bf16.mxu0 %v25871_v25  ;;  %v14736_v40 = vsel %vm5549_vm3, 1.0, %v25875_v44  ;;  %v20211_v8 = vpack.c.bf16 %v23812_v53, %v23810_v16  ;;  %vm5553_vm11 = vcmp.eq.s32.totalorder %v26056_v15, %v22919_v47  ;;  %vm12833_vm12 = vcmp.eq.s32.totalorder %v26056_v15, %v22921_v59 }
 0x305   :  { %16870 = vmatprep.mubr.msk.f32.mxu1 %vm21239_vm0, %v25875_v44  ;;  %18238 = vmatprep.mubr.msk.f32.mxu0 %vm21239_vm0, %v25875_v44  ;;  %v19341_v38 = vpack.c.bf16 %v3935_v5, %v3928_v34  ;;  %v20205_v14 = vpack.c.bf16 %v11215_v11, %v11208_v57  ;;  %v14833_v34 = vsel %vm12830_vm6, 1.0, %v25875_v44  ;;  %v20214_v5 = vpack.c.bf16 %v23856_v22, %v23845_v37  ;;  %v26054_v11 = vld [vmem:[#allocation30_spill] sm:$0xff] }
 0x306   :  { %vm5551_vm7 = vcmp.eq.s32.totalorder %v26054_v11, %v22919_v47  ;;  %vm12831_vm8 = vcmp.eq.s32.totalorder %v26054_v11, %v22921_v59  ;;  %v11691_v15 = vand.u32 4294901760, %v11643_v51 }
 0x307   :  { %19336 = vmatpush3.bf16.msra.mxu1 %v19335_v55  ;;  %20200 = vmatpush3.bf16.msra.mxu0 %v20199_v28  ;;  %v19344_v28 = vpack.c.bf16 %v23781_v1, %v23775_v3  ;;  %v14832_v55 = vsel %vm12829_vm4, 1.0, %v25875_v44  ;;  %v26060_v3 = vand.u32 4294901760, %v23826_v46 }
 0x308   :  { %19337 = vmatprep.subr.bf16.mxu1 %v25871_v25  ;;  %20201 = vmatprep.subr.bf16.mxu0 %v25871_v25  ;;  %v21099_v35 = vpack.i.bf16 %v14832_v55, %v14736_v40  ;;  %v14740_v55 = vsel %vm5553_vm11, 1.0, %v25875_v44 }
 0x30a   :  { %21100 = vxpose.xlu1.b32.cont [2/8] (short) (narrow) %v21099_v35, 8 }
 0x30b   :  { %19339 = vmatpush3.bf16.msra.mxu1 %v19338_v6  ;;  %20203 = vmatpush3.bf16.msra.mxu0 %v20202_v50  ;;  %v14737_v6 = vsel %vm5550_vm5, 1.0, %v25875_v44  ;;  %v19350_v50 = vpack.c.bf16 %v23821_v48, %v23819_v26  ;;  %v19377_v26 = vpack.c.bf16 %v3933_v13, %v3926_v45  ;;  %v20241_v48 = vpack.c.bf16 %v11213_v31, %v11206_v12  ;;  %v4363_v45 = vld [vmem:[#allocation5 + $0x1d0] sm:$0xff]  ;;  %v11644_v13 = vld [vmem:[#allocation5 + $0x4d8] sm:$0xff] }
 0x30c   :  { %19340 = vmatprep.subr.bf16.mxu1 %v25871_v25  ;;  %20204 = vmatprep.subr.bf16.mxu0 %v25871_v25  ;;  %v21101_v57 = vpack.i.bf16 %v14833_v34, %v14737_v6 }
 0x30e   :  { %21102 = vxpose.xlu1.b32.cont [3/8] (short) (narrow) %v21101_v57, 8  ;;  %v20232_v57 = vpack.c.bf16 %v11171_v2, %v11164_v62  ;;  %v26064_v62 = vand.u32 4294901760, %v23812_v53  ;;  %v26067_v53 = vand.u32 4294901760, %v23845_v37  ;;  %v4361_v37 = vld [vmem:[#allocation5 + $0x1c0] sm:$0xff] }
 0x30f   :  { %19342 = vmatpush3.bf16.msra.mxu1 %v19341_v38  ;;  %20206 = vmatpush3.bf16.msra.mxu0 %v20205_v14  ;;  %v14738_v38 = vsel %vm5551_vm7, 1.0, %v25875_v44  ;;  %v14834_v14 = vsel %vm12831_vm8, 1.0, %v25875_v44  ;;  %v4405_v12 = vand.u32 4294901760, %v4361_v37 }
 0x310   :  { %19343 = vmatprep.subr.bf16.mxu1 %v25871_v25  ;;  %20207 = vmatprep.subr.bf16.mxu0 %v25871_v25  ;;  %v21103_v27 = vpack.i.bf16 %v14834_v14, %v14738_v38  ;;  %v26059_v14 = vand.u32 4294901760, %v23829_v36 }
 0x312   :  { %16871 = vmatmul.mubr.f32.vlgmr.msra.gmra.mrb[0].mxu1 %v23797_v63  ;;  %18239 = vmatmul.mubr.f32.vlgmr.msra.gmra.mrb[0].mxu0 %v23795_v52 }
 0x313   :  { %19345 = vmatpush3.bf16.msra.mxu1 %v19344_v28  ;;  %20209 = vmatpush3.bf16.msra.mxu0 %v20208_v9  ;;  %v26055_v28 = vld [vmem:[#allocation31_spill] sm:$0xff] }
 0x314   :  { %19346 = vmatprep.subr.bf16.mxu1 %v25871_v25  ;;  %20210 = vmatprep.subr.bf16.mxu0 %v25871_v25  ;;  %vm5552_vm9 = vcmp.eq.s32.totalorder %v26055_v28, %v22919_v47  ;;  %vm12832_vm10 = vcmp.eq.s32.totalorder %v26055_v28, %v22921_v59 }
 0x315   :  { %16889 = vmatprep.mubr.msk.f32.mxu1 %vm21239_vm0, %v25875_v44  ;;  %18257 = vmatprep.mubr.msk.f32.mxu0 %vm21239_vm0, %v25875_v44  ;;  %v14739_v9 = vsel %vm5552_vm9, 1.0, %v25875_v44  ;;  %v14835_v30 = vsel %vm12832_vm10, 1.0, %v25875_v44 }
 0x316   :  { %21104 = vxpose.xlu1.b32.cont [4/8] (short) (narrow) %v21103_v27, 8  ;;  %v21105_v40 = vpack.i.bf16 %v14835_v30, %v14739_v9  ;;  %v4366_v9 = vld [vmem:[#allocation5 + $0x1e8] sm:$0xff]  ;;  %v24115_v30 = vsub.f32 %v4361_v37, %v4405_v12  ;;  %v11647_v37 = vld [vmem:[#allocation5 + $0x4f0] sm:$0xff] }
 0x317   :  { %19348 = vmatpush3.bf16.msra.mxu1 %v19347_v58  ;;  %20212 = vmatpush3.bf16.msra.mxu0 %v20211_v8  ;;  %v14836_v58 = vsel %vm12833_vm12, 1.0, %v25875_v44  ;;  %v26057_v8 = vld [vmem:[#allocation33_spill] sm:$0xff] }
 0x318   :  { %19349 = vmatprep.subr.bf16.mxu1 %v25871_v25  ;;  %20213 = vmatprep.subr.bf16.mxu0 %v25871_v25  ;;  %vm5554_vm13 = vcmp.eq.s32.totalorder %v26057_v8, %v22919_v47  ;;  %vm12834_vm14 = vcmp.eq.s32.totalorder %v26057_v8, %v22921_v59  ;;  %v21107_v35 = vpack.i.bf16 %v14836_v58, %v14740_v55  ;;  %v11645_v55 = vld [vmem:[#allocation5 + $0x4e0] sm:$0xff]  ;;  %v11682_v58 = vsel %vm157_vm2, %v21075_v39, 0 }
 0x319   :  { %v14741_v21 = vsel %vm5554_vm13, 1.0, %v25875_v44  ;;  %v14837_v6 = vsel %vm12834_vm14, 1.0, %v25875_v44  ;;  %v4402_v8 = vsel %vm157_vm2, %v21072_v42, 0 }
 0x31a   :  { %21106 = vxpose.xlu1.b32.cont [5/8] (short) (narrow) %v21105_v40, 8  ;;  %v21109_v34 = vpack.i.bf16 %v14837_v6, %v14741_v21  ;;  %v11694_v40 = vand.u32 4294901760, %v11644_v13 }
 0x31b   :  { %19351 = vmatpush3.bf16.msra.mxu1 %v19350_v50  ;;  %20215 = vmatpush3.bf16.msra.mxu0 %v20214_v5  ;;  %v26058_v50 = vld [vmem:[#allocation34_spill] sm:$0xff]  ;;  %v19368_v5 = vpack.c.bf16 %v3891_v7, %v3884_v20  ;;  %v19371_v20 = vpack.c.bf16 %v26062_v18, %v26061_v24  ;;  %v26063_v7 = vand.u32 4294901760, %v23810_v16  ;;  %v19374_v16 = vpack.c.bf16 %v26066_v41, %v26065_v17  ;;  %v4367_v18 = vld [vmem:[#allocation5 + $0x1f0] sm:$0xff] }
 0x31c   :  { %19352 = vmatprep.subr.bf16.mxu1 %v25871_v25  ;;  %20216 = vmatprep.subr.bf16.mxu0 %v25871_v25  ;;  %vm5555_vm15 = vcmp.eq.s32.totalorder %v26058_v50, %v22919_v47  ;;  %vm12835_vm1 = vcmp.eq.s32.totalorder %v26058_v50, %v22921_v59 }
 0x31d   :  { %v14742_v11 = vsel %vm5555_vm15, 1.0, %v25875_v44  ;;  %v14838_v38 = vsel %vm12835_vm1, 1.0, %v25875_v44  ;;  %v20235_v2 = vpack.c.bf16 %v26064_v62, %v26063_v7  ;;  %v24150_v62 = vsub.f32 %v11643_v51, %v11691_v15 }
 0x31e   :  { %21108 = vxpose.xlu1.b32.cont [6/8] (short) (narrow) %v21107_v35, 8  ;;  %v21111_v1 = vpack.i.bf16 %v14838_v38, %v14742_v11  ;;  %v11700_v11 = vand.u32 4294901760, %v11646_v43  ;;  %v24135_v38 = vand.u32 4294901760, %v11682_v58 }
 0x31f   :  { %19354 = vmatpush3.bf16.msra.mxu1 %v19353_v23  ;;  %20218 = vmatpush3.bf16.msra.mxu0 %v20217_v60  ;;  %v11685_v60 = vand.u32 4294901760, %v11641_v4  ;;  %v25826_v51 = vand.u32 4294901760, %v24150_v62 }
 0x320   :  { %19355 = vmatprep.subr.bf16.mxu1 %v25871_v25  ;;  %20219 = vmatprep.subr.bf16.mxu0 %v25871_v25 }
 0x321   :  { %v24123_v21 = vsub.f32 %v11641_v4, %v11685_v60 }
 0x322   :  { %16890 = vmatmul.mubr.f32.vlgmr.msra.gmra.mrb[0].mxu1 %v23829_v36  ;;  %18258 = vmatmul.mubr.f32.vlgmr.msra.gmra.mrb[0].mxu0 %v23826_v46  ;;  %v26068_v46 = vand.u32 4294901760, %v23856_v22  ;;  %v4362_v22 = vld [vmem:[#allocation5 + $0x1c8] sm:$0xff] }
 0x323   :  { %19357 = vmatpush3.bf16.msra.mxu1 %v23785_v32  ;;  %20221 = vmatpush3.bf16.msra.mxu0 %v23789_v0  ;;  %v4408_v31 = vand.u32 4294901760, %v4362_v22  ;;  %v11770_v7 = vand.u32 4294901760, %v24123_v21 }
 0x324   :  { %19358 = vmatprep.subr.bf16.mxu1 %v25871_v25  ;;  %20222 = vmatprep.subr.bf16.mxu0 %v25871_v25  ;;  %v20238_v36 = vpack.c.bf16 %v26068_v46, %v26067_v53 }
 0x325   :  { %16908 = vmatprep.mubr.msk.f32.mxu1 %vm21239_vm0, %v25875_v44  ;;  %18276 = vmatprep.mubr.msk.f32.mxu0 %vm21239_vm0, %v25875_v44  ;;  %v24121_v35 = vsub.f32 %v4362_v22, %v4408_v31 }
 0x326   :  { %21110 = vxpose.xlu1.b32.cont [7/8] (short) (narrow) %v21109_v34, 8  ;;  %v4420_v34 = vand.u32 4294901760, %v4366_v9 }
 0x327   :  { %19360 = vmatpush3.bf16.msra.mxu1 %v23791_v54  ;;  %20224 = vmatpush3.bf16.msra.mxu0 %v23801_v61 }
 0x328   :  { %19361 = vmatprep.subr.bf16.mxu1 %v25871_v25  ;;  %20225 = vmatprep.subr.bf16.mxu0 %v25871_v25  ;;  %v24161_v53 = vsub.f32 %v4366_v9, %v4420_v34 }
 0x32a   :  { %21112 = vxpose.xlu1.b32.end [8/8] (short) (narrow) %v21111_v1, 8  ;;  %v24141_v1 = vpack.c.bf16 %v11694_v40, %v11691_v15 }
 0x32b   :  { %19363 = vmatpush3.bf16.msra.mxu1 %v23814_v10  ;;  %20227 = vmatpush3.bf16.msra.mxu0 %v23823_v33 }
 0x32c   :  { %19364 = vmatprep.subr.bf16.mxu1 %v25871_v25  ;;  %20228 = vmatprep.subr.bf16.mxu0 %v25871_v25 }
 0x32e   :  { %v24083_v23 = vpop.trf.xlu0 }
 0x32f   :  { %19366 = vmatpush3.bf16.msra.mxu1 %v23861_v19  ;;  %20230 = vmatpush3.bf16.msra.mxu0 %v23888_v56 }
 0x330   :  { %19367 = vmatprep.subr.bf16.mxu1 %v25871_v25  ;;  %20231 = vmatprep.subr.bf16.mxu0 %v25871_v25 }
 0x332   :  { %16909 = vmatmul.mubr.f32.vlgmr.msra.gmra.mrb[0].mxu1 %v26059_v14  ;;  %18277 = vmatmul.mubr.f32.vlgmr.msra.gmra.mrb[0].mxu0 %v26060_v3  ;;  %v24137_v14 = vand.u32 4294901760, %v4402_v8 }
 0x333   :  { %19369 = vmatpush3.bf16.msra.mxu1 %v19368_v5  ;;  %20233 = vmatpush3.bf16.msra.mxu0 %v20232_v57  ;;  %v11697_v57 = vand.u32 4294901760, %v11645_v55 }
 0x334   :  { %19370 = vmatprep.subr.bf16.mxu1 %v25871_v25  ;;  %20234 = vmatprep.subr.bf16.mxu0 %v25871_v25 }
 0x335   :  { %16927 = vmatprep.mubr.msk.f32.mxu1 %vm21239_vm0, %v25875_v44  ;;  %18295 = vmatprep.mubr.msk.f32.mxu0 %vm21239_vm0, %v25875_v44  ;;  %v24163_v46 = vpack.c.bf16 %v11700_v11, %v11697_v57 }
 0x337   :  { %19372 = vmatpush3.bf16.msra.mxu1 %v19371_v20  ;;  %20236 = vmatpush3.bf16.msra.mxu0 %v20235_v2  ;;  %v4368_v20 = vld [vmem:[#allocation5 + $0x1f8] sm:$0xff]  ;;  %v24152_v2 = vsub.f32 %v11644_v13, %v11694_v40  ;;  %v24196_v13 = vsub.f32 %v11646_v43, %v11700_v11  ;;  %v25831_v11 = vand.u32 4294901760, %v24161_v53 }
 0x338   :  { %19373 = vmatprep.subr.bf16.mxu1 %v25871_v25  ;;  %20237 = vmatprep.subr.bf16.mxu0 %v25871_v25 }
 0x33b   :  { %19375 = vmatpush3.bf16.msra.mxu1 %v19374_v16  ;;  %20239 = vmatpush3.bf16.msra.mxu0 %v20238_v36  ;;  %v24166_v36 = vsub.f32 %v11682_v58, %v24135_v38 }
 0x33c   :  { %19376 = vmatprep.subr.bf16.mxu1 %v25871_v25  ;;  %20240 = vmatprep.subr.bf16.mxu0 %v25871_v25 }
 0x33f   :  { %19378 = vmatpush3.bf16.msra.mxu1 %v19377_v26  ;;  %20242 = vmatpush3.bf16.msra.mxu0 %v20241_v48  ;;  %v24169_v26 = vsub.f32 %v4402_v8, %v24137_v14  ;;  %v4423_v48 = vand.u32 4294901760, %v4367_v18  ;;  %v11785_v8 = vsub.f32 %v24150_v62, %v25826_v51 }
 0x340   :  { %19379 = vmatprep.subr.bf16.mxu1 %v25871_v25  ;;  %20243 = vmatprep.subr.bf16.mxu0 %v25871_v25 }
 0x342   :  { %16928 = vmatmul.mubr.f32.vlgmr.msra.gmra.mrb[0].mxu1 %v23797_v63  ;;  %18296 = vmatmul.mubr.f32.vlgmr.msra.gmra.mrb[0].mxu0 %v23795_v52 }
 0x343   :  { %19381 = vmatpush3.bf16.msra.mxu1 %v23785_v32  ;;  %20245 = vmatpush3.bf16.msra.mxu0 %v23789_v0  ;;  %v11642_v32 = vld [vmem:[#allocation5 + $0x4c8] sm:$0xff]  ;;  %v4364_v0 = vld [vmem:[#allocation5 + $0x1d8] sm:$0xff] }
 0x344   :  { %19382 = vmatprep.subr.bf16.mxu1 %v25871_v25  ;;  %20246 = vmatprep.subr.bf16.mxu0 %v25871_v25  ;;  %v11688_v27 = vand.u32 4294901760, %v11642_v32  ;;  %v4414_v28 = vand.u32 4294901760, %v4364_v0 }
 0x345   :  { %16946 = vmatprep.mubr.msk.f32.mxu1 %vm21239_vm0, %v25875_v44  ;;  %18314 = vmatprep.mubr.msk.f32.mxu0 %vm21239_vm0, %v25875_v44 }
 0x346   :  { %v24129_v50 = vpack.c.bf16 %v11688_v27, %v11685_v60  ;;  %v24145_v24 = vsub.f32 %v4364_v0, %v4414_v28  ;;  %v24185_v0 = vsub.f32 %v11645_v55, %v11697_v57  ;;  %v25825_v60 = vand.u32 4294901760, %v24152_v2 }
 0x347   :  { %19384 = vmatpush3.bf16.msra.mxu1 %v23791_v54  ;;  %20248 = vmatpush3.bf16.msra.mxu0 %v23801_v61  ;;  %v4411_v54 = vand.u32 4294901760, %v4363_v45  ;;  %v4365_v61 = vld [vmem:[#allocation5 + $0x1e0] sm:$0xff] }
 0x348   :  { %19385 = vmatprep.subr.bf16.mxu1 %v25871_v25  ;;  %20249 = vmatprep.subr.bf16.mxu0 %v25871_v25  ;;  %v4417_v6 = vand.u32 4294901760, %v4365_v61  ;;  %v25827_v42 = vand.u32 4294901760, %v24145_v24  ;;  %v11792_v57 = vsub.f32 %v24152_v2, %v25825_v60 }
 0x349   :  { %v24131_v5 = vpack.c.bf16 %v4414_v28, %v4411_v54  ;;  %v24139_v3 = vsub.f32 %v4363_v45, %v4411_v54  ;;  %v24203_v54 = vsub.f32 %v4367_v18, %v4423_v48  ;;  %v25834_v28 = vand.u32 4294901760, %v24169_v26 }
 0x34a   :  { %v24154_v17 = vpack.c.bf16 %v4420_v34, %v4417_v6  ;;  %v24159_v16 = vsub.f32 %v4365_v61, %v4417_v6  ;;  %v25829_v61 = vand.u32 4294901760, %v24166_v36  ;;  %v4512_v58 = vsub.f32 %v24145_v24, %v25827_v42 }
 0x34b   :  { %19387 = vmatpush3.bf16.msra.mxu1 %v23814_v10  ;;  %20251 = vmatpush3.bf16.msra.mxu0 %v23823_v33  ;;  %v24125_v10 = vpack.c.bf16 %v4408_v31, %v4405_v12  ;;  %v24127_v33 = vsub.f32 %v11642_v32, %v11688_v27  ;;  %v11771_v32 = vsub.f32 %v24123_v21, %v11770_v7  ;;  %v25828_v45 = vand.u32 4294901760, %v24139_v3 }
 0x34c   :  { %19388 = vmatprep.subr.bf16.mxu1 %v25871_v25  ;;  %20252 = vmatprep.subr.bf16.mxu0 %v25871_v25  ;;  %v11703_v12 = vand.u32 4294901760, %v11647_v37  ;;  %v25832_v6 = vand.u32 4294901760, %v24159_v16  ;;  %v25830_v18 = vand.u32 4294901760, %v24185_v0  ;;  %v11793_v51 = vand.u32 4294901760, %v11792_v57 }
 0x34d   :  { %v11777_v41 = vand.u32 4294901760, %v24127_v33  ;;  %v11772_v40 = vand.u32 4294901760, %v11771_v32  ;;  %v4505_v55 = vsub.f32 %v24139_v3, %v25828_v45  ;;  %v11760_v32 = vsub.f32 %v24166_v36, %v25829_v61 }
 0x34e   :  { %v4526_v42 = vsub.f32 %v24161_v53, %v25831_v11  ;;  %v11799_v45 = vsub.f32 %v24185_v0, %v25830_v18  ;;  %v4532_v61 = vand.u32 4294901760, %v24203_v54 }
 0x34f   :  { %19390 = vmatpush3.bf16.msra.mxu1 %v23861_v19  ;;  %20254 = vmatpush3.bf16.msra.mxu0 %v23888_v56  ;;  %v4490_v19 = vand.u32 4294901760, %v24115_v30  ;;  %v4497_v56 = vand.u32 4294901760, %v24121_v35  ;;  %v11778_v39 = vsub.f32 %v24127_v33, %v11777_v41  ;;  %v4506_v60 = vand.u32 4294901760, %v4505_v55 }
 0x350   :  { %19391 = vmatprep.subr.bf16.mxu1 %v25871_v25  ;;  %20255 = vmatprep.subr.bf16.mxu0 %v25871_v25  ;;  %v4527_v11 = vand.u32 4294901760, %v4526_v42 }
 0x351   :  { %v4491_v22 = vsub.f32 %v24115_v30, %v4490_v19  ;;  %v4498_v4 = vsub.f32 %v24121_v35, %v4497_v56  ;;  %v11779_v43 = vand.u32 4294901760, %v11778_v39 }
 0x352   :  { %16947 = vmatmul.mubr.f32.vlgmr.msra.gmra.mrb[0].mxu1 %v23797_v63  ;;  %18315 = vmatmul.mubr.f32.vlgmr.msra.gmra.mrb[0].mxu0 %v23795_v52  ;;  %v4426_v63 = vand.u32 4294901760, %v4368_v20  ;;  %v11648_v52 = vld [vmem:[#allocation5 + $0x4f8] sm:$0xff] }
 0x353   :  { %19393 = vmatpush3.bf16.msra.mxu1 %v24125_v10  ;;  %20257 = vmatpush3.bf16.msra.mxu0 %v24129_v50  ;;  %v11706_v31 = vand.u32 4294901760, %v11648_v52  ;;  %v4492_v9 = vand.u32 4294901760, %v4491_v22  ;;  %v4499_v15 = vand.u32 4294901760, %v4498_v4  ;;  %v24230_v22 = vsub.f32 %v11647_v37, %v11703_v12 }
 0x354   :  { %19394 = vmatprep.subr.bf16.mxu1 %v25871_v25  ;;  %20258 = vmatprep.subr.bf16.mxu0 %v25871_v25  ;;  %v24201_v27 = vpack.c.bf16 %v4426_v63, %v4423_v48  ;;  %v24219_v34 = vsub.f32 %v4368_v20, %v4426_v63  ;;  %v25833_v20 = vand.u32 4294901760, %v24196_v13  ;;  %v4480_v63 = vsub.f32 %v24169_v26, %v25834_v28 }
 0x355   :  { %16965 = vmatprep.mubr.msk.f32.mxu1 %vm21239_vm0, %v25875_v44  ;;  %18333 = vmatprep.mubr.msk.f32.mxu0 %vm21239_vm0, %v25875_v44  ;;  %v24228_v48 = vpack.c.bf16 %v11706_v31, %v11703_v12  ;;  %v24232_v4 = vsub.f32 %v11648_v52, %v11706_v31  ;;  %v19404_v39 = vpack.c.bf16 %v4499_v15, %v4492_v9  ;;  %v4513_v12 = vand.u32 4294901760, %v4512_v58 }
 0x356   :  { %v20268_v37 = vpack.c.bf16 %v11779_v43, %v11772_v40  ;;  %v11786_v52 = vand.u32 4294901760, %v11785_v8  ;;  %v4519_v31 = vsub.f32 %v24159_v16, %v25832_v6  ;;  %v11806_v9 = vsub.f32 %v24196_v13, %v25833_v20 }
 0x357   :  { %19396 = vmatpush3.bf16.msra.mxu1 %v24131_v5  ;;  %20260 = vmatpush3.bf16.msra.mxu0 %v24141_v1  ;;  %v4539_v15 = vand.u32 4294901760, %v24219_v34  ;;  %v11812_v40 = vand.u32 4294901760, %v24230_v22  ;;  %v11819_v55 = vand.u32 4294901760, %v24232_v4  ;;  %v4481_v43 = vand.u32 4294901760, %v4480_v63 }
 0x358   :  { %19397 = vmatprep.subr.bf16.mxu1 %v25871_v25  ;;  %20261 = vmatprep.subr.bf16.mxu0 %v25871_v25  ;;  %v11761_v58 = vand.u32 4294901760, %v11760_v32  ;;  %v19407_v8 = vpack.c.bf16 %v4513_v12, %v4506_v60  ;;  %v4520_v57 = vand.u32 4294901760, %v4519_v31  ;;  %v20271_v18 = vpack.c.bf16 %v11793_v51, %v11786_v52 }
 0x359   :  { %v11800_v6 = vand.u32 4294901760, %v11799_v45  ;;  %v4533_v20 = vsub.f32 %v24203_v54, %v4532_v61  ;;  %v11807_v28 = vand.u32 4294901760, %v11806_v9  ;;  %v4540_v63 = vsub.f32 %v24219_v34, %v4539_v15 }
 0x35a   :  { %v11813_v60 = vsub.f32 %v24230_v22, %v11812_v40  ;;  %v11820_v42 = vsub.f32 %v24232_v4, %v11819_v55  ;;  %v19410_v45 = vpack.c.bf16 %v4527_v11, %v4520_v57  ;;  %v26069_v11 = vld [vmem:[#allocation35_spill] sm:$0xff]  ;;  %v19419_v57 = vpack.c.bf16 %v24145_v24, %v24139_v3 }
 0x35b   :  { %19399 = vmatpush3.bf16.msra.mxu1 %v24154_v17  ;;  %20263 = vmatpush3.bf16.msra.mxu0 %v24163_v46  ;;  %v4534_v51 = vand.u32 4294901760, %v4533_v20  ;;  %v20274_v32 = vpack.c.bf16 %v11807_v28, %v11800_v6  ;;  %vm6154_vm3 = vcmp.eq.s32.totalorder %v26069_v11, %v22919_v47  ;;  %vm13434_vm4 = vcmp.eq.s32.totalorder %v26069_v11, %v22921_v59 }
 0x35c   :  { %19400 = vmatprep.subr.bf16.mxu1 %v25871_v25  ;;  %20264 = vmatprep.subr.bf16.mxu0 %v25871_v25  ;;  %v11821_v12 = vand.u32 4294901760, %v11820_v42  ;;  %v14743_v28 = vsel %vm6154_vm3, 1.0, %v25875_v44  ;;  %v14839_v6 = vsel %vm13434_vm4, 1.0, %v25875_v44  ;;  %v20280_v20 = vpack.c.bf16 %v24127_v33, %v24123_v21  ;;  %v26071_v42 = vld [vmem:[#allocation37_spill] sm:$0xff] }
 0x35d   :  { %v21118_v9 = vpack.i.bf16 %v14839_v6, %v14743_v28  ;;  %vm6156_vm7 = vcmp.eq.s32.totalorder %v26071_v42, %v22919_v47  ;;  %vm13436_vm8 = vcmp.eq.s32.totalorder %v26071_v42, %v22921_v59  ;;  %v19425_v11 = vpack.c.bf16 %v24219_v34, %v24203_v54  ;;  %v12247_v54 = vld [vmem:[#allocation5 + $0x500] sm:$0xff] }
 0x35e   :  { %v20289_v28 = vpack.c.bf16 %v24232_v4, %v24230_v22  ;;  %v26079_v21 = vand.u32 4294901760, %v24139_v3  ;;  %v26080_v33 = vand.u32 4294901760, %v24145_v24  ;;  %v26083_v3 = vand.u32 4294901760, %v24159_v16  ;;  %v12249_v4 = vld [vmem:[#allocation5 + $0x510] sm:$0xff] }
 0x35f   :  { %19402 = vmatpush3.bf16.msra.mxu1 %v24201_v27  ;;  %20266 = vmatpush3.bf16.msra.mxu0 %v24228_v48  ;;  %v26084_v24 = vand.u32 4294901760, %v24161_v53  ;;  %v21096_v34 = vunpack.i.h.bf16 %v24083_v23  ;;  %v21093_v22 = vunpack.i.l.bf16 %v24083_v23  ;;  %v12252_v23 = vld [vmem:[#allocation5 + $0x528] sm:$0xff] }
 0x360   :  { %19403 = vmatprep.subr.bf16.mxu1 %v25871_v25  ;;  %20267 = vmatprep.subr.bf16.mxu0 %v25871_v25 }
 0x361   :  { %21119 = vxpose.xlu0.b32.start [1/8] (short) (narrow) %v21118_v9, 8 }
 0x362   :  { %16966 = vmatmul.mubr.f32.vlgmr.msra.gmra.mrb[0].mxu1 %v4481_v43  ;;  %18334 = vmatmul.mubr.f32.vlgmr.msra.gmra.mrb[0].mxu0 %v11761_v58  ;;  %v26070_v43 = vld [vmem:[#allocation36_spill] sm:$0xff] }
 0x363   :  { %19405 = vmatpush3.bf16.msra.mxu1 %v19404_v39  ;;  %20269 = vmatpush3.bf16.msra.mxu0 %v20268_v37  ;;  %v4541_v39 = vand.u32 4294901760, %v4540_v63  ;;  %v11814_v37 = vand.u32 4294901760, %v11813_v60  ;;  %vm6155_vm5 = vcmp.eq.s32.totalorder %v26070_v43, %v22919_v47  ;;  %vm13435_vm6 = vcmp.eq.s32.totalorder %v26070_v43, %v22921_v59  ;;  %v26074_v43 = vld [vmem:[#allocation40_spill] sm:$0xff] }
 0x364   :  { %19406 = vmatprep.subr.bf16.mxu1 %v25871_v25  ;;  %20270 = vmatprep.subr.bf16.mxu0 %v25871_v25  ;;  %v14744_v58 = vsel %vm6155_vm5, 1.0, %v25875_v44  ;;  %v20283_v63 = vpack.c.bf16 %v24152_v2, %v24150_v62  ;;  %vm6159_vm13 = vcmp.eq.s32.totalorder %v26074_v43, %v22919_v47  ;;  %vm13439_vm14 = vcmp.eq.s32.totalorder %v26074_v43, %v22921_v59 }
 0x365   :  { %16984 = vmatprep.mubr.msk.f32.mxu1 %vm21239_vm0, %v25875_v44  ;;  %18352 = vmatprep.mubr.msk.f32.mxu0 %vm21239_vm0, %v25875_v44  ;;  %v19413_v52 = vpack.c.bf16 %v4541_v39, %v4534_v51  ;;  %v20277_v31 = vpack.c.bf16 %v11821_v12, %v11814_v37  ;;  %v14841_v51 = vsel %vm13436_vm8, 1.0, %v25875_v44  ;;  %v20286_v39 = vpack.c.bf16 %v24196_v13, %v24185_v0  ;;  %v26072_v12 = vld [vmem:[#allocation38_spill] sm:$0xff] }
 0x366   :  { %vm6157_vm9 = vcmp.eq.s32.totalorder %v26072_v12, %v22919_v47  ;;  %vm13437_vm10 = vcmp.eq.s32.totalorder %v26072_v12, %v22921_v59  ;;  %v12297_v43 = vand.u32 4294901760, %v12249_v4  ;;  %vm6760_vm5 = vcmp.eq.s32.totalorder %v22554_v29, %v22919_v47 }
 0x367   :  { %19408 = vmatpush3.bf16.msra.mxu1 %v19407_v8  ;;  %20272 = vmatpush3.bf16.msra.mxu0 %v20271_v18  ;;  %v19416_v18 = vpack.c.bf16 %v24121_v35, %v24115_v30  ;;  %v14840_v8 = vsel %vm13435_vm6, 1.0, %v25875_v44  ;;  %v26078_v30 = vand.u32 4294901760, %v24166_v36  ;;  %vm14040_vm6 = vcmp.eq.s32.totalorder %v22554_v29, %v22921_v59 }
 0x368   :  { %19409 = vmatprep.subr.bf16.mxu1 %v25871_v25  ;;  %20273 = vmatprep.subr.bf16.mxu0 %v25871_v25  ;;  %v21120_v60 = vpack.i.bf16 %v14840_v8, %v14744_v58  ;;  %v14748_v8 = vsel %vm6159_vm13, 1.0, %v25875_v44  ;;  %vm14041_vm8 = vcmp.eq.s32.totalorder %v22569_v49, %v22921_v59 }
 0x36a   :  { %21121 = vxpose.xlu0.b32.cont [2/8] (short) (narrow) %v21120_v60, 8 }
 0x36b   :  { %19411 = vmatpush3.bf16.msra.mxu1 %v19410_v45  ;;  %20275 = vmatpush3.bf16.msra.mxu0 %v20274_v32  ;;  %v14745_v45 = vsel %vm6156_vm7, 1.0, %v25875_v44  ;;  %v19422_v32 = vpack.c.bf16 %v24161_v53, %v24159_v16  ;;  %v19449_v16 = vpack.c.bf16 %v4539_v15, %v4532_v61  ;;  %v20313_v53 = vpack.c.bf16 %v11819_v55, %v11812_v40  ;;  %v4969_v61 = vld [vmem:[#allocation5 + $0x210] sm:$0xff]  ;;  %v12250_v15 = vld [vmem:[#allocation5 + $0x518] sm:$0xff] }
 0x36c   :  { %19412 = vmatprep.subr.bf16.mxu1 %v25871_v25  ;;  %20276 = vmatprep.subr.bf16.mxu0 %v25871_v25  ;;  %v21122_v37 = vpack.i.bf16 %v14841_v51, %v14745_v45  ;;  %vm6761_vm7 = vcmp.eq.s32.totalorder %v22569_v49, %v22919_v47  ;;  %v26087_v49 = vld [vmem:[#allocation43_spill] sm:$0xff] }
 0x36d   :  { %v14752_v29 = vsel %vm6761_vm7, 1.0, %v25875_v44 }
 0x36e   :  { %21123 = vxpose.xlu0.b32.cont [3/8] (short) (narrow) %v21122_v37, 8  ;;  %v20304_v37 = vpack.c.bf16 %v11777_v41, %v11770_v7  ;;  %v26082_v7 = vand.u32 4294901760, %v24152_v2  ;;  %v26085_v2 = vand.u32 4294901760, %v24185_v0  ;;  %v4967_v0 = vld [vmem:[#allocation5 + $0x200] sm:$0xff] }
 0x36f   :  { %19414 = vmatpush3.bf16.msra.mxu1 %v19413_v52  ;;  %20278 = vmatpush3.bf16.msra.mxu0 %v20277_v31  ;;  %v14746_v52 = vsel %vm6157_vm9, 1.0, %v25875_v44  ;;  %v14842_v31 = vsel %vm13437_vm10, 1.0, %v25875_v44  ;;  %v5011_v40 = vand.u32 4294901760, %v4967_v0  ;;  %vm6762_vm9 = vcmp.eq.s32.totalorder %v26087_v49, %v22919_v47 }
 0x370   :  { %19415 = vmatprep.subr.bf16.mxu1 %v25871_v25  ;;  %20279 = vmatprep.subr.bf16.mxu0 %v25871_v25  ;;  %v21124_v6 = vpack.i.bf16 %v14842_v31, %v14746_v52  ;;  %v26077_v31 = vand.u32 4294901760, %v24169_v26  ;;  %vm14042_vm10 = vcmp.eq.s32.totalorder %v26087_v49, %v22921_v59 }
 0x372   :  { %16985 = vmatmul.mubr.f32.vlgmr.msra.gmra.mrb[0].mxu1 %v24137_v14  ;;  %18353 = vmatmul.mubr.f32.vlgmr.msra.gmra.mrb[0].mxu0 %v24135_v38 }
 0x373   :  { %19417 = vmatpush3.bf16.msra.mxu1 %v19416_v18  ;;  %20281 = vmatpush3.bf16.msra.mxu0 %v20280_v20  ;;  %v26073_v18 = vld [vmem:[#allocation39_spill] sm:$0xff] }
 0x374   :  { %19418 = vmatprep.subr.bf16.mxu1 %v25871_v25  ;;  %20282 = vmatprep.subr.bf16.mxu0 %v25871_v25  ;;  %vm6158_vm11 = vcmp.eq.s32.totalorder %v26073_v18, %v22919_v47  ;;  %vm13438_vm12 = vcmp.eq.s32.totalorder %v26073_v18, %v22921_v59 }
 0x375   :  { %17003 = vmatprep.mubr.msk.f32.mxu1 %vm21239_vm0, %v25875_v44  ;;  %18371 = vmatprep.mubr.msk.f32.mxu0 %vm21239_vm0, %v25875_v44  ;;  %v14747_v20 = vsel %vm6158_vm11, 1.0, %v25875_v44  ;;  %v14843_v9 = vsel %vm13438_vm12, 1.0, %v25875_v44 }
 0x376   :  { %21125 = vxpose.xlu0.b32.cont [4/8] (short) (narrow) %v21124_v6, 8  ;;  %v21126_v58 = vpack.i.bf16 %v14843_v9, %v14747_v20  ;;  %v4972_v20 = vld [vmem:[#allocation5 + $0x228] sm:$0xff]  ;;  %v24455_v9 = vsub.f32 %v4967_v0, %v5011_v40  ;;  %v12253_v0 = vld [vmem:[#allocation5 + $0x530] sm:$0xff] }
 0x377   :  { %19420 = vmatpush3.bf16.msra.mxu1 %v19419_v57  ;;  %20284 = vmatpush3.bf16.msra.mxu0 %v20283_v63  ;;  %v14844_v57 = vsel %vm13439_vm14, 1.0, %v25875_v44  ;;  %v26075_v63 = vld [vmem:[#allocation41_spill] sm:$0xff] }
 0x378   :  { %19421 = vmatprep.subr.bf16.mxu1 %v25871_v25  ;;  %20285 = vmatprep.subr.bf16.mxu0 %v25871_v25  ;;  %vm6160_vm15 = vcmp.eq.s32.totalorder %v26075_v63, %v22919_v47  ;;  %vm13440_vm1 = vcmp.eq.s32.totalorder %v26075_v63, %v22921_v59  ;;  %v21128_v60 = vpack.i.bf16 %v14844_v57, %v14748_v8  ;;  %v12251_v8 = vld [vmem:[#allocation5 + $0x520] sm:$0xff]  ;;  %v12288_v57 = vsel %vm157_vm2, %v21096_v34, 0 }
 0x379   :  { %v14749_v42 = vsel %vm6160_vm15, 1.0, %v25875_v44  ;;  %v14845_v45 = vsel %vm13440_vm1, 1.0, %v25875_v44  ;;  %v5008_v63 = vsel %vm157_vm2, %v21093_v22, 0 }
 0x37a   :  { %21127 = vxpose.xlu0.b32.cont [5/8] (short) (narrow) %v21126_v58, 8  ;;  %v21130_v51 = vpack.i.bf16 %v14845_v45, %v14749_v42  ;;  %v12300_v58 = vand.u32 4294901760, %v12250_v15 }
 0x37b   :  { %19423 = vmatpush3.bf16.msra.mxu1 %v19422_v32  ;;  %20287 = vmatpush3.bf16.msra.mxu0 %v20286_v39  ;;  %v26076_v32 = vld [vmem:[#allocation42_spill] sm:$0xff]  ;;  %v19440_v39 = vpack.c.bf16 %v4497_v56, %v4490_v19  ;;  %v19443_v19 = vpack.c.bf16 %v26080_v33, %v26079_v21  ;;  %v26081_v56 = vand.u32 4294901760, %v24150_v62  ;;  %v19446_v62 = vpack.c.bf16 %v26084_v24, %v26083_v3  ;;  %v4973_v33 = vld [vmem:[#allocation5 + $0x230] sm:$0xff] }
 0x37c   :  { %19424 = vmatprep.subr.bf16.mxu1 %v25871_v25  ;;  %20288 = vmatprep.subr.bf16.mxu0 %v25871_v25  ;;  %vm6161_vm3 = vcmp.eq.s32.totalorder %v26076_v32, %v22919_v47  ;;  %vm13441_vm4 = vcmp.eq.s32.totalorder %v26076_v32, %v22921_v59 }
 0x37d   :  { %v14750_v12 = vsel %vm6161_vm3, 1.0, %v25875_v44  ;;  %v14846_v52 = vsel %vm13441_vm4, 1.0, %v25875_v44  ;;  %v20307_v41 = vpack.c.bf16 %v26082_v7, %v26081_v56  ;;  %v24490_v7 = vsub.f32 %v12249_v4, %v12297_v43 }
 0x37e   :  { %21129 = vxpose.xlu0.b32.cont [6/8] (short) (narrow) %v21128_v60, 8  ;;  %v21132_v35 = vpack.i.bf16 %v14846_v52, %v14750_v12  ;;  %v12306_v12 = vand.u32 4294901760, %v12252_v23  ;;  %v24475_v52 = vand.u32 4294901760, %v12288_v57 }
 0x37f   :  { %19426 = vmatpush3.bf16.msra.mxu1 %v19425_v11  ;;  %20290 = vmatpush3.bf16.msra.mxu0 %v20289_v28  ;;  %v12291_v28 = vand.u32 4294901760, %v12247_v54  ;;  %v25836_v4 = vand.u32 4294901760, %v24490_v7 }
 0x380   :  { %19427 = vmatprep.subr.bf16.mxu1 %v25871_v25  ;;  %20291 = vmatprep.subr.bf16.mxu0 %v25871_v25 }
 0x381   :  { %v24463_v42 = vsub.f32 %v12247_v54, %v12291_v28 }
 0x382   :  { %17004 = vmatmul.mubr.f32.vlgmr.msra.gmra.mrb[0].mxu1 %v24169_v26  ;;  %18372 = vmatmul.mubr.f32.vlgmr.msra.gmra.mrb[0].mxu0 %v24166_v36  ;;  %v26086_v36 = vand.u32 4294901760, %v24196_v13  ;;  %v4968_v13 = vld [vmem:[#allocation5 + $0x208] sm:$0xff] }
 0x383   :  { %19429 = vmatpush3.bf16.msra.mxu1 %v24125_v10  ;;  %20293 = vmatpush3.bf16.msra.mxu0 %v24129_v50  ;;  %v5014_v55 = vand.u32 4294901760, %v4968_v13  ;;  %v12376_v56 = vand.u32 4294901760, %v24463_v42 }
 0x384   :  { %19430 = vmatprep.subr.bf16.mxu1 %v25871_v25  ;;  %20294 = vmatprep.subr.bf16.mxu0 %v25871_v25  ;;  %v20310_v26 = vpack.c.bf16 %v26086_v36, %v26085_v2 }
 0x385   :  { %17022 = vmatprep.mubr.msk.f32.mxu1 %vm21239_vm0, %v25875_v44  ;;  %18390 = vmatprep.mubr.msk.f32.mxu0 %vm21239_vm0, %v25875_v44  ;;  %v24461_v60 = vsub.f32 %v4968_v13, %v5014_v55 }
 0x386   :  { %21131 = vxpose.xlu0.b32.cont [7/8] (short) (narrow) %v21130_v51, 8  ;;  %v5026_v51 = vand.u32 4294901760, %v4972_v20 }
 0x387   :  { %19432 = vmatpush3.bf16.msra.mxu1 %v24131_v5  ;;  %20296 = vmatpush3.bf16.msra.mxu0 %v24141_v1 }
 0x388   :  { %19433 = vmatprep.subr.bf16.mxu1 %v25871_v25  ;;  %20297 = vmatprep.subr.bf16.mxu0 %v25871_v25  ;;  %v24501_v2 = vsub.f32 %v4972_v20, %v5026_v51 }
 0x38a   :  { %21133 = vxpose.xlu0.b32.end [8/8] (short) (narrow) %v21132_v35, 8  ;;  %v24481_v35 = vpack.c.bf16 %v12300_v58, %v12297_v43 }
 0x38b   :  { %19435 = vmatpush3.bf16.msra.mxu1 %v24154_v17  ;;  %20299 = vmatpush3.bf16.msra.mxu0 %v24163_v46 }
 0x38c   :  { %19436 = vmatprep.subr.bf16.mxu1 %v25871_v25  ;;  %20300 = vmatprep.subr.bf16.mxu0 %v25871_v25 }
 0x38e   :  { %v24423_v11 = vpop.trf.xlu1 }
 0x38f   :  { %19438 = vmatpush3.bf16.msra.mxu1 %v24201_v27  ;;  %20302 = vmatpush3.bf16.msra.mxu0 %v24228_v48 }
 0x390   :  { %19439 = vmatprep.subr.bf16.mxu1 %v25871_v25  ;;  %20303 = vmatprep.subr.bf16.mxu0 %v25871_v25 }
 0x392   :  { %17023 = vmatmul.mubr.f32.vlgmr.msra.gmra.mrb[0].mxu1 %v26077_v31  ;;  %18391 = vmatmul.mubr.f32.vlgmr.msra.gmra.mrb[0].mxu0 %v26078_v30  ;;  %v24477_v31 = vand.u32 4294901760, %v5008_v63 }
 0x393   :  { %19441 = vmatpush3.bf16.msra.mxu1 %v19440_v39  ;;  %20305 = vmatpush3.bf16.msra.mxu0 %v20304_v37  ;;  %v12303_v37 = vand.u32 4294901760, %v12251_v8 }
 0x394   :  { %19442 = vmatprep.subr.bf16.mxu1 %v25871_v25  ;;  %20306 = vmatprep.subr.bf16.mxu0 %v25871_v25 }
 0x395   :  { %17041 = vmatprep.mubr.msk.f32.mxu1 %vm21239_vm0, %v25875_v44  ;;  %18409 = vmatprep.mubr.msk.f32.mxu0 %vm21239_vm0, %v25875_v44  ;;  %v24503_v36 = vpack.c.bf16 %v12306_v12, %v12303_v37 }
 0x397   :  { %19444 = vmatpush3.bf16.msra.mxu1 %v19443_v19  ;;  %20308 = vmatpush3.bf16.msra.mxu0 %v20307_v41  ;;  %v4974_v19 = vld [vmem:[#allocation5 + $0x238] sm:$0xff]  ;;  %v24492_v41 = vsub.f32 %v12250_v15, %v12300_v58  ;;  %v24536_v15 = vsub.f32 %v12252_v23, %v12306_v12  ;;  %v25841_v12 = vand.u32 4294901760, %v24501_v2 }
 0x398   :  { %19445 = vmatprep.subr.bf16.mxu1 %v25871_v25  ;;  %20309 = vmatprep.subr.bf16.mxu0 %v25871_v25 }
 0x39b   :  { %19447 = vmatpush3.bf16.msra.mxu1 %v19446_v62  ;;  %20311 = vmatpush3.bf16.msra.mxu0 %v20310_v26  ;;  %v24506_v26 = vsub.f32 %v12288_v57, %v24475_v52 }
 0x39c   :  { %19448 = vmatprep.subr.bf16.mxu1 %v25871_v25  ;;  %20312 = vmatprep.subr.bf16.mxu0 %v25871_v25 }
 0x39f   :  { %19450 = vmatpush3.bf16.msra.mxu1 %v19449_v16  ;;  %20314 = vmatpush3.bf16.msra.mxu0 %v20313_v53  ;;  %v24509_v16 = vsub.f32 %v5008_v63, %v24477_v31  ;;  %v5029_v53 = vand.u32 4294901760, %v4973_v33  ;;  %v12391_v63 = vsub.f32 %v24490_v7, %v25836_v4 }
 0x3a0   :  { %19451 = vmatprep.subr.bf16.mxu1 %v25871_v25  ;;  %20315 = vmatprep.subr.bf16.mxu0 %v25871_v25 }
 0x3a2   :  { %17042 = vmatmul.mubr.f32.vlgmr.msra.gmra.mrb[0].mxu1 %v24137_v14  ;;  %18410 = vmatmul.mubr.f32.vlgmr.msra.gmra.mrb[0].mxu0 %v24135_v38 }
 0x3a3   :  { %19453 = vmatpush3.bf16.msra.mxu1 %v24125_v10  ;;  %20317 = vmatpush3.bf16.msra.mxu0 %v24129_v50  ;;  %v12248_v10 = vld [vmem:[#allocation5 + $0x508] sm:$0xff]  ;;  %v4970_v50 = vld [vmem:[#allocation5 + $0x218] sm:$0xff] }
 0x3a4   :  { %19454 = vmatprep.subr.bf16.mxu1 %v25871_v25  ;;  %20318 = vmatprep.subr.bf16.mxu0 %v25871_v25  ;;  %v12294_v6 = vand.u32 4294901760, %v12248_v10  ;;  %v5020_v18 = vand.u32 4294901760, %v4970_v50 }
 0x3a5   :  { %17060 = vmatprep.mubr.msk.f32.mxu1 %vm21239_vm0, %v25875_v44  ;;  %18428 = vmatprep.mubr.msk.f32.mxu0 %vm21239_vm0, %v25875_v44 }
 0x3a6   :  { %v24469_v32 = vpack.c.bf16 %v12294_v6, %v12291_v28  ;;  %v24485_v21 = vsub.f32 %v4970_v50, %v5020_v18  ;;  %v24525_v50 = vsub.f32 %v12251_v8, %v12303_v37  ;;  %v25835_v28 = vand.u32 4294901760, %v24492_v41 }
 0x3a7   :  { %19456 = vmatpush3.bf16.msra.mxu1 %v24131_v5  ;;  %20320 = vmatpush3.bf16.msra.mxu0 %v24141_v1  ;;  %v5017_v5 = vand.u32 4294901760, %v4969_v61  ;;  %v4971_v1 = vld [vmem:[#allocation5 + $0x220] sm:$0xff] }
 0x3a8   :  { %19457 = vmatprep.subr.bf16.mxu1 %v25871_v25  ;;  %20321 = vmatprep.subr.bf16.mxu0 %v25871_v25  ;;  %v5023_v45 = vand.u32 4294901760, %v4971_v1  ;;  %v25837_v22 = vand.u32 4294901760, %v24485_v21  ;;  %v12398_v37 = vsub.f32 %v24492_v41, %v25835_v28 }
 0x3a9   :  { %v24471_v39 = vpack.c.bf16 %v5020_v18, %v5017_v5  ;;  %v24479_v30 = vsub.f32 %v4969_v61, %v5017_v5  ;;  %v24543_v5 = vsub.f32 %v4973_v33, %v5029_v53  ;;  %v25844_v18 = vand.u32 4294901760, %v24509_v16 }
 0x3aa   :  { %v24494_v3 = vpack.c.bf16 %v5026_v51, %v5023_v45  ;;  %v24499_v62 = vsub.f32 %v4971_v1, %v5023_v45  ;;  %v25839_v1 = vand.u32 4294901760, %v24506_v26  ;;  %v5118_v57 = vsub.f32 %v24485_v21, %v25837_v22 }
 0x3ab   :  { %19459 = vmatpush3.bf16.msra.mxu1 %v24154_v17  ;;  %20323 = vmatpush3.bf16.msra.mxu0 %v24163_v46  ;;  %v24465_v17 = vpack.c.bf16 %v5014_v55, %v5011_v40  ;;  %v24467_v46 = vsub.f32 %v12248_v10, %v12294_v6  ;;  %v12377_v10 = vsub.f32 %v24463_v42, %v12376_v56  ;;  %v25838_v61 = vand.u32 4294901760, %v24479_v30 }
 0x3ac   :  { %19460 = vmatprep.subr.bf16.mxu1 %v25871_v25  ;;  %20324 = vmatprep.subr.bf16.mxu0 %v25871_v25  ;;  %v12309_v40 = vand.u32 4294901760, %v12253_v0  ;;  %v25842_v45 = vand.u32 4294901760, %v24499_v62  ;;  %v25840_v33 = vand.u32 4294901760, %v24525_v50  ;;  %v12399_v4 = vand.u32 4294901760, %v12398_v37 }
 0x3ad   :  { %v12383_v24 = vand.u32 4294901760, %v24467_v46  ;;  %v12378_v58 = vand.u32 4294901760, %v12377_v10  ;;  %v5111_v8 = vsub.f32 %v24479_v30, %v25838_v61  ;;  %v12366_v10 = vsub.f32 %v24506_v26, %v25839_v1 }
 0x3ae   :  { %v5132_v22 = vsub.f32 %v24501_v2, %v25841_v12  ;;  %v12405_v61 = vsub.f32 %v24525_v50, %v25840_v33  ;;  %v5138_v1 = vand.u32 4294901760, %v24543_v5 }
 0x3af   :  { %19462 = vmatpush3.bf16.msra.mxu1 %v24201_v27  ;;  %20326 = vmatpush3.bf16.msra.mxu0 %v24228_v48  ;;  %v5096_v27 = vand.u32 4294901760, %v24455_v9  ;;  %v5103_v48 = vand.u32 4294901760, %v24461_v60  ;;  %v12384_v34 = vsub.f32 %v24467_v46, %v12383_v24  ;;  %v5112_v28 = vand.u32 4294901760, %v5111_v8 }
 0x3b0   :  { %19463 = vmatprep.subr.bf16.mxu1 %v25871_v25  ;;  %20327 = vmatprep.subr.bf16.mxu0 %v25871_v25  ;;  %v5133_v12 = vand.u32 4294901760, %v5132_v22 }
 0x3b1   :  { %v5097_v13 = vsub.f32 %v24455_v9, %v5096_v27  ;;  %v5104_v54 = vsub.f32 %v24461_v60, %v5103_v48  ;;  %v12385_v23 = vand.u32 4294901760, %v12384_v34 }
 0x3b2   :  { %17061 = vmatmul.mubr.f32.vlgmr.msra.gmra.mrb[0].mxu1 %v24137_v14  ;;  %18429 = vmatmul.mubr.f32.vlgmr.msra.gmra.mrb[0].mxu0 %v24135_v38  ;;  %v5032_v14 = vand.u32 4294901760, %v4974_v19  ;;  %v12254_v38 = vld [vmem:[#allocation5 + $0x538] sm:$0xff] }
 0x3b3   :  { %19465 = vmatpush3.bf16.msra.mxu1 %v24465_v17  ;;  %20329 = vmatpush3.bf16.msra.mxu0 %v24469_v32  ;;  %v12312_v55 = vand.u32 4294901760, %v12254_v38  ;;  %v5098_v20 = vand.u32 4294901760, %v5097_v13  ;;  %v5105_v43 = vand.u32 4294901760, %v5104_v54  ;;  %v24570_v13 = vsub.f32 %v12253_v0, %v12309_v40 }
 0x3b4   :  { %19466 = vmatprep.subr.bf16.mxu1 %v25871_v25  ;;  %20330 = vmatprep.subr.bf16.mxu0 %v25871_v25  ;;  %v24541_v6 = vpack.c.bf16 %v5032_v14, %v5029_v53  ;;  %v24559_v51 = vsub.f32 %v4974_v19, %v5032_v14  ;;  %v25843_v19 = vand.u32 4294901760, %v24536_v15  ;;  %v5086_v14 = vsub.f32 %v24509_v16, %v25844_v18 }
 0x3b5   :  { %17079 = vmatprep.mubr.msk.f32.mxu1 %vm21239_vm0, %v25875_v44  ;;  %18447 = vmatprep.mubr.msk.f32.mxu0 %vm21239_vm0, %v25875_v44  ;;  %v24568_v53 = vpack.c.bf16 %v12312_v55, %v12309_v40  ;;  %v24572_v54 = vsub.f32 %v12254_v38, %v12312_v55  ;;  %v19476_v34 = vpack.c.bf16 %v5105_v43, %v5098_v20  ;;  %v5119_v40 = vand.u32 4294901760, %v5118_v57 }
 0x3b6   :  { %v20340_v0 = vpack.c.bf16 %v12385_v23, %v12378_v58  ;;  %v12392_v38 = vand.u32 4294901760, %v12391_v63  ;;  %v5125_v55 = vsub.f32 %v24499_v62, %v25842_v45  ;;  %v12412_v20 = vsub.f32 %v24536_v15, %v25843_v19 }
 0x3b7   :  { %19468 = vmatpush3.bf16.msra.mxu1 %v24471_v39  ;;  %20332 = vmatpush3.bf16.msra.mxu0 %v24481_v35  ;;  %v5145_v43 = vand.u32 4294901760, %v24559_v51  ;;  %v12418_v58 = vand.u32 4294901760, %v24570_v13  ;;  %v12425_v8 = vand.u32 4294901760, %v24572_v54  ;;  %v5087_v23 = vand.u32 4294901760, %v5086_v14 }
 0x3b8   :  { %19469 = vmatprep.subr.bf16.mxu1 %v25871_v25  ;;  %20333 = vmatprep.subr.bf16.mxu0 %v25871_v25  ;;  %v12367_v57 = vand.u32 4294901760, %v12366_v10  ;;  %v19479_v63 = vpack.c.bf16 %v5119_v40, %v5112_v28  ;;  %v5126_v37 = vand.u32 4294901760, %v5125_v55  ;;  %v20343_v33 = vpack.c.bf16 %v12399_v4, %v12392_v38 }
 0x3b9   :  { %v12406_v45 = vand.u32 4294901760, %v12405_v61  ;;  %v5139_v19 = vsub.f32 %v24543_v5, %v5138_v1  ;;  %v12413_v18 = vand.u32 4294901760, %v12412_v20  ;;  %v5146_v14 = vsub.f32 %v24559_v51, %v5145_v43 }
 0x3ba   :  { %v12419_v28 = vsub.f32 %v24570_v13, %v12418_v58  ;;  %v12426_v22 = vsub.f32 %v24572_v54, %v12425_v8  ;;  %v19482_v61 = vpack.c.bf16 %v5133_v12, %v5126_v37  ;;  %v19488_v12 = vpack.c.bf16 %v24461_v60, %v24455_v9 }
 0x3bb   :  { %19471 = vmatpush3.bf16.msra.mxu1 %v24494_v3  ;;  %20335 = vmatpush3.bf16.msra.mxu0 %v24503_v36  ;;  %v5140_v4 = vand.u32 4294901760, %v5139_v19  ;;  %v20346_v10 = vpack.c.bf16 %v12413_v18, %v12406_v45  ;;  %v14751_v18 = vsel %vm6760_vm5, 1.0, %v25875_v44  ;;  %v14847_v45 = vsel %vm14040_vm6, 1.0, %v25875_v44 }
 0x3bc   :  { %19472 = vmatprep.subr.bf16.mxu1 %v25871_v25  ;;  %20336 = vmatprep.subr.bf16.mxu0 %v25871_v25  ;;  %v12427_v40 = vand.u32 4294901760, %v12426_v22  ;;  %v21139_v19 = vpack.i.bf16 %v14847_v45, %v14751_v18  ;;  %v14848_v20 = vsel %vm14041_vm8, 1.0, %v25875_v44  ;;  %v14753_v37 = vsel %vm6762_vm9, 1.0, %v25875_v44 }
 0x3bd   :  { %v20358_v22 = vpack.c.bf16 %v24536_v15, %v24525_v50  ;;  %v26094_v9 = vand.u32 4294901760, %v24506_v26 }
 0x3be   :  { %21140 = vxpose.xlu1.b32.start [1/8] (short) (narrow) %v21139_v19, 8 }
 0x3bf   :  { %19474 = vmatpush3.bf16.msra.mxu1 %v24541_v6  ;;  %20338 = vmatpush3.bf16.msra.mxu0 %v24568_v53 }
 0x3c0   :  { %19475 = vmatprep.subr.bf16.mxu1 %v25871_v25  ;;  %20339 = vmatprep.subr.bf16.mxu0 %v25871_v25 }
 0x3c2   :  { %17080 = vmatmul.mubr.f32.vlgmr.msra.gmra.mrb[0].mxu1 %v5087_v23  ;;  %18448 = vmatmul.mubr.f32.vlgmr.msra.gmra.mrb[0].mxu0 %v12367_v57  ;;  %v19491_v23 = vpack.c.bf16 %v24485_v21, %v24479_v30  ;;  %v20355_v57 = vpack.c.bf16 %v24492_v41, %v24490_v7 }
 0x3c3   :  { %19477 = vmatpush3.bf16.msra.mxu1 %v19476_v34  ;;  %20341 = vmatpush3.bf16.msra.mxu0 %v20340_v0  ;;  %v5147_v34 = vand.u32 4294901760, %v5146_v14  ;;  %v12420_v0 = vand.u32 4294901760, %v12419_v28  ;;  %v14849_v14 = vsel %vm14042_vm10, 1.0, %v25875_v44  ;;  %v19494_v28 = vpack.c.bf16 %v24501_v2, %v24499_v62 }
 0x3c4   :  { %19478 = vmatprep.subr.bf16.mxu1 %v25871_v25  ;;  %20342 = vmatprep.subr.bf16.mxu0 %v25871_v25 }
 0x3c5   :  { %17098 = vmatprep.mubr.msk.f32.mxu1 %vm21239_vm0, %v25875_v44  ;;  %18466 = vmatprep.mubr.msk.f32.mxu0 %vm21239_vm0, %v25875_v44  ;;  %v19485_v38 = vpack.c.bf16 %v5147_v34, %v5140_v4  ;;  %v20349_v55 = vpack.c.bf16 %v12427_v40, %v12420_v0  ;;  %v26088_v4 = vld [vmem:[#allocation44_spill] sm:$0xff]  ;;  %v19497_v0 = vpack.c.bf16 %v24559_v51, %v24543_v5  ;;  %v12853_v5 = vld [vmem:[#allocation5 + $0x540] sm:$0xff]  ;;  %v21117_v51 = vunpack.i.h.bf16 %v24423_v11 }
 0x3c6   :  { %vm6763_vm11 = vcmp.eq.s32.totalorder %v26088_v4, %v22919_v47  ;;  %vm14043_vm12 = vcmp.eq.s32.totalorder %v26088_v4, %v22921_v59  ;;  %v20361_v40 = vpack.c.bf16 %v24572_v54, %v24570_v13  ;;  %v21114_v13 = vunpack.i.l.bf16 %v24423_v11  ;;  %v12855_v54 = vld [vmem:[#allocation5 + $0x550] sm:$0xff]  ;;  %v12858_v11 = vld [vmem:[#allocation5 + $0x568] sm:$0xff] }
 0x3c7   :  { %19480 = vmatpush3.bf16.msra.mxu1 %v19479_v63  ;;  %20344 = vmatpush3.bf16.msra.mxu0 %v20343_v33  ;;  %v20352_v33 = vpack.c.bf16 %v24467_v46, %v24463_v42  ;;  %v21141_v63 = vpack.i.bf16 %v14848_v20, %v14752_v29  ;;  %v14850_v34 = vsel %vm14043_vm12, 1.0, %v25875_v44  ;;  %v26091_v20 = vld [vmem:[#allocation47_spill] sm:$0xff]  ;;  %v26095_v42 = vand.u32 4294901760, %v24479_v30 }
 0x3c8   :  { %19481 = vmatprep.subr.bf16.mxu1 %v25871_v25  ;;  %20345 = vmatprep.subr.bf16.mxu0 %v25871_v25  ;;  %vm6766_vm3 = vcmp.eq.s32.totalorder %v26091_v20, %v22919_v47  ;;  %vm14046_vm4 = vcmp.eq.s32.totalorder %v26091_v20, %v22921_v59  ;;  %v26096_v46 = vand.u32 4294901760, %v24485_v21  ;;  %v26099_v30 = vand.u32 4294901760, %v24499_v62 }
 0x3c9   :  { %21142 = vxpose.xlu1.b32.cont [2/8] (short) (narrow) %v21141_v63, 8  ;;  %v14853_v63 = vsel %vm14046_vm4, 1.0, %v25875_v44  ;;  %v26100_v21 = vand.u32 4294901760, %v24501_v2  ;;  %v19521_v62 = vpack.c.bf16 %v5145_v43, %v5138_v1  ;;  %v20385_v2 = vpack.c.bf16 %v12425_v8, %v12418_v58  ;;  %v5575_v1 = vld [vmem:[#allocation5 + $0x250] sm:$0xff]  ;;  %v12856_v43 = vld [vmem:[#allocation5 + $0x558] sm:$0xff] }
 0x3ca   :  { %v12897_v4 = vand.u32 4294901760, %v12853_v5 }
 0x3cb   :  { %19483 = vmatpush3.bf16.msra.mxu1 %v19482_v61  ;;  %20347 = vmatpush3.bf16.msra.mxu0 %v20346_v10  ;;  %v21143_v61 = vpack.i.bf16 %v14849_v14, %v14753_v37  ;;  %v14754_v10 = vsel %vm6763_vm11, 1.0, %v25875_v44  ;;  %v26092_v37 = vld [vmem:[#allocation48_spill] sm:$0xff]  ;;  %v19512_v14 = vpack.c.bf16 %v5103_v48, %v5096_v27  ;;  %v19515_v27 = vpack.c.bf16 %v26096_v46, %v26095_v42 }
 0x3cc   :  { %19484 = vmatprep.subr.bf16.mxu1 %v25871_v25  ;;  %20348 = vmatprep.subr.bf16.mxu0 %v25871_v25  ;;  %vm6767_vm5 = vcmp.eq.s32.totalorder %v26092_v37, %v22919_v47  ;;  %vm14047_vm6 = vcmp.eq.s32.totalorder %v26092_v37, %v22921_v59  ;;  %v26097_v48 = vand.u32 4294901760, %v24490_v7  ;;  %v19518_v7 = vpack.c.bf16 %v26100_v21, %v26099_v30 }
 0x3cd   :  { %21144 = vxpose.xlu1.b32.cont [3/8] (short) (narrow) %v21143_v61, 8 }
 0x3cf   :  { %19486 = vmatpush3.bf16.msra.mxu1 %v19485_v38  ;;  %20350 = vmatpush3.bf16.msra.mxu0 %v20349_v55  ;;  %v21145_v38 = vpack.i.bf16 %v14850_v34, %v14754_v10  ;;  %v26089_v55 = vld [vmem:[#allocation45_spill] sm:$0xff] }
 0x3d0   :  { %19487 = vmatprep.subr.bf16.mxu1 %v25871_v25  ;;  %20351 = vmatprep.subr.bf16.mxu0 %v25871_v25  ;;  %vm6764_vm13 = vcmp.eq.s32.totalorder %v26089_v55, %v22919_v47  ;;  %vm14044_vm14 = vcmp.eq.s32.totalorder %v26089_v55, %v22921_v59  ;;  %v12906_v55 = vand.u32 4294901760, %v12856_v43 }
 0x3d1   :  { %21146 = vxpose.xlu1.b32.cont [4/8] (short) (narrow) %v21145_v38, 8  ;;  %v14755_v18 = vsel %vm6764_vm13, 1.0, %v25875_v44  ;;  %v14851_v45 = vsel %vm14044_vm14, 1.0, %v25875_v44  ;;  %v12903_v38 = vand.u32 4294901760, %v12855_v54 }
 0x3d2   :  { %17099 = vmatmul.mubr.f32.vlgmr.msra.gmra.mrb[0].mxu1 %v24477_v31  ;;  %18467 = vmatmul.mubr.f32.vlgmr.msra.gmra.mrb[0].mxu0 %v24475_v52  ;;  %v24832_v46 = vsub.f32 %v12856_v43, %v12906_v55 }
 0x3d3   :  { %19489 = vmatpush3.bf16.msra.mxu1 %v19488_v12  ;;  %20353 = vmatpush3.bf16.msra.mxu0 %v20352_v33  ;;  %v26090_v12 = vld [vmem:[#allocation46_spill] sm:$0xff]  ;;  %v21147_v33 = vpack.i.bf16 %v14851_v45, %v14755_v18  ;;  %v12894_v45 = vsel %vm157_vm2, %v21117_v51, 0  ;;  %v24830_v42 = vsub.f32 %v12855_v54, %v12903_v38 }
 0x3d4   :  { %19490 = vmatprep.subr.bf16.mxu1 %v25871_v25  ;;  %20354 = vmatprep.subr.bf16.mxu0 %v25871_v25  ;;  %vm6765_vm15 = vcmp.eq.s32.totalorder %v26090_v12, %v22919_v47  ;;  %vm14045_vm1 = vcmp.eq.s32.totalorder %v26090_v12, %v22921_v59  ;;  %v14758_v47 = vsel %vm6767_vm5, 1.0, %v25875_v44  ;;  %v26093_v59 = vand.u32 4294901760, %v24509_v16  ;;  %v12857_v18 = vld [vmem:[#allocation5 + $0x560] sm:$0xff] }
 0x3d5   :  { %17117 = vmatprep.mubr.msk.f32.mxu1 %vm21239_vm0, %v25875_v44  ;;  %18485 = vmatprep.mubr.msk.f32.mxu0 %vm21239_vm0, %v25875_v44  ;;  %v14756_v19 = vsel %vm6765_vm15, 1.0, %v25875_v44  ;;  %v14852_v29 = vsel %vm14045_vm1, 1.0, %v25875_v44  ;;  %v5614_v12 = vsel %vm157_vm2, %v21114_v13, 0  ;;  %v24815_v37 = vand.u32 4294901760, %v12894_v45 }
 0x3d6   :  { %21148 = vxpose.xlu1.b32.cont [5/8] (short) (narrow) %v21147_v33, 8  ;;  %v25845_v54 = vand.u32 4294901760, %v24832_v46 }
 0x3d7   :  { %19492 = vmatpush3.bf16.msra.mxu1 %v19491_v23  ;;  %20356 = vmatpush3.bf16.msra.mxu0 %v20355_v57  ;;  %v21149_v23 = vpack.i.bf16 %v14852_v29, %v14756_v19  ;;  %v14757_v57 = vsel %vm6766_vm3, 1.0, %v25875_v44  ;;  %v24803_v19 = vsub.f32 %v12853_v5, %v12897_v4  ;;  %v24846_v21 = vsub.f32 %v12894_v45, %v24815_v37 }
 0x3d8   :  { %19493 = vmatprep.subr.bf16.mxu1 %v25871_v25  ;;  %20357 = vmatprep.subr.bf16.mxu0 %v25871_v25  ;;  %v21151_v49 = vpack.i.bf16 %v14853_v63, %v14757_v57  ;;  %v12909_v63 = vand.u32 4294901760, %v12857_v18  ;;  %v13004_v45 = vsub.f32 %v24832_v46, %v25845_v54 }
 0x3da   :  { %21150 = vxpose.xlu1.b32.cont [6/8] (short) (narrow) %v21149_v23, 8 }
 0x3db   :  { %19495 = vmatpush3.bf16.msra.mxu1 %v19494_v28  ;;  %20359 = vmatpush3.bf16.msra.mxu0 %v20358_v22  ;;  %v20376_v28 = vpack.c.bf16 %v12383_v24, %v12376_v56  ;;  %v14854_v22 = vsel %vm14047_vm6, 1.0, %v25875_v44  ;;  %v26098_v56 = vand.u32 4294901760, %v24492_v41  ;;  %v26101_v41 = vand.u32 4294901760, %v24525_v50  ;;  %v5573_v50 = vld [vmem:[#allocation5 + $0x240] sm:$0xff] }
 0x3dc   :  { %19496 = vmatprep.subr.bf16.mxu1 %v25871_v25  ;;  %20360 = vmatprep.subr.bf16.mxu0 %v25871_v25  ;;  %v21153_v60 = vpack.i.bf16 %v14854_v22, %v14758_v47  ;;  %v5617_v58 = vand.u32 4294901760, %v5573_v50  ;;  %v24821_v47 = vpack.c.bf16 %v12906_v55, %v12903_v38 }
 0x3dd   :  { %v20379_v24 = vpack.c.bf16 %v26098_v56, %v26097_v48 }
 0x3de   :  { %21152 = vxpose.xlu1.b32.cont [7/8] (short) (narrow) %v21151_v49, 8  ;;  %v12912_v49 = vand.u32 4294901760, %v12858_v11 }
 0x3df   :  { %19498 = vmatpush3.bf16.msra.mxu1 %v19497_v0  ;;  %20362 = vmatpush3.bf16.msra.mxu0 %v20361_v40  ;;  %v5578_v0 = vld [vmem:[#allocation5 + $0x268] sm:$0xff]  ;;  %v24795_v40 = vsub.f32 %v5573_v50, %v5617_v58 }
 0x3e0   :  { %19499 = vmatprep.subr.bf16.mxu1 %v25871_v25  ;;  %20363 = vmatprep.subr.bf16.mxu0 %v25871_v25  ;;  %v5632_v20 = vand.u32 4294901760, %v5578_v0  ;;  %v24843_v30 = vpack.c.bf16 %v12912_v49, %v12909_v63 }
 0x3e2   :  { %17118 = vmatmul.mubr.f32.vlgmr.msra.gmra.mrb[0].mxu1 %v24509_v16  ;;  %18486 = vmatmul.mubr.f32.vlgmr.msra.gmra.mrb[0].mxu0 %v24506_v26  ;;  %v26102_v26 = vand.u32 4294901760, %v24536_v15  ;;  %v5574_v15 = vld [vmem:[#allocation5 + $0x248] sm:$0xff] }
 0x3e3   :  { %19501 = vmatpush3.bf16.msra.mxu1 %v24465_v17  ;;  %20365 = vmatpush3.bf16.msra.mxu0 %v24469_v32  ;;  %v5620_v8 = vand.u32 4294901760, %v5574_v15 }
 0x3e4   :  { %19502 = vmatprep.subr.bf16.mxu1 %v25871_v25  ;;  %20366 = vmatprep.subr.bf16.mxu0 %v25871_v25  ;;  %v20382_v16 = vpack.c.bf16 %v26102_v26, %v26101_v41  ;;  %v12859_v26 = vld [vmem:[#allocation5 + $0x570] sm:$0xff] }
 0x3e5   :  { %17136 = vmatprep.mubr.msk.f32.mxu1 %vm21239_vm0, %v25875_v44  ;;  %18504 = vmatprep.mubr.msk.f32.mxu0 %vm21239_vm0, %v25875_v44  ;;  %v24801_v33 = vsub.f32 %v5574_v15, %v5620_v8  ;;  %v24865_v15 = vsub.f32 %v12857_v18, %v12909_v63  ;;  %v12915_v51 = vand.u32 4294901760, %v12859_v26 }
 0x3e6   :  { %21154 = vxpose.xlu1.b32.end [8/8] (short) (narrow) %v21153_v60, 8  ;;  %v12982_v60 = vand.u32 4294901760, %v24803_v19 }
 0x3e7   :  { %19504 = vmatpush3.bf16.msra.mxu1 %v24471_v39  ;;  %20368 = vmatpush3.bf16.msra.mxu0 %v24481_v35  ;;  %v24910_v63 = vsub.f32 %v12859_v26, %v12915_v51 }
 0x3e8   :  { %19505 = vmatprep.subr.bf16.mxu1 %v25871_v25  ;;  %20369 = vmatprep.subr.bf16.mxu0 %v25871_v25 }
 0x3eb   :  { %19507 = vmatpush3.bf16.msra.mxu1 %v24494_v3  ;;  %20371 = vmatpush3.bf16.msra.mxu0 %v24503_v36 }
 0x3ec   :  { %19508 = vmatprep.subr.bf16.mxu1 %v25871_v25  ;;  %20372 = vmatprep.subr.bf16.mxu0 %v25871_v25 }
 0x3ee   :  { %v24763_v61 = vpop.trf.xlu0 }
 0x3ef   :  { %19510 = vmatpush3.bf16.msra.mxu1 %v24541_v6  ;;  %20374 = vmatpush3.bf16.msra.mxu0 %v24568_v53 }
 0x3f0   :  { %19511 = vmatprep.subr.bf16.mxu1 %v25871_v25  ;;  %20375 = vmatprep.subr.bf16.mxu0 %v25871_v25 }
 0x3f2   :  { %17137 = vmatmul.mubr.f32.vlgmr.msra.gmra.mrb[0].mxu1 %v26093_v59  ;;  %18505 = vmatmul.mubr.f32.vlgmr.msra.gmra.mrb[0].mxu0 %v26094_v9  ;;  %v5579_v59 = vld [vmem:[#allocation5 + $0x270] sm:$0xff]  ;;  %v5580_v9 = vld [vmem:[#allocation5 + $0x278] sm:$0xff] }
 0x3f3   :  { %19513 = vmatpush3.bf16.msra.mxu1 %v19512_v14  ;;  %20377 = vmatpush3.bf16.msra.mxu0 %v20376_v28  ;;  %v24817_v14 = vand.u32 4294901760, %v5614_v12  ;;  %v5635_v41 = vand.u32 4294901760, %v5579_v59 }
 0x3f4   :  { %19514 = vmatprep.subr.bf16.mxu1 %v25871_v25  ;;  %20378 = vmatprep.subr.bf16.mxu0 %v25871_v25 }
 0x3f5   :  { %17155 = vmatprep.mubr.msk.f32.mxu1 %vm21239_vm0, %v25875_v44  ;;  %18523 = vmatprep.mubr.msk.f32.mxu0 %vm21239_vm0, %v25875_v44 }
 0x3f7   :  { %19516 = vmatpush3.bf16.msra.mxu1 %v19515_v27  ;;  %20380 = vmatpush3.bf16.msra.mxu0 %v20379_v24  ;;  %v24841_v24 = vsub.f32 %v5578_v0, %v5632_v20 }
 0x3f8   :  { %19517 = vmatprep.subr.bf16.mxu1 %v25871_v25  ;;  %20381 = vmatprep.subr.bf16.mxu0 %v25871_v25 }
 0x3fb   :  { %19519 = vmatpush3.bf16.msra.mxu1 %v19518_v7  ;;  %20383 = vmatpush3.bf16.msra.mxu0 %v20382_v16  ;;  %v24849_v7 = vsub.f32 %v5614_v12, %v24817_v14  ;;  %v25847_v12 = vand.u32 4294901760, %v24841_v24 }
 0x3fc   :  { %19520 = vmatprep.subr.bf16.mxu1 %v25871_v25  ;;  %20384 = vmatprep.subr.bf16.mxu0 %v25871_v25 }
 0x3ff   :  { %19522 = vmatpush3.bf16.msra.mxu1 %v19521_v62  ;;  %20386 = vmatpush3.bf16.msra.mxu0 %v20385_v2  ;;  %v12983_v2 = vsub.f32 %v24803_v19, %v12982_v60 }
 0x400   :  { %19523 = vmatprep.subr.bf16.mxu1 %v25871_v25  ;;  %20387 = vmatprep.subr.bf16.mxu0 %v25871_v25 }
 0x402   :  { %17156 = vmatmul.mubr.f32.vlgmr.msra.gmra.mrb[0].mxu1 %v24477_v31  ;;  %18524 = vmatmul.mubr.f32.vlgmr.msra.gmra.mrb[0].mxu0 %v24475_v52 }
 0x403   :  { %19525 = vmatpush3.bf16.msra.mxu1 %v24465_v17  ;;  %20389 = vmatpush3.bf16.msra.mxu0 %v24469_v32  ;;  %v12854_v17 = vld [vmem:[#allocation5 + $0x548] sm:$0xff]  ;;  %v5576_v32 = vld [vmem:[#allocation5 + $0x258] sm:$0xff] }
 0x404   :  { %19526 = vmatprep.subr.bf16.mxu1 %v25871_v25  ;;  %20390 = vmatprep.subr.bf16.mxu0 %v25871_v25  ;;  %v12900_v10 = vand.u32 4294901760, %v12854_v17  ;;  %v5626_v34 = vand.u32 4294901760, %v5576_v32 }
 0x405   :  { %17174 = vmatprep.mubr.msk.f32.mxu1 %vm21239_vm0, %v25875_v44  ;;  %18542 = vmatprep.mubr.msk.f32.mxu0 %vm21239_vm0, %v25875_v44 }
 0x406   :  { %v24809_v23 = vpack.c.bf16 %v12900_v10, %v12897_v4  ;;  %v24825_v22 = vsub.f32 %v5576_v32, %v5626_v34  ;;  %v24876_v32 = vsub.f32 %v12858_v11, %v12912_v49  ;;  %v12971_v4 = vand.u32 4294901760, %v24846_v21 }
 0x407   :  { %19528 = vmatpush3.bf16.msra.mxu1 %v24471_v39  ;;  %20392 = vmatpush3.bf16.msra.mxu0 %v24481_v35  ;;  %v5623_v39 = vand.u32 4294901760, %v5575_v1  ;;  %v5577_v35 = vld [vmem:[#allocation5 + $0x260] sm:$0xff] }
 0x408   :  { %19529 = vmatprep.subr.bf16.mxu1 %v25871_v25  ;;  %20393 = vmatprep.subr.bf16.mxu0 %v25871_v25  ;;  %v5629_v29 = vand.u32 4294901760, %v5577_v35 }
 0x409   :  { %v24811_v57 = vpack.c.bf16 %v5626_v34, %v5623_v39  ;;  %v24819_v28 = vsub.f32 %v5575_v1, %v5623_v39  ;;  %v25850_v1 = vand.u32 4294901760, %v24830_v42  ;;  %v12984_v34 = vand.u32 4294901760, %v12983_v2 }
 0x40a   :  { %v24834_v27 = vpack.c.bf16 %v5632_v20, %v5629_v29  ;;  %v24839_v56 = vsub.f32 %v5577_v35, %v5629_v29  ;;  %v25846_v29 = vand.u32 4294901760, %v24865_v15 }
 0x40b   :  { %19531 = vmatpush3.bf16.msra.mxu1 %v24494_v3  ;;  %20395 = vmatpush3.bf16.msra.mxu0 %v24503_v36  ;;  %v24805_v3 = vpack.c.bf16 %v5620_v8, %v5617_v58  ;;  %v24807_v36 = vsub.f32 %v12854_v17, %v12900_v10  ;;  %v5716_v50 = vand.u32 4294901760, %v24819_v28  ;;  %v5723_v17 = vand.u32 4294901760, %v24825_v22 }
 0x40c   :  { %19532 = vmatprep.subr.bf16.mxu1 %v25871_v25  ;;  %20396 = vmatprep.subr.bf16.mxu0 %v25871_v25  ;;  %v24883_v58 = vsub.f32 %v5579_v59, %v5635_v41  ;;  %v5691_v8 = vand.u32 4294901760, %v24849_v7  ;;  %v12997_v55 = vsub.f32 %v24830_v42, %v25850_v1  ;;  %v25848_v18 = vand.u32 4294901760, %v24839_v56 }
 0x40d   :  { %v12989_v48 = vand.u32 4294901760, %v24807_v36  ;;  %v5717_v35 = vsub.f32 %v24819_v28, %v5716_v50  ;;  %v5724_v38 = vsub.f32 %v24825_v22, %v5723_v17  ;;  %v25849_v59 = vand.u32 4294901760, %v24876_v32 }
 0x40e   :  { %v5731_v2 = vsub.f32 %v24839_v56, %v25848_v18  ;;  %v5744_v54 = vand.u32 4294901760, %v24883_v58 }
 0x40f   :  { %19534 = vmatpush3.bf16.msra.mxu1 %v24541_v6  ;;  %20398 = vmatpush3.bf16.msra.mxu0 %v24568_v53  ;;  %v5702_v6 = vand.u32 4294901760, %v24795_v40  ;;  %v5709_v53 = vand.u32 4294901760, %v24801_v33  ;;  %v12990_v5 = vsub.f32 %v24807_v36, %v12989_v48 }
 0x410   :  { %19535 = vmatprep.subr.bf16.mxu1 %v25871_v25  ;;  %20399 = vmatprep.subr.bf16.mxu0 %v25871_v25 }
 0x411   :  { %v5703_v16 = vsub.f32 %v24795_v40, %v5702_v6  ;;  %v5710_v62 = vsub.f32 %v24801_v33, %v5709_v53  ;;  %v12991_v0 = vand.u32 4294901760, %v12990_v5  ;;  %v13005_v5 = vand.u32 4294901760, %v13004_v45 }
 0x412   :  { %17175 = vmatmul.mubr.f32.vlgmr.msra.gmra.mrb[0].mxu1 %v24477_v31  ;;  %18543 = vmatmul.mubr.f32.vlgmr.msra.gmra.mrb[0].mxu0 %v24475_v52  ;;  %v5638_v31 = vand.u32 4294901760, %v5580_v9  ;;  %v12860_v52 = vld [vmem:[#allocation5 + $0x578] sm:$0xff]  ;;  %v5732_v45 = vand.u32 4294901760, %v5731_v2 }
 0x413   :  { %19537 = vmatpush3.bf16.msra.mxu1 %v24805_v3  ;;  %20401 = vmatpush3.bf16.msra.mxu0 %v24809_v23  ;;  %v12918_v13 = vand.u32 4294901760, %v12860_v52  ;;  %v5704_v10 = vand.u32 4294901760, %v5703_v16  ;;  %v5711_v39 = vand.u32 4294901760, %v5710_v62  ;;  %v5718_v16 = vand.u32 4294901760, %v5717_v35 }
 0x414   :  { %19538 = vmatprep.subr.bf16.mxu1 %v25871_v25  ;;  %20402 = vmatprep.subr.bf16.mxu0 %v25871_v25  ;;  %v24881_v43 = vpack.c.bf16 %v5638_v31, %v5635_v41  ;;  %v24899_v11 = vsub.f32 %v5580_v9, %v5638_v31  ;;  %v5692_v9 = vsub.f32 %v24849_v7, %v5691_v8  ;;  %v5725_v62 = vand.u32 4294901760, %v5724_v38 }
 0x415   :  { %17193 = vmatprep.mubr.msk.f32.mxu1 %vm21239_vm0, %v25875_v44  ;;  %18561 = vmatprep.mubr.msk.f32.mxu0 %vm21239_vm0, %v25875_v44  ;;  %v24908_v20 = vpack.c.bf16 %v12918_v13, %v12915_v51  ;;  %v24912_v49 = vsub.f32 %v12860_v52, %v12918_v13  ;;  %v12972_v41 = vsub.f32 %v24846_v21, %v12971_v4  ;;  %v12998_v52 = vand.u32 4294901760, %v12997_v55 }
 0x416   :  { %v19548_v31 = vpack.c.bf16 %v5711_v39, %v5704_v10  ;;  %v20412_v26 = vpack.c.bf16 %v12991_v0, %v12984_v34  ;;  %v5738_v51 = vsub.f32 %v24841_v24, %v25847_v12  ;;  %v13011_v13 = vsub.f32 %v24865_v15, %v25846_v29 }
 0x417   :  { %19540 = vmatpush3.bf16.msra.mxu1 %v24811_v57  ;;  %20404 = vmatpush3.bf16.msra.mxu0 %v24821_v47  ;;  %v13018_v10 = vsub.f32 %v24876_v32, %v25849_v59  ;;  %v5751_v39 = vand.u32 4294901760, %v24899_v11  ;;  %v13024_v34 = vand.u32 4294901760, %v24910_v63  ;;  %v13031_v35 = vand.u32 4294901760, %v24912_v49 }
 0x418   :  { %19541 = vmatprep.subr.bf16.mxu1 %v25871_v25  ;;  %20405 = vmatprep.subr.bf16.mxu0 %v25871_v25  ;;  %v5693_v0 = vand.u32 4294901760, %v5692_v9  ;;  %v12973_v38 = vand.u32 4294901760, %v12972_v41  ;;  %v19551_v55 = vpack.c.bf16 %v5725_v62, %v5718_v16  ;;  %v20415_v29 = vpack.c.bf16 %v13005_v5, %v12998_v52 }
 0x419   :  { %v5739_v12 = vand.u32 4294901760, %v5738_v51  ;;  %v13012_v18 = vand.u32 4294901760, %v13011_v13  ;;  %v5745_v59 = vsub.f32 %v24883_v58, %v5744_v54  ;;  %v13019_v1 = vand.u32 4294901760, %v13018_v10 }
 0x41a   :  { %v5752_v9 = vsub.f32 %v24899_v11, %v5751_v39  ;;  %v13025_v41 = vsub.f32 %v24910_v63, %v13024_v34  ;;  %v13032_v16 = vsub.f32 %v24912_v49, %v13031_v35  ;;  %v20430_v10 = vpack.c.bf16 %v24876_v32, %v24865_v15 }
 0x41b   :  { %19543 = vmatpush3.bf16.msra.mxu1 %v24834_v27  ;;  %20407 = vmatpush3.bf16.msra.mxu0 %v24843_v30  ;;  %v20418_v62 = vpack.c.bf16 %v13019_v1, %v13012_v18  ;;  %v19560_v1 = vpack.c.bf16 %v24801_v33, %v24795_v40  ;;  %v20424_v18 = vpack.c.bf16 %v24807_v36, %v24803_v19  ;;  %v26103_v33 = vand.u32 4294901760, %v24830_v42 }
 0x41c   :  { %19544 = vmatprep.subr.bf16.mxu1 %v25871_v25  ;;  %20408 = vmatprep.subr.bf16.mxu0 %v25871_v25  ;;  %v5753_v52 = vand.u32 4294901760, %v5752_v9  ;;  %v13026_v2 = vand.u32 4294901760, %v13025_v41  ;;  %v13033_v5 = vand.u32 4294901760, %v13032_v16  ;;  %v19587_v40 = vpack.c.bf16 %v5723_v17, %v5716_v50  ;;  %v6181_v50 = vld [vmem:[#allocation5 + $0x290] sm:$0xff]  ;;  %v13463_v9 = vld [vmem:[#allocation5 + $0x5a0] sm:$0xff] }
 0x41d   :  { %v26104_v19 = vand.u32 4294901760, %v24832_v46  ;;  %v21135_v17 = vunpack.i.l.bf16 %v24763_v61 }
 0x41e   :  { %v20421_v13 = vpack.c.bf16 %v13033_v5, %v13026_v2 }
 0x41f   :  { %19546 = vmatpush3.bf16.msra.mxu1 %v24881_v43  ;;  %20410 = vmatpush3.bf16.msra.mxu0 %v24908_v20  ;;  %v20451_v36 = vpack.c.bf16 %v26104_v19, %v26103_v33  ;;  %v6220_v16 = vsel %vm157_vm2, %v21135_v17, 0 }
 0x420   :  { %19547 = vmatprep.subr.bf16.mxu1 %v25871_v25  ;;  %20411 = vmatprep.subr.bf16.mxu0 %v25871_v25 }
 0x422   :  { %17194 = vmatmul.mubr.f32.vlgmr.msra.gmra.mrb[0].mxu1 %v5693_v0  ;;  %18562 = vmatmul.mubr.f32.vlgmr.msra.gmra.mrb[0].mxu0 %v12973_v38  ;;  %v19569_v0 = vpack.c.bf16 %v24899_v11, %v24883_v58  ;;  %v20433_v38 = vpack.c.bf16 %v24912_v49, %v24910_v63  ;;  %v6184_v49 = vld [vmem:[#allocation5 + $0x2a8] sm:$0xff] }
 0x423   :  { %19549 = vmatpush3.bf16.msra.mxu1 %v19548_v31  ;;  %20413 = vmatpush3.bf16.msra.mxu0 %v20412_v26  ;;  %v19554_v31 = vpack.c.bf16 %v5739_v12, %v5732_v45  ;;  %v5746_v26 = vand.u32 4294901760, %v5745_v59  ;;  %v19563_v12 = vpack.c.bf16 %v24825_v22, %v24819_v28  ;;  %v19566_v59 = vpack.c.bf16 %v24841_v24, %v24839_v56 }
 0x424   :  { %19550 = vmatprep.subr.bf16.mxu1 %v25871_v25  ;;  %20414 = vmatprep.subr.bf16.mxu0 %v25871_v25  ;;  %v20448_v45 = vpack.c.bf16 %v12989_v48, %v12982_v60  ;;  %v26105_v28 = vand.u32 4294901760, %v24839_v56  ;;  %v26106_v22 = vand.u32 4294901760, %v24841_v24  ;;  %v26108_v60 = vand.u32 4294901760, %v24876_v32  ;;  %v6179_v24 = vld [vmem:[#allocation5 + $0x280] sm:$0xff]  ;;  %v13461_v32 = vld [vmem:[#allocation5 + $0x590] sm:$0xff] }
 0x425   :  { %17212 = vmatprep.mubr.msk.f32.mxu1 %vm21239_vm0, %v25875_v44  ;;  %18580 = vmatprep.mubr.msk.f32.mxu0 %vm21239_vm0, %v25875_v44  ;;  %v19557_v51 = vpack.c.bf16 %v5753_v52, %v5746_v26  ;;  %v19593_v48 = vpack.c.bf16 %v5751_v39, %v5744_v54  ;;  %v20457_v56 = vpack.c.bf16 %v13031_v35, %v13024_v34  ;;  %v13462_v54 = vld [vmem:[#allocation5 + $0x598] sm:$0xff]  ;;  %v6223_v58 = vand.u32 4294901760, %v6179_v24 }
 0x426   :  { %v13509_v34 = vand.u32 4294901760, %v13461_v32  ;;  %v13512_v35 = vand.u32 4294901760, %v13462_v54  ;;  %v6238_v52 = vand.u32 4294901760, %v6184_v49 }
 0x427   :  { %19552 = vmatpush3.bf16.msra.mxu1 %v19551_v55  ;;  %20416 = vmatpush3.bf16.msra.mxu0 %v20415_v29  ;;  %v20427_v29 = vpack.c.bf16 %v24832_v46, %v24830_v42  ;;  %v19584_v55 = vpack.c.bf16 %v5709_v53, %v5702_v6  ;;  %v19590_v6 = vpack.c.bf16 %v26106_v22, %v26105_v28  ;;  %v26107_v53 = vand.u32 4294901760, %v24865_v15 }
 0x428   :  { %19553 = vmatprep.subr.bf16.mxu1 %v25871_v25  ;;  %20417 = vmatprep.subr.bf16.mxu0 %v25871_v25  ;;  %v21138_v15 = vunpack.i.h.bf16 %v24763_v61  ;;  %v25087_v39 = vsub.f32 %v6179_v24, %v6223_v58  ;;  %v13464_v61 = vld [vmem:[#allocation5 + $0x5a8] sm:$0xff] }
 0x429   :  { %v20454_v42 = vpack.c.bf16 %v26108_v60, %v26107_v53  ;;  %v13465_v60 = vld [vmem:[#allocation5 + $0x5b0] sm:$0xff] }
 0x42a   :  { %v13500_v41 = vsel %vm157_vm2, %v21138_v15, 0  ;;  %v13521_v15 = vand.u32 4294901760, %v13465_v60 }
 0x42b   :  { %19555 = vmatpush3.bf16.msra.mxu1 %v19554_v31  ;;  %20419 = vmatpush3.bf16.msra.mxu0 %v20418_v62 }
 0x42c   :  { %19556 = vmatprep.subr.bf16.mxu1 %v25871_v25  ;;  %20420 = vmatprep.subr.bf16.mxu0 %v25871_v25 }
 0x42f   :  { %19558 = vmatpush3.bf16.msra.mxu1 %v19557_v51  ;;  %20422 = vmatpush3.bf16.msra.mxu0 %v20421_v13  ;;  %v13515_v51 = vand.u32 4294901760, %v13463_v9  ;;  %v13518_v13 = vand.u32 4294901760, %v13464_v61 }
 0x430   :  { %19559 = vmatprep.subr.bf16.mxu1 %v25871_v25  ;;  %20423 = vmatprep.subr.bf16.mxu0 %v25871_v25 }
 0x431   :  { %v25135_v28 = vpack.c.bf16 %v13518_v13, %v13515_v51 }
 0x432   :  { %17213 = vmatmul.mubr.f32.vlgmr.msra.gmra.mrb[0].mxu1 %v24817_v14  ;;  %18581 = vmatmul.mubr.f32.vlgmr.msra.gmra.mrb[0].mxu0 %v24815_v37 }
 0x433   :  { %19561 = vmatpush3.bf16.msra.mxu1 %v19560_v1  ;;  %20425 = vmatpush3.bf16.msra.mxu0 %v20424_v18  ;;  %v25107_v1 = vand.u32 4294901760, %v13500_v41  ;;  %v25109_v18 = vand.u32 4294901760, %v6220_v16 }
 0x434   :  { %19562 = vmatprep.subr.bf16.mxu1 %v25871_v25  ;;  %20426 = vmatprep.subr.bf16.mxu0 %v25871_v25 }
 0x435   :  { %17231 = vmatprep.mubr.msk.f32.mxu1 %vm21239_vm0, %v25875_v44  ;;  %18599 = vmatprep.mubr.msk.f32.mxu0 %vm21239_vm0, %v25875_v44  ;;  %v25138_v22 = vsub.f32 %v13500_v41, %v25107_v1 }
 0x437   :  { %19564 = vmatpush3.bf16.msra.mxu1 %v19563_v12  ;;  %20428 = vmatpush3.bf16.msra.mxu0 %v20427_v29  ;;  %v25113_v29 = vpack.c.bf16 %v13512_v35, %v13509_v34 }
 0x438   :  { %19565 = vmatprep.subr.bf16.mxu1 %v25871_v25  ;;  %20429 = vmatprep.subr.bf16.mxu0 %v25871_v25 }
 0x43b   :  { %19567 = vmatpush3.bf16.msra.mxu1 %v19566_v59  ;;  %20431 = vmatpush3.bf16.msra.mxu0 %v20430_v10  ;;  %v6185_v10 = vld [vmem:[#allocation5 + $0x2b0] sm:$0xff] }
 0x43c   :  { %19568 = vmatprep.subr.bf16.mxu1 %v25871_v25  ;;  %20432 = vmatprep.subr.bf16.mxu0 %v25871_v25  ;;  %v6241_v53 = vand.u32 4294901760, %v6185_v10 }
 0x43f   :  { %19570 = vmatpush3.bf16.msra.mxu1 %v19569_v0  ;;  %20434 = vmatpush3.bf16.msra.mxu0 %v20433_v38  ;;  %v6186_v0 = vld [vmem:[#allocation5 + $0x2b8] sm:$0xff] }
 0x440   :  { %19571 = vmatprep.subr.bf16.mxu1 %v25871_v25  ;;  %20435 = vmatprep.subr.bf16.mxu0 %v25871_v25 }
 0x442   :  { %17232 = vmatmul.mubr.f32.vlgmr.msra.gmra.mrb[0].mxu1 %v24849_v7  ;;  %18600 = vmatmul.mubr.f32.vlgmr.msra.gmra.mrb[0].mxu0 %v24846_v21  ;;  %v6180_v21 = vld [vmem:[#allocation5 + $0x288] sm:$0xff]  ;;  %v13459_v7 = vld [vmem:[#allocation5 + $0x580] sm:$0xff] }
 0x443   :  { %19573 = vmatpush3.bf16.msra.mxu1 %v24805_v3  ;;  %20437 = vmatpush3.bf16.msra.mxu0 %v24809_v23 }
 0x444   :  { %19574 = vmatprep.subr.bf16.mxu1 %v25871_v25  ;;  %20438 = vmatprep.subr.bf16.mxu0 %v25871_v25 }
 0x445   :  { %17250 = vmatprep.mubr.msk.f32.mxu1 %vm21239_vm0, %v25875_v44  ;;  %18618 = vmatprep.mubr.msk.f32.mxu0 %vm21239_vm0, %v25875_v44 }
 0x447   :  { %19576 = vmatpush3.bf16.msra.mxu1 %v24811_v57  ;;  %20440 = vmatpush3.bf16.msra.mxu0 %v24821_v47 }
 0x448   :  { %19577 = vmatprep.subr.bf16.mxu1 %v25871_v25  ;;  %20441 = vmatprep.subr.bf16.mxu0 %v25871_v25 }
 0x44a   :  { %v25055_v46 = vpop.trf.xlu1 }
 0x44b   :  { %19579 = vmatpush3.bf16.msra.mxu1 %v24834_v27  ;;  %20443 = vmatpush3.bf16.msra.mxu0 %v24843_v30 }
 0x44c   :  { %19580 = vmatprep.subr.bf16.mxu1 %v25871_v25  ;;  %20444 = vmatprep.subr.bf16.mxu0 %v25871_v25 }
 0x44f   :  { %19582 = vmatpush3.bf16.msra.mxu1 %v24881_v43  ;;  %20446 = vmatpush3.bf16.msra.mxu0 %v24908_v20 }
 0x450   :  { %19583 = vmatprep.subr.bf16.mxu1 %v25871_v25  ;;  %20447 = vmatprep.subr.bf16.mxu0 %v25871_v25 }
 0x452   :  { %17251 = vmatmul.mubr.f32.vlgmr.msra.gmra.mrb[0].mxu1 %v5691_v8  ;;  %18619 = vmatmul.mubr.f32.vlgmr.msra.gmra.mrb[0].mxu0 %v12971_v4  ;;  %v6226_v8 = vand.u32 4294901760, %v6180_v21  ;;  %v13503_v4 = vand.u32 4294901760, %v13459_v7 }
 0x453   :  { %19585 = vmatpush3.bf16.msra.mxu1 %v19584_v55  ;;  %20449 = vmatpush3.bf16.msra.mxu0 %v20448_v45  ;;  %v25122_v55 = vsub.f32 %v13461_v32, %v13509_v34  ;;  %v25124_v45 = vsub.f32 %v13462_v54, %v13512_v35 }
 0x454   :  { %19586 = vmatprep.subr.bf16.mxu1 %v25871_v25  ;;  %20450 = vmatprep.subr.bf16.mxu0 %v25871_v25  ;;  %v25093_v31 = vsub.f32 %v6180_v21, %v6226_v8  ;;  %v25095_v26 = vsub.f32 %v13459_v7, %v13503_v4  ;;  %v25157_v21 = vsub.f32 %v13463_v9, %v13515_v51 }
 0x455   :  { %17269 = vmatprep.mubr.msk.f32.mxu1 %vm21239_vm0, %v25875_v44  ;;  %18637 = vmatprep.mubr.msk.f32.mxu0 %vm21239_vm0, %v25875_v44  ;;  %v25851_v32 = vand.u32 4294901760, %v25124_v45  ;;  %v25202_v51 = vsub.f32 %v13465_v60, %v13521_v15 }
 0x456   :  { %v13588_v38 = vand.u32 4294901760, %v25095_v26 }
 0x457   :  { %19588 = vmatpush3.bf16.msra.mxu1 %v19587_v40  ;;  %20452 = vmatpush3.bf16.msra.mxu0 %v20451_v36  ;;  %v25133_v36 = vsub.f32 %v6184_v49, %v6238_v52  ;;  %v13610_v41 = vsub.f32 %v25124_v45, %v25851_v32 }
 0x458   :  { %19589 = vmatprep.subr.bf16.mxu1 %v25871_v25  ;;  %20453 = vmatprep.subr.bf16.mxu0 %v25871_v25 }
 0x45b   :  { %19591 = vmatpush3.bf16.msra.mxu1 %v19590_v6  ;;  %20455 = vmatpush3.bf16.msra.mxu0 %v20454_v42  ;;  %v25141_v6 = vsub.f32 %v6220_v16, %v25109_v18  ;;  %v25853_v16 = vand.u32 4294901760, %v25133_v36 }
 0x45c   :  { %19592 = vmatprep.subr.bf16.mxu1 %v25871_v25  ;;  %20456 = vmatprep.subr.bf16.mxu0 %v25871_v25 }
 0x45f   :  { %19594 = vmatpush3.bf16.msra.mxu1 %v19593_v48  ;;  %20458 = vmatpush3.bf16.msra.mxu0 %v20457_v56  ;;  %v13589_v56 = vsub.f32 %v25095_v26, %v13588_v38 }
 0x460   :  { %19595 = vmatprep.subr.bf16.mxu1 %v25871_v25  ;;  %20459 = vmatprep.subr.bf16.mxu0 %v25871_v25 }
 0x462   :  { %17270 = vmatmul.mubr.f32.vlgmr.msra.gmra.mrb[0].mxu1 %v24817_v14  ;;  %18638 = vmatmul.mubr.f32.vlgmr.msra.gmra.mrb[0].mxu0 %v24815_v37 }
 0x463   :  { %19597 = vmatpush3.bf16.msra.mxu1 %v24805_v3  ;;  %20461 = vmatpush3.bf16.msra.mxu0 %v24809_v23  ;;  %v13460_v3 = vld [vmem:[#allocation5 + $0x588] sm:$0xff]  ;;  %v6182_v23 = vld [vmem:[#allocation5 + $0x298] sm:$0xff] }
 0x464   :  { %19598 = vmatprep.subr.bf16.mxu1 %v25871_v25  ;;  %20462 = vmatprep.subr.bf16.mxu0 %v25871_v25  ;;  %v13506_v11 = vand.u32 4294901760, %v13460_v3  ;;  %v6232_v63 = vand.u32 4294901760, %v6182_v23 }
 0x465   :  { %17288 = vmatprep.mubr.msk.f32.mxu1 %vm21239_vm0, %v25875_v44  ;;  %18656 = vmatprep.mubr.msk.f32.mxu0 %vm21239_vm0, %v25875_v44 }
 0x466   :  { %v25101_v2 = vpack.c.bf16 %v13506_v11, %v13503_v4  ;;  %v25117_v59 = vsub.f32 %v6182_v23, %v6232_v63  ;;  %v25168_v23 = vsub.f32 %v13464_v61, %v13518_v13  ;;  %v13577_v4 = vand.u32 4294901760, %v25138_v22 }
 0x467   :  { %19600 = vmatpush3.bf16.msra.mxu1 %v24811_v57  ;;  %20464 = vmatpush3.bf16.msra.mxu0 %v24821_v47  ;;  %v6229_v57 = vand.u32 4294901760, %v6181_v50  ;;  %v6183_v47 = vld [vmem:[#allocation5 + $0x2a0] sm:$0xff] }
 0x468   :  { %19601 = vmatprep.subr.bf16.mxu1 %v25871_v25  ;;  %20465 = vmatprep.subr.bf16.mxu0 %v25871_v25  ;;  %v6235_v62 = vand.u32 4294901760, %v6183_v47 }
 0x469   :  { %v25103_v5 = vpack.c.bf16 %v6232_v63, %v6229_v57  ;;  %v25111_v12 = vsub.f32 %v6181_v50, %v6229_v57  ;;  %v25856_v50 = vand.u32 4294901760, %v25122_v55  ;;  %v13590_v63 = vand.u32 4294901760, %v13589_v56 }
 0x46a   :  { %v25126_v40 = vpack.c.bf16 %v6238_v52, %v6235_v62  ;;  %v25131_v19 = vsub.f32 %v6183_v47, %v6235_v62  ;;  %v25852_v62 = vand.u32 4294901760, %v25157_v21 }
 0x46b   :  { %19603 = vmatpush3.bf16.msra.mxu1 %v24834_v27  ;;  %20467 = vmatpush3.bf16.msra.mxu0 %v24843_v30  ;;  %v25097_v27 = vpack.c.bf16 %v6226_v8, %v6223_v58  ;;  %v25099_v30 = vsub.f32 %v13460_v3, %v13506_v11  ;;  %v6322_v24 = vand.u32 4294901760, %v25111_v12  ;;  %v6329_v3 = vand.u32 4294901760, %v25117_v59 }
 0x46c   :  { %19604 = vmatprep.subr.bf16.mxu1 %v25871_v25  ;;  %20468 = vmatprep.subr.bf16.mxu0 %v25871_v25  ;;  %v25175_v58 = vsub.f32 %v6185_v10, %v6241_v53  ;;  %v6297_v8 = vand.u32 4294901760, %v25141_v6  ;;  %v13603_v35 = vsub.f32 %v25122_v55, %v25856_v50  ;;  %v25854_v9 = vand.u32 4294901760, %v25131_v19 }
 0x46d   :  { %v13595_v33 = vand.u32 4294901760, %v25099_v30  ;;  %v6323_v47 = vsub.f32 %v25111_v12, %v6322_v24  ;;  %v6330_v34 = vsub.f32 %v25117_v59, %v6329_v3  ;;  %v25855_v10 = vand.u32 4294901760, %v25168_v23 }
 0x46e   :  { %v6337_v56 = vsub.f32 %v25131_v19, %v25854_v9  ;;  %v6350_v32 = vand.u32 4294901760, %v25175_v58 }
 0x46f   :  { %19606 = vmatpush3.bf16.msra.mxu1 %v24881_v43  ;;  %20470 = vmatpush3.bf16.msra.mxu0 %v24908_v20  ;;  %v6308_v43 = vand.u32 4294901760, %v25087_v39  ;;  %v6315_v20 = vand.u32 4294901760, %v25093_v31  ;;  %v13596_v7 = vsub.f32 %v25099_v30, %v13595_v33 }
 0x470   :  { %19607 = vmatprep.subr.bf16.mxu1 %v25871_v25  ;;  %20471 = vmatprep.subr.bf16.mxu0 %v25871_v25 }
 0x471   :  { %v6309_v42 = vsub.f32 %v25087_v39, %v6308_v43  ;;  %v6316_v48 = vsub.f32 %v25093_v31, %v6315_v20  ;;  %v13597_v49 = vand.u32 4294901760, %v13596_v7  ;;  %v13611_v7 = vand.u32 4294901760, %v13610_v41 }
 0x472   :  { %17289 = vmatmul.mubr.f32.vlgmr.msra.gmra.mrb[0].mxu1 %v24817_v14  ;;  %18657 = vmatmul.mubr.f32.vlgmr.msra.gmra.mrb[0].mxu0 %v24815_v37  ;;  %v6244_v14 = vand.u32 4294901760, %v6186_v0  ;;  %v13466_v37 = vld [vmem:[#allocation5 + $0x5b8] sm:$0xff]  ;;  %v6338_v41 = vand.u32 4294901760, %v6337_v56 }
 0x473   :  { %19609 = vmatpush3.bf16.msra.mxu1 %v25097_v27  ;;  %20473 = vmatpush3.bf16.msra.mxu0 %v25101_v2  ;;  %v13524_v17 = vand.u32 4294901760, %v13466_v37  ;;  %v6310_v11 = vand.u32 4294901760, %v6309_v42  ;;  %v6317_v57 = vand.u32 4294901760, %v6316_v48  ;;  %v6324_v42 = vand.u32 4294901760, %v6323_v47 }
 0x474   :  { %19610 = vmatprep.subr.bf16.mxu1 %v25871_v25  ;;  %20474 = vmatprep.subr.bf16.mxu0 %v25871_v25  ;;  %v25173_v54 = vpack.c.bf16 %v6244_v14, %v6241_v53  ;;  %v25191_v61 = vsub.f32 %v6186_v0, %v6244_v14  ;;  %v6298_v0 = vsub.f32 %v25141_v6, %v6297_v8  ;;  %v6331_v48 = vand.u32 4294901760, %v6330_v34 }
 0x475   :  { %17307 = vmatprep.mubr.msk.f32.mxu1 %vm21239_vm0, %v25875_v44  ;;  %18675 = vmatprep.mubr.msk.f32.mxu0 %vm21239_vm0, %v25875_v44  ;;  %v25200_v52 = vpack.c.bf16 %v13524_v17, %v13521_v15  ;;  %v25204_v13 = vsub.f32 %v13466_v37, %v13524_v17  ;;  %v13578_v53 = vsub.f32 %v25138_v22, %v13577_v4  ;;  %v13604_v37 = vand.u32 4294901760, %v13603_v35 }
 0x476   :  { %v19620_v14 = vpack.c.bf16 %v6317_v57, %v6310_v11  ;;  %v20484_v60 = vpack.c.bf16 %v13597_v49, %v13590_v63  ;;  %v6344_v15 = vsub.f32 %v25133_v36, %v25853_v16  ;;  %v13617_v17 = vsub.f32 %v25157_v21, %v25852_v62 }
 0x477   :  { %19612 = vmatpush3.bf16.msra.mxu1 %v25103_v5  ;;  %20476 = vmatpush3.bf16.msra.mxu0 %v25113_v29  ;;  %v13624_v11 = vsub.f32 %v25168_v23, %v25855_v10  ;;  %v6357_v57 = vand.u32 4294901760, %v25191_v61  ;;  %v13630_v63 = vand.u32 4294901760, %v25202_v51  ;;  %v13637_v47 = vand.u32 4294901760, %v25204_v13 }
 0x478   :  { %19613 = vmatprep.subr.bf16.mxu1 %v25871_v25  ;;  %20477 = vmatprep.subr.bf16.mxu0 %v25871_v25  ;;  %v6299_v49 = vand.u32 4294901760, %v6298_v0  ;;  %v13579_v34 = vand.u32 4294901760, %v13578_v53  ;;  %v19623_v35 = vpack.c.bf16 %v6331_v48, %v6324_v42  ;;  %v20487_v62 = vpack.c.bf16 %v13611_v7, %v13604_v37 }
 0x479   :  { %v6345_v16 = vand.u32 4294901760, %v6344_v15  ;;  %v13618_v9 = vand.u32 4294901760, %v13617_v17  ;;  %v6351_v10 = vsub.f32 %v25175_v58, %v6350_v32  ;;  %v13625_v50 = vand.u32 4294901760, %v13624_v11 }
 0x47a   :  { %v6358_v0 = vsub.f32 %v25191_v61, %v6357_v57  ;;  %v13631_v53 = vsub.f32 %v25202_v51, %v13630_v63  ;;  %v13638_v42 = vsub.f32 %v25204_v13, %v13637_v47  ;;  %v20502_v11 = vpack.c.bf16 %v25168_v23, %v25157_v21 }
 0x47b   :  { %19615 = vmatpush3.bf16.msra.mxu1 %v25126_v40  ;;  %20479 = vmatpush3.bf16.msra.mxu0 %v25135_v28  ;;  %v20490_v48 = vpack.c.bf16 %v13625_v50, %v13618_v9  ;;  %v19632_v50 = vpack.c.bf16 %v25093_v31, %v25087_v39  ;;  %v20496_v9 = vpack.c.bf16 %v25099_v30, %v25095_v26  ;;  %v26109_v31 = vand.u32 4294901760, %v25122_v55 }
 0x47c   :  { %19616 = vmatprep.subr.bf16.mxu1 %v25871_v25  ;;  %20480 = vmatprep.subr.bf16.mxu0 %v25871_v25  ;;  %v6359_v37 = vand.u32 4294901760, %v6358_v0  ;;  %v13632_v56 = vand.u32 4294901760, %v13631_v53  ;;  %v13639_v7 = vand.u32 4294901760, %v13638_v42  ;;  %v19659_v39 = vpack.c.bf16 %v6329_v3, %v6322_v24  ;;  %v14067_v3 = vld [vmem:[#allocation5 + $0x5d0] sm:$0xff] }
 0x47d   :  { %v26110_v26 = vand.u32 4294901760, %v25124_v45  ;;  %v21159_v24 = vunpack.i.h.bf16 %v25055_v46 }
 0x47e   :  { %v20493_v17 = vpack.c.bf16 %v13639_v7, %v13632_v56 }
 0x47f   :  { %19618 = vmatpush3.bf16.msra.mxu1 %v25173_v54  ;;  %20482 = vmatpush3.bf16.msra.mxu0 %v25200_v52  ;;  %v20523_v30 = vpack.c.bf16 %v26110_v26, %v26109_v31  ;;  %v14106_v0 = vsel %vm157_vm2, %v21159_v24, 0 }
 0x480   :  { %19619 = vmatprep.subr.bf16.mxu1 %v25871_v25  ;;  %20483 = vmatprep.subr.bf16.mxu0 %v25871_v25 }
 0x482   :  { %17308 = vmatmul.mubr.f32.vlgmr.msra.gmra.mrb[0].mxu1 %v6299_v49  ;;  %18676 = vmatmul.mubr.f32.vlgmr.msra.gmra.mrb[0].mxu0 %v13579_v34  ;;  %v19641_v49 = vpack.c.bf16 %v25191_v61, %v25175_v58  ;;  %v20505_v34 = vpack.c.bf16 %v25204_v13, %v25202_v51  ;;  %v6790_v51 = vld [vmem:[#allocation5 + $0x2e8] sm:$0xff] }
 0x483   :  { %19621 = vmatpush3.bf16.msra.mxu1 %v19620_v14  ;;  %20485 = vmatpush3.bf16.msra.mxu0 %v20484_v60  ;;  %v19626_v14 = vpack.c.bf16 %v6345_v16, %v6338_v41  ;;  %v6352_v60 = vand.u32 4294901760, %v6351_v10  ;;  %v19635_v16 = vpack.c.bf16 %v25117_v59, %v25111_v12  ;;  %v19638_v10 = vpack.c.bf16 %v25133_v36, %v25131_v19 }
 0x484   :  { %19622 = vmatprep.subr.bf16.mxu1 %v25871_v25  ;;  %20486 = vmatprep.subr.bf16.mxu0 %v25871_v25  ;;  %v20520_v41 = vpack.c.bf16 %v13595_v33, %v13588_v38  ;;  %v26111_v12 = vand.u32 4294901760, %v25131_v19  ;;  %v26112_v59 = vand.u32 4294901760, %v25133_v36  ;;  %v26114_v38 = vand.u32 4294901760, %v25168_v23  ;;  %v6785_v19 = vld [vmem:[#allocation5 + $0x2c0] sm:$0xff]  ;;  %v6786_v36 = vld [vmem:[#allocation5 + $0x2c8] sm:$0xff]  ;;  %v14068_v23 = vld [vmem:[#allocation5 + $0x5d8] sm:$0xff] }
 0x485   :  { %17326 = vmatprep.mubr.msk.f32.mxu1 %vm21239_vm0, %v25875_v44  ;;  %18694 = vmatprep.mubr.msk.f32.mxu0 %vm21239_vm0, %v25875_v44  ;;  %v19629_v15 = vpack.c.bf16 %v6359_v37, %v6352_v60  ;;  %v20529_v33 = vpack.c.bf16 %v13637_v47, %v13630_v63  ;;  %v6832_v58 = vand.u32 4294901760, %v6786_v36  ;;  %v14118_v63 = vand.u32 4294901760, %v14068_v23  ;;  %v14069_v47 = vld [vmem:[#allocation5 + $0x5e0] sm:$0xff] }
 0x486   :  { %v14121_v7 = vand.u32 4294901760, %v14069_v47 }
 0x487   :  { %19624 = vmatpush3.bf16.msra.mxu1 %v19623_v35  ;;  %20488 = vmatpush3.bf16.msra.mxu0 %v20487_v62  ;;  %v20499_v62 = vpack.c.bf16 %v25124_v45, %v25122_v55  ;;  %v19656_v35 = vpack.c.bf16 %v6315_v20, %v6308_v43  ;;  %v19662_v43 = vpack.c.bf16 %v26112_v59, %v26111_v12  ;;  %v26113_v20 = vand.u32 4294901760, %v25157_v21 }
 0x488   :  { %19625 = vmatprep.subr.bf16.mxu1 %v25871_v25  ;;  %20489 = vmatprep.subr.bf16.mxu0 %v25871_v25  ;;  %v19665_v45 = vpack.c.bf16 %v6357_v57, %v6350_v32  ;;  %v21156_v21 = vunpack.i.l.bf16 %v25055_v46  ;;  %v6829_v32 = vand.u32 4294901760, %v6785_v19  ;;  %v14115_v57 = vand.u32 4294901760, %v14067_v3  ;;  %v14070_v46 = vld [vmem:[#allocation5 + $0x5e8] sm:$0xff] }
 0x489   :  { %v20526_v55 = vpack.c.bf16 %v26114_v38, %v26113_v20  ;;  %v25383_v42 = vsub.f32 %v6786_v36, %v6832_v58  ;;  %v14071_v20 = vld [vmem:[#allocation5 + $0x5f0] sm:$0xff] }
 0x48a   :  { %v25377_v13 = vsub.f32 %v6785_v19, %v6829_v32  ;;  %v6826_v53 = vsel %vm157_vm2, %v21156_v21, 0  ;;  %v25447_v19 = vsub.f32 %v14069_v47, %v14121_v7 }
 0x48b   :  { %19627 = vmatpush3.bf16.msra.mxu1 %v19626_v14  ;;  %20491 = vmatpush3.bf16.msra.mxu0 %v20490_v48  ;;  %v6844_v48 = vand.u32 4294901760, %v6790_v51 }
 0x48c   :  { %19628 = vmatprep.subr.bf16.mxu1 %v25871_v25  ;;  %20492 = vmatprep.subr.bf16.mxu0 %v25871_v25 }
 0x48d   :  { %v25423_v26 = vsub.f32 %v6790_v51, %v6844_v48 }
 0x48f   :  { %19630 = vmatpush3.bf16.msra.mxu1 %v19629_v15  ;;  %20494 = vmatpush3.bf16.msra.mxu0 %v20493_v17  ;;  %v14124_v15 = vand.u32 4294901760, %v14070_v46  ;;  %v25397_v17 = vand.u32 4294901760, %v14106_v0 }
 0x490   :  { %19631 = vmatprep.subr.bf16.mxu1 %v25871_v25  ;;  %20495 = vmatprep.subr.bf16.mxu0 %v25871_v25 }
 0x491   :  { %v25428_v12 = vsub.f32 %v14106_v0, %v25397_v17  ;;  %v25858_v0 = vand.u32 4294901760, %v25423_v26 }
 0x492   :  { %17327 = vmatmul.mubr.f32.vlgmr.msra.gmra.mrb[0].mxu1 %v25109_v18  ;;  %18695 = vmatmul.mubr.f32.vlgmr.msra.gmra.mrb[0].mxu0 %v25107_v1 }
 0x493   :  { %19633 = vmatpush3.bf16.msra.mxu1 %v19632_v50  ;;  %20497 = vmatpush3.bf16.msra.mxu0 %v20496_v9  ;;  %v25399_v50 = vand.u32 4294901760, %v6826_v53 }
 0x494   :  { %19634 = vmatprep.subr.bf16.mxu1 %v25871_v25  ;;  %20498 = vmatprep.subr.bf16.mxu0 %v25871_v25 }
 0x495   :  { %17345 = vmatprep.mubr.msk.f32.mxu1 %vm21239_vm0, %v25875_v44  ;;  %18713 = vmatprep.mubr.msk.f32.mxu0 %vm21239_vm0, %v25875_v44  ;;  %v25431_v59 = vsub.f32 %v6826_v53, %v25399_v50  ;;  %v25857_v53 = vand.u32 4294901760, %v25447_v19 }
 0x497   :  { %19636 = vmatpush3.bf16.msra.mxu1 %v19635_v16  ;;  %20500 = vmatpush3.bf16.msra.mxu0 %v20499_v62  ;;  %v25403_v16 = vpack.c.bf16 %v14118_v63, %v14115_v57 }
 0x498   :  { %19637 = vmatprep.subr.bf16.mxu1 %v25871_v25  ;;  %20501 = vmatprep.subr.bf16.mxu0 %v25871_v25 }
 0x49b   :  { %19639 = vmatpush3.bf16.msra.mxu1 %v19638_v10  ;;  %20503 = vmatpush3.bf16.msra.mxu0 %v20502_v11  ;;  %v6791_v10 = vld [vmem:[#allocation5 + $0x2f0] sm:$0xff]  ;;  %v6792_v11 = vld [vmem:[#allocation5 + $0x2f8] sm:$0xff] }
 0x49c   :  { %19640 = vmatprep.subr.bf16.mxu1 %v25871_v25  ;;  %20504 = vmatprep.subr.bf16.mxu0 %v25871_v25 }
 0x49f   :  { %19642 = vmatpush3.bf16.msra.mxu1 %v19641_v49  ;;  %20506 = vmatpush3.bf16.msra.mxu0 %v20505_v34  ;;  %v25412_v34 = vsub.f32 %v14067_v3, %v14115_v57 }
 0x4a0   :  { %19643 = vmatprep.subr.bf16.mxu1 %v25871_v25  ;;  %20507 = vmatprep.subr.bf16.mxu0 %v25871_v25 }
 0x4a2   :  { %17346 = vmatmul.mubr.f32.vlgmr.msra.gmra.mrb[0].mxu1 %v25141_v6  ;;  %18714 = vmatmul.mubr.f32.vlgmr.msra.gmra.mrb[0].mxu0 %v25138_v22  ;;  %v14065_v22 = vld [vmem:[#allocation5 + $0x5c0] sm:$0xff]  ;;  %v6787_v6 = vld [vmem:[#allocation5 + $0x2d0] sm:$0xff] }
 0x4a3   :  { %19645 = vmatpush3.bf16.msra.mxu1 %v25097_v27  ;;  %20509 = vmatpush3.bf16.msra.mxu0 %v25101_v2 }
 0x4a4   :  { %19646 = vmatprep.subr.bf16.mxu1 %v25871_v25  ;;  %20510 = vmatprep.subr.bf16.mxu0 %v25871_v25 }
 0x4a5   :  { %17364 = vmatprep.mubr.msk.f32.mxu1 %vm21239_vm0, %v25875_v44  ;;  %18732 = vmatprep.mubr.msk.f32.mxu0 %vm21239_vm0, %v25875_v44 }
 0x4a7   :  { %19648 = vmatpush3.bf16.msra.mxu1 %v25103_v5  ;;  %20512 = vmatpush3.bf16.msra.mxu0 %v25113_v29 }
 0x4a8   :  { %19649 = vmatprep.subr.bf16.mxu1 %v25871_v25  ;;  %20513 = vmatprep.subr.bf16.mxu0 %v25871_v25 }
 0x4ab   :  { %19651 = vmatpush3.bf16.msra.mxu1 %v25126_v40  ;;  %20515 = vmatpush3.bf16.msra.mxu0 %v25135_v28 }
 0x4ac   :  { %19652 = vmatprep.subr.bf16.mxu1 %v25871_v25  ;;  %20516 = vmatprep.subr.bf16.mxu0 %v25871_v25 }
 0x4af   :  { %19654 = vmatpush3.bf16.msra.mxu1 %v25173_v54  ;;  %20518 = vmatpush3.bf16.msra.mxu0 %v25200_v52 }
 0x4b0   :  { %19655 = vmatprep.subr.bf16.mxu1 %v25871_v25  ;;  %20519 = vmatprep.subr.bf16.mxu0 %v25871_v25 }
 0x4b2   :  { %17365 = vmatmul.mubr.f32.vlgmr.msra.gmra.mrb[0].mxu1 %v6297_v8  ;;  %18733 = vmatmul.mubr.f32.vlgmr.msra.gmra.mrb[0].mxu0 %v13577_v4  ;;  %v14109_v8 = vand.u32 4294901760, %v14065_v22 }
 0x4b3   :  { %19657 = vmatpush3.bf16.msra.mxu1 %v19656_v35  ;;  %20521 = vmatpush3.bf16.msra.mxu0 %v20520_v41  ;;  %v25414_v35 = vsub.f32 %v14068_v23, %v14118_v63 }
 0x4b4   :  { %19658 = vmatprep.subr.bf16.mxu1 %v25871_v25  ;;  %20522 = vmatprep.subr.bf16.mxu0 %v25871_v25  ;;  %v25385_v14 = vsub.f32 %v14065_v22, %v14109_v8 }
 0x4b5   :  { %17383 = vmatprep.mubr.msk.f32.mxu1 %vm21239_vm0, %v25875_v44  ;;  %18751 = vmatprep.mubr.msk.f32.mxu0 %vm21239_vm0, %v25875_v44  ;;  %v25861_v21 = vand.u32 4294901760, %v25414_v35 }
 0x4b6   :  { %v14194_v49 = vand.u32 4294901760, %v25385_v14 }
 0x4b7   :  { %19660 = vmatpush3.bf16.msra.mxu1 %v19659_v39  ;;  %20524 = vmatpush3.bf16.msra.mxu0 %v20523_v30  ;;  %v25425_v30 = vpack.c.bf16 %v14124_v15, %v14121_v7 }
 0x4b8   :  { %19661 = vmatprep.subr.bf16.mxu1 %v25871_v25  ;;  %20525 = vmatprep.subr.bf16.mxu0 %v25871_v25 }
 0x4bb   :  { %19663 = vmatpush3.bf16.msra.mxu1 %v19662_v43  ;;  %20527 = vmatpush3.bf16.msra.mxu0 %v20526_v55  ;;  %v6847_v43 = vand.u32 4294901760, %v6791_v10 }
 0x4bc   :  { %19664 = vmatprep.subr.bf16.mxu1 %v25871_v25  ;;  %20528 = vmatprep.subr.bf16.mxu0 %v25871_v25 }
 0x4bd   :  { %v25465_v23 = vsub.f32 %v6791_v10, %v6847_v43 }
 0x4bf   :  { %19666 = vmatpush3.bf16.msra.mxu1 %v19665_v45  ;;  %20530 = vmatpush3.bf16.msra.mxu0 %v20529_v33  ;;  %v14195_v45 = vsub.f32 %v25385_v14, %v14194_v49 }
 0x4c0   :  { %19667 = vmatprep.subr.bf16.mxu1 %v25871_v25  ;;  %20531 = vmatprep.subr.bf16.mxu0 %v25871_v25 }
 0x4c2   :  { %17384 = vmatmul.mubr.f32.vlgmr.msra.gmra.mrb[0].mxu1 %v25109_v18  ;;  %18752 = vmatmul.mubr.f32.vlgmr.msra.gmra.mrb[0].mxu0 %v25107_v1 }
 0x4c3   :  { %19669 = vmatpush3.bf16.msra.mxu1 %v25097_v27  ;;  %20533 = vmatpush3.bf16.msra.mxu0 %v25101_v2  ;;  %v14066_v27 = vld [vmem:[#allocation5 + $0x5c8] sm:$0xff]  ;;  %v6788_v2 = vld [vmem:[#allocation5 + $0x2d8] sm:$0xff] }
 0x4c4   :  { %19670 = vmatprep.subr.bf16.mxu1 %v25871_v25  ;;  %20534 = vmatprep.subr.bf16.mxu0 %v25871_v25  ;;  %v14112_v4 = vand.u32 4294901760, %v14066_v27  ;;  %v6838_v61 = vand.u32 4294901760, %v6788_v2 }
 0x4c5   :  { %17402 = vmatprep.mubr.msk.f32.mxu1 %vm21239_vm0, %v25875_v44  ;;  %18770 = vmatprep.mubr.msk.f32.mxu0 %vm21239_vm0, %v25875_v44 }
 0x4c6   :  { %v25391_v37 = vpack.c.bf16 %v14112_v4, %v14109_v8  ;;  %v25407_v62 = vsub.f32 %v6788_v2, %v6838_v61  ;;  %v14127_v2 = vand.u32 4294901760, %v14071_v20 }
 0x4c7   :  { %19672 = vmatpush3.bf16.msra.mxu1 %v25103_v5  ;;  %20536 = vmatpush3.bf16.msra.mxu0 %v25113_v29  ;;  %v6835_v5 = vand.u32 4294901760, %v6787_v6  ;;  %v6789_v29 = vld [vmem:[#allocation5 + $0x2e0] sm:$0xff] }
 0x4c8   :  { %19673 = vmatprep.subr.bf16.mxu1 %v25871_v25  ;;  %20537 = vmatprep.subr.bf16.mxu0 %v25871_v25  ;;  %v6841_v60 = vand.u32 4294901760, %v6789_v29  ;;  %v6935_v22 = vand.u32 4294901760, %v25407_v62 }
 0x4c9   :  { %v25393_v56 = vpack.c.bf16 %v6838_v61, %v6835_v5  ;;  %v25401_v9 = vsub.f32 %v6787_v6, %v6835_v5  ;;  %v25458_v6 = vsub.f32 %v14070_v46, %v14124_v15  ;;  %v14196_v5 = vand.u32 4294901760, %v14195_v45 }
 0x4ca   :  { %v25416_v41 = vpack.c.bf16 %v6844_v48, %v6841_v60  ;;  %v25421_v31 = vsub.f32 %v6789_v29, %v6841_v60  ;;  %v6936_v51 = vsub.f32 %v25407_v62, %v6935_v22  ;;  %v14216_v46 = vsub.f32 %v25414_v35, %v25861_v21 }
 0x4cb   :  { %19675 = vmatpush3.bf16.msra.mxu1 %v25126_v40  ;;  %20539 = vmatpush3.bf16.msra.mxu0 %v25135_v28  ;;  %v25387_v40 = vpack.c.bf16 %v6832_v58, %v6829_v32  ;;  %v25389_v28 = vsub.f32 %v14066_v27, %v14112_v4  ;;  %v6928_v33 = vand.u32 4294901760, %v25401_v9  ;;  %v14208_v27 = vand.u32 4294901760, %v25412_v34 }
 0x4cc   :  { %19676 = vmatprep.subr.bf16.mxu1 %v25871_v25  ;;  %20540 = vmatprep.subr.bf16.mxu0 %v25871_v25  ;;  %v6903_v32 = vand.u32 4294901760, %v25431_v59  ;;  %v14183_v58 = vand.u32 4294901760, %v25428_v12  ;;  %v25859_v63 = vand.u32 4294901760, %v25421_v31  ;;  %v25492_v48 = vsub.f32 %v14071_v20, %v14127_v2 }
 0x4cd   :  { %v14201_v39 = vand.u32 4294901760, %v25389_v28  ;;  %v6929_v61 = vsub.f32 %v25401_v9, %v6928_v33  ;;  %v14209_v57 = vsub.f32 %v25412_v34, %v14208_v27  ;;  %v25860_v15 = vand.u32 4294901760, %v25458_v6 }
 0x4ce   :  { %v6904_v10 = vsub.f32 %v25431_v59, %v6903_v32  ;;  %v14217_v45 = vand.u32 4294901760, %v14216_v46 }
 0x4cf   :  { %19678 = vmatpush3.bf16.msra.mxu1 %v25173_v54  ;;  %20542 = vmatpush3.bf16.msra.mxu0 %v25200_v52  ;;  %v6914_v54 = vand.u32 4294901760, %v25377_v13  ;;  %v6921_v52 = vand.u32 4294901760, %v25383_v42  ;;  %v14202_v36 = vsub.f32 %v25389_v28, %v14201_v39 }
 0x4d0   :  { %19679 = vmatprep.subr.bf16.mxu1 %v25871_v25  ;;  %20543 = vmatprep.subr.bf16.mxu0 %v25871_v25 }
 0x4d1   :  { %v6915_v38 = vsub.f32 %v25377_v13, %v6914_v54  ;;  %v6922_v55 = vsub.f32 %v25383_v42, %v6921_v52  ;;  %v14203_v29 = vand.u32 4294901760, %v14202_v36  ;;  %v6950_v36 = vsub.f32 %v25423_v26, %v25858_v0 }
 0x4d2   :  { %17403 = vmatmul.mubr.f32.vlgmr.msra.gmra.mrb[0].mxu1 %v25109_v18  ;;  %18771 = vmatmul.mubr.f32.vlgmr.msra.gmra.mrb[0].mxu0 %v25107_v1  ;;  %v6850_v18 = vand.u32 4294901760, %v6792_v11  ;;  %v14072_v1 = vld [vmem:[#allocation5 + $0x5f8] sm:$0xff] }
 0x4d3   :  { %19681 = vmatpush3.bf16.msra.mxu1 %v25387_v40  ;;  %20545 = vmatpush3.bf16.msra.mxu0 %v25391_v37  ;;  %v14130_v24 = vand.u32 4294901760, %v14072_v1  ;;  %v6916_v8 = vand.u32 4294901760, %v6915_v38  ;;  %v6923_v4 = vand.u32 4294901760, %v6922_v55  ;;  %v20556_v20 = vpack.c.bf16 %v14203_v29, %v14196_v5 }
 0x4d4   :  { %19682 = vmatprep.subr.bf16.mxu1 %v25871_v25  ;;  %20546 = vmatprep.subr.bf16.mxu0 %v25871_v25  ;;  %v25463_v3 = vpack.c.bf16 %v6850_v18, %v6847_v43  ;;  %v25481_v47 = vsub.f32 %v6792_v11, %v6850_v18  ;;  %v14184_v11 = vsub.f32 %v25428_v12, %v14183_v58  ;;  %v6930_v18 = vand.u32 4294901760, %v6929_v61 }
 0x4d5   :  { %17421 = vmatprep.mubr.msk.f32.mxu1 %vm21239_vm0, %v25875_v44  ;;  %18789 = vmatprep.mubr.msk.f32.mxu0 %vm21239_vm0, %v25875_v44  ;;  %v25490_v60 = vpack.c.bf16 %v14130_v24, %v14127_v2  ;;  %v25494_v7 = vsub.f32 %v14072_v1, %v14130_v24  ;;  %v19692_v43 = vpack.c.bf16 %v6923_v4, %v6916_v8  ;;  %v6937_v38 = vand.u32 4294901760, %v6936_v51 }
 0x4d6   :  { %v14210_v1 = vand.u32 4294901760, %v14209_v57  ;;  %v6943_v55 = vsub.f32 %v25421_v31, %v25859_v63  ;;  %v14223_v2 = vsub.f32 %v25447_v19, %v25857_v53  ;;  %v6956_v24 = vand.u32 4294901760, %v25465_v23 }
 0x4d7   :  { %19684 = vmatpush3.bf16.msra.mxu1 %v25393_v56  ;;  %20548 = vmatpush3.bf16.msra.mxu0 %v25403_v16  ;;  %v14230_v8 = vsub.f32 %v25458_v6, %v25860_v15  ;;  %v6963_v4 = vand.u32 4294901760, %v25481_v47  ;;  %v14236_v5 = vand.u32 4294901760, %v25492_v48  ;;  %v14243_v61 = vand.u32 4294901760, %v25494_v7 }
 0x4d8   :  { %19685 = vmatprep.subr.bf16.mxu1 %v25871_v25  ;;  %20549 = vmatprep.subr.bf16.mxu0 %v25871_v25  ;;  %v6905_v29 = vand.u32 4294901760, %v6904_v10  ;;  %v14185_v51 = vand.u32 4294901760, %v14184_v11  ;;  %v19695_v57 = vpack.c.bf16 %v6937_v38, %v6930_v18  ;;  %v6944_v46 = vand.u32 4294901760, %v6943_v55 }
 0x4d9   :  { %v20559_v53 = vpack.c.bf16 %v14217_v45, %v14210_v1  ;;  %v6951_v0 = vand.u32 4294901760, %v6950_v36  ;;  %v14224_v63 = vand.u32 4294901760, %v14223_v2  ;;  %v6957_v15 = vsub.f32 %v25465_v23, %v6956_v24 }
 0x4da   :  { %v14231_v21 = vand.u32 4294901760, %v14230_v8  ;;  %v6964_v10 = vsub.f32 %v25481_v47, %v6963_v4  ;;  %v14237_v11 = vsub.f32 %v25492_v48, %v14236_v5  ;;  %v14244_v18 = vsub.f32 %v25494_v7, %v14243_v61 }
 0x4db   :  { %19687 = vmatpush3.bf16.msra.mxu1 %v25416_v41  ;;  %20551 = vmatpush3.bf16.msra.mxu0 %v25425_v30  ;;  %v20574_v8 = vpack.c.bf16 %v25458_v6, %v25447_v19 }
 0x4dc   :  { %19688 = vmatprep.subr.bf16.mxu1 %v25871_v25  ;;  %20552 = vmatprep.subr.bf16.mxu0 %v25871_v25  ;;  %v20562_v38 = vpack.c.bf16 %v14231_v21, %v14224_v63  ;;  %v6965_v1 = vand.u32 4294901760, %v6964_v10  ;;  %v14238_v55 = vand.u32 4294901760, %v14237_v11  ;;  %v14245_v45 = vand.u32 4294901760, %v14244_v18 }
 0x4dd   :  { %v19704_v21 = vpack.c.bf16 %v25383_v42, %v25377_v13  ;;  %v20568_v63 = vpack.c.bf16 %v25389_v28, %v25385_v14  ;;  %v19731_v13 = vpack.c.bf16 %v6935_v22, %v6928_v33  ;;  %v26115_v42 = vand.u32 4294901760, %v25414_v35 }
 0x4de   :  { %v20565_v2 = vpack.c.bf16 %v14245_v45, %v14238_v55  ;;  %v26116_v28 = vand.u32 4294901760, %v25421_v31 }
 0x4df   :  { %19690 = vmatpush3.bf16.msra.mxu1 %v25463_v3  ;;  %20554 = vmatpush3.bf16.msra.mxu0 %v25490_v60  ;;  %v20595_v14 = vpack.c.bf16 %v26115_v42, %v14208_v27 }
 0x4e0   :  { %19691 = vmatprep.subr.bf16.mxu1 %v25871_v25  ;;  %20555 = vmatprep.subr.bf16.mxu0 %v25871_v25 }
 0x4e2   :  { %17422 = vmatmul.mubr.f32.vlgmr.msra.gmra.mrb[0].mxu1 %v6905_v29  ;;  %18790 = vmatmul.mubr.f32.vlgmr.msra.gmra.mrb[0].mxu0 %v14185_v51  ;;  %v19713_v29 = vpack.c.bf16 %v25481_v47, %v25465_v23  ;;  %v20577_v51 = vpack.c.bf16 %v25494_v7, %v25492_v48 }
 0x4e3   :  { %19693 = vmatpush3.bf16.msra.mxu1 %v19692_v43  ;;  %20557 = vmatpush3.bf16.msra.mxu0 %v20556_v20  ;;  %v19698_v43 = vpack.c.bf16 %v6951_v0, %v6944_v46  ;;  %v6958_v20 = vand.u32 4294901760, %v6957_v15  ;;  %v19707_v0 = vpack.c.bf16 %v25407_v62, %v25401_v9  ;;  %v19710_v15 = vpack.c.bf16 %v25423_v26, %v25421_v31 }
 0x4e4   :  { %19694 = vmatprep.subr.bf16.mxu1 %v25871_v25  ;;  %20558 = vmatprep.subr.bf16.mxu0 %v25871_v25  ;;  %v20592_v46 = vpack.c.bf16 %v14201_v39, %v14194_v49  ;;  %v26117_v9 = vand.u32 4294901760, %v25423_v26 }
 0x4e5   :  { %17440 = vmatprep.mubr.msk.f32.mxu1 %vm21239_vm0, %v25875_v44  ;;  %18808 = vmatprep.mubr.msk.f32.mxu0 %vm21239_vm0, %v25875_v44  ;;  %v19701_v36 = vpack.c.bf16 %v6965_v1, %v6958_v20 }
 0x4e6   :  { %v19734_v62 = vpack.c.bf16 %v26117_v9, %v26116_v28 }
 0x4e7   :  { %19696 = vmatpush3.bf16.msra.mxu1 %v19695_v57  ;;  %20560 = vmatpush3.bf16.msra.mxu0 %v20559_v53  ;;  %v20571_v53 = vpack.c.bf16 %v25414_v35, %v25412_v34  ;;  %v19728_v57 = vpack.c.bf16 %v6921_v52, %v6914_v54  ;;  %v26118_v54 = vand.u32 4294901760, %v25447_v19  ;;  %v26119_v52 = vand.u32 4294901760, %v25458_v6 }
 0x4e8   :  { %19697 = vmatprep.subr.bf16.mxu1 %v25871_v25  ;;  %20561 = vmatprep.subr.bf16.mxu0 %v25871_v25  ;;  %v19737_v34 = vpack.c.bf16 %v6963_v4, %v6956_v24  ;;  %v20601_v35 = vpack.c.bf16 %v14243_v61, %v14236_v5 }
 0x4e9   :  { %v20598_v49 = vpack.c.bf16 %v26119_v52, %v26118_v54 }
 0x4eb   :  { %19699 = vmatpush3.bf16.msra.mxu1 %v19698_v43  ;;  %20563 = vmatpush3.bf16.msra.mxu0 %v20562_v38 }
 0x4ec   :  { %19700 = vmatprep.subr.bf16.mxu1 %v25871_v25  ;;  %20564 = vmatprep.subr.bf16.mxu0 %v25871_v25 }
 0x4ef   :  { %19702 = vmatpush3.bf16.msra.mxu1 %v19701_v36  ;;  %20566 = vmatpush3.bf16.msra.mxu0 %v20565_v2 }
 0x4f0   :  { %19703 = vmatprep.subr.bf16.mxu1 %v25871_v25  ;;  %20567 = vmatprep.subr.bf16.mxu0 %v25871_v25 }
 0x4f2   :  { %17441 = vmatmul.mubr.f32.vlgmr.msra.gmra.mrb[0].mxu1 %v25399_v50  ;;  %18809 = vmatmul.mubr.f32.vlgmr.msra.gmra.mrb[0].mxu0 %v25397_v17 }
 0x4f3   :  { %19705 = vmatpush3.bf16.msra.mxu1 %v19704_v21  ;;  %20569 = vmatpush3.bf16.msra.mxu0 %v20568_v63 }
 0x4f4   :  { %19706 = vmatprep.subr.bf16.mxu1 %v25871_v25  ;;  %20570 = vmatprep.subr.bf16.mxu0 %v25871_v25 }
 0x4f5   :  { %17459 = vmatprep.mubr.msk.f32.mxu1 %vm21239_vm0, %v25875_v44  ;;  %18827 = vmatprep.mubr.msk.f32.mxu0 %vm21239_vm0, %v25875_v44 }
 0x4f7   :  { %19708 = vmatpush3.bf16.msra.mxu1 %v19707_v0  ;;  %20572 = vmatpush3.bf16.msra.mxu0 %v20571_v53 }
 0x4f8   :  { %19709 = vmatprep.subr.bf16.mxu1 %v25871_v25  ;;  %20573 = vmatprep.subr.bf16.mxu0 %v25871_v25 }
 0x4fb   :  { %19711 = vmatpush3.bf16.msra.mxu1 %v19710_v15  ;;  %20575 = vmatpush3.bf16.msra.mxu0 %v20574_v8 }
 0x4fc   :  { %19712 = vmatprep.subr.bf16.mxu1 %v25871_v25  ;;  %20576 = vmatprep.subr.bf16.mxu0 %v25871_v25 }
 0x4ff   :  { %19714 = vmatpush3.bf16.msra.mxu1 %v19713_v29  ;;  %20578 = vmatpush3.bf16.msra.mxu0 %v20577_v51 }
 0x500   :  { %19715 = vmatprep.subr.bf16.mxu1 %v25871_v25  ;;  %20579 = vmatprep.subr.bf16.mxu0 %v25871_v25 }
 0x502   :  { %17460 = vmatmul.mubr.f32.vlgmr.msra.gmra.mrb[0].mxu1 %v25431_v59  ;;  %18828 = vmatmul.mubr.f32.vlgmr.msra.gmra.mrb[0].mxu0 %v25428_v12 }
 0x503   :  { %19717 = vmatpush3.bf16.msra.mxu1 %v25387_v40  ;;  %20581 = vmatpush3.bf16.msra.mxu0 %v25391_v37 }
 0x504   :  { %19718 = vmatprep.subr.bf16.mxu1 %v25871_v25  ;;  %20582 = vmatprep.subr.bf16.mxu0 %v25871_v25 }
 0x505   :  { %17478 = vmatprep.mubr.msk.f32.mxu1 %vm21239_vm0, %v25875_v44  ;;  %18846 = vmatprep.mubr.msk.f32.mxu0 %vm21239_vm0, %v25875_v44 }
 0x507   :  { %19720 = vmatpush3.bf16.msra.mxu1 %v25393_v56  ;;  %20584 = vmatpush3.bf16.msra.mxu0 %v25403_v16 }
 0x508   :  { %19721 = vmatprep.subr.bf16.mxu1 %v25871_v25  ;;  %20585 = vmatprep.subr.bf16.mxu0 %v25871_v25 }
 0x50b   :  { %19723 = vmatpush3.bf16.msra.mxu1 %v25416_v41  ;;  %20587 = vmatpush3.bf16.msra.mxu0 %v25425_v30 }
 0x50c   :  { %19724 = vmatprep.subr.bf16.mxu1 %v25871_v25  ;;  %20588 = vmatprep.subr.bf16.mxu0 %v25871_v25 }
 0x50f   :  { %19726 = vmatpush3.bf16.msra.mxu1 %v25463_v3  ;;  %20590 = vmatpush3.bf16.msra.mxu0 %v25490_v60 }
 0x510   :  { %19727 = vmatprep.subr.bf16.mxu1 %v25871_v25  ;;  %20591 = vmatprep.subr.bf16.mxu0 %v25871_v25 }
 0x512   :  { %17479 = vmatmul.mubr.f32.vlgmr.msra.gmra.mrb[0].mxu1 %v6903_v32  ;;  %18847 = vmatmul.mubr.f32.vlgmr.msra.gmra.mrb[0].mxu0 %v14183_v58 }
 0x513   :  { %19729 = vmatpush3.bf16.msra.mxu1 %v19728_v57  ;;  %20593 = vmatpush3.bf16.msra.mxu0 %v20592_v46 }
 0x514   :  { %19730 = vmatprep.subr.bf16.mxu1 %v25871_v25  ;;  %20594 = vmatprep.subr.bf16.mxu0 %v25871_v25 }
 0x515   :  { %17497 = vmatprep.mubr.msk.f32.mxu1 %vm21239_vm0, %v25875_v44  ;;  %18865 = vmatprep.mubr.msk.f32.mxu0 %vm21239_vm0, %v25875_v44 }
 0x517   :  { %19732 = vmatpush3.bf16.msra.mxu1 %v19731_v13  ;;  %20596 = vmatpush3.bf16.msra.mxu0 %v20595_v14 }
 0x518   :  { %19733 = vmatprep.subr.bf16.mxu1 %v25871_v25  ;;  %20597 = vmatprep.subr.bf16.mxu0 %v25871_v25 }
 0x51b   :  { %19735 = vmatpush3.bf16.msra.mxu1 %v19734_v62  ;;  %20599 = vmatpush3.bf16.msra.mxu0 %v20598_v49 }
 0x51c   :  { %19736 = vmatprep.subr.bf16.mxu1 %v25871_v25  ;;  %20600 = vmatprep.subr.bf16.mxu0 %v25871_v25 }
 0x51f   :  { %19738 = vmatpush3.bf16.msra.mxu1 %v19737_v34  ;;  %20602 = vmatpush3.bf16.msra.mxu0 %v20601_v35 }
 0x520   :  { %19739 = vmatprep.subr.bf16.mxu1 %v25871_v25  ;;  %20603 = vmatprep.subr.bf16.mxu0 %v25871_v25 }
 0x522   :  { %17498 = vmatmul.mubr.f32.vlgmr.msra.gmra.mrb[0].mxu1 %v25399_v50  ;;  %18866 = vmatmul.mubr.f32.vlgmr.msra.gmra.mrb[0].mxu0 %v25397_v17 }
 0x523   :  { %19741 = vmatpush3.bf16.msra.mxu1 %v25387_v40  ;;  %20605 = vmatpush3.bf16.msra.mxu0 %v25391_v37 }
 0x524   :  { %19742 = vmatprep.subr.bf16.mxu1 %v25871_v25  ;;  %20606 = vmatprep.subr.bf16.mxu0 %v25871_v25 }
 0x525   :  { %17516 = vmatprep.mubr.msk.f32.mxu1 %vm21239_vm0, %v25875_v44  ;;  %18884 = vmatprep.mubr.msk.f32.mxu0 %vm21239_vm0, %v25875_v44 }
 0x527   :  { %19744 = vmatpush3.bf16.msra.mxu1 %v25393_v56  ;;  %20608 = vmatpush3.bf16.msra.mxu0 %v25403_v16 }
 0x528   :  { %19745 = vmatprep.subr.bf16.mxu1 %v25871_v25  ;;  %20609 = vmatprep.subr.bf16.mxu0 %v25871_v25 }
 0x52b   :  { %19747 = vmatpush3.bf16.msra.mxu1 %v25416_v41  ;;  %20611 = vmatpush3.bf16.msra.mxu0 %v25425_v30 }
 0x52c   :  { %19748 = vmatprep.subr.bf16.mxu1 %v25871_v25  ;;  %20612 = vmatprep.subr.bf16.mxu0 %v25871_v25 }
 0x52f   :  { %19750 = vmatpush3.bf16.msra.mxu1 %v25463_v3  ;;  %20614 = vmatpush3.bf16.msra.mxu0 %v25490_v60 }
 0x532   :  { %17517 = vmatmul.mubr.f32.vlgmr.msra.gmra.mrb[0].mxu1 %v25399_v50  ;;  %18885 = vmatmul.mubr.f32.vlgmr.msra.gmra.mrb[0].mxu0 %v25397_v17 }
 0x605   :  { %v7361_v44 = vpop.f32.mrb[0].mxu1  ;;  %v14641_v40 = vpop.f32.mrb[0].mxu0 }
 0x606   :  { %v20615_v37 = vadd.f32 %v14641_v40, %v7361_v44  ;;  %v17518_v56 = vpop.f32.mrb[1].mxu1  ;;  %v18886_v16 = vpop.f32.mrb[1].mxu0 }
 0x608   :  { %14646 = vst [vmem:[#allocation7] sm:$0xff] %v20615_v37 }
 0x609   :  { %21216 = shalt.err (!%p21213_p6)
}
 0x60a   :  { %s21217_s10 = scalar_lea.hbm %s25685_s2, 128 }
 0x60b   :  { %p21218_p7 = scmp.ne.s32.totalorder %s25685_s2, %s21217_s10  ;;  %p21221_p8 = scmp.lt.u32.totalorder %s21217_s10, %s25685_s2 }
 0x60d   :  { %p21223_p9 = pnand %p21221_p8, %p21218_p7 }
 0x60f   :  { %21226 = shalt.err (!%p21223_p9)
}
 0x610   :  { %14656 = dma.vmem_to_hbm [thread:$0]  %s14654_s6, 128, %s25685_s2, [#allocation4]  }
 0x611   :  { %21231 = dma.done.wait [#allocation4], 128  }
 0x612   :  { %21232 = vsyncadd [#allocation4], 4294967168 }
 0x613   :  { %14660 = vsyncpa [#allocation3], 1 }
 0x614   :  { %14661 = vsyncpa [#allocation6], 1 }
 0x615   :  { %14662 = vsyncpa [#allocation4], 1 }

</bundles_post_ra>
